<compile_context>
chip_gen: v6e
topology: v6e:2x2x1
jax: 0.10.0
libtpu: 0.0.40
codegen_flags: <defaults>
</compile_context>

<pallas_src>
import functools

import jax
import jax.numpy as jnp
import numpy as np
from jax import lax
from jax.experimental import pallas as pl
from jax.experimental.pallas import tpu as pltpu

T_BLK = 8  # time steps per grid step (amortizes ~600-cycle per-step overhead)


def _round_up(x, m):
    return ((x + m - 1) // m) * m


def _sigmoid(x):
    # sigmoid(x) == 0.5*(1 + tanh(x/2)): single EUP tanh per gate (EUP has its
    # own bundle slot) instead of exp + divide on the VALU-dependent chain.
    return 0.5 * (jnp.tanh(0.5 * x) + 1.0)


# ---------------------------------------------------------------------------
# Pallas kernel: whole sequence, grid over time blocks, fori_loop inside.
# ---------------------------------------------------------------------------
def _hrnn_seq_kernel(
    gx_ref,            # [T_blk, B, 4*S_pad] precomputed x@Wih_blk + b_s (gate-major)
    h0_ref, c0_ref,    # [B, D_pad]          packed padded initial state [k|v|p|0|u|0]
    w_u_ref,           # [D_pad, 4*U_pad]    stacked URNN weights (gate-major, padded)
    wcomb_ref,         # [U_pad, 4*S_pad]    folded (Whh_slave @ W_out).T (gate-major)
    b_u_ref,           # [1, 4*U_pad]        URNN bias
    hc_out_ref,        # [T_blk, B, 2*D_pad] per-step packed [h | c]
    h_sc, c_sc,        # VMEM [B, D_pad]     running state across grid steps
    *, S_pad, U_pad, T_blk,
):
    tb = pl.program_id(0)

    @pl.when(tb == 0)
    def _():
        h_sc[...] = h0_ref[...]
        c_sc[...] = c0_ref[...]

    # Hoist weight loads and the bias broadcast out of the time loop.
    w_u = w_u_ref[...]
    w_comb = wcomb_ref[...]
    b_u = jnp.broadcast_to(b_u_ref[...], (h0_ref.shape[0], 4 * U_pad))

    def step(i, carry):
        h_full, c_full = carry                                # [B, D_pad] each

        # --- URNN LSTM: one matmul on the packed padded state ----------------
        gates_u = jnp.dot(h_full, w_u, preferred_element_type=jnp.float32) + b_u
        i_u = _sigmoid(gates_u[:, 0 * U_pad:1 * U_pad])
        f_u = _sigmoid(gates_u[:, 1 * U_pad:2 * U_pad])
        g_u = jnp.tanh(gates_u[:, 2 * U_pad:3 * U_pad])
        o_u = _sigmoid(gates_u[:, 3 * U_pad:4 * U_pad])
        cu_new = f_u * c_full[:, S_pad:] + i_u * g_u          # [B, U_pad]
        hu_new = o_u * jnp.tanh(cu_new)

        # --- Slave LSTMs (k/v/p): precomputed x-gates + ONE recurrent matmul -
        gates_s = gx_ref[i] + jnp.dot(hu_new, w_comb,
                                      preferred_element_type=jnp.float32)
        i_s = _sigmoid(gates_s[:, 0 * S_pad:1 * S_pad])
        f_s = _sigmoid(gates_s[:, 1 * S_pad:2 * S_pad])
        g_s = jnp.tanh(gates_s[:, 2 * S_pad:3 * S_pad])
        o_s = _sigmoid(gates_s[:, 3 * S_pad:4 * S_pad])
        cs_new = f_s * c_full[:, :S_pad] + i_s * g_s          # [B, S_pad]
        hs_new = o_s * jnp.tanh(cs_new)

        # Lane-aligned 128-wide slabs -> cheap concatenation, no masked stores.
        h_new = jnp.concatenate([hs_new, hu_new], axis=-1)    # [B, D_pad]
        c_new = jnp.concatenate([cs_new, cu_new], axis=-1)    # [B, D_pad]

        # Single lane-dense per-step store of packed [h | c] (width 2*D_pad).
        hc_out_ref[i] = jnp.concatenate([h_new, c_new], axis=-1)
        return h_new, c_new

    h_fin, c_fin = lax.fori_loop(0, T_blk, step, (h_sc[...], c_sc[...]),
                                 unroll=True)
    h_sc[...] = h_fin
    c_sc[...] = c_fin


# ---------------------------------------------------------------------------
# One-time parameter preparation (transposes / folding / 128-lane padding)
# ---------------------------------------------------------------------------
def prepare_params(params, modal_order=("k", "v", "p")):
    Hs = int(params["k"]["weight_hh"].shape[1])
    Hu = int(params["u"]["weight_hh"].shape[1])
    S_pad = _round_up(3 * Hs, 128)      # slave gate slab / packed slave state width
    U_pad = _round_up(Hu, 128)          # URNN gate slab / packed URNN state width
    D_pad = S_pad + U_pad
    Gs, Gu = 4 * S_pad, 4 * U_pad

    in_dims = [int(params[m]["weight_ih"].shape[1]) for m in modal_order]
    D_in = int(sum(in_dims))
    offs = np.cumsum([0] + in_dims)

    # --- URNN: stacked weights acting on packed padded state [hk|hv|hp|0|hu|0]
    W_u = np.zeros((D_pad, Gu), np.float32)
    b_u = np.zeros((1, Gu), np.float32)
    Wih_u = np.asarray(params["u"]["weight_ih"], np.float32)    # [4Hu, 3Hs]
    Whh_u = np.asarray(params["u"]["weight_hh"], np.float32)    # [4Hu, Hu]
    bu = np.asarray(params["u"]["bias_ih"] + params["u"]["bias_hh"], np.float32)
    for g in range(4):
        rows = slice(g * Hu, (g + 1) * Hu)
        cols = slice(g * U_pad, g * U_pad + Hu)
        W_u[0:3 * Hs, cols] = Wih_u[rows, :].T
        W_u[S_pad:S_pad + Hu, cols] = Whh_u[rows, :].T
        b_u[0, cols] = bu[rows]

    # --- Slaves: block-diag ih weights, readout folded into recurrent weights.
    W_out = np.asarray(params["out"]["weight"], np.float32)     # [3Hs, Hu]
    b_out = np.asarray(params["out"]["bias"], np.float32)       # [3Hs]

    Wih_blk = np.zeros((D_in, Gs), np.float32)
    W_comb = np.zeros((U_pad, Gs), np.float32)
    b_s = np.zeros((1, Gs), np.float32)
    for g in range(4):                                          # gates i, f, g, o
        for mi, m in enumerate(modal_order):
            Wih_m = np.asarray(params[m]["weight_ih"], np.float32)   # [4Hs, Dm]
            Whh_m = np.asarray(params[m]["weight_hh"], np.float32)   # [4Hs, Hs]
            bm = np.asarray(params[m]["bias_ih"] + params[m]["bias_hh"],
                            np.float32)
            rows = slice(g * Hs, (g + 1) * Hs)
            cols = slice(g * S_pad + mi * Hs, g * S_pad + (mi + 1) * Hs)
            W_out_m = W_out[mi * Hs:(mi + 1) * Hs, :]                 # [Hs, Hu]
            b_out_m = b_out[mi * Hs:(mi + 1) * Hs]

            Wih_blk[offs[mi]:offs[mi + 1], cols] = Wih_m[rows, :].T
            W_comb[0:Hu, cols] = (Whh_m[rows, :] @ W_out_m).T
            b_s[0, cols] = bm[rows] + Whh_m[rows, :] @ b_out_m

    weights = {
        "W_u": jnp.asarray(W_u), "b_u": jnp.asarray(b_u),
        "Wih_blk": jnp.asarray(Wih_blk), "W_comb": jnp.asarray(W_comb),
        "b_s": jnp.asarray(b_s),
    }
    return {"weights": weights, "Hs": Hs, "Hu": Hu,
            "S_pad": S_pad, "U_pad": U_pad, "in_dims": tuple(in_dims)}


# ---------------------------------------------------------------------------
# JAX wrapper: state packing, hoisted x projection, single pallas_call per seq
# ---------------------------------------------------------------------------
@functools.partial(jax.jit, static_argnames=("Hs", "Hu", "S_pad", "U_pad"))
def _hrnn_run(weights, x_cat, states, *, Hs, Hu, S_pad, U_pad):
    (hk, ck), (hv, cv), (hp, cp), (hu, cu) = states
    T, B, D_in = x_cat.shape
    D_pad = S_pad + U_pad
    Gs, Gu = 4 * S_pad, 4 * U_pad
    B_pad = _round_up(B, 8)             # full sublane group
    T_blk = min(T_BLK, T)
    T_pad = _round_up(T, T_blk)

    def pack(a_k, a_v, a_p, a_u):
        buf = jnp.zeros((B_pad, D_pad), jnp.float32)
        buf = buf.at[:B, 0:Hs].set(a_k.astype(jnp.float32))
        buf = buf.at[:B, Hs:2 * Hs].set(a_v.astype(jnp.float32))
        buf = buf.at[:B, 2 * Hs:3 * Hs].set(a_p.astype(jnp.float32))
        buf = buf.at[:B, S_pad:S_pad + Hu].set(a_u.astype(jnp.float32))
        return buf

    h0 = pack(hk, hv, hp, hu)
    c0 = pack(ck, cv, cp, cu)

    x_pad = x_cat.astype(jnp.float32)
    if (T_pad, B_pad) != (T, B):
        x_pad = jnp.pad(x_pad, ((0, T_pad - T), (0, B_pad - B), (0, 0)))

    # Hoisted input projection over ALL timesteps (one well-shaped matmul),
    # with the folded slave bias added once -> per-step x-gates are a pure load.
    gx = (jnp.einsum("tbd,dg->tbg", x_pad, weights["Wih_blk"],
                     preferred_element_type=jnp.float32)
          + weights["b_s"])

    kernel = functools.partial(_hrnn_seq_kernel, S_pad=S_pad, U_pad=U_pad,
                               T_blk=T_blk)

    grid_spec = pltpu.PrefetchScalarGridSpec(
        num_scalar_prefetch=0,
        grid=(T_pad // T_blk,),
        in_specs=[
            pl.BlockSpec((T_blk, B_pad, Gs), lambda tb: (tb, 0, 0)),  # x-gates
            pl.BlockSpec((B_pad, D_pad), lambda tb: (0, 0)),          # h0
            pl.BlockSpec((B_pad, D_pad), lambda tb: (0, 0)),          # c0
            pl.BlockSpec((D_pad, Gu), lambda tb: (0, 0)),             # W_u
            pl.BlockSpec((U_pad, Gs), lambda tb: (0, 0)),             # W_comb
            pl.BlockSpec((1, Gu), lambda tb: (0, 0)),                 # b_u
        ],
        out_specs=pl.BlockSpec((T_blk, B_pad, 2 * D_pad),
                               lambda tb: (tb, 0, 0)),
        scratch_shapes=[
            pltpu.VMEM((B_pad, D_pad), jnp.float32),   # running packed h
            pltpu.VMEM((B_pad, D_pad), jnp.float32),   # running packed c
        ],
    )

    hc_seq = pl.pallas_call(
        kernel,
        out_shape=jax.ShapeDtypeStruct((T_pad, B_pad, 2 * D_pad), jnp.float32),
        grid_spec=grid_spec,
        compiler_params=pltpu.CompilerParams(
            dimension_semantics=("arbitrary",),        # time is sequential
            vmem_limit_bytes=32 * 1024 * 1024),
    )(gx, h0, c0, weights["W_u"], weights["W_comb"], weights["b_u"])

    h_seq = hc_seq[:T, :B, :D_pad]
    c_seq = hc_seq[:T, :B, D_pad:]
    return h_seq, c_seq


def unpack_state(h, c, prepped):
    """Packed padded [..., D_pad] -> PyTorch-style list of (h, c) tuples."""
    Hs, Hu, S_pad = prepped["Hs"], prepped["Hu"], prepped["S_pad"]

    def split(a):
        return (a[..., 0:Hs], a[..., Hs:2 * Hs], a[..., 2 * Hs:3 * Hs],
                a[..., S_pad:S_pad + Hu])

    hk, hv, hp, hu = split(h)
    ck, cv, cp, cu = split(c)
    return [(hk, ck), (hv, cv), (hp, cp), (hu, cu)]


def hierarchical_rnn_sequence(prepped, xk_seq, xv_seq, xp_seq, states):
    """Run T steps of the cell in a single kernel launch.

    Returns per-step packed (h_seq, c_seq), each [T, B, S_pad+U_pad] with the
    padded layout [hk|hv|hp|0|hu|0] / [ck|cv|cp|0|cu|0]."""
    x_cat = jnp.concatenate([xk_seq, xv_seq, xp_seq], axis=-1)
    return _hrnn_run(prepped["weights"], x_cat, states,
                     Hs=prepped["Hs"], Hu=prepped["Hu"],
                     S_pad=prepped["S_pad"], U_pad=prepped["U_pad"])


def hierarchical_rnn_cell(prepped, xk, xv, xp, step, states):
    """Single-step API matching VariableHierarchicalRNNCell.forward."""
    del step  # unused by the reference forward
    h_seq, c_seq = hierarchical_rnn_sequence(
        prepped, xk[None], xv[None], xp[None], states)
    return unpack_state(h_seq[0], c_seq[0], prepped)


# ---------------------------------------------------------------------------
# Pure-JAX reference (mirrors the PyTorch forward) for verification
# ---------------------------------------------------------------------------
def _lstm_cell_ref(x, hc, p):
    h, c = hc
    gates = (x @ p["weight_ih"].T + p["bias_ih"]
             + h @ p["weight_hh"].T + p["bias_hh"])
    i, f, g, o = jnp.split(gates, 4, axis=-1)
    i, f, o = jax.nn.sigmoid(i), jax.nn.sigmoid(f), jax.nn.sigmoid(o)
    g = jnp.tanh(g)
    c_new = f * c + i * g
    h_new = o * jnp.tanh(c_new)
    return h_new, c_new


def forward_ref(params, xk, xv, xp, step, states):
    del step
    (hk, ck), (hv, cv), (hp, cp), (hu, cu) = states
    alpha = 1.0
    _prev_k_hid = hk
    hk = alpha * hk
    urnn_in = jnp.concatenate([hk, hv, hp], axis=-1)
    hu_n, cu_n = _lstm_cell_ref(urnn_in, (hu, cu), params["u"])
    urnn_out = hu_n @ params["out"]["weight"].T + params["out"]["bias"]
    k_hid, v_hid, p_hid = jnp.split(urnn_out, 3, axis=-1)
    k_hid = alpha * k_hid + (1 - alpha) * _prev_k_hid
    hk_n, ck_n = _lstm_cell_ref(xk, (k_hid, ck), params["k"])
    hv_n, cv_n = _lstm_cell_ref(xv, (v_hid, cv), params["v"])
    hp_n, cp_n = _lstm_cell_ref(xp, (p_hid, cp), params["p"])
    return [(hk_n, ck_n), (hv_n, cv_n), (hp_n, cp_n), (hu_n, cu_n)]


# ---------------------------------------------------------------------------
# Deterministic construction + run + verify
# ---------------------------------------------------------------------------
def _make_lstm_params(key, in_dim, hid_dim):
    k1, k2, k3, k4 = jax.random.split(key, 4)
    return {
        "weight_ih": 0.1 * jax.random.normal(k1, (4 * hid_dim, in_dim), jnp.float32),
        "weight_hh": 0.1 * jax.random.normal(k2, (4 * hid_dim, hid_dim), jnp.float32),
        "bias_ih": 0.1 * jax.random.normal(k3, (4 * hid_dim,), jnp.float32),
        "bias_hh": 0.1 * jax.random.normal(k4, (4 * hid_dim,), jnp.float32),
    }


if __name__ == "__main__":
    key = jax.random.PRNGKey(0)

    batch = 4
    seq_len = 8
    srnn_input_dims = {"k": 10, "v": 8, "p": 6}
    srnn_hid = 32
    urnn_hid = 16
    modal_num = len(srnn_input_dims)

    keys = jax.random.split(key, 16)
    params = {
        "k": _make_lstm_params(keys[0], srnn_input_dims["k"], srnn_hid),
        "v": _make_lstm_params(keys[1], srnn_input_dims["v"], srnn_hid),
        "p": _make_lstm_params(keys[2], srnn_input_dims["p"], srnn_hid),
        "u": _make_lstm_params(keys[3], srnn_hid * modal_num, urnn_hid),
        "out": {
            "weight": 0.1 * jax.random.normal(
                keys[4], (srnn_hid * modal_num, urnn_hid), jnp.float32),
            "bias": 0.1 * jax.random.normal(
                keys[5], (srnn_hid * modal_num,), jnp.float32),
        },
    }

    # One-time weight preparation (folding + 128-lane padding), hoisted.
    prepped = prepare_params(params)

    xk_seq = jax.random.normal(keys[6], (seq_len, batch, srnn_input_dims["k"]))
    xv_seq = jax.random.normal(keys[7], (seq_len, batch, srnn_input_dims["v"]))
    xp_seq = jax.random.normal(keys[8], (seq_len, batch, srnn_input_dims["p"]))

    # Non-zero previous states to exercise every path in the cell.
    states0 = [
        (0.5 * jax.random.normal(keys[9], (batch, srnn_hid)),
         0.5 * jax.random.normal(keys[10], (batch, srnn_hid))),
        (jnp.zeros((batch, srnn_hid)), jnp.zeros((batch, srnn_hid))),
        (0.5 * jax.random.normal(keys[11], (batch, srnn_hid)),
         jnp.zeros((batch, srnn_hid))),
        (jnp.zeros((batch, urnn_hid)), jnp.zeros((batch, urnn_hid))),
    ]

    # --- Full sequence in one kernel launch ---------------------------------
    h_seq, c_seq = hierarchical_rnn_sequence(prepped, xk_seq, xv_seq, xp_seq,
                                             states0)
    jax.block_until_ready((h_seq, c_seq))

    # --- Reference: step the pure-JAX module seq_len times -------------------
    ref_states = states0
    for t in range(seq_len):
        ref_states = forward_ref(params, xk_seq[t], xv_seq[t], xp_seq[t], t,
                                 ref_states)
        got_states = unpack_state(h_seq[t], c_seq[t], prepped)
        for (h_k, c_k), (h_r, c_r) in zip(got_states, ref_states):
            np.testing.assert_allclose(np.asarray(h_k), np.asarray(h_r),
                                       rtol=1e-3, atol=5e-3)
            np.testing.assert_allclose(np.asarray(c_k), np.asarray(c_r),
                                       rtol=1e-3, atol=5e-3)

    # --- Single-step API (module-signature fidelity) -------------------------
    one_step = hierarchical_rnn_cell(prepped, xk_seq[0], xv_seq[0], xp_seq[0],
                                     0, states0)
    jax.block_until_ready(one_step)
    ref_one = forward_ref(params, xk_seq[0], xv_seq[0], xp_seq[0], 0, states0)
    for (h_k, c_k), (h_r, c_r) in zip(one_step, ref_one):
        np.testing.assert_allclose(np.asarray(h_k), np.asarray(h_r),
                                   rtol=1e-3, atol=5e-3)
        np.testing.assert_allclose(np.asarray(c_k), np.asarray(c_r),
                                   rtol=1e-3, atol=5e-3)

    print("KERNEL_OK")
</pallas_src>

<mosaic_0001>
module attributes {stable_mosaic.version = 11 : i64} {
  func.func @_hrnn_seq_kernel(%arg0: i32, %arg1: memref<8x8x512xf32, #tpu.memory_space<vmem>>, %arg2: memref<8x256xf32, #tpu.memory_space<vmem>>, %arg3: memref<8x256xf32, #tpu.memory_space<vmem>>, %arg4: memref<256x512xf32, #tpu.memory_space<vmem>>, %arg5: memref<128x512xf32, #tpu.memory_space<vmem>>, %arg6: memref<1x512xf32, #tpu.memory_space<vmem>>, %arg7: memref<8x8x512xf32, #tpu.memory_space<vmem>>, %arg8: memref<8x256xf32, #tpu.memory_space<vmem>>, %arg9: memref<8x256xf32, #tpu.memory_space<vmem>>) attributes {dimension_semantics = [#tpu.dimension_semantics<arbitrary>], iteration_bounds = array<i64: 1>, scalar_prefetch = 0 : i64, scratch_operands = 2 : i64, tpu.core_type = #tpu.core_type<tc>, window_params = [{transform_indices = @transform_0, window_bounds = array<i64: 8, 8, 512>}, {pipeline_mode = #tpu.pipeline_mode<synchronous>, transform_indices = @transform_1, window_bounds = array<i64: 8, 256>}, {pipeline_mode = #tpu.pipeline_mode<synchronous>, transform_indices = @transform_2, window_bounds = array<i64: 8, 256>}, {pipeline_mode = #tpu.pipeline_mode<synchronous>, transform_indices = @transform_3, window_bounds = array<i64: 256, 512>}, {pipeline_mode = #tpu.pipeline_mode<synchronous>, transform_indices = @transform_4, window_bounds = array<i64: 128, 512>}, {pipeline_mode = #tpu.pipeline_mode<synchronous>, transform_indices = @transform_5, window_bounds = array<i64: 1, 512>}, {transform_indices = @transform_6, window_bounds = array<i64: 8, 8, 512>}]} {
    %c0_i32 = arith.constant 0 : i32
    %0 = arith.cmpi eq, %arg0, %c0_i32 : i32
    %1 = arith.extui %0 : i1 to i32
    %c0_i32_0 = arith.constant 0 : i32
    %2 = arith.cmpi ne, %1, %c0_i32_0 : i32
    scf.if %2 {
      %c0_206 = arith.constant 0 : index
      %c0_207 = arith.constant 0 : index
      %636 = vector.load %arg2[%c0_206, %c0_207] : memref<8x256xf32, #tpu.memory_space<vmem>>, vector<8x256xf32>
      %c0_208 = arith.constant 0 : index
      %c0_209 = arith.constant 0 : index
      %637 = vector.load %arg8[%c0_208, %c0_209] : memref<8x256xf32, #tpu.memory_space<vmem>>, vector<8x256xf32>
      tpu.vector_store %arg8[%c0_208, %c0_209], %636 {strides = array<i32>} : memref<8x256xf32, #tpu.memory_space<vmem>>, vector<8x256xf32>,
      %c0_210 = arith.constant 0 : index
      %c0_211 = arith.constant 0 : index
      %638 = vector.load %arg3[%c0_210, %c0_211] : memref<8x256xf32, #tpu.memory_space<vmem>>, vector<8x256xf32>
      %c0_212 = arith.constant 0 : index
      %c0_213 = arith.constant 0 : index
      %639 = vector.load %arg9[%c0_212, %c0_213] : memref<8x256xf32, #tpu.memory_space<vmem>>, vector<8x256xf32>
      tpu.vector_store %arg9[%c0_212, %c0_213], %638 {strides = array<i32>} : memref<8x256xf32, #tpu.memory_space<vmem>>, vector<8x256xf32>,
    } else {
    }
    %c0 = arith.constant 0 : index
    %c0_1 = arith.constant 0 : index
    %3 = vector.load %arg4[%c0, %c0_1] : memref<256x512xf32, #tpu.memory_space<vmem>>, vector<256x512xf32>
    %c0_2 = arith.constant 0 : index
    %c0_3 = arith.constant 0 : index
    %4 = vector.load %arg5[%c0_2, %c0_3] : memref<128x512xf32, #tpu.memory_space<vmem>>, vector<128x512xf32>
    %c0_4 = arith.constant 0 : index
    %c0_5 = arith.constant 0 : index
    %5 = vector.load %arg6[%c0_4, %c0_5] : memref<1x512xf32, #tpu.memory_space<vmem>>, vector<1x512xf32>
    %6 = vector.shape_cast %5 : vector<1x512xf32> to vector<1x512xf32>
    %7 = vector.broadcast %6 : vector<1x512xf32> to vector<8x512xf32>
    %c0_6 = arith.constant 0 : index
    %c0_7 = arith.constant 0 : index
    %8 = vector.load %arg8[%c0_6, %c0_7] : memref<8x256xf32, #tpu.memory_space<vmem>>, vector<8x256xf32>
    %c0_8 = arith.constant 0 : index
    %c0_9 = arith.constant 0 : index
    %9 = vector.load %arg9[%c0_8, %c0_9] : memref<8x256xf32, #tpu.memory_space<vmem>>, vector<8x256xf32>
    %c0_i32_10 = arith.constant 0 : i32
    %cst = arith.constant dense<0.000000e+00> : vector<8x512xf32>
    %10 = tpu.matmul %8, %3, %cst {dimension_numbers = #tpu.dot_dimension_numbers<[1], [0], [0], [1], [0, 0, 1, 1], [], []>} : vector<8x256xf32>, vector<256x512xf32>, vector<8x512xf32> -> vector<8x512xf32>
    %11 = arith.addf %10, %7 : vector<8x512xf32>
    %12 = vector.extract_strided_slice %11 {offsets = [0, 0], sizes = [8, 128], strides = [1, 1]} : vector<8x512xf32> to vector<8x128xf32>
    %cst_11 = arith.constant 5.000000e-01 : f32
    %13 = vector.broadcast %cst_11 : f32 to vector<8x128xf32>
    %14 = arith.mulf %13, %12 : vector<8x128xf32>
    %15 = math.tanh %14 : vector<8x128xf32>
    %cst_12 = arith.constant 1.000000e+00 : f32
    %16 = vector.broadcast %cst_12 : f32 to vector<8x128xf32>
    %17 = arith.addf %15, %16 : vector<8x128xf32>
    %cst_13 = arith.constant 5.000000e-01 : f32
    %18 = vector.broadcast %cst_13 : f32 to vector<8x128xf32>
    %19 = arith.mulf %18, %17 : vector<8x128xf32>
    %20 = vector.extract_strided_slice %11 {offsets = [0, 128], sizes = [8, 128], strides = [1, 1]} : vector<8x512xf32> to vector<8x128xf32>
    %cst_14 = arith.constant 5.000000e-01 : f32
    %21 = vector.broadcast %cst_14 : f32 to vector<8x128xf32>
    %22 = arith.mulf %21, %20 : vector<8x128xf32>
    %23 = math.tanh %22 : vector<8x128xf32>
    %cst_15 = arith.constant 1.000000e+00 : f32
    %24 = vector.broadcast %cst_15 : f32 to vector<8x128xf32>
    %25 = arith.addf %23, %24 : vector<8x128xf32>
    %cst_16 = arith.constant 5.000000e-01 : f32
    %26 = vector.broadcast %cst_16 : f32 to vector<8x128xf32>
    %27 = arith.mulf %26, %25 : vector<8x128xf32>
    %28 = vector.extract_strided_slice %11 {offsets = [0, 256], sizes = [8, 128], strides = [1, 1]} : vector<8x512xf32> to vector<8x128xf32>
    %29 = math.tanh %28 : vector<8x128xf32>
    %30 = vector.extract_strided_slice %11 {offsets = [0, 384], sizes = [8, 128], strides = [1, 1]} : vector<8x512xf32> to vector<8x128xf32>
    %cst_17 = arith.constant 5.000000e-01 : f32
    %31 = vector.broadcast %cst_17 : f32 to vector<8x128xf32>
    %32 = arith.mulf %31, %30 : vector<8x128xf32>
    %33 = math.tanh %32 : vector<8x128xf32>
    %cst_18 = arith.constant 1.000000e+00 : f32
    %34 = vector.broadcast %cst_18 : f32 to vector<8x128xf32>
    %35 = arith.addf %33, %34 : vector<8x128xf32>
    %cst_19 = arith.constant 5.000000e-01 : f32
    %36 = vector.broadcast %cst_19 : f32 to vector<8x128xf32>
    %37 = arith.mulf %36, %35 : vector<8x128xf32>
    %38 = vector.extract_strided_slice %9 {offsets = [0, 128], sizes = [8, 128], strides = [1, 1]} : vector<8x256xf32> to vector<8x128xf32>
    %39 = arith.mulf %27, %38 : vector<8x128xf32>
    %40 = arith.mulf %19, %29 : vector<8x128xf32>
    %41 = arith.addf %39, %40 : vector<8x128xf32>
    %42 = math.tanh %41 : vector<8x128xf32>
    %43 = arith.mulf %37, %42 : vector<8x128xf32>
    %44 = arith.index_cast %c0_i32_10 : i32 to index
    %c0_20 = arith.constant 0 : index
    %c0_21 = arith.constant 0 : index
    %45 = vector.load %arg1[%44, %c0_20, %c0_21] : memref<8x8x512xf32, #tpu.memory_space<vmem>>, vector<1x8x512xf32>
    %46 = vector.shape_cast %45 : vector<1x8x512xf32> to vector<8x512xf32>
    %cst_22 = arith.constant dense<0.000000e+00> : vector<8x512xf32>
    %47 = tpu.matmul %43, %4, %cst_22 {dimension_numbers = #tpu.dot_dimension_numbers<[1], [0], [0], [1], [0, 0, 1, 1], [], []>} : vector<8x128xf32>, vector<128x512xf32>, vector<8x512xf32> -> vector<8x512xf32>
    %48 = arith.addf %46, %47 : vector<8x512xf32>
    %49 = vector.extract_strided_slice %48 {offsets = [0, 0], sizes = [8, 128], strides = [1, 1]} : vector<8x512xf32> to vector<8x128xf32>
    %cst_23 = arith.constant 5.000000e-01 : f32
    %50 = vector.broadcast %cst_23 : f32 to vector<8x128xf32>
    %51 = arith.mulf %50, %49 : vector<8x128xf32>
    %52 = math.tanh %51 : vector<8x128xf32>
    %cst_24 = arith.constant 1.000000e+00 : f32
    %53 = vector.broadcast %cst_24 : f32 to vector<8x128xf32>
    %54 = arith.addf %52, %53 : vector<8x128xf32>
    %cst_25 = arith.constant 5.000000e-01 : f32
    %55 = vector.broadcast %cst_25 : f32 to vector<8x128xf32>
    %56 = arith.mulf %55, %54 : vector<8x128xf32>
    %57 = vector.extract_strided_slice %48 {offsets = [0, 128], sizes = [8, 128], strides = [1, 1]} : vector<8x512xf32> to vector<8x128xf32>
    %cst_26 = arith.constant 5.000000e-01 : f32
    %58 = vector.broadcast %cst_26 : f32 to vector<8x128xf32>
    %59 = arith.mulf %58, %57 : vector<8x128xf32>
    %60 = math.tanh %59 : vector<8x128xf32>
    %cst_27 = arith.constant 1.000000e+00 : f32
    %61 = vector.broadcast %cst_27 : f32 to vector<8x128xf32>
    %62 = arith.addf %60, %61 : vector<8x128xf32>
    %cst_28 = arith.constant 5.000000e-01 : f32
    %63 = vector.broadcast %cst_28 : f32 to vector<8x128xf32>
    %64 = arith.mulf %63, %62 : vector<8x128xf32>
    %65 = vector.extract_strided_slice %48 {offsets = [0, 256], sizes = [8, 128], strides = [1, 1]} : vector<8x512xf32> to vector<8x128xf32>
    %66 = math.tanh %65 : vector<8x128xf32>
    %67 = vector.extract_strided_slice %48 {offsets = [0, 384], sizes = [8, 128], strides = [1, 1]} : vector<8x512xf32> to vector<8x128xf32>
    %cst_29 = arith.constant 5.000000e-01 : f32
    %68 = vector.broadcast %cst_29 : f32 to vector<8x128xf32>
    %69 = arith.mulf %68, %67 : vector<8x128xf32>
    %70 = math.tanh %69 : vector<8x128xf32>
    %cst_30 = arith.constant 1.000000e+00 : f32
    %71 = vector.broadcast %cst_30 : f32 to vector<8x128xf32>
    %72 = arith.addf %70, %71 : vector<8x128xf32>
    %cst_31 = arith.constant 5.000000e-01 : f32
    %73 = vector.broadcast %cst_31 : f32 to vector<8x128xf32>
    %74 = arith.mulf %73, %72 : vector<8x128xf32>
    %75 = vector.extract_strided_slice %9 {offsets = [0, 0], sizes = [8, 128], strides = [1, 1]} : vector<8x256xf32> to vector<8x128xf32>
    %76 = arith.mulf %64, %75 : vector<8x128xf32>
    %77 = arith.mulf %56, %66 : vector<8x128xf32>
    %78 = arith.addf %76, %77 : vector<8x128xf32>
    %79 = math.tanh %78 : vector<8x128xf32>
    %80 = arith.mulf %74, %79 : vector<8x128xf32>
    %81 = tpu.concatenate %80, %43 in 1 : vector<8x128xf32>, vector<8x128xf32> -> vector<8x256xf32>
    %82 = tpu.concatenate %78, %41 in 1 : vector<8x128xf32>, vector<8x128xf32> -> vector<8x256xf32>
    %83 = tpu.concatenate %81, %82 in 1 : vector<8x256xf32>, vector<8x256xf32> -> vector<8x512xf32>
    %84 = arith.index_cast %c0_i32_10 : i32 to index
    %c0_32 = arith.constant 0 : index
    %c0_33 = arith.constant 0 : index
    %85 = vector.load %arg7[%84, %c0_32, %c0_33] : memref<8x8x512xf32, #tpu.memory_space<vmem>>, vector<1x8x512xf32>
    %86 = vector.shape_cast %85 : vector<1x8x512xf32> to vector<8x512xf32>
    %87 = vector.shape_cast %83 : vector<8x512xf32> to vector<1x8x512xf32>
    tpu.vector_store %arg7[%84, %c0_32, %c0_33], %87 {strides = array<i32>} : memref<8x8x512xf32, #tpu.memory_space<vmem>>, vector<1x8x512xf32>,
    %c1_i32 = arith.constant 1 : i32
    %cst_34 = arith.constant dense<0.000000e+00> : vector<8x512xf32>
    %88 = tpu.matmul %81, %3, %cst_34 {dimension_numbers = #tpu.dot_dimension_numbers<[1], [0], [0], [1], [0, 0, 1, 1], [], []>} : vector<8x256xf32>, vector<256x512xf32>, vector<8x512xf32> -> vector<8x512xf32>
    %89 = arith.addf %88, %7 : vector<8x512xf32>
    %90 = vector.extract_strided_slice %89 {offsets = [0, 0], sizes = [8, 128], strides = [1, 1]} : vector<8x512xf32> to vector<8x128xf32>
    %cst_35 = arith.constant 5.000000e-01 : f32
    %91 = vector.broadcast %cst_35 : f32 to vector<8x128xf32>
    %92 = arith.mulf %91, %90 : vector<8x128xf32>
    %93 = math.tanh %92 : vector<8x128xf32>
    %cst_36 = arith.constant 1.000000e+00 : f32
    %94 = vector.broadcast %cst_36 : f32 to vector<8x128xf32>
    %95 = arith.addf %93, %94 : vector<8x128xf32>
    %cst_37 = arith.constant 5.000000e-01 : f32
    %96 = vector.broadcast %cst_37 : f32 to vector<8x128xf32>
    %97 = arith.mulf %96, %95 : vector<8x128xf32>
    %98 = vector.extract_strided_slice %89 {offsets = [0, 128], sizes = [8, 128], strides = [1, 1]} : vector<8x512xf32> to vector<8x128xf32>
    %cst_38 = arith.constant 5.000000e-01 : f32
    %99 = vector.broadcast %cst_38 : f32 to vector<8x128xf32>
    %100 = arith.mulf %99, %98 : vector<8x128xf32>
    %101 = math.tanh %100 : vector<8x128xf32>
    %cst_39 = arith.constant 1.000000e+00 : f32
    %102 = vector.broadcast %cst_39 : f32 to vector<8x128xf32>
    %103 = arith.addf %101, %102 : vector<8x128xf32>
    %cst_40 = arith.constant 5.000000e-01 : f32
    %104 = vector.broadcast %cst_40 : f32 to vector<8x128xf32>
    %105 = arith.mulf %104, %103 : vector<8x128xf32>
    %106 = vector.extract_strided_slice %89 {offsets = [0, 256], sizes = [8, 128], strides = [1, 1]} : vector<8x512xf32> to vector<8x128xf32>
    %107 = math.tanh %106 : vector<8x128xf32>
    %108 = vector.extract_strided_slice %89 {offsets = [0, 384], sizes = [8, 128], strides = [1, 1]} : vector<8x512xf32> to vector<8x128xf32>
    %cst_41 = arith.constant 5.000000e-01 : f32
    %109 = vector.broadcast %cst_41 : f32 to vector<8x128xf32>
    %110 = arith.mulf %109, %108 : vector<8x128xf32>
    %111 = math.tanh %110 : vector<8x128xf32>
    %cst_42 = arith.constant 1.000000e+00 : f32
    %112 = vector.broadcast %cst_42 : f32 to vector<8x128xf32>
    %113 = arith.addf %111, %112 : vector<8x128xf32>
    %cst_43 = arith.constant 5.000000e-01 : f32
    %114 = vector.broadcast %cst_43 : f32 to vector<8x128xf32>
    %115 = arith.mulf %114, %113 : vector<8x128xf32>
    %116 = vector.extract_strided_slice %82 {offsets = [0, 128], sizes = [8, 128], strides = [1, 1]} : vector<8x256xf32> to vector<8x128xf32>
    %117 = arith.mulf %105, %116 : vector<8x128xf32>
    %118 = arith.mulf %97, %107 : vector<8x128xf32>
    %119 = arith.addf %117, %118 : vector<8x128xf32>
    %120 = math.tanh %119 : vector<8x128xf32>
    %121 = arith.mulf %115, %120 : vector<8x128xf32>
    %122 = arith.index_cast %c1_i32 : i32 to index
    %c0_44 = arith.constant 0 : index
    %c0_45 = arith.constant 0 : index
    %123 = vector.load %arg1[%122, %c0_44, %c0_45] : memref<8x8x512xf32, #tpu.memory_space<vmem>>, vector<1x8x512xf32>
    %124 = vector.shape_cast %123 : vector<1x8x512xf32> to vector<8x512xf32>
    %cst_46 = arith.constant dense<0.000000e+00> : vector<8x512xf32>
    %125 = tpu.matmul %121, %4, %cst_46 {dimension_numbers = #tpu.dot_dimension_numbers<[1], [0], [0], [1], [0, 0, 1, 1], [], []>} : vector<8x128xf32>, vector<128x512xf32>, vector<8x512xf32> -> vector<8x512xf32>
    %126 = arith.addf %124, %125 : vector<8x512xf32>
    %127 = vector.extract_strided_slice %126 {offsets = [0, 0], sizes = [8, 128], strides = [1, 1]} : vector<8x512xf32> to vector<8x128xf32>
    %cst_47 = arith.constant 5.000000e-01 : f32
    %128 = vector.broadcast %cst_47 : f32 to vector<8x128xf32>
    %129 = arith.mulf %128, %127 : vector<8x128xf32>
    %130 = math.tanh %129 : vector<8x128xf32>
    %cst_48 = arith.constant 1.000000e+00 : f32
    %131 = vector.broadcast %cst_48 : f32 to vector<8x128xf32>
    %132 = arith.addf %130, %131 : vector<8x128xf32>
    %cst_49 = arith.constant 5.000000e-01 : f32
    %133 = vector.broadcast %cst_49 : f32 to vector<8x128xf32>
    %134 = arith.mulf %133, %132 : vector<8x128xf32>
    %135 = vector.extract_strided_slice %126 {offsets = [0, 128], sizes = [8, 128], strides = [1, 1]} : vector<8x512xf32> to vector<8x128xf32>
    %cst_50 = arith.constant 5.000000e-01 : f32
    %136 = vector.broadcast %cst_50 : f32 to vector<8x128xf32>
    %137 = arith.mulf %136, %135 : vector<8x128xf32>
    %138 = math.tanh %137 : vector<8x128xf32>
    %cst_51 = arith.constant 1.000000e+00 : f32
    %139 = vector.broadcast %cst_51 : f32 to vector<8x128xf32>
    %140 = arith.addf %138, %139 : vector<8x128xf32>
    %cst_52 = arith.constant 5.000000e-01 : f32
    %141 = vector.broadcast %cst_52 : f32 to vector<8x128xf32>
    %142 = arith.mulf %141, %140 : vector<8x128xf32>
    %143 = vector.extract_strided_slice %126 {offsets = [0, 256], sizes = [8, 128], strides = [1, 1]} : vector<8x512xf32> to vector<8x128xf32>
    %144 = math.tanh %143 : vector<8x128xf32>
    %145 = vector.extract_strided_slice %126 {offsets = [0, 384], sizes = [8, 128], strides = [1, 1]} : vector<8x512xf32> to vector<8x128xf32>
    %cst_53 = arith.constant 5.000000e-01 : f32
    %146 = vector.broadcast %cst_53 : f32 to vector<8x128xf32>
    %147 = arith.mulf %146, %145 : vector<8x128xf32>
    %148 = math.tanh %147 : vector<8x128xf32>
    %cst_54 = arith.constant 1.000000e+00 : f32
    %149 = vector.broadcast %cst_54 : f32 to vector<8x128xf32>
    %150 = arith.addf %148, %149 : vector<8x128xf32>
    %cst_55 = arith.constant 5.000000e-01 : f32
    %151 = vector.broadcast %cst_55 : f32 to vector<8x128xf32>
    %152 = arith.mulf %151, %150 : vector<8x128xf32>
    %153 = vector.extract_strided_slice %82 {offsets = [0, 0], sizes = [8, 128], strides = [1, 1]} : vector<8x256xf32> to vector<8x128xf32>
    %154 = arith.mulf %142, %153 : vector<8x128xf32>
    %155 = arith.mulf %134, %144 : vector<8x128xf32>
    %156 = arith.addf %154, %155 : vector<8x128xf32>
    %157 = math.tanh %156 : vector<8x128xf32>
    %158 = arith.mulf %152, %157 : vector<8x128xf32>
    %159 = tpu.concatenate %158, %121 in 1 : vector<8x128xf32>, vector<8x128xf32> -> vector<8x256xf32>
    %160 = tpu.concatenate %156, %119 in 1 : vector<8x128xf32>, vector<8x128xf32> -> vector<8x256xf32>
    %161 = tpu.concatenate %159, %160 in 1 : vector<8x256xf32>, vector<8x256xf32> -> vector<8x512xf32>
    %162 = arith.index_cast %c1_i32 : i32 to index
    %c0_56 = arith.constant 0 : index
    %c0_57 = arith.constant 0 : index
    %163 = vector.load %arg7[%162, %c0_56, %c0_57] : memref<8x8x512xf32, #tpu.memory_space<vmem>>, vector<1x8x512xf32>
    %164 = vector.shape_cast %163 : vector<1x8x512xf32> to vector<8x512xf32>
    %165 = vector.shape_cast %161 : vector<8x512xf32> to vector<1x8x512xf32>
    tpu.vector_store %arg7[%162, %c0_56, %c0_57], %165 {strides = array<i32>} : memref<8x8x512xf32, #tpu.memory_space<vmem>>, vector<1x8x512xf32>,
    %c2_i32 = arith.constant 2 : i32
    %cst_58 = arith.constant dense<0.000000e+00> : vector<8x512xf32>
    %166 = tpu.matmul %159, %3, %cst_58 {dimension_numbers = #tpu.dot_dimension_numbers<[1], [0], [0], [1], [0, 0, 1, 1], [], []>} : vector<8x256xf32>, vector<256x512xf32>, vector<8x512xf32> -> vector<8x512xf32>
    %167 = arith.addf %166, %7 : vector<8x512xf32>
    %168 = vector.extract_strided_slice %167 {offsets = [0, 0], sizes = [8, 128], strides = [1, 1]} : vector<8x512xf32> to vector<8x128xf32>
    %cst_59 = arith.constant 5.000000e-01 : f32
    %169 = vector.broadcast %cst_59 : f32 to vector<8x128xf32>
    %170 = arith.mulf %169, %168 : vector<8x128xf32>
    %171 = math.tanh %170 : vector<8x128xf32>
    %cst_60 = arith.constant 1.000000e+00 : f32
    %172 = vector.broadcast %cst_60 : f32 to vector<8x128xf32>
    %173 = arith.addf %171, %172 : vector<8x128xf32>
    %cst_61 = arith.constant 5.000000e-01 : f32
    %174 = vector.broadcast %cst_61 : f32 to vector<8x128xf32>
    %175 = arith.mulf %174, %173 : vector<8x128xf32>
    %176 = vector.extract_strided_slice %167 {offsets = [0, 128], sizes = [8, 128], strides = [1, 1]} : vector<8x512xf32> to vector<8x128xf32>
    %cst_62 = arith.constant 5.000000e-01 : f32
    %177 = vector.broadcast %cst_62 : f32 to vector<8x128xf32>
    %178 = arith.mulf %177, %176 : vector<8x128xf32>
    %179 = math.tanh %178 : vector<8x128xf32>
    %cst_63 = arith.constant 1.000000e+00 : f32
    %180 = vector.broadcast %cst_63 : f32 to vector<8x128xf32>
    %181 = arith.addf %179, %180 : vector<8x128xf32>
    %cst_64 = arith.constant 5.000000e-01 : f32
    %182 = vector.broadcast %cst_64 : f32 to vector<8x128xf32>
    %183 = arith.mulf %182, %181 : vector<8x128xf32>
    %184 = vector.extract_strided_slice %167 {offsets = [0, 256], sizes = [8, 128], strides = [1, 1]} : vector<8x512xf32> to vector<8x128xf32>
    %185 = math.tanh %184 : vector<8x128xf32>
    %186 = vector.extract_strided_slice %167 {offsets = [0, 384], sizes = [8, 128], strides = [1, 1]} : vector<8x512xf32> to vector<8x128xf32>
    %cst_65 = arith.constant 5.000000e-01 : f32
    %187 = vector.broadcast %cst_65 : f32 to vector<8x128xf32>
    %188 = arith.mulf %187, %186 : vector<8x128xf32>
    %189 = math.tanh %188 : vector<8x128xf32>
    %cst_66 = arith.constant 1.000000e+00 : f32
    %190 = vector.broadcast %cst_66 : f32 to vector<8x128xf32>
    %191 = arith.addf %189, %190 : vector<8x128xf32>
    %cst_67 = arith.constant 5.000000e-01 : f32
    %192 = vector.broadcast %cst_67 : f32 to vector<8x128xf32>
    %193 = arith.mulf %192, %191 : vector<8x128xf32>
    %194 = vector.extract_strided_slice %160 {offsets = [0, 128], sizes = [8, 128], strides = [1, 1]} : vector<8x256xf32> to vector<8x128xf32>
    %195 = arith.mulf %183, %194 : vector<8x128xf32>
    %196 = arith.mulf %175, %185 : vector<8x128xf32>
    %197 = arith.addf %195, %196 : vector<8x128xf32>
    %198 = math.tanh %197 : vector<8x128xf32>
    %199 = arith.mulf %193, %198 : vector<8x128xf32>
    %200 = arith.index_cast %c2_i32 : i32 to index
    %c0_68 = arith.constant 0 : index
    %c0_69 = arith.constant 0 : index
    %201 = vector.load %arg1[%200, %c0_68, %c0_69] : memref<8x8x512xf32, #tpu.memory_space<vmem>>, vector<1x8x512xf32>
    %202 = vector.shape_cast %201 : vector<1x8x512xf32> to vector<8x512xf32>
    %cst_70 = arith.constant dense<0.000000e+00> : vector<8x512xf32>
    %203 = tpu.matmul %199, %4, %cst_70 {dimension_numbers = #tpu.dot_dimension_numbers<[1], [0], [0], [1], [0, 0, 1, 1], [], []>} : vector<8x128xf32>, vector<128x512xf32>, vector<8x512xf32> -> vector<8x512xf32>
    %204 = arith.addf %202, %203 : vector<8x512xf32>
    %205 = vector.extract_strided_slice %204 {offsets = [0, 0], sizes = [8, 128], strides = [1, 1]} : vector<8x512xf32> to vector<8x128xf32>
    %cst_71 = arith.constant 5.000000e-01 : f32
    %206 = vector.broadcast %cst_71 : f32 to vector<8x128xf32>
    %207 = arith.mulf %206, %205 : vector<8x128xf32>
    %208 = math.tanh %207 : vector<8x128xf32>
    %cst_72 = arith.constant 1.000000e+00 : f32
    %209 = vector.broadcast %cst_72 : f32 to vector<8x128xf32>
    %210 = arith.addf %208, %209 : vector<8x128xf32>
    %cst_73 = arith.constant 5.000000e-01 : f32
    %211 = vector.broadcast %cst_73 : f32 to vector<8x128xf32>
    %212 = arith.mulf %211, %210 : vector<8x128xf32>
    %213 = vector.extract_strided_slice %204 {offsets = [0, 128], sizes = [8, 128], strides = [1, 1]} : vector<8x512xf32> to vector<8x128xf32>
    %cst_74 = arith.constant 5.000000e-01 : f32
    %214 = vector.broadcast %cst_74 : f32 to vector<8x128xf32>
    %215 = arith.mulf %214, %213 : vector<8x128xf32>
    %216 = math.tanh %215 : vector<8x128xf32>
    %cst_75 = arith.constant 1.000000e+00 : f32
    %217 = vector.broadcast %cst_75 : f32 to vector<8x128xf32>
    %218 = arith.addf %216, %217 : vector<8x128xf32>
    %cst_76 = arith.constant 5.000000e-01 : f32
    %219 = vector.broadcast %cst_76 : f32 to vector<8x128xf32>
    %220 = arith.mulf %219, %218 : vector<8x128xf32>
    %221 = vector.extract_strided_slice %204 {offsets = [0, 256], sizes = [8, 128], strides = [1, 1]} : vector<8x512xf32> to vector<8x128xf32>
    %222 = math.tanh %221 : vector<8x128xf32>
    %223 = vector.extract_strided_slice %204 {offsets = [0, 384], sizes = [8, 128], strides = [1, 1]} : vector<8x512xf32> to vector<8x128xf32>
    %cst_77 = arith.constant 5.000000e-01 : f32
    %224 = vector.broadcast %cst_77 : f32 to vector<8x128xf32>
    %225 = arith.mulf %224, %223 : vector<8x128xf32>
    %226 = math.tanh %225 : vector<8x128xf32>
    %cst_78 = arith.constant 1.000000e+00 : f32
    %227 = vector.broadcast %cst_78 : f32 to vector<8x128xf32>
    %228 = arith.addf %226, %227 : vector<8x128xf32>
    %cst_79 = arith.constant 5.000000e-01 : f32
    %229 = vector.broadcast %cst_79 : f32 to vector<8x128xf32>
    %230 = arith.mulf %229, %228 : vector<8x128xf32>
    %231 = vector.extract_strided_slice %160 {offsets = [0, 0], sizes = [8, 128], strides = [1, 1]} : vector<8x256xf32> to vector<8x128xf32>
    %232 = arith.mulf %220, %231 : vector<8x128xf32>
    %233 = arith.mulf %212, %222 : vector<8x128xf32>
    %234 = arith.addf %232, %233 : vector<8x128xf32>
    %235 = math.tanh %234 : vector<8x128xf32>
    %236 = arith.mulf %230, %235 : vector<8x128xf32>
    %237 = tpu.concatenate %236, %199 in 1 : vector<8x128xf32>, vector<8x128xf32> -> vector<8x256xf32>
    %238 = tpu.concatenate %234, %197 in 1 : vector<8x128xf32>, vector<8x128xf32> -> vector<8x256xf32>
    %239 = tpu.concatenate %237, %238 in 1 : vector<8x256xf32>, vector<8x256xf32> -> vector<8x512xf32>
    %240 = arith.index_cast %c2_i32 : i32 to index
    %c0_80 = arith.constant 0 : index
    %c0_81 = arith.constant 0 : index
    %241 = vector.load %arg7[%240, %c0_80, %c0_81] : memref<8x8x512xf32, #tpu.memory_space<vmem>>, vector<1x8x512xf32>
    %242 = vector.shape_cast %241 : vector<1x8x512xf32> to vector<8x512xf32>
    %243 = vector.shape_cast %239 : vector<8x512xf32> to vector<1x8x512xf32>
    tpu.vector_store %arg7[%240, %c0_80, %c0_81], %243 {strides = array<i32>} : memref<8x8x512xf32, #tpu.memory_space<vmem>>, vector<1x8x512xf32>,
    %c3_i32 = arith.constant 3 : i32
    %cst_82 = arith.constant dense<0.000000e+00> : vector<8x512xf32>
    %244 = tpu.matmul %237, %3, %cst_82 {dimension_numbers = #tpu.dot_dimension_numbers<[1], [0], [0], [1], [0, 0, 1, 1], [], []>} : vector<8x256xf32>, vector<256x512xf32>, vector<8x512xf32> -> vector<8x512xf32>
    %245 = arith.addf %244, %7 : vector<8x512xf32>
    %246 = vector.extract_strided_slice %245 {offsets = [0, 0], sizes = [8, 128], strides = [1, 1]} : vector<8x512xf32> to vector<8x128xf32>
    %cst_83 = arith.constant 5.000000e-01 : f32
    %247 = vector.broadcast %cst_83 : f32 to vector<8x128xf32>
    %248 = arith.mulf %247, %246 : vector<8x128xf32>
    %249 = math.tanh %248 : vector<8x128xf32>
    %cst_84 = arith.constant 1.000000e+00 : f32
    %250 = vector.broadcast %cst_84 : f32 to vector<8x128xf32>
    %251 = arith.addf %249, %250 : vector<8x128xf32>
    %cst_85 = arith.constant 5.000000e-01 : f32
    %252 = vector.broadcast %cst_85 : f32 to vector<8x128xf32>
    %253 = arith.mulf %252, %251 : vector<8x128xf32>
    %254 = vector.extract_strided_slice %245 {offsets = [0, 128], sizes = [8, 128], strides = [1, 1]} : vector<8x512xf32> to vector<8x128xf32>
    %cst_86 = arith.constant 5.000000e-01 : f32
    %255 = vector.broadcast %cst_86 : f32 to vector<8x128xf32>
    %256 = arith.mulf %255, %254 : vector<8x128xf32>
    %257 = math.tanh %256 : vector<8x128xf32>
    %cst_87 = arith.constant 1.000000e+00 : f32
    %258 = vector.broadcast %cst_87 : f32 to vector<8x128xf32>
    %259 = arith.addf %257, %258 : vector<8x128xf32>
    %cst_88 = arith.constant 5.000000e-01 : f32
    %260 = vector.broadcast %cst_88 : f32 to vector<8x128xf32>
    %261 = arith.mulf %260, %259 : vector<8x128xf32>
    %262 = vector.extract_strided_slice %245 {offsets = [0, 256], sizes = [8, 128], strides = [1, 1]} : vector<8x512xf32> to vector<8x128xf32>
    %263 = math.tanh %262 : vector<8x128xf32>
    %264 = vector.extract_strided_slice %245 {offsets = [0, 384], sizes = [8, 128], strides = [1, 1]} : vector<8x512xf32> to vector<8x128xf32>
    %cst_89 = arith.constant 5.000000e-01 : f32
    %265 = vector.broadcast %cst_89 : f32 to vector<8x128xf32>
    %266 = arith.mulf %265, %264 : vector<8x128xf32>
    %267 = math.tanh %266 : vector<8x128xf32>
    %cst_90 = arith.constant 1.000000e+00 : f32
    %268 = vector.broadcast %cst_90 : f32 to vector<8x128xf32>
    %269 = arith.addf %267, %268 : vector<8x128xf32>
    %cst_91 = arith.constant 5.000000e-01 : f32
    %270 = vector.broadcast %cst_91 : f32 to vector<8x128xf32>
    %271 = arith.mulf %270, %269 : vector<8x128xf32>
    %272 = vector.extract_strided_slice %238 {offsets = [0, 128], sizes = [8, 128], strides = [1, 1]} : vector<8x256xf32> to vector<8x128xf32>
    %273 = arith.mulf %261, %272 : vector<8x128xf32>
    %274 = arith.mulf %253, %263 : vector<8x128xf32>
    %275 = arith.addf %273, %274 : vector<8x128xf32>
    %276 = math.tanh %275 : vector<8x128xf32>
    %277 = arith.mulf %271, %276 : vector<8x128xf32>
    %278 = arith.index_cast %c3_i32 : i32 to index
    %c0_92 = arith.constant 0 : index
    %c0_93 = arith.constant 0 : index
    %279 = vector.load %arg1[%278, %c0_92, %c0_93] : memref<8x8x512xf32, #tpu.memory_space<vmem>>, vector<1x8x512xf32>
    %280 = vector.shape_cast %279 : vector<1x8x512xf32> to vector<8x512xf32>
    %cst_94 = arith.constant dense<0.000000e+00> : vector<8x512xf32>
    %281 = tpu.matmul %277, %4, %cst_94 {dimension_numbers = #tpu.dot_dimension_numbers<[1], [0], [0], [1], [0, 0, 1, 1], [], []>} : vector<8x128xf32>, vector<128x512xf32>, vector<8x512xf32> -> vector<8x512xf32>
    %282 = arith.addf %280, %281 : vector<8x512xf32>
    %283 = vector.extract_strided_slice %282 {offsets = [0, 0], sizes = [8, 128], strides = [1, 1]} : vector<8x512xf32> to vector<8x128xf32>
    %cst_95 = arith.constant 5.000000e-01 : f32
    %284 = vector.broadcast %cst_95 : f32 to vector<8x128xf32>
    %285 = arith.mulf %284, %283 : vector<8x128xf32>
    %286 = math.tanh %285 : vector<8x128xf32>
    %cst_96 = arith.constant 1.000000e+00 : f32
    %287 = vector.broadcast %cst_96 : f32 to vector<8x128xf32>
    %288 = arith.addf %286, %287 : vector<8x128xf32>
    %cst_97 = arith.constant 5.000000e-01 : f32
    %289 = vector.broadcast %cst_97 : f32 to vector<8x128xf32>
    %290 = arith.mulf %289, %288 : vector<8x128xf32>
    %291 = vector.extract_strided_slice %282 {offsets = [0, 128], sizes = [8, 128], strides = [1, 1]} : vector<8x512xf32> to vector<8x128xf32>
    %cst_98 = arith.constant 5.000000e-01 : f32
    %292 = vector.broadcast %cst_98 : f32 to vector<8x128xf32>
    %293 = arith.mulf %292, %291 : vector<8x128xf32>
    %294 = math.tanh %293 : vector<8x128xf32>
    %cst_99 = arith.constant 1.000000e+00 : f32
    %295 = vector.broadcast %cst_99 : f32 to vector<8x128xf32>
    %296 = arith.addf %294, %295 : vector<8x128xf32>
    %cst_100 = arith.constant 5.000000e-01 : f32
    %297 = vector.broadcast %cst_100 : f32 to vector<8x128xf32>
    %298 = arith.mulf %297, %296 : vector<8x128xf32>
    %299 = vector.extract_strided_slice %282 {offsets = [0, 256], sizes = [8, 128], strides = [1, 1]} : vector<8x512xf32> to vector<8x128xf32>
    %300 = math.tanh %299 : vector<8x128xf32>
    %301 = vector.extract_strided_slice %282 {offsets = [0, 384], sizes = [8, 128], strides = [1, 1]} : vector<8x512xf32> to vector<8x128xf32>
    %cst_101 = arith.constant 5.000000e-01 : f32
    %302 = vector.broadcast %cst_101 : f32 to vector<8x128xf32>
    %303 = arith.mulf %302, %301 : vector<8x128xf32>
    %304 = math.tanh %303 : vector<8x128xf32>
    %cst_102 = arith.constant 1.000000e+00 : f32
    %305 = vector.broadcast %cst_102 : f32 to vector<8x128xf32>
    %306 = arith.addf %304, %305 : vector<8x128xf32>
    %cst_103 = arith.constant 5.000000e-01 : f32
    %307 = vector.broadcast %cst_103 : f32 to vector<8x128xf32>
    %308 = arith.mulf %307, %306 : vector<8x128xf32>
    %309 = vector.extract_strided_slice %238 {offsets = [0, 0], sizes = [8, 128], strides = [1, 1]} : vector<8x256xf32> to vector<8x128xf32>
    %310 = arith.mulf %298, %309 : vector<8x128xf32>
    %311 = arith.mulf %290, %300 : vector<8x128xf32>
    %312 = arith.addf %310, %311 : vector<8x128xf32>
    %313 = math.tanh %312 : vector<8x128xf32>
    %314 = arith.mulf %308, %313 : vector<8x128xf32>
    %315 = tpu.concatenate %314, %277 in 1 : vector<8x128xf32>, vector<8x128xf32> -> vector<8x256xf32>
    %316 = tpu.concatenate %312, %275 in 1 : vector<8x128xf32>, vector<8x128xf32> -> vector<8x256xf32>
    %317 = tpu.concatenate %315, %316 in 1 : vector<8x256xf32>, vector<8x256xf32> -> vector<8x512xf32>
    %318 = arith.index_cast %c3_i32 : i32 to index
    %c0_104 = arith.constant 0 : index
    %c0_105 = arith.constant 0 : index
    %319 = vector.load %arg7[%318, %c0_104, %c0_105] : memref<8x8x512xf32, #tpu.memory_space<vmem>>, vector<1x8x512xf32>
    %320 = vector.shape_cast %319 : vector<1x8x512xf32> to vector<8x512xf32>
    %321 = vector.shape_cast %317 : vector<8x512xf32> to vector<1x8x512xf32>
    tpu.vector_store %arg7[%318, %c0_104, %c0_105], %321 {strides = array<i32>} : memref<8x8x512xf32, #tpu.memory_space<vmem>>, vector<1x8x512xf32>,
    %c4_i32 = arith.constant 4 : i32
    %cst_106 = arith.constant dense<0.000000e+00> : vector<8x512xf32>
    %322 = tpu.matmul %315, %3, %cst_106 {dimension_numbers = #tpu.dot_dimension_numbers<[1], [0], [0], [1], [0, 0, 1, 1], [], []>} : vector<8x256xf32>, vector<256x512xf32>, vector<8x512xf32> -> vector<8x512xf32>
    %323 = arith.addf %322, %7 : vector<8x512xf32>
    %324 = vector.extract_strided_slice %323 {offsets = [0, 0], sizes = [8, 128], strides = [1, 1]} : vector<8x512xf32> to vector<8x128xf32>
    %cst_107 = arith.constant 5.000000e-01 : f32
    %325 = vector.broadcast %cst_107 : f32 to vector<8x128xf32>
    %326 = arith.mulf %325, %324 : vector<8x128xf32>
    %327 = math.tanh %326 : vector<8x128xf32>
    %cst_108 = arith.constant 1.000000e+00 : f32
    %328 = vector.broadcast %cst_108 : f32 to vector<8x128xf32>
    %329 = arith.addf %327, %328 : vector<8x128xf32>
    %cst_109 = arith.constant 5.000000e-01 : f32
    %330 = vector.broadcast %cst_109 : f32 to vector<8x128xf32>
    %331 = arith.mulf %330, %329 : vector<8x128xf32>
    %332 = vector.extract_strided_slice %323 {offsets = [0, 128], sizes = [8, 128], strides = [1, 1]} : vector<8x512xf32> to vector<8x128xf32>
    %cst_110 = arith.constant 5.000000e-01 : f32
    %333 = vector.broadcast %cst_110 : f32 to vector<8x128xf32>
    %334 = arith.mulf %333, %332 : vector<8x128xf32>
    %335 = math.tanh %334 : vector<8x128xf32>
    %cst_111 = arith.constant 1.000000e+00 : f32
    %336 = vector.broadcast %cst_111 : f32 to vector<8x128xf32>
    %337 = arith.addf %335, %336 : vector<8x128xf32>
    %cst_112 = arith.constant 5.000000e-01 : f32
    %338 = vector.broadcast %cst_112 : f32 to vector<8x128xf32>
    %339 = arith.mulf %338, %337 : vector<8x128xf32>
    %340 = vector.extract_strided_slice %323 {offsets = [0, 256], sizes = [8, 128], strides = [1, 1]} : vector<8x512xf32> to vector<8x128xf32>
    %341 = math.tanh %340 : vector<8x128xf32>
    %342 = vector.extract_strided_slice %323 {offsets = [0, 384], sizes = [8, 128], strides = [1, 1]} : vector<8x512xf32> to vector<8x128xf32>
    %cst_113 = arith.constant 5.000000e-01 : f32
    %343 = vector.broadcast %cst_113 : f32 to vector<8x128xf32>
    %344 = arith.mulf %343, %342 : vector<8x128xf32>
    %345 = math.tanh %344 : vector<8x128xf32>
    %cst_114 = arith.constant 1.000000e+00 : f32
    %346 = vector.broadcast %cst_114 : f32 to vector<8x128xf32>
    %347 = arith.addf %345, %346 : vector<8x128xf32>
    %cst_115 = arith.constant 5.000000e-01 : f32
    %348 = vector.broadcast %cst_115 : f32 to vector<8x128xf32>
    %349 = arith.mulf %348, %347 : vector<8x128xf32>
    %350 = vector.extract_strided_slice %316 {offsets = [0, 128], sizes = [8, 128], strides = [1, 1]} : vector<8x256xf32> to vector<8x128xf32>
    %351 = arith.mulf %339, %350 : vector<8x128xf32>
    %352 = arith.mulf %331, %341 : vector<8x128xf32>
    %353 = arith.addf %351, %352 : vector<8x128xf32>
    %354 = math.tanh %353 : vector<8x128xf32>
    %355 = arith.mulf %349, %354 : vector<8x128xf32>
    %356 = arith.index_cast %c4_i32 : i32 to index
    %c0_116 = arith.constant 0 : index
    %c0_117 = arith.constant 0 : index
    %357 = vector.load %arg1[%356, %c0_116, %c0_117] : memref<8x8x512xf32, #tpu.memory_space<vmem>>, vector<1x8x512xf32>
    %358 = vector.shape_cast %357 : vector<1x8x512xf32> to vector<8x512xf32>
    %cst_118 = arith.constant dense<0.000000e+00> : vector<8x512xf32>
    %359 = tpu.matmul %355, %4, %cst_118 {dimension_numbers = #tpu.dot_dimension_numbers<[1], [0], [0], [1], [0, 0, 1, 1], [], []>} : vector<8x128xf32>, vector<128x512xf32>, vector<8x512xf32> -> vector<8x512xf32>
    %360 = arith.addf %358, %359 : vector<8x512xf32>
    %361 = vector.extract_strided_slice %360 {offsets = [0, 0], sizes = [8, 128], strides = [1, 1]} : vector<8x512xf32> to vector<8x128xf32>
    %cst_119 = arith.constant 5.000000e-01 : f32
    %362 = vector.broadcast %cst_119 : f32 to vector<8x128xf32>
    %363 = arith.mulf %362, %361 : vector<8x128xf32>
    %364 = math.tanh %363 : vector<8x128xf32>
    %cst_120 = arith.constant 1.000000e+00 : f32
    %365 = vector.broadcast %cst_120 : f32 to vector<8x128xf32>
    %366 = arith.addf %364, %365 : vector<8x128xf32>
    %cst_121 = arith.constant 5.000000e-01 : f32
    %367 = vector.broadcast %cst_121 : f32 to vector<8x128xf32>
    %368 = arith.mulf %367, %366 : vector<8x128xf32>
    %369 = vector.extract_strided_slice %360 {offsets = [0, 128], sizes = [8, 128], strides = [1, 1]} : vector<8x512xf32> to vector<8x128xf32>
    %cst_122 = arith.constant 5.000000e-01 : f32
    %370 = vector.broadcast %cst_122 : f32 to vector<8x128xf32>
    %371 = arith.mulf %370, %369 : vector<8x128xf32>
    %372 = math.tanh %371 : vector<8x128xf32>
    %cst_123 = arith.constant 1.000000e+00 : f32
    %373 = vector.broadcast %cst_123 : f32 to vector<8x128xf32>
    %374 = arith.addf %372, %373 : vector<8x128xf32>
    %cst_124 = arith.constant 5.000000e-01 : f32
    %375 = vector.broadcast %cst_124 : f32 to vector<8x128xf32>
    %376 = arith.mulf %375, %374 : vector<8x128xf32>
    %377 = vector.extract_strided_slice %360 {offsets = [0, 256], sizes = [8, 128], strides = [1, 1]} : vector<8x512xf32> to vector<8x128xf32>
    %378 = math.tanh %377 : vector<8x128xf32>
    %379 = vector.extract_strided_slice %360 {offsets = [0, 384], sizes = [8, 128], strides = [1, 1]} : vector<8x512xf32> to vector<8x128xf32>
    %cst_125 = arith.constant 5.000000e-01 : f32
    %380 = vector.broadcast %cst_125 : f32 to vector<8x128xf32>
    %381 = arith.mulf %380, %379 : vector<8x128xf32>
    %382 = math.tanh %381 : vector<8x128xf32>
    %cst_126 = arith.constant 1.000000e+00 : f32
    %383 = vector.broadcast %cst_126 : f32 to vector<8x128xf32>
    %384 = arith.addf %382, %383 : vector<8x128xf32>
    %cst_127 = arith.constant 5.000000e-01 : f32
    %385 = vector.broadcast %cst_127 : f32 to vector<8x128xf32>
    %386 = arith.mulf %385, %384 : vector<8x128xf32>
    %387 = vector.extract_strided_slice %316 {offsets = [0, 0], sizes = [8, 128], strides = [1, 1]} : vector<8x256xf32> to vector<8x128xf32>
    %388 = arith.mulf %376, %387 : vector<8x128xf32>
    %389 = arith.mulf %368, %378 : vector<8x128xf32>
    %390 = arith.addf %388, %389 : vector<8x128xf32>
    %391 = math.tanh %390 : vector<8x128xf32>
    %392 = arith.mulf %386, %391 : vector<8x128xf32>
    %393 = tpu.concatenate %392, %355 in 1 : vector<8x128xf32>, vector<8x128xf32> -> vector<8x256xf32>
    %394 = tpu.concatenate %390, %353 in 1 : vector<8x128xf32>, vector<8x128xf32> -> vector<8x256xf32>
    %395 = tpu.concatenate %393, %394 in 1 : vector<8x256xf32>, vector<8x256xf32> -> vector<8x512xf32>
    %396 = arith.index_cast %c4_i32 : i32 to index
    %c0_128 = arith.constant 0 : index
    %c0_129 = arith.constant 0 : index
    %397 = vector.load %arg7[%396, %c0_128, %c0_129] : memref<8x8x512xf32, #tpu.memory_space<vmem>>, vector<1x8x512xf32>
    %398 = vector.shape_cast %397 : vector<1x8x512xf32> to vector<8x512xf32>
    %399 = vector.shape_cast %395 : vector<8x512xf32> to vector<1x8x512xf32>
    tpu.vector_store %arg7[%396, %c0_128, %c0_129], %399 {strides = array<i32>} : memref<8x8x512xf32, #tpu.memory_space<vmem>>, vector<1x8x512xf32>,
    %c5_i32 = arith.constant 5 : i32
    %cst_130 = arith.constant dense<0.000000e+00> : vector<8x512xf32>
    %400 = tpu.matmul %393, %3, %cst_130 {dimension_numbers = #tpu.dot_dimension_numbers<[1], [0], [0], [1], [0, 0, 1, 1], [], []>} : vector<8x256xf32>, vector<256x512xf32>, vector<8x512xf32> -> vector<8x512xf32>
    %401 = arith.addf %400, %7 : vector<8x512xf32>
    %402 = vector.extract_strided_slice %401 {offsets = [0, 0], sizes = [8, 128], strides = [1, 1]} : vector<8x512xf32> to vector<8x128xf32>
    %cst_131 = arith.constant 5.000000e-01 : f32
    %403 = vector.broadcast %cst_131 : f32 to vector<8x128xf32>
    %404 = arith.mulf %403, %402 : vector<8x128xf32>
    %405 = math.tanh %404 : vector<8x128xf32>
    %cst_132 = arith.constant 1.000000e+00 : f32
    %406 = vector.broadcast %cst_132 : f32 to vector<8x128xf32>
    %407 = arith.addf %405, %406 : vector<8x128xf32>
    %cst_133 = arith.constant 5.000000e-01 : f32
    %408 = vector.broadcast %cst_133 : f32 to vector<8x128xf32>
    %409 = arith.mulf %408, %407 : vector<8x128xf32>
    %410 = vector.extract_strided_slice %401 {offsets = [0, 128], sizes = [8, 128], strides = [1, 1]} : vector<8x512xf32> to vector<8x128xf32>
    %cst_134 = arith.constant 5.000000e-01 : f32
    %411 = vector.broadcast %cst_134 : f32 to vector<8x128xf32>
    %412 = arith.mulf %411, %410 : vector<8x128xf32>
    %413 = math.tanh %412 : vector<8x128xf32>
    %cst_135 = arith.constant 1.000000e+00 : f32
    %414 = vector.broadcast %cst_135 : f32 to vector<8x128xf32>
    %415 = arith.addf %413, %414 : vector<8x128xf32>
    %cst_136 = arith.constant 5.000000e-01 : f32
    %416 = vector.broadcast %cst_136 : f32 to vector<8x128xf32>
    %417 = arith.mulf %416, %415 : vector<8x128xf32>
    %418 = vector.extract_strided_slice %401 {offsets = [0, 256], sizes = [8, 128], strides = [1, 1]} : vector<8x512xf32> to vector<8x128xf32>
    %419 = math.tanh %418 : vector<8x128xf32>
    %420 = vector.extract_strided_slice %401 {offsets = [0, 384], sizes = [8, 128], strides = [1, 1]} : vector<8x512xf32> to vector<8x128xf32>
    %cst_137 = arith.constant 5.000000e-01 : f32
    %421 = vector.broadcast %cst_137 : f32 to vector<8x128xf32>
    %422 = arith.mulf %421, %420 : vector<8x128xf32>
    %423 = math.tanh %422 : vector<8x128xf32>
    %cst_138 = arith.constant 1.000000e+00 : f32
    %424 = vector.broadcast %cst_138 : f32 to vector<8x128xf32>
    %425 = arith.addf %423, %424 : vector<8x128xf32>
    %cst_139 = arith.constant 5.000000e-01 : f32
    %426 = vector.broadcast %cst_139 : f32 to vector<8x128xf32>
    %427 = arith.mulf %426, %425 : vector<8x128xf32>
    %428 = vector.extract_strided_slice %394 {offsets = [0, 128], sizes = [8, 128], strides = [1, 1]} : vector<8x256xf32> to vector<8x128xf32>
    %429 = arith.mulf %417, %428 : vector<8x128xf32>
    %430 = arith.mulf %409, %419 : vector<8x128xf32>
    %431 = arith.addf %429, %430 : vector<8x128xf32>
    %432 = math.tanh %431 : vector<8x128xf32>
    %433 = arith.mulf %427, %432 : vector<8x128xf32>
    %434 = arith.index_cast %c5_i32 : i32 to index
    %c0_140 = arith.constant 0 : index
    %c0_141 = arith.constant 0 : index
    %435 = vector.load %arg1[%434, %c0_140, %c0_141] : memref<8x8x512xf32, #tpu.memory_space<vmem>>, vector<1x8x512xf32>
    %436 = vector.shape_cast %435 : vector<1x8x512xf32> to vector<8x512xf32>
    %cst_142 = arith.constant dense<0.000000e+00> : vector<8x512xf32>
    %437 = tpu.matmul %433, %4, %cst_142 {dimension_numbers = #tpu.dot_dimension_numbers<[1], [0], [0], [1], [0, 0, 1, 1], [], []>} : vector<8x128xf32>, vector<128x512xf32>, vector<8x512xf32> -> vector<8x512xf32>
    %438 = arith.addf %436, %437 : vector<8x512xf32>
    %439 = vector.extract_strided_slice %438 {offsets = [0, 0], sizes = [8, 128], strides = [1, 1]} : vector<8x512xf32> to vector<8x128xf32>
    %cst_143 = arith.constant 5.000000e-01 : f32
    %440 = vector.broadcast %cst_143 : f32 to vector<8x128xf32>
    %441 = arith.mulf %440, %439 : vector<8x128xf32>
    %442 = math.tanh %441 : vector<8x128xf32>
    %cst_144 = arith.constant 1.000000e+00 : f32
    %443 = vector.broadcast %cst_144 : f32 to vector<8x128xf32>
    %444 = arith.addf %442, %443 : vector<8x128xf32>
    %cst_145 = arith.constant 5.000000e-01 : f32
    %445 = vector.broadcast %cst_145 : f32 to vector<8x128xf32>
    %446 = arith.mulf %445, %444 : vector<8x128xf32>
    %447 = vector.extract_strided_slice %438 {offsets = [0, 128], sizes = [8, 128], strides = [1, 1]} : vector<8x512xf32> to vector<8x128xf32>
    %cst_146 = arith.constant 5.000000e-01 : f32
    %448 = vector.broadcast %cst_146 : f32 to vector<8x128xf32>
    %449 = arith.mulf %448, %447 : vector<8x128xf32>
    %450 = math.tanh %449 : vector<8x128xf32>
    %cst_147 = arith.constant 1.000000e+00 : f32
    %451 = vector.broadcast %cst_147 : f32 to vector<8x128xf32>
    %452 = arith.addf %450, %451 : vector<8x128xf32>
    %cst_148 = arith.constant 5.000000e-01 : f32
    %453 = vector.broadcast %cst_148 : f32 to vector<8x128xf32>
    %454 = arith.mulf %453, %452 : vector<8x128xf32>
    %455 = vector.extract_strided_slice %438 {offsets = [0, 256], sizes = [8, 128], strides = [1, 1]} : vector<8x512xf32> to vector<8x128xf32>
    %456 = math.tanh %455 : vector<8x128xf32>
    %457 = vector.extract_strided_slice %438 {offsets = [0, 384], sizes = [8, 128], strides = [1, 1]} : vector<8x512xf32> to vector<8x128xf32>
    %cst_149 = arith.constant 5.000000e-01 : f32
    %458 = vector.broadcast %cst_149 : f32 to vector<8x128xf32>
    %459 = arith.mulf %458, %457 : vector<8x128xf32>
    %460 = math.tanh %459 : vector<8x128xf32>
    %cst_150 = arith.constant 1.000000e+00 : f32
    %461 = vector.broadcast %cst_150 : f32 to vector<8x128xf32>
    %462 = arith.addf %460, %461 : vector<8x128xf32>
    %cst_151 = arith.constant 5.000000e-01 : f32
    %463 = vector.broadcast %cst_151 : f32 to vector<8x128xf32>
    %464 = arith.mulf %463, %462 : vector<8x128xf32>
    %465 = vector.extract_strided_slice %394 {offsets = [0, 0], sizes = [8, 128], strides = [1, 1]} : vector<8x256xf32> to vector<8x128xf32>
    %466 = arith.mulf %454, %465 : vector<8x128xf32>
    %467 = arith.mulf %446, %456 : vector<8x128xf32>
    %468 = arith.addf %466, %467 : vector<8x128xf32>
    %469 = math.tanh %468 : vector<8x128xf32>
    %470 = arith.mulf %464, %469 : vector<8x128xf32>
    %471 = tpu.concatenate %470, %433 in 1 : vector<8x128xf32>, vector<8x128xf32> -> vector<8x256xf32>
    %472 = tpu.concatenate %468, %431 in 1 : vector<8x128xf32>, vector<8x128xf32> -> vector<8x256xf32>
    %473 = tpu.concatenate %471, %472 in 1 : vector<8x256xf32>, vector<8x256xf32> -> vector<8x512xf32>
    %474 = arith.index_cast %c5_i32 : i32 to index
    %c0_152 = arith.constant 0 : index
    %c0_153 = arith.constant 0 : index
    %475 = vector.load %arg7[%474, %c0_152, %c0_153] : memref<8x8x512xf32, #tpu.memory_space<vmem>>, vector<1x8x512xf32>
    %476 = vector.shape_cast %475 : vector<1x8x512xf32> to vector<8x512xf32>
    %477 = vector.shape_cast %473 : vector<8x512xf32> to vector<1x8x512xf32>
    tpu.vector_store %arg7[%474, %c0_152, %c0_153], %477 {strides = array<i32>} : memref<8x8x512xf32, #tpu.memory_space<vmem>>, vector<1x8x512xf32>,
    %c6_i32 = arith.constant 6 : i32
    %cst_154 = arith.constant dense<0.000000e+00> : vector<8x512xf32>
    %478 = tpu.matmul %471, %3, %cst_154 {dimension_numbers = #tpu.dot_dimension_numbers<[1], [0], [0], [1], [0, 0, 1, 1], [], []>} : vector<8x256xf32>, vector<256x512xf32>, vector<8x512xf32> -> vector<8x512xf32>
    %479 = arith.addf %478, %7 : vector<8x512xf32>
    %480 = vector.extract_strided_slice %479 {offsets = [0, 0], sizes = [8, 128], strides = [1, 1]} : vector<8x512xf32> to vector<8x128xf32>
    %cst_155 = arith.constant 5.000000e-01 : f32
    %481 = vector.broadcast %cst_155 : f32 to vector<8x128xf32>
    %482 = arith.mulf %481, %480 : vector<8x128xf32>
    %483 = math.tanh %482 : vector<8x128xf32>
    %cst_156 = arith.constant 1.000000e+00 : f32
    %484 = vector.broadcast %cst_156 : f32 to vector<8x128xf32>
    %485 = arith.addf %483, %484 : vector<8x128xf32>
    %cst_157 = arith.constant 5.000000e-01 : f32
    %486 = vector.broadcast %cst_157 : f32 to vector<8x128xf32>
    %487 = arith.mulf %486, %485 : vector<8x128xf32>
    %488 = vector.extract_strided_slice %479 {offsets = [0, 128], sizes = [8, 128], strides = [1, 1]} : vector<8x512xf32> to vector<8x128xf32>
    %cst_158 = arith.constant 5.000000e-01 : f32
    %489 = vector.broadcast %cst_158 : f32 to vector<8x128xf32>
    %490 = arith.mulf %489, %488 : vector<8x128xf32>
    %491 = math.tanh %490 : vector<8x128xf32>
    %cst_159 = arith.constant 1.000000e+00 : f32
    %492 = vector.broadcast %cst_159 : f32 to vector<8x128xf32>
    %493 = arith.addf %491, %492 : vector<8x128xf32>
    %cst_160 = arith.constant 5.000000e-01 : f32
    %494 = vector.broadcast %cst_160 : f32 to vector<8x128xf32>
    %495 = arith.mulf %494, %493 : vector<8x128xf32>
    %496 = vector.extract_strided_slice %479 {offsets = [0, 256], sizes = [8, 128], strides = [1, 1]} : vector<8x512xf32> to vector<8x128xf32>
    %497 = math.tanh %496 : vector<8x128xf32>
    %498 = vector.extract_strided_slice %479 {offsets = [0, 384], sizes = [8, 128], strides = [1, 1]} : vector<8x512xf32> to vector<8x128xf32>
    %cst_161 = arith.constant 5.000000e-01 : f32
    %499 = vector.broadcast %cst_161 : f32 to vector<8x128xf32>
    %500 = arith.mulf %499, %498 : vector<8x128xf32>
    %501 = math.tanh %500 : vector<8x128xf32>
    %cst_162 = arith.constant 1.000000e+00 : f32
    %502 = vector.broadcast %cst_162 : f32 to vector<8x128xf32>
    %503 = arith.addf %501, %502 : vector<8x128xf32>
    %cst_163 = arith.constant 5.000000e-01 : f32
    %504 = vector.broadcast %cst_163 : f32 to vector<8x128xf32>
    %505 = arith.mulf %504, %503 : vector<8x128xf32>
    %506 = vector.extract_strided_slice %472 {offsets = [0, 128], sizes = [8, 128], strides = [1, 1]} : vector<8x256xf32> to vector<8x128xf32>
    %507 = arith.mulf %495, %506 : vector<8x128xf32>
    %508 = arith.mulf %487, %497 : vector<8x128xf32>
    %509 = arith.addf %507, %508 : vector<8x128xf32>
    %510 = math.tanh %509 : vector<8x128xf32>
    %511 = arith.mulf %505, %510 : vector<8x128xf32>
    %512 = arith.index_cast %c6_i32 : i32 to index
    %c0_164 = arith.constant 0 : index
    %c0_165 = arith.constant 0 : index
    %513 = vector.load %arg1[%512, %c0_164, %c0_165] : memref<8x8x512xf32, #tpu.memory_space<vmem>>, vector<1x8x512xf32>
    %514 = vector.shape_cast %513 : vector<1x8x512xf32> to vector<8x512xf32>
    %cst_166 = arith.constant dense<0.000000e+00> : vector<8x512xf32>
    %515 = tpu.matmul %511, %4, %cst_166 {dimension_numbers = #tpu.dot_dimension_numbers<[1], [0], [0], [1], [0, 0, 1, 1], [], []>} : vector<8x128xf32>, vector<128x512xf32>, vector<8x512xf32> -> vector<8x512xf32>
    %516 = arith.addf %514, %515 : vector<8x512xf32>
    %517 = vector.extract_strided_slice %516 {offsets = [0, 0], sizes = [8, 128], strides = [1, 1]} : vector<8x512xf32> to vector<8x128xf32>
    %cst_167 = arith.constant 5.000000e-01 : f32
    %518 = vector.broadcast %cst_167 : f32 to vector<8x128xf32>
    %519 = arith.mulf %518, %517 : vector<8x128xf32>
    %520 = math.tanh %519 : vector<8x128xf32>
    %cst_168 = arith.constant 1.000000e+00 : f32
    %521 = vector.broadcast %cst_168 : f32 to vector<8x128xf32>
    %522 = arith.addf %520, %521 : vector<8x128xf32>
    %cst_169 = arith.constant 5.000000e-01 : f32
    %523 = vector.broadcast %cst_169 : f32 to vector<8x128xf32>
    %524 = arith.mulf %523, %522 : vector<8x128xf32>
    %525 = vector.extract_strided_slice %516 {offsets = [0, 128], sizes = [8, 128], strides = [1, 1]} : vector<8x512xf32> to vector<8x128xf32>
    %cst_170 = arith.constant 5.000000e-01 : f32
    %526 = vector.broadcast %cst_170 : f32 to vector<8x128xf32>
    %527 = arith.mulf %526, %525 : vector<8x128xf32>
    %528 = math.tanh %527 : vector<8x128xf32>
    %cst_171 = arith.constant 1.000000e+00 : f32
    %529 = vector.broadcast %cst_171 : f32 to vector<8x128xf32>
    %530 = arith.addf %528, %529 : vector<8x128xf32>
    %cst_172 = arith.constant 5.000000e-01 : f32
    %531 = vector.broadcast %cst_172 : f32 to vector<8x128xf32>
    %532 = arith.mulf %531, %530 : vector<8x128xf32>
    %533 = vector.extract_strided_slice %516 {offsets = [0, 256], sizes = [8, 128], strides = [1, 1]} : vector<8x512xf32> to vector<8x128xf32>
    %534 = math.tanh %533 : vector<8x128xf32>
    %535 = vector.extract_strided_slice %516 {offsets = [0, 384], sizes = [8, 128], strides = [1, 1]} : vector<8x512xf32> to vector<8x128xf32>
    %cst_173 = arith.constant 5.000000e-01 : f32
    %536 = vector.broadcast %cst_173 : f32 to vector<8x128xf32>
    %537 = arith.mulf %536, %535 : vector<8x128xf32>
    %538 = math.tanh %537 : vector<8x128xf32>
    %cst_174 = arith.constant 1.000000e+00 : f32
    %539 = vector.broadcast %cst_174 : f32 to vector<8x128xf32>
    %540 = arith.addf %538, %539 : vector<8x128xf32>
    %cst_175 = arith.constant 5.000000e-01 : f32
    %541 = vector.broadcast %cst_175 : f32 to vector<8x128xf32>
    %542 = arith.mulf %541, %540 : vector<8x128xf32>
    %543 = vector.extract_strided_slice %472 {offsets = [0, 0], sizes = [8, 128], strides = [1, 1]} : vector<8x256xf32> to vector<8x128xf32>
    %544 = arith.mulf %532, %543 : vector<8x128xf32>
    %545 = arith.mulf %524, %534 : vector<8x128xf32>
    %546 = arith.addf %544, %545 : vector<8x128xf32>
    %547 = math.tanh %546 : vector<8x128xf32>
    %548 = arith.mulf %542, %547 : vector<8x128xf32>
    %549 = tpu.concatenate %548, %511 in 1 : vector<8x128xf32>, vector<8x128xf32> -> vector<8x256xf32>
    %550 = tpu.concatenate %546, %509 in 1 : vector<8x128xf32>, vector<8x128xf32> -> vector<8x256xf32>
    %551 = tpu.concatenate %549, %550 in 1 : vector<8x256xf32>, vector<8x256xf32> -> vector<8x512xf32>
    %552 = arith.index_cast %c6_i32 : i32 to index
    %c0_176 = arith.constant 0 : index
    %c0_177 = arith.constant 0 : index
    %553 = vector.load %arg7[%552, %c0_176, %c0_177] : memref<8x8x512xf32, #tpu.memory_space<vmem>>, vector<1x8x512xf32>
    %554 = vector.shape_cast %553 : vector<1x8x512xf32> to vector<8x512xf32>
    %555 = vector.shape_cast %551 : vector<8x512xf32> to vector<1x8x512xf32>
    tpu.vector_store %arg7[%552, %c0_176, %c0_177], %555 {strides = array<i32>} : memref<8x8x512xf32, #tpu.memory_space<vmem>>, vector<1x8x512xf32>,
    %c7_i32 = arith.constant 7 : i32
    %cst_178 = arith.constant dense<0.000000e+00> : vector<8x512xf32>
    %556 = tpu.matmul %549, %3, %cst_178 {dimension_numbers = #tpu.dot_dimension_numbers<[1], [0], [0], [1], [0, 0, 1, 1], [], []>} : vector<8x256xf32>, vector<256x512xf32>, vector<8x512xf32> -> vector<8x512xf32>
    %557 = arith.addf %556, %7 : vector<8x512xf32>
    %558 = vector.extract_strided_slice %557 {offsets = [0, 0], sizes = [8, 128], strides = [1, 1]} : vector<8x512xf32> to vector<8x128xf32>
    %cst_179 = arith.constant 5.000000e-01 : f32
    %559 = vector.broadcast %cst_179 : f32 to vector<8x128xf32>
    %560 = arith.mulf %559, %558 : vector<8x128xf32>
    %561 = math.tanh %560 : vector<8x128xf32>
    %cst_180 = arith.constant 1.000000e+00 : f32
    %562 = vector.broadcast %cst_180 : f32 to vector<8x128xf32>
    %563 = arith.addf %561, %562 : vector<8x128xf32>
    %cst_181 = arith.constant 5.000000e-01 : f32
    %564 = vector.broadcast %cst_181 : f32 to vector<8x128xf32>
    %565 = arith.mulf %564, %563 : vector<8x128xf32>
    %566 = vector.extract_strided_slice %557 {offsets = [0, 128], sizes = [8, 128], strides = [1, 1]} : vector<8x512xf32> to vector<8x128xf32>
    %cst_182 = arith.constant 5.000000e-01 : f32
    %567 = vector.broadcast %cst_182 : f32 to vector<8x128xf32>
    %568 = arith.mulf %567, %566 : vector<8x128xf32>
    %569 = math.tanh %568 : vector<8x128xf32>
    %cst_183 = arith.constant 1.000000e+00 : f32
    %570 = vector.broadcast %cst_183 : f32 to vector<8x128xf32>
    %571 = arith.addf %569, %570 : vector<8x128xf32>
    %cst_184 = arith.constant 5.000000e-01 : f32
    %572 = vector.broadcast %cst_184 : f32 to vector<8x128xf32>
    %573 = arith.mulf %572, %571 : vector<8x128xf32>
    %574 = vector.extract_strided_slice %557 {offsets = [0, 256], sizes = [8, 128], strides = [1, 1]} : vector<8x512xf32> to vector<8x128xf32>
    %575 = math.tanh %574 : vector<8x128xf32>
    %576 = vector.extract_strided_slice %557 {offsets = [0, 384], sizes = [8, 128], strides = [1, 1]} : vector<8x512xf32> to vector<8x128xf32>
    %cst_185 = arith.constant 5.000000e-01 : f32
    %577 = vector.broadcast %cst_185 : f32 to vector<8x128xf32>
    %578 = arith.mulf %577, %576 : vector<8x128xf32>
    %579 = math.tanh %578 : vector<8x128xf32>
    %cst_186 = arith.constant 1.000000e+00 : f32
    %580 = vector.broadcast %cst_186 : f32 to vector<8x128xf32>
    %581 = arith.addf %579, %580 : vector<8x128xf32>
    %cst_187 = arith.constant 5.000000e-01 : f32
    %582 = vector.broadcast %cst_187 : f32 to vector<8x128xf32>
    %583 = arith.mulf %582, %581 : vector<8x128xf32>
    %584 = vector.extract_strided_slice %550 {offsets = [0, 128], sizes = [8, 128], strides = [1, 1]} : vector<8x256xf32> to vector<8x128xf32>
    %585 = arith.mulf %573, %584 : vector<8x128xf32>
    %586 = arith.mulf %565, %575 : vector<8x128xf32>
    %587 = arith.addf %585, %586 : vector<8x128xf32>
    %588 = math.tanh %587 : vector<8x128xf32>
    %589 = arith.mulf %583, %588 : vector<8x128xf32>
    %590 = arith.index_cast %c7_i32 : i32 to index
    %c0_188 = arith.constant 0 : index
    %c0_189 = arith.constant 0 : index
    %591 = vector.load %arg1[%590, %c0_188, %c0_189] : memref<8x8x512xf32, #tpu.memory_space<vmem>>, vector<1x8x512xf32>
    %592 = vector.shape_cast %591 : vector<1x8x512xf32> to vector<8x512xf32>
    %cst_190 = arith.constant dense<0.000000e+00> : vector<8x512xf32>
    %593 = tpu.matmul %589, %4, %cst_190 {dimension_numbers = #tpu.dot_dimension_numbers<[1], [0], [0], [1], [0, 0, 1, 1], [], []>} : vector<8x128xf32>, vector<128x512xf32>, vector<8x512xf32> -> vector<8x512xf32>
    %594 = arith.addf %592, %593 : vector<8x512xf32>
    %595 = vector.extract_strided_slice %594 {offsets = [0, 0], sizes = [8, 128], strides = [1, 1]} : vector<8x512xf32> to vector<8x128xf32>
    %cst_191 = arith.constant 5.000000e-01 : f32
    %596 = vector.broadcast %cst_191 : f32 to vector<8x128xf32>
    %597 = arith.mulf %596, %595 : vector<8x128xf32>
    %598 = math.tanh %597 : vector<8x128xf32>
    %cst_192 = arith.constant 1.000000e+00 : f32
    %599 = vector.broadcast %cst_192 : f32 to vector<8x128xf32>
    %600 = arith.addf %598, %599 : vector<8x128xf32>
    %cst_193 = arith.constant 5.000000e-01 : f32
    %601 = vector.broadcast %cst_193 : f32 to vector<8x128xf32>
    %602 = arith.mulf %601, %600 : vector<8x128xf32>
    %603 = vector.extract_strided_slice %594 {offsets = [0, 128], sizes = [8, 128], strides = [1, 1]} : vector<8x512xf32> to vector<8x128xf32>
    %cst_194 = arith.constant 5.000000e-01 : f32
    %604 = vector.broadcast %cst_194 : f32 to vector<8x128xf32>
    %605 = arith.mulf %604, %603 : vector<8x128xf32>
    %606 = math.tanh %605 : vector<8x128xf32>
    %cst_195 = arith.constant 1.000000e+00 : f32
    %607 = vector.broadcast %cst_195 : f32 to vector<8x128xf32>
    %608 = arith.addf %606, %607 : vector<8x128xf32>
    %cst_196 = arith.constant 5.000000e-01 : f32
    %609 = vector.broadcast %cst_196 : f32 to vector<8x128xf32>
    %610 = arith.mulf %609, %608 : vector<8x128xf32>
    %611 = vector.extract_strided_slice %594 {offsets = [0, 256], sizes = [8, 128], strides = [1, 1]} : vector<8x512xf32> to vector<8x128xf32>
    %612 = math.tanh %611 : vector<8x128xf32>
    %613 = vector.extract_strided_slice %594 {offsets = [0, 384], sizes = [8, 128], strides = [1, 1]} : vector<8x512xf32> to vector<8x128xf32>
    %cst_197 = arith.constant 5.000000e-01 : f32
    %614 = vector.broadcast %cst_197 : f32 to vector<8x128xf32>
    %615 = arith.mulf %614, %613 : vector<8x128xf32>
    %616 = math.tanh %615 : vector<8x128xf32>
    %cst_198 = arith.constant 1.000000e+00 : f32
    %617 = vector.broadcast %cst_198 : f32 to vector<8x128xf32>
    %618 = arith.addf %616, %617 : vector<8x128xf32>
    %cst_199 = arith.constant 5.000000e-01 : f32
    %619 = vector.broadcast %cst_199 : f32 to vector<8x128xf32>
    %620 = arith.mulf %619, %618 : vector<8x128xf32>
    %621 = vector.extract_strided_slice %550 {offsets = [0, 0], sizes = [8, 128], strides = [1, 1]} : vector<8x256xf32> to vector<8x128xf32>
    %622 = arith.mulf %610, %621 : vector<8x128xf32>
    %623 = arith.mulf %602, %612 : vector<8x128xf32>
    %624 = arith.addf %622, %623 : vector<8x128xf32>
    %625 = math.tanh %624 : vector<8x128xf32>
    %626 = arith.mulf %620, %625 : vector<8x128xf32>
    %627 = tpu.concatenate %626, %589 in 1 : vector<8x128xf32>, vector<8x128xf32> -> vector<8x256xf32>
    %628 = tpu.concatenate %624, %587 in 1 : vector<8x128xf32>, vector<8x128xf32> -> vector<8x256xf32>
    %629 = tpu.concatenate %627, %628 in 1 : vector<8x256xf32>, vector<8x256xf32> -> vector<8x512xf32>
    %630 = arith.index_cast %c7_i32 : i32 to index
    %c0_200 = arith.constant 0 : index
    %c0_201 = arith.constant 0 : index
    %631 = vector.load %arg7[%630, %c0_200, %c0_201] : memref<8x8x512xf32, #tpu.memory_space<vmem>>, vector<1x8x512xf32>
    %632 = vector.shape_cast %631 : vector<1x8x512xf32> to vector<8x512xf32>
    %633 = vector.shape_cast %629 : vector<8x512xf32> to vector<1x8x512xf32>
    tpu.vector_store %arg7[%630, %c0_200, %c0_201], %633 {strides = array<i32>} : memref<8x8x512xf32, #tpu.memory_space<vmem>>, vector<1x8x512xf32>,
    %c8_i32 = arith.constant 8 : i32
    %c0_202 = arith.constant 0 : index
    %c0_203 = arith.constant 0 : index
    %634 = vector.load %arg8[%c0_202, %c0_203] : memref<8x256xf32, #tpu.memory_space<vmem>>, vector<8x256xf32>
    tpu.vector_store %arg8[%c0_202, %c0_203], %627 {strides = array<i32>} : memref<8x256xf32, #tpu.memory_space<vmem>>, vector<8x256xf32>,
    %c0_204 = arith.constant 0 : index
    %c0_205 = arith.constant 0 : index
    %635 = vector.load %arg9[%c0_204, %c0_205] : memref<8x256xf32, #tpu.memory_space<vmem>>, vector<8x256xf32>
    tpu.vector_store %arg9[%c0_204, %c0_205], %628 {strides = array<i32>} : memref<8x256xf32, #tpu.memory_space<vmem>>, vector<8x256xf32>,
    return
  }
  func.func @transform_0(%arg0: i32) -> (i32, i32, i32) {
    %c0_i32 = arith.constant 0 : i32
    %c0_i32_0 = arith.constant 0 : i32
    %c0_i32_1 = arith.constant 0 : i32
    return %arg0, %c0_i32, %c0_i32_0 : i32, i32, i32
  }
  func.func @transform_1(%arg0: i32) -> (i32, i32) {
    %c0_i32 = arith.constant 0 : i32
    %c0_i32_0 = arith.constant 0 : i32
    %c0_i32_1 = arith.constant 0 : i32
    return %c0_i32, %c0_i32_0 : i32, i32
  }
  func.func @transform_2(%arg0: i32) -> (i32, i32) {
    %c0_i32 = arith.constant 0 : i32
    %c0_i32_0 = arith.constant 0 : i32
    %c0_i32_1 = arith.constant 0 : i32
    return %c0_i32, %c0_i32_0 : i32, i32
  }
  func.func @transform_3(%arg0: i32) -> (i32, i32) {
    %c0_i32 = arith.constant 0 : i32
    %c0_i32_0 = arith.constant 0 : i32
    %c0_i32_1 = arith.constant 0 : i32
    return %c0_i32, %c0_i32_0 : i32, i32
  }
  func.func @transform_4(%arg0: i32) -> (i32, i32) {
    %c0_i32 = arith.constant 0 : i32
    %c0_i32_0 = arith.constant 0 : i32
    %c0_i32_1 = arith.constant 0 : i32
    return %c0_i32, %c0_i32_0 : i32, i32
  }
  func.func @transform_5(%arg0: i32) -> (i32, i32) {
    %c0_i32 = arith.constant 0 : i32
    %c0_i32_0 = arith.constant 0 : i32
    %c0_i32_1 = arith.constant 0 : i32
    return %c0_i32, %c0_i32_0 : i32, i32
  }
  func.func @transform_6(%arg0: i32) -> (i32, i32, i32) {
    %c0_i32 = arith.constant 0 : i32
    %c0_i32_0 = arith.constant 0 : i32
    %c0_i32_1 = arith.constant 0 : i32
    return %arg0, %c0_i32, %c0_i32_0 : i32, i32, i32
  }
}

</mosaic_0001>

<bundles_post_ra>
// kernel: _hrnn_run.1
= control target key start
LH: loop header
LB: loop body
LE: loop exit
PB: predicated region body
PF: predicated region fallthrough
CT: control target
= control target key end

     0   :  { %11 = vsyncpa [#allocation5], 0  ;;  %s3764_s21 = smov [#allocation4]   ;;  %s7979_s0 = inlined_call_operand.vmem [shape: f32[8,8,512], index: 0, kind: input, shape index: {}]   ;;  %s7980_s1 = inlined_call_operand.vmem [shape: f32[8,256], index: 1, kind: input, shape index: {}]   ;;  %s7981_s2 = inlined_call_operand.vmem [shape: f32[8,256], index: 2, kind: input, shape index: {}]   ;;  %s7982_s3 = inlined_call_operand.hbm [shape: f32[256,512], index: 3, kind: input, shape index: {}]   ;;  %s7983_s4 = inlined_call_operand.vmem [shape: f32[128,512], index: 4, kind: input, shape index: {}]   ;;  %s7984_s5 = inlined_call_operand.vmem [shape: f32[1,512], index: 5, kind: input, shape index: {}]   ;;  %s7985_s6 = inlined_call_operand.vmem [shape: f32[8,8,512], index: 6, kind: output, shape index: {}]  }
   0x1   :  { %s23_s22 = sshll.u32 %s3764_s21, 4  ;;  %s24_s22 = int_to_ptr.vmem [resolvable:$true] %s23_s22 }
   0x2   :  { %s3750_s23 = scalar_lea.vmem %s24_s22, 16384  ;;  %p3755_p1 = scmp.lt.s32.totalorder %s24_s22, %s24_s22 }
   0x3   :  { %p3751_p0 = scmp.ne.s32.totalorder %s24_s22, %s3750_s23  ;;  %p3756_p2 = scmp.lt.s32.totalorder %s3750_s23, %s3750_s23 }
   0x5   :  { %p3757_p3 = por %p3756_p2, %p3755_p1 }
   0x7   :  { %p3758_p4 = pnand %p3757_p3, %p3751_p0 }
   0x9   :  { %3761 = shalt.err (!%p3758_p4)
}
   0xa   :  { %s3765_s24 = smov 512   ;;  %s3766_s25 = smov 32  }
   0xb   :  { %29 = dma.hbm_to_vmem [thread:$0]  %s7982_s3, 16384, %s24_s22, [#allocation5], %s3765_s24, %s3765_s24, %s3766_s25  }
   0xc   :  { %3762 = dma.done.wait [#allocation5], 16384  }
   0xd   :  { %3763 = vsyncadd [#allocation5], 4294950912  ;;  %v3806_v0 = vld [vmem:[#allocation4 + $0x1e8] sm:$0xff]  ;;  %v3808_v1 = vld [vmem:[#allocation4 + $0x1e0] sm:$0xff] }
   0xe   :  { %v3810_v2 = vld [vmem:[#allocation4 + $0x1c8] sm:$0xff]  ;;  %267 = vmatprep.subr.mxu0 %v3806_v0  ;;  %v3813_v3 = vld [vmem:[#allocation4 + $0x1c0] sm:$0xff]  ;;  %v3818_v5 = vld [vmem:[#allocation4 + $0x1f8] sm:$0xff] }
   0xf   :  { %268 = vmatpush1.msra.mxu0 %v3808_v1  ;;  %v3816_v4 = vld [vmem:[#allocation4 + $0x1a8] sm:$0xff]  ;;  %v3821_v6 = vld [vmem:[#allocation4 + $0x1a0] sm:$0xff]  ;;  %338 = vmatprep.subr.mxu1 %v3818_v5  ;;  %v3824_v7 = vld [vmem:[#allocation4 + $0x1f0] sm:$0xff] }
  0x10   :  { %269 = vmatprep.subr.mxu0 %v3810_v2  ;;  %v3826_v8 = vld [vmem:[#allocation4 + $0x1d8] sm:$0xff]  ;;  %v3829_v9 = vld [vmem:[#allocation4 + $0x188] sm:$0xff]  ;;  %339 = vmatpush1.msra.mxu1 %v3824_v7  ;;  %v3832_v10 = vld [vmem:[#allocation4 + $0x1d0] sm:$0xff] }
  0x11   :  { %270 = vmatpush1.msra.mxu0 %v3813_v3  ;;  %v3835_v11 = vld [vmem:[#allocation4 + $0x180] sm:$0xff]  ;;  %340 = vmatprep.subr.mxu1 %v3826_v8  ;;  %v3838_v12 = vld [vmem:[#allocation4 + $0x1b8] sm:$0xff]  ;;  %v3840_v13 = vld [vmem:[#allocation4 + $0x1b0] sm:$0xff] }
  0x12   :  { %271 = vmatprep.subr.mxu0 %v3816_v4  ;;  %v3843_v14 = vld [vmem:[#allocation4 + $0x168] sm:$0xff]  ;;  %341 = vmatpush1.msra.mxu1 %v3832_v10  ;;  %v3846_v15 = vld [vmem:[#allocation4 + $0x198] sm:$0xff]  ;;  %v3849_v16 = vld [vmem:[#allocation4 + $0x160] sm:$0xff] }
  0x13   :  { %272 = vmatpush1.msra.mxu0 %v3821_v6  ;;  %342 = vmatprep.subr.mxu1 %v3838_v12  ;;  %v3852_v17 = vld [vmem:[#allocation4 + $0x190] sm:$0xff]  ;;  %v3855_v18 = vld [vmem:[#allocation4 + $0x148] sm:$0xff]  ;;  %v3858_v19 = vld [vmem:[#allocation4 + $0x178] sm:$0xff] }
  0x14   :  { %273 = vmatprep.subr.mxu0 %v3829_v9  ;;  %343 = vmatpush1.msra.mxu1 %v3840_v13  ;;  %v3861_v20 = vld [vmem:[#allocation4 + $0x140] sm:$0xff]  ;;  %v3864_v21 = vld [vmem:[#allocation4 + $0x170] sm:$0xff]  ;;  %v3867_v22 = vld [vmem:[#allocation4 + $0x128] sm:$0xff] }
  0x15   :  { %274 = vmatpush1.msra.mxu0 %v3835_v11  ;;  %344 = vmatprep.subr.mxu1 %v3846_v15  ;;  %v3870_v23 = vld [vmem:[#allocation4 + $0x158] sm:$0xff]  ;;  %v3873_v24 = vld [vmem:[#allocation4 + $0x120] sm:$0xff]  ;;  %v3876_v25 = vld [vmem:[#allocation4 + $0x150] sm:$0xff] }
  0x16   :  { %275 = vmatprep.subr.mxu0 %v3843_v14  ;;  %345 = vmatpush1.msra.mxu1 %v3852_v17  ;;  %v3879_v26 = vld [vmem:[#allocation4 + $0x108] sm:$0xff]  ;;  %v3882_v27 = vld [vmem:[#allocation4 + $0x138] sm:$0xff]  ;;  %v3885_v28 = vld [vmem:[#allocation4 + $0x100] sm:$0xff] }
  0x17   :  { %276 = vmatpush1.msra.mxu0 %v3849_v16  ;;  %346 = vmatprep.subr.mxu1 %v3858_v19  ;;  %v3888_v29 = vld [vmem:[#allocation4 + $0x130] sm:$0xff]  ;;  %v3891_v30 = vld [vmem:[#allocation4 + $0xe8] sm:$0xff]  ;;  %v3894_v31 = vld [vmem:[#allocation4 + $0x118] sm:$0xff] }
  0x18   :  { %277 = vmatprep.subr.mxu0 %v3855_v18  ;;  %347 = vmatpush1.msra.mxu1 %v3864_v21  ;;  %v3897_v32 = vld [vmem:[#allocation4 + $0xe0] sm:$0xff]  ;;  %v3900_v33 = vld [vmem:[#allocation4 + $0x110] sm:$0xff]  ;;  %v3903_v34 = vld [vmem:[#allocation4 + $0xc8] sm:$0xff] }
  0x19   :  { %278 = vmatpush1.msra.mxu0 %v3861_v20  ;;  %348 = vmatprep.subr.mxu1 %v3870_v23  ;;  %v3906_v35 = vld [vmem:[#allocation4 + $0xf8] sm:$0xff]  ;;  %v3909_v36 = vld [vmem:[#allocation4 + $0xc0] sm:$0xff]  ;;  %v3912_v37 = vld [vmem:[#allocation4 + $0xf0] sm:$0xff] }
  0x1a   :  { %279 = vmatprep.subr.mxu0 %v3867_v22  ;;  %349 = vmatpush1.msra.mxu1 %v3876_v25  ;;  %v3915_v38 = vld [vmem:[#allocation4 + $0xa8] sm:$0xff]  ;;  %v3918_v39 = vld [vmem:[#allocation4 + $0xd8] sm:$0xff]  ;;  %v3921_v40 = vld [vmem:[#allocation4 + $0xa0] sm:$0xff] }
  0x1b   :  { %280 = vmatpush1.msra.mxu0 %v3873_v24  ;;  %350 = vmatprep.subr.mxu1 %v3882_v27  ;;  %v3924_v41 = vld [vmem:[#allocation4 + $0xd0] sm:$0xff]  ;;  %v3927_v42 = vld [vmem:[#allocation4 + $0x88] sm:$0xff]  ;;  %v3930_v43 = vld [vmem:[#allocation4 + $0xb8] sm:$0xff] }
  0x1c   :  { %281 = vmatprep.subr.mxu0 %v3879_v26  ;;  %351 = vmatpush1.msra.mxu1 %v3888_v29  ;;  %v3933_v44 = vld [vmem:[#allocation4 + $0x80] sm:$0xff]  ;;  %v3936_v45 = vld [vmem:[#allocation4 + $0xb0] sm:$0xff]  ;;  %v3939_v46 = vld [vmem:[#allocation4 + $0x68] sm:$0xff] }
  0x1d   :  { %282 = vmatpush1.msra.mxu0 %v3885_v28  ;;  %352 = vmatprep.subr.mxu1 %v3894_v31  ;;  %8583 = vst [vmem:[#allocation7_spill] sm:$0xff] %v3933_v44  ;;  %8584 = vst [vmem:[#allocation8_spill] sm:$0xff] %v3939_v46  ;;  %v3942_v47 = vld [vmem:[#allocation4 + $0x98] sm:$0xff]  ;;  %v3945_v48 = vld [vmem:[#allocation4 + $0x60] sm:$0xff] }
  0x1e   :  { %283 = vmatprep.subr.mxu0 %v3891_v30  ;;  %353 = vmatpush1.msra.mxu1 %v3900_v33  ;;  %8585 = vst [vmem:[#allocation9_spill] sm:$0xff] %v3945_v48  ;;  %v3948_v49 = vld [vmem:[#allocation4 + $0x90] sm:$0xff]  ;;  %v3951_v50 = vld [vmem:[#allocation4 + $0x48] sm:$0xff]  ;;  %v3954_v51 = vld [vmem:[#allocation4 + $0x78] sm:$0xff] }
  0x1f   :  { %284 = vmatpush1.msra.mxu0 %v3897_v32  ;;  %354 = vmatprep.subr.mxu1 %v3906_v35  ;;  %8586 = vst [vmem:[#allocation10_spill] sm:$0xff] %v3948_v49  ;;  %8587 = vst [vmem:[#allocation11_spill] sm:$0xff] %v3951_v50  ;;  %v3957_v52 = vld [vmem:[#allocation4 + $0x40] sm:$0xff]  ;;  %v3960_v53 = vld [vmem:[#allocation4 + $0x70] sm:$0xff] }
  0x20   :  { %285 = vmatprep.subr.mxu0 %v3903_v34  ;;  %355 = vmatpush1.msra.mxu1 %v3912_v37  ;;  %8588 = vst [vmem:[#allocation12_spill] sm:$0xff] %v3954_v51  ;;  %8589 = vst [vmem:[#allocation13_spill] sm:$0xff] %v3957_v52  ;;  %v3963_v54 = vld [vmem:[#allocation4 + $0x28] sm:$0xff]  ;;  %v3966_v55 = vld [vmem:[#allocation4 + $0x58] sm:$0xff] }
  0x21   :  { %286 = vmatpush1.msra.mxu0 %v3909_v36  ;;  %356 = vmatprep.subr.mxu1 %v3918_v39  ;;  %8590 = vst [vmem:[#allocation14_spill] sm:$0xff] %v3960_v53  ;;  %8591 = vst [vmem:[#allocation15_spill] sm:$0xff] %v3963_v54  ;;  %v3969_v56 = vld [vmem:[#allocation4 + $0x20] sm:$0xff]  ;;  %v3972_v57 = vld [vmem:[#allocation4 + $0x50] sm:$0xff] }
  0x22   :  { %287 = vmatprep.subr.mxu0 %v3915_v38  ;;  %357 = vmatpush1.msra.mxu1 %v3924_v41  ;;  %8592 = vst [vmem:[#allocation16_spill] sm:$0xff] %v3966_v55  ;;  %8593 = vst [vmem:[#allocation17_spill] sm:$0xff] %v3969_v56  ;;  %v3975_v58 = vld [vmem:[#allocation4 + $0x8] sm:$0xff]  ;;  %v3978_v59 = vld [vmem:[#allocation4 + $0x38] sm:$0xff] }
  0x23   :  { %288 = vmatpush1.msra.mxu0 %v3921_v40  ;;  %358 = vmatprep.subr.mxu1 %v3930_v43  ;;  %8594 = vst [vmem:[#allocation18_spill] sm:$0xff] %v3972_v57  ;;  %8595 = vst [vmem:[#allocation19_spill] sm:$0xff] %v3975_v58  ;;  %v3981_v60 = vld [vmem:[#allocation4] sm:$0xff]  ;;  %v3984_v61 = vld [vmem:[#allocation4 + $0x30] sm:$0xff] }
  0x24   :  { %289 = vmatprep.subr.mxu0 %v3927_v42  ;;  %359 = vmatpush1.msra.mxu1 %v3936_v45  ;;  %8596 = vst [vmem:[#allocation20_spill] sm:$0xff] %v3978_v59  ;;  %8597 = vst [vmem:[#allocation21_spill] sm:$0xff] %v3981_v60  ;;  %v3987_v62 = vld [vmem:[#allocation4 + $0x3e8] sm:$0xff]  ;;  %v3990_v63 = vld [vmem:[#allocation4 + $0x18] sm:$0xff] }
  0x25   :  { %290 = vmatpush1.msra.mxu0 %v3933_v44  ;;  %360 = vmatprep.subr.mxu1 %v3942_v47  ;;  %8598 = vst [vmem:[#allocation22_spill] sm:$0xff] %v3984_v61  ;;  %8599 = vst [vmem:[#allocation23_spill] sm:$0xff] %v3987_v62 }
  0x26   :  { %291 = vmatprep.subr.mxu0 %v3939_v46  ;;  %361 = vmatpush1.msra.mxu1 %v3948_v49  ;;  %8600 = vst [vmem:[#allocation24_spill] sm:$0xff] %v3990_v63 }
  0x27   :  { %292 = vmatpush1.msra.mxu0 %v3945_v48  ;;  %362 = vmatprep.subr.mxu1 %v3954_v51 }
  0x28   :  { %293 = vmatprep.subr.mxu0 %v3951_v50  ;;  %363 = vmatpush1.msra.mxu1 %v3960_v53 }
  0x29   :  { %294 = vmatpush1.msra.mxu0 %v3957_v52  ;;  %364 = vmatprep.subr.mxu1 %v3966_v55  ;;  %v3993_v52 = vld [vmem:[#allocation4 + $0x3e0] sm:$0xff]  ;;  %v3999_v55 = vld [vmem:[#allocation4 + $0x3c8] sm:$0xff] }
  0x2a   :  { %295 = vmatprep.subr.mxu0 %v3963_v54  ;;  %365 = vmatpush1.msra.mxu1 %v3972_v57  ;;  %8601 = vst [vmem:[#allocation25_spill] sm:$0xff] %v3993_v52  ;;  %v3996_v54 = vld [vmem:[#allocation4 + $0x10] sm:$0xff]  ;;  %8603 = vst [vmem:[#allocation27_spill] sm:$0xff] %v3999_v55  ;;  %v4005_v57 = vld [vmem:[#allocation4 + $0x3c0] sm:$0xff] }
  0x2b   :  { %296 = vmatpush1.msra.mxu0 %v3969_v56  ;;  %366 = vmatprep.subr.mxu1 %v3978_v59  ;;  %8602 = vst [vmem:[#allocation26_spill] sm:$0xff] %v3996_v54  ;;  %v4002_v56 = vld [vmem:[#allocation4 + $0x3f8] sm:$0xff]  ;;  %8605 = vst [vmem:[#allocation29_spill] sm:$0xff] %v4005_v57  ;;  %v4011_v59 = vld [vmem:[#allocation4 + $0x3a8] sm:$0xff] }
  0x2c   :  { %297 = vmatprep.subr.mxu0 %v3975_v58  ;;  %367 = vmatpush1.msra.mxu1 %v3984_v61  ;;  %8604 = vst [vmem:[#allocation28_spill] sm:$0xff] %v4002_v56  ;;  %v4008_v58 = vld [vmem:[#allocation4 + $0x3f0] sm:$0xff]  ;;  %8607 = vst [vmem:[#allocation31_spill] sm:$0xff] %v4011_v59  ;;  %v4017_v61 = vld [vmem:[#allocation4 + $0x3a0] sm:$0xff] }
  0x2d   :  { %298 = vmatpush1.msra.mxu0 %v3981_v60  ;;  %368 = vmatprep.subr.mxu1 %v3990_v63  ;;  %8606 = vst [vmem:[#allocation30_spill] sm:$0xff] %v4008_v58  ;;  %v4014_v60 = vld [vmem:[#allocation4 + $0x3d8] sm:$0xff]  ;;  %8609 = vst [vmem:[#allocation33_spill] sm:$0xff] %v4017_v61  ;;  %v4023_v63 = vld [vmem:[#allocation4 + $0x388] sm:$0xff] }
  0x2e   :  { %299 = vmatprep.subr.mxu0 %v3987_v62  ;;  %369 = vmatpush1.msra.mxu1 %v3996_v54  ;;  %8608 = vst [vmem:[#allocation32_spill] sm:$0xff] %v4014_v60  ;;  %v4020_v62 = vld [vmem:[#allocation4 + $0x3d0] sm:$0xff]  ;;  %8611 = vst [vmem:[#allocation35_spill] sm:$0xff] %v4023_v63  ;;  %v4029_v54 = vld [vmem:[#allocation4 + $0x380] sm:$0xff] }
  0x2f   :  { %300 = vmatpush2.msra.mxu0 %v3993_v52  ;;  %370 = vmatprep.subr.mxu1 %v4002_v56  ;;  %8610 = vst [vmem:[#allocation34_spill] sm:$0xff] %v4020_v62  ;;  %v4026_v52 = vld [vmem:[#allocation4 + $0x3b8] sm:$0xff]  ;;  %8613 = vst [vmem:[#allocation37_spill] sm:$0xff] %v4029_v54  ;;  %v4035_v56 = vld [vmem:[#allocation4 + $0x368] sm:$0xff] }
  0x30   :  { %301 = vmatprep.subr.mxu0 %v3999_v55  ;;  %371 = vmatpush2.msra.mxu1 %v4008_v58  ;;  %8612 = vst [vmem:[#allocation36_spill] sm:$0xff] %v4026_v52  ;;  %v4032_v55 = vld [vmem:[#allocation4 + $0x3b0] sm:$0xff]  ;;  %8615 = vst [vmem:[#allocation39_spill] sm:$0xff] %v4035_v56  ;;  %v4041_v58 = vld [vmem:[#allocation4 + $0x360] sm:$0xff] }
  0x31   :  { %302 = vmatpush2.msra.mxu0 %v4005_v57  ;;  %372 = vmatprep.subr.mxu1 %v4014_v60  ;;  %8614 = vst [vmem:[#allocation38_spill] sm:$0xff] %v4032_v55  ;;  %v4038_v57 = vld [vmem:[#allocation4 + $0x398] sm:$0xff]  ;;  %8617 = vst [vmem:[#allocation41_spill] sm:$0xff] %v4041_v58  ;;  %v4047_v60 = vld [vmem:[#allocation4 + $0x348] sm:$0xff] }
  0x32   :  { %303 = vmatprep.subr.mxu0 %v4011_v59  ;;  %373 = vmatpush2.msra.mxu1 %v4020_v62  ;;  %8616 = vst [vmem:[#allocation40_spill] sm:$0xff] %v4038_v57  ;;  %v4044_v59 = vld [vmem:[#allocation4 + $0x390] sm:$0xff]  ;;  %8619 = vst [vmem:[#allocation43_spill] sm:$0xff] %v4047_v60  ;;  %v4053_v62 = vld [vmem:[#allocation4 + $0x340] sm:$0xff] }
  0x33   :  { %304 = vmatpush2.msra.mxu0 %v4017_v61  ;;  %374 = vmatprep.subr.mxu1 %v4026_v52  ;;  %8618 = vst [vmem:[#allocation42_spill] sm:$0xff] %v4044_v59  ;;  %v4050_v61 = vld [vmem:[#allocation4 + $0x378] sm:$0xff]  ;;  %8621 = vst [vmem:[#allocation45_spill] sm:$0xff] %v4053_v62  ;;  %v4059_v52 = vld [vmem:[#allocation4 + $0x328] sm:$0xff] }
  0x34   :  { %305 = vmatprep.subr.mxu0 %v4023_v63  ;;  %375 = vmatpush2.msra.mxu1 %v4032_v55  ;;  %8620 = vst [vmem:[#allocation44_spill] sm:$0xff] %v4050_v61  ;;  %v4056_v63 = vld [vmem:[#allocation4 + $0x370] sm:$0xff]  ;;  %8623 = vst [vmem:[#allocation47_spill] sm:$0xff] %v4059_v52  ;;  %v4065_v55 = vld [vmem:[#allocation4 + $0x320] sm:$0xff] }
  0x35   :  { %306 = vmatpush2.msra.mxu0 %v4029_v54  ;;  %376 = vmatprep.subr.mxu1 %v4038_v57  ;;  %8622 = vst [vmem:[#allocation46_spill] sm:$0xff] %v4056_v63  ;;  %v4062_v54 = vld [vmem:[#allocation4 + $0x358] sm:$0xff]  ;;  %8625 = vst [vmem:[#allocation49_spill] sm:$0xff] %v4065_v55  ;;  %v4071_v57 = vld [vmem:[#allocation4 + $0x308] sm:$0xff] }
  0x36   :  { %307 = vmatprep.subr.mxu0 %v4035_v56  ;;  %377 = vmatpush2.msra.mxu1 %v4044_v59  ;;  %8624 = vst [vmem:[#allocation48_spill] sm:$0xff] %v4062_v54  ;;  %v4068_v56 = vld [vmem:[#allocation4 + $0x350] sm:$0xff]  ;;  %8627 = vst [vmem:[#allocation51_spill] sm:$0xff] %v4071_v57  ;;  %v4077_v59 = vld [vmem:[#allocation4 + $0x300] sm:$0xff] }
  0x37   :  { %308 = vmatpush2.msra.mxu0 %v4041_v58  ;;  %378 = vmatprep.subr.mxu1 %v4050_v61  ;;  %8626 = vst [vmem:[#allocation50_spill] sm:$0xff] %v4068_v56  ;;  %v4074_v58 = vld [vmem:[#allocation4 + $0x338] sm:$0xff]  ;;  %8629 = vst [vmem:[#allocation53_spill] sm:$0xff] %v4077_v59  ;;  %v4083_v61 = vld [vmem:[#allocation4 + $0x2e8] sm:$0xff] }
  0x38   :  { %309 = vmatprep.subr.mxu0 %v4047_v60  ;;  %379 = vmatpush2.msra.mxu1 %v4056_v63  ;;  %8628 = vst [vmem:[#allocation52_spill] sm:$0xff] %v4074_v58  ;;  %v4080_v60 = vld [vmem:[#allocation4 + $0x330] sm:$0xff]  ;;  %8631 = vst [vmem:[#allocation55_spill] sm:$0xff] %v4083_v61  ;;  %v4089_v63 = vld [vmem:[#allocation4 + $0x2e0] sm:$0xff] }
  0x39   :  { %310 = vmatpush2.msra.mxu0 %v4053_v62  ;;  %380 = vmatprep.subr.mxu1 %v4062_v54  ;;  %8630 = vst [vmem:[#allocation54_spill] sm:$0xff] %v4080_v60  ;;  %v4086_v62 = vld [vmem:[#allocation4 + $0x318] sm:$0xff]  ;;  %8633 = vst [vmem:[#allocation57_spill] sm:$0xff] %v4089_v63  ;;  %v4095_v54 = vld [vmem:[#allocation4 + $0x2c8] sm:$0xff] }
  0x3a   :  { %311 = vmatprep.subr.mxu0 %v4059_v52  ;;  %381 = vmatpush2.msra.mxu1 %v4068_v56  ;;  %8632 = vst [vmem:[#allocation56_spill] sm:$0xff] %v4086_v62  ;;  %v4092_v52 = vld [vmem:[#allocation4 + $0x310] sm:$0xff]  ;;  %8635 = vst [vmem:[#allocation59_spill] sm:$0xff] %v4095_v54  ;;  %v4101_v56 = vld [vmem:[#allocation4 + $0x2c0] sm:$0xff] }
  0x3b   :  { %312 = vmatpush2.msra.mxu0 %v4065_v55  ;;  %382 = vmatprep.subr.mxu1 %v4074_v58  ;;  %8634 = vst [vmem:[#allocation58_spill] sm:$0xff] %v4092_v52  ;;  %v4098_v55 = vld [vmem:[#allocation4 + $0x2f8] sm:$0xff]  ;;  %8637 = vst [vmem:[#allocation61_spill] sm:$0xff] %v4101_v56  ;;  %v4107_v58 = vld [vmem:[#allocation4 + $0x2a8] sm:$0xff] }
  0x3c   :  { %313 = vmatprep.subr.mxu0 %v4071_v57  ;;  %383 = vmatpush2.msra.mxu1 %v4080_v60  ;;  %8636 = vst [vmem:[#allocation60_spill] sm:$0xff] %v4098_v55  ;;  %v4104_v57 = vld [vmem:[#allocation4 + $0x2f0] sm:$0xff]  ;;  %8639 = vst [vmem:[#allocation63_spill] sm:$0xff] %v4107_v58  ;;  %v4113_v60 = vld [vmem:[#allocation4 + $0x2a0] sm:$0xff] }
  0x3d   :  { %314 = vmatpush2.msra.mxu0 %v4077_v59  ;;  %384 = vmatprep.subr.mxu1 %v4086_v62  ;;  %8638 = vst [vmem:[#allocation62_spill] sm:$0xff] %v4104_v57  ;;  %v4110_v59 = vld [vmem:[#allocation4 + $0x2d8] sm:$0xff]  ;;  %8641 = vst [vmem:[#allocation65_spill] sm:$0xff] %v4113_v60  ;;  %v4119_v62 = vld [vmem:[#allocation4 + $0x288] sm:$0xff] }
  0x3e   :  { %315 = vmatprep.subr.mxu0 %v4083_v61  ;;  %385 = vmatpush2.msra.mxu1 %v4092_v52  ;;  %8640 = vst [vmem:[#allocation64_spill] sm:$0xff] %v4110_v59  ;;  %v4116_v61 = vld [vmem:[#allocation4 + $0x2d0] sm:$0xff]  ;;  %8643 = vst [vmem:[#allocation67_spill] sm:$0xff] %v4119_v62  ;;  %v4125_v52 = vld [vmem:[#allocation4 + $0x280] sm:$0xff] }
  0x3f   :  { %316 = vmatpush2.msra.mxu0 %v4089_v63  ;;  %386 = vmatprep.subr.mxu1 %v4098_v55  ;;  %8642 = vst [vmem:[#allocation66_spill] sm:$0xff] %v4116_v61  ;;  %v4122_v63 = vld [vmem:[#allocation4 + $0x2b8] sm:$0xff]  ;;  %8645 = vst [vmem:[#allocation69_spill] sm:$0xff] %v4125_v52  ;;  %v4131_v55 = vld [vmem:[#allocation4 + $0x268] sm:$0xff] }
  0x40   :  { %317 = vmatprep.subr.mxu0 %v4095_v54  ;;  %387 = vmatpush2.msra.mxu1 %v4104_v57  ;;  %8644 = vst [vmem:[#allocation68_spill] sm:$0xff] %v4122_v63  ;;  %v4128_v54 = vld [vmem:[#allocation4 + $0x2b0] sm:$0xff]  ;;  %8647 = vst [vmem:[#allocation71_spill] sm:$0xff] %v4131_v55  ;;  %v4137_v57 = vld [vmem:[#allocation4 + $0x260] sm:$0xff] }
  0x41   :  { %318 = vmatpush2.msra.mxu0 %v4101_v56  ;;  %388 = vmatprep.subr.mxu1 %v4110_v59  ;;  %8646 = vst [vmem:[#allocation70_spill] sm:$0xff] %v4128_v54  ;;  %v4134_v56 = vld [vmem:[#allocation4 + $0x298] sm:$0xff]  ;;  %8649 = vst [vmem:[#allocation73_spill] sm:$0xff] %v4137_v57  ;;  %v4143_v59 = vld [vmem:[#allocation4 + $0x248] sm:$0xff] }
  0x42   :  { %319 = vmatprep.subr.mxu0 %v4107_v58  ;;  %389 = vmatpush2.msra.mxu1 %v4116_v61  ;;  %8648 = vst [vmem:[#allocation72_spill] sm:$0xff] %v4134_v56  ;;  %v4140_v58 = vld [vmem:[#allocation4 + $0x290] sm:$0xff]  ;;  %8651 = vst [vmem:[#allocation75_spill] sm:$0xff] %v4143_v59  ;;  %v4149_v61 = vld [vmem:[#allocation4 + $0x240] sm:$0xff] }
  0x43   :  { %320 = vmatpush2.msra.mxu0 %v4113_v60  ;;  %390 = vmatprep.subr.mxu1 %v4122_v63  ;;  %8650 = vst [vmem:[#allocation74_spill] sm:$0xff] %v4140_v58  ;;  %v4146_v60 = vld [vmem:[#allocation4 + $0x278] sm:$0xff]  ;;  %8653 = vst [vmem:[#allocation77_spill] sm:$0xff] %v4149_v61  ;;  %v4156_v63 = vld [vmem:[#allocation4 + $0x228] sm:$0xff] }
  0x44   :  { %321 = vmatprep.subr.mxu0 %v4119_v62  ;;  %391 = vmatpush2.msra.mxu1 %v4128_v54  ;;  %8652 = vst [vmem:[#allocation76_spill] sm:$0xff] %v4146_v60  ;;  %v42_v62 = vld [vmem:[%s7980_s1 + $0x8] sm:$0xff]  ;;  %8654 = vst [vmem:[#allocation78_spill] sm:$0xff] %v4156_v63  ;;  %v4162_v54 = vld [vmem:[#allocation4 + $0x220] sm:$0xff] }
  0x45   :  { %322 = vmatpush2.msra.mxu0 %v4125_v52  ;;  %392 = vmatprep.subr.mxu1 %v4134_v56  ;;  %v4159_v52 = vld [vmem:[#allocation4 + $0x270] sm:$0xff]  ;;  %8656 = vst [vmem:[#allocation80_spill] sm:$0xff] %v4162_v54  ;;  %v4168_v56 = vld [vmem:[#allocation4 + $0x208] sm:$0xff] }
  0x46   :  { %323 = vmatprep.subr.mxu0 %v4131_v55  ;;  %393 = vmatpush2.msra.mxu1 %v4140_v58  ;;  %8655 = vst [vmem:[#allocation79_spill] sm:$0xff] %v4159_v52  ;;  %v4165_v55 = vld [vmem:[#allocation4 + $0x258] sm:$0xff]  ;;  %8658 = vst [vmem:[#allocation82_spill] sm:$0xff] %v4168_v56  ;;  %v4173_v58 = vld [vmem:[#allocation4 + $0x200] sm:$0xff] }
  0x47   :  { %324 = vmatpush2.msra.mxu0 %v4137_v57  ;;  %394 = vmatprep.subr.mxu1 %v4146_v60  ;;  %8657 = vst [vmem:[#allocation81_spill] sm:$0xff] %v4165_v55  ;;  %v4170_v57 = vld [vmem:[#allocation4 + $0x250] sm:$0xff]  ;;  %8660 = vst [vmem:[#allocation84_spill] sm:$0xff] %v4173_v58  ;;  %v41_v60 = vld [vmem:[%s7980_s1] sm:$0xff] }
  0x48   :  { %325 = vmatprep.subr.mxu0 %v4143_v59  ;;  %331 = vmatprep.mubr.f32.mxu0 %v42_v62  ;;  %8659 = vst [vmem:[#allocation83_spill] sm:$0xff] %v4170_v57  ;;  %v4176_v59 = vld [vmem:[#allocation4 + $0x238] sm:$0xff] }
  0x49   :  { %326 = vmatpush2.msra.mxu0 %v4149_v61  ;;  %395 = vmatpush2.msra.mxu1 %v4159_v52  ;;  %8661 = vst [vmem:[#allocation85_spill] sm:$0xff] %v4176_v59  ;;  %v4183_v61 = vld [vmem:[#allocation4 + $0x230] sm:$0xff] }
  0x4a   :  { %327 = vmatprep.subr.mxu0 %v4156_v63  ;;  %396 = vmatprep.subr.mxu1 %v4165_v55  ;;  %8662 = vst [vmem:[#allocation86_spill] sm:$0xff] %v4183_v61  ;;  %v4187_v63 = vld [vmem:[#allocation4 + $0x218] sm:$0xff]  ;;  %v4191_v52 = vld [vmem:[#allocation4 + $0x210] sm:$0xff] }
  0x4b   :  { %328 = vmatpush2.msra.mxu0 %v4162_v54  ;;  %397 = vmatpush2.msra.mxu1 %v4170_v57  ;;  %8663 = vst [vmem:[#allocation87_spill] sm:$0xff] %v4187_v63  ;;  %8664 = vst [vmem:[#allocation88_spill] sm:$0xff] %v4191_v52 }
  0x4c   :  { %329 = vmatprep.subr.mxu0 %v4168_v56  ;;  %398 = vmatprep.subr.mxu1 %v4176_v59  ;;  %v4199_v56 = vld [vmem:[%s7983_s4 + $0x1e8] sm:$0xff] }
  0x4d   :  { %330 = vmatpush2.msra.mxu0 %v4173_v58  ;;  %399 = vmatpush2.msra.mxu1 %v4183_v61  ;;  %8665 = vst [vmem:[#allocation89_spill] sm:$0xff] %v4199_v56  ;;  %v4204_v58 = vld [vmem:[%s7983_s4 + $0x1f8] sm:$0xff]  ;;  %v241_v61 = vld [vmem:[%s7984_s5] sm:$0xf] }
  0x4e   :  { %332 = vmatmul.mubr.f32.vlgmr.msra.gmra.mxu0 %v41_v60  ;;  %400 = vmatprep.subr.mxu1 %v4187_v63  ;;  %8666 = vst [vmem:[#allocation90_spill] sm:$0xff] %v4204_v58 }
  0x4f   :  { %402 = vmatprep.mubr.f32.mxu1 %v42_v62  ;;  %401 = vmatpush2.msra.mxu1 %v4191_v52  ;;  %v4211_v62 = vld [vmem:[%s7983_s4 + $0x1e0] sm:$0xff]  ;;  %v8124_v52 = vmov 0.0  }
  0x50   :  { %403 = vmatmul.mubr.f32.vlgmr.msra.gmra.mxu1 %v41_v60  ;;  %431 = vmatprep.subr.mxu0 %v4199_v56  ;;  %8667 = vst [vmem:[#allocation91_spill] sm:$0xff] %v4211_v62  ;;  %v4216_v60 = vld [vmem:[%s7983_s4 + $0x1f0] sm:$0xff]  ;;  %v4223_v56 = vld [vmem:[%s7983_s4 + $0x1c8] sm:$0xff] }
  0x51   :  { %502 = vmatprep.subr.mxu1 %v4204_v58  ;;  %8668 = vst [vmem:[#allocation92_spill] sm:$0xff] %v4216_v60  ;;  %432 = vmatpush1.msra.mxu0 %v4211_v62  ;;  %8669 = vst [vmem:[#allocation93_spill] sm:$0xff] %v4223_v56  ;;  %v4228_v58 = vld [vmem:[%s7983_s4 + $0x1d8] sm:$0xff]  ;;  %v4235_v62 = vld [vmem:[%s7983_s4 + $0x1c0] sm:$0xff] }
  0x52   :  { %503 = vmatpush1.msra.mxu1 %v4216_v60  ;;  %8670 = vst [vmem:[#allocation94_spill] sm:$0xff] %v4228_v58  ;;  %433 = vmatprep.subr.mxu0 %v4223_v56  ;;  %8671 = vst [vmem:[#allocation95_spill] sm:$0xff] %v4235_v62  ;;  %v4240_v60 = vld [vmem:[%s7983_s4 + $0x1d0] sm:$0xff]  ;;  %v4247_v56 = vld [vmem:[%s7983_s4 + $0x1a8] sm:$0xff] }
  0x53   :  { %504 = vmatprep.subr.mxu1 %v4228_v58  ;;  %8672 = vst [vmem:[#allocation96_spill] sm:$0xff] %v4240_v60  ;;  %434 = vmatpush1.msra.mxu0 %v4235_v62  ;;  %8673 = vst [vmem:[#allocation97_spill] sm:$0xff] %v4247_v56  ;;  %v4252_v58 = vld [vmem:[%s7983_s4 + $0x1b8] sm:$0xff]  ;;  %v4259_v62 = vld [vmem:[%s7983_s4 + $0x1a0] sm:$0xff] }
  0x54   :  { %505 = vmatpush1.msra.mxu1 %v4240_v60  ;;  %8674 = vst [vmem:[#allocation98_spill] sm:$0xff] %v4252_v58  ;;  %435 = vmatprep.subr.mxu0 %v4247_v56  ;;  %8675 = vst [vmem:[#allocation99_spill] sm:$0xff] %v4259_v62  ;;  %v4264_v60 = vld [vmem:[%s7983_s4 + $0x1b0] sm:$0xff]  ;;  %v4271_v56 = vld [vmem:[%s7983_s4 + $0x188] sm:$0xff] }
  0x55   :  { %506 = vmatprep.subr.mxu1 %v4252_v58  ;;  %8676 = vst [vmem:[#allocation100_spill] sm:$0xff] %v4264_v60  ;;  %436 = vmatpush1.msra.mxu0 %v4259_v62  ;;  %8677 = vst [vmem:[#allocation101_spill] sm:$0xff] %v4271_v56  ;;  %v4276_v58 = vld [vmem:[%s7983_s4 + $0x198] sm:$0xff]  ;;  %v4283_v62 = vld [vmem:[%s7983_s4 + $0x180] sm:$0xff] }
  0x56   :  { %507 = vmatpush1.msra.mxu1 %v4264_v60  ;;  %8678 = vst [vmem:[#allocation102_spill] sm:$0xff] %v4276_v58  ;;  %437 = vmatprep.subr.mxu0 %v4271_v56  ;;  %8679 = vst [vmem:[#allocation103_spill] sm:$0xff] %v4283_v62  ;;  %v4288_v60 = vld [vmem:[%s7983_s4 + $0x190] sm:$0xff]  ;;  %v4295_v56 = vld [vmem:[%s7983_s4 + $0x168] sm:$0xff] }
  0x57   :  { %508 = vmatprep.subr.mxu1 %v4276_v58  ;;  %8680 = vst [vmem:[#allocation104_spill] sm:$0xff] %v4288_v60  ;;  %438 = vmatpush1.msra.mxu0 %v4283_v62  ;;  %8681 = vst [vmem:[#allocation105_spill] sm:$0xff] %v4295_v56  ;;  %v4300_v58 = vld [vmem:[%s7983_s4 + $0x178] sm:$0xff]  ;;  %v4307_v62 = vld [vmem:[%s7983_s4 + $0x160] sm:$0xff] }
  0x58   :  { %509 = vmatpush1.msra.mxu1 %v4288_v60  ;;  %8682 = vst [vmem:[#allocation106_spill] sm:$0xff] %v4300_v58  ;;  %439 = vmatprep.subr.mxu0 %v4295_v56  ;;  %8683 = vst [vmem:[#allocation107_spill] sm:$0xff] %v4307_v62  ;;  %v4312_v60 = vld [vmem:[%s7983_s4 + $0x170] sm:$0xff]  ;;  %v4319_v56 = vld [vmem:[%s7983_s4 + $0x148] sm:$0xff] }
  0x59   :  { %510 = vmatprep.subr.mxu1 %v4300_v58  ;;  %8684 = vst [vmem:[#allocation108_spill] sm:$0xff] %v4312_v60  ;;  %440 = vmatpush1.msra.mxu0 %v4307_v62  ;;  %8685 = vst [vmem:[#allocation109_spill] sm:$0xff] %v4319_v56  ;;  %v4324_v58 = vld [vmem:[%s7983_s4 + $0x158] sm:$0xff]  ;;  %v4331_v62 = vld [vmem:[%s7983_s4 + $0x140] sm:$0xff] }
  0x5a   :  { %511 = vmatpush1.msra.mxu1 %v4312_v60  ;;  %8686 = vst [vmem:[#allocation110_spill] sm:$0xff] %v4324_v58  ;;  %441 = vmatprep.subr.mxu0 %v4319_v56  ;;  %8687 = vst [vmem:[#allocation111_spill] sm:$0xff] %v4331_v62  ;;  %v4336_v60 = vld [vmem:[%s7983_s4 + $0x150] sm:$0xff]  ;;  %v4343_v56 = vld [vmem:[%s7983_s4 + $0x128] sm:$0xff] }
  0x5b   :  { %512 = vmatprep.subr.mxu1 %v4324_v58  ;;  %8688 = vst [vmem:[#allocation112_spill] sm:$0xff] %v4336_v60  ;;  %442 = vmatpush1.msra.mxu0 %v4331_v62  ;;  %8689 = vst [vmem:[#allocation113_spill] sm:$0xff] %v4343_v56  ;;  %v4348_v58 = vld [vmem:[%s7983_s4 + $0x138] sm:$0xff]  ;;  %v4355_v62 = vld [vmem:[%s7983_s4 + $0x120] sm:$0xff] }
  0x5c   :  { %513 = vmatpush1.msra.mxu1 %v4336_v60  ;;  %8690 = vst [vmem:[#allocation114_spill] sm:$0xff] %v4348_v58  ;;  %443 = vmatprep.subr.mxu0 %v4343_v56  ;;  %8691 = vst [vmem:[#allocation115_spill] sm:$0xff] %v4355_v62  ;;  %v4360_v60 = vld [vmem:[%s7983_s4 + $0x130] sm:$0xff]  ;;  %v4367_v56 = vld [vmem:[%s7983_s4 + $0x108] sm:$0xff] }
  0x5d   :  { %514 = vmatprep.subr.mxu1 %v4348_v58  ;;  %8692 = vst [vmem:[#allocation116_spill] sm:$0xff] %v4360_v60  ;;  %444 = vmatpush1.msra.mxu0 %v4355_v62  ;;  %8693 = vst [vmem:[#allocation117_spill] sm:$0xff] %v4367_v56  ;;  %v4372_v58 = vld [vmem:[%s7983_s4 + $0x118] sm:$0xff]  ;;  %v4379_v62 = vld [vmem:[%s7983_s4 + $0x100] sm:$0xff] }
  0x5e   :  { %515 = vmatpush1.msra.mxu1 %v4360_v60  ;;  %8694 = vst [vmem:[#allocation118_spill] sm:$0xff] %v4372_v58  ;;  %445 = vmatprep.subr.mxu0 %v4367_v56  ;;  %8695 = vst [vmem:[#allocation119_spill] sm:$0xff] %v4379_v62  ;;  %v4384_v60 = vld [vmem:[%s7983_s4 + $0x110] sm:$0xff]  ;;  %v4391_v56 = vld [vmem:[%s7983_s4 + $0xe8] sm:$0xff] }
  0x5f   :  { %516 = vmatprep.subr.mxu1 %v4372_v58  ;;  %8696 = vst [vmem:[#allocation120_spill] sm:$0xff] %v4384_v60  ;;  %446 = vmatpush1.msra.mxu0 %v4379_v62  ;;  %8697 = vst [vmem:[#allocation121_spill] sm:$0xff] %v4391_v56  ;;  %v4396_v58 = vld [vmem:[%s7983_s4 + $0xf8] sm:$0xff]  ;;  %v4403_v62 = vld [vmem:[%s7983_s4 + $0xe0] sm:$0xff] }
  0x60   :  { %517 = vmatpush1.msra.mxu1 %v4384_v60  ;;  %8698 = vst [vmem:[#allocation122_spill] sm:$0xff] %v4396_v58  ;;  %447 = vmatprep.subr.mxu0 %v4391_v56  ;;  %8699 = vst [vmem:[#allocation123_spill] sm:$0xff] %v4403_v62  ;;  %v4408_v60 = vld [vmem:[%s7983_s4 + $0xf0] sm:$0xff]  ;;  %v4415_v56 = vld [vmem:[%s7983_s4 + $0xc8] sm:$0xff] }
  0x61   :  { %518 = vmatprep.subr.mxu1 %v4396_v58  ;;  %8700 = vst [vmem:[#allocation124_spill] sm:$0xff] %v4408_v60  ;;  %448 = vmatpush1.msra.mxu0 %v4403_v62  ;;  %8701 = vst [vmem:[#allocation125_spill] sm:$0xff] %v4415_v56  ;;  %v4420_v58 = vld [vmem:[%s7983_s4 + $0xd8] sm:$0xff]  ;;  %v4427_v62 = vld [vmem:[%s7983_s4 + $0xc0] sm:$0xff] }
  0x62   :  { %519 = vmatpush1.msra.mxu1 %v4408_v60  ;;  %8702 = vst [vmem:[#allocation126_spill] sm:$0xff] %v4420_v58  ;;  %449 = vmatprep.subr.mxu0 %v4415_v56  ;;  %8703 = vst [vmem:[#allocation127_spill] sm:$0xff] %v4427_v62  ;;  %v4432_v60 = vld [vmem:[%s7983_s4 + $0xd0] sm:$0xff]  ;;  %v4439_v56 = vld [vmem:[%s7983_s4 + $0xa8] sm:$0xff] }
  0x63   :  { %520 = vmatprep.subr.mxu1 %v4420_v58  ;;  %8704 = vst [vmem:[#allocation128_spill] sm:$0xff] %v4432_v60  ;;  %450 = vmatpush1.msra.mxu0 %v4427_v62  ;;  %8705 = vst [vmem:[#allocation129_spill] sm:$0xff] %v4439_v56  ;;  %v4444_v58 = vld [vmem:[%s7983_s4 + $0xb8] sm:$0xff]  ;;  %v4451_v62 = vld [vmem:[%s7983_s4 + $0xa0] sm:$0xff] }
  0x64   :  { %521 = vmatpush1.msra.mxu1 %v4432_v60  ;;  %8706 = vst [vmem:[#allocation130_spill] sm:$0xff] %v4444_v58  ;;  %451 = vmatprep.subr.mxu0 %v4439_v56  ;;  %8707 = vst [vmem:[#allocation131_spill] sm:$0xff] %v4451_v62  ;;  %v4456_v60 = vld [vmem:[%s7983_s4 + $0xb0] sm:$0xff]  ;;  %v4463_v56 = vld [vmem:[%s7983_s4 + $0x88] sm:$0xff] }
  0x65   :  { %522 = vmatprep.subr.mxu1 %v4444_v58  ;;  %8708 = vst [vmem:[#allocation132_spill] sm:$0xff] %v4456_v60  ;;  %452 = vmatpush1.msra.mxu0 %v4451_v62  ;;  %8709 = vst [vmem:[#allocation133_spill] sm:$0xff] %v4463_v56  ;;  %v4468_v58 = vld [vmem:[%s7983_s4 + $0x98] sm:$0xff]  ;;  %v4475_v62 = vld [vmem:[%s7983_s4 + $0x80] sm:$0xff] }
  0x66   :  { %523 = vmatpush1.msra.mxu1 %v4456_v60  ;;  %8710 = vst [vmem:[#allocation134_spill] sm:$0xff] %v4468_v58  ;;  %453 = vmatprep.subr.mxu0 %v4463_v56  ;;  %8711 = vst [vmem:[#allocation135_spill] sm:$0xff] %v4475_v62  ;;  %v4480_v60 = vld [vmem:[%s7983_s4 + $0x90] sm:$0xff]  ;;  %v4487_v56 = vld [vmem:[%s7983_s4 + $0x68] sm:$0xff] }
  0x67   :  { %524 = vmatprep.subr.mxu1 %v4468_v58  ;;  %8712 = vst [vmem:[#allocation136_spill] sm:$0xff] %v4480_v60  ;;  %454 = vmatpush1.msra.mxu0 %v4475_v62  ;;  %8713 = vst [vmem:[#allocation137_spill] sm:$0xff] %v4487_v56  ;;  %v4492_v58 = vld [vmem:[%s7983_s4 + $0x78] sm:$0xff]  ;;  %v4499_v62 = vld [vmem:[%s7983_s4 + $0x60] sm:$0xff] }
  0x68   :  { %525 = vmatpush1.msra.mxu1 %v4480_v60  ;;  %8714 = vst [vmem:[#allocation138_spill] sm:$0xff] %v4492_v58  ;;  %455 = vmatprep.subr.mxu0 %v4487_v56  ;;  %8715 = vst [vmem:[#allocation139_spill] sm:$0xff] %v4499_v62  ;;  %v4504_v60 = vld [vmem:[%s7983_s4 + $0x70] sm:$0xff]  ;;  %v4511_v56 = vld [vmem:[%s7983_s4 + $0x48] sm:$0xff] }
  0x69   :  { %526 = vmatprep.subr.mxu1 %v4492_v58  ;;  %8716 = vst [vmem:[#allocation140_spill] sm:$0xff] %v4504_v60  ;;  %456 = vmatpush1.msra.mxu0 %v4499_v62  ;;  %8717 = vst [vmem:[#allocation141_spill] sm:$0xff] %v4511_v56  ;;  %v4516_v58 = vld [vmem:[%s7983_s4 + $0x58] sm:$0xff]  ;;  %v4523_v62 = vld [vmem:[%s7983_s4 + $0x40] sm:$0xff] }
  0x6a   :  { %527 = vmatpush1.msra.mxu1 %v4504_v60  ;;  %8718 = vst [vmem:[#allocation142_spill] sm:$0xff] %v4516_v58  ;;  %457 = vmatprep.subr.mxu0 %v4511_v56  ;;  %8719 = vst [vmem:[#allocation143_spill] sm:$0xff] %v4523_v62  ;;  %v4528_v60 = vld [vmem:[%s7983_s4 + $0x50] sm:$0xff]  ;;  %v4535_v56 = vld [vmem:[%s7983_s4 + $0x28] sm:$0xff] }
  0x6b   :  { %528 = vmatprep.subr.mxu1 %v4516_v58  ;;  %8720 = vst [vmem:[#allocation144_spill] sm:$0xff] %v4528_v60  ;;  %458 = vmatpush1.msra.mxu0 %v4523_v62  ;;  %8721 = vst [vmem:[#allocation145_spill] sm:$0xff] %v4535_v56  ;;  %v4540_v58 = vld [vmem:[%s7983_s4 + $0x38] sm:$0xff]  ;;  %v4547_v62 = vld [vmem:[%s7983_s4 + $0x20] sm:$0xff] }
  0x6c   :  { %529 = vmatpush1.msra.mxu1 %v4528_v60  ;;  %8722 = vst [vmem:[#allocation146_spill] sm:$0xff] %v4540_v58  ;;  %459 = vmatprep.subr.mxu0 %v4535_v56  ;;  %8723 = vst [vmem:[#allocation147_spill] sm:$0xff] %v4547_v62  ;;  %v4552_v60 = vld [vmem:[%s7983_s4 + $0x30] sm:$0xff]  ;;  %v4559_v56 = vld [vmem:[%s7983_s4 + $0x8] sm:$0xff] }
  0x6d   :  { %530 = vmatprep.subr.mxu1 %v4540_v58  ;;  %8724 = vst [vmem:[#allocation148_spill] sm:$0xff] %v4552_v60  ;;  %460 = vmatpush1.msra.mxu0 %v4547_v62  ;;  %8725 = vst [vmem:[#allocation149_spill] sm:$0xff] %v4559_v56  ;;  %v4564_v58 = vld [vmem:[%s7983_s4 + $0x18] sm:$0xff]  ;;  %v4571_v62 = vld [vmem:[%s7983_s4] sm:$0xff] }
  0x6e   :  { %531 = vmatpush1.msra.mxu1 %v4552_v60  ;;  %8726 = vst [vmem:[#allocation150_spill] sm:$0xff] %v4564_v58  ;;  %461 = vmatprep.subr.mxu0 %v4559_v56  ;;  %8727 = vst [vmem:[#allocation151_spill] sm:$0xff] %v4571_v62  ;;  %v4576_v60 = vld [vmem:[%s7983_s4 + $0x10] sm:$0xff] }
  0x6f   :  { %532 = vmatprep.subr.mxu1 %v4564_v58  ;;  %8728 = vst [vmem:[#allocation152_spill] sm:$0xff] %v4576_v60  ;;  %462 = vmatpush1.msra.mxu0 %v4571_v62  ;;  %v243_v58 = vlaneseq }
  0x70   :  { %495 = vmatprep.mubr.f32.mxu0 %v8124_v52  ;;  %533 = vmatpush1.msra.mxu1 %v4576_v60 }
  0x71   :  { %566 = vmatprep.mubr.f32.mxu1 %v8124_v52  ;;  %599 = vmatprep.subr.mxu0 %v3806_v0  ;;  %v244_v56 = vshrl.u32 %v243_v58, 7 }
  0x72   :  { %670 = vmatprep.subr.mxu1 %v3818_v5 }
  0x73   :  { %v245_v63 = vsub.s32 0, %v244_v56  ;;  %v249_v54 = vsub.s32 1, %v244_v56  ;;  %v253_v59 = vsub.s32 2, %v244_v56  ;;  %v257_v51 = vsub.s32 3, %v244_v56 }
  0x75   :  { %v4587_v62 = vrot.slane %v241_v61, %v245_v63  ;;  %v4589_v57 = vrot.slane %v241_v61, %v249_v54  ;;  %v4592_v55 = vrot.slane %v241_v61, %v253_v59  ;;  %v4596_v63 = vrot.slane %v241_v61, %v257_v51 }
  0x77   :  { %8729 = vst [vmem:[#allocation153_spill] sm:$0xff] %v4587_v62 }
 0x10e   :  { %v333_v60 = vpop.f32.mrf.mxu0 }
 0x10f   :  { %v334_v52 = vadd.f32 %v333_v60, %v4587_v62 }
 0x110   :  { %v335_v0 = vpop.f32.mrf.mxu0  ;;  %v404_v50 = vpop.f32.mrf.mxu1 }
 0x111   :  { %v409_v5 = vmul.f32 0.5, %v334_v52  ;;  %v336_v58 = vadd.f32 %v335_v0, %v4589_v57  ;;  %v405_v48 = vadd.f32 %v404_v50, %v4592_v55  ;;  %v46_v50 = vld [vmem:[%s7981_s2 + $0x8] sm:$0xff] }
 0x112   :  { %v406_v54 = vpop.f32.mrf.mxu1 }
 0x113   :  { %3006 = vtanh.f32 %v409_v5  ;;  %v413_v53 = vmul.f32 0.5, %v336_v58  ;;  %v407_v46 = vadd.f32 %v406_v54, %v4596_v63  ;;  %v8775_v58 = vld [vmem:[#allocation54_spill] sm:$0xff]  ;;  %v8776_v54 = vld [vmem:[#allocation51_spill] sm:$0xff] }
 0x115   :  { %3008 = vtanh.f32 %v413_v53  ;;  %v418_v60 = vmul.f32 0.5, %v407_v46 }
 0x116   :  { %3010 = vtanh.f32 %v405_v48 }
 0x117   :  { %3012 = vtanh.f32 %v418_v60  ;;  %v8777_v60 = vld [vmem:[#allocation56_spill] sm:$0xff] }
 0x120   :  { %v3007_v59 = vpop.eup %3006 }
 0x121   :  { %v411_v62 = vadd.f32 1.0, %v3007_v59  ;;  %v8778_v59 = vld [vmem:[#allocation53_spill] sm:$0xff] }
 0x122   :  { %v3009_v49 = vpop.eup %3008 }
 0x123   :  { %v412_v52 = vmul.f32 0.5, %v411_v62  ;;  %v415_v44 = vadd.f32 1.0, %v3009_v49  ;;  %v3011_v0 = vpop.eup %3010 }
 0x124   :  { %v3013_v46 = vpop.eup %3012 }
 0x125   :  { %v416_v56 = vmul.f32 0.5, %v415_v44  ;;  %v423_v48 = vmul.f32 %v3011_v0, %v412_v52  ;;  %v420_v49 = vadd.f32 1.0, %v3013_v46  ;;  %v8772_v44 = vld [vmem:[#allocation47_spill] sm:$0xff]  ;;  %v8779_v52 = vld [vmem:[#allocation58_spill] sm:$0xff]  ;;  %v8785_v46 = vld [vmem:[#allocation64_spill] sm:$0xff] }
 0x126   :  { %v8780_v0 = vld [vmem:[#allocation55_spill] sm:$0xff] }
 0x127   :  { %v422_v53 = vmul.f32 %v416_v56, %v46_v50  ;;  %v421_v61 = vmul.f32 0.5, %v420_v49  ;;  %v8781_v50 = vld [vmem:[#allocation60_spill] sm:$0xff]  ;;  %v8782_v56 = vld [vmem:[#allocation57_spill] sm:$0xff] }
 0x128   :  { %v8786_v49 = vld [vmem:[#allocation61_spill] sm:$0xff] }
 0x129   :  { %v4602_v51 = vadd.f32 %v423_v48, %v422_v53  ;;  %v8783_v53 = vld [vmem:[#allocation62_spill] sm:$0xff]  ;;  %v8784_v48 = vld [vmem:[#allocation59_spill] sm:$0xff] }
 0x12b   :  { %598 = vst [vmem:[%s7985_s6 + $0x18] sm:$0xff] %v4602_v51  ;;  %3014 = vtanh.f32 %v4602_v51 }
 0x138   :  { %v3015_v62 = vpop.eup %3014 }
 0x139   :  { %v426_v5 = vmul.f32 %v3015_v62, %v421_v61  ;;  %v8787_v61 = vld [vmem:[#allocation66_spill] sm:$0xff]  ;;  %v8788_v62 = vld [vmem:[#allocation63_spill] sm:$0xff] }
 0x13b   :  { %596 = vst [vmem:[%s7985_s6 + $0x8] sm:$0xff] %v426_v5  ;;  %496 = vmatmul.mubr.f32.vlgmr.msra.gmra.mxu0 %v426_v5  ;;  %567 = vmatmul.mubr.f32.vlgmr.msra.gmra.mxu1 %v426_v5 }
 0x13c   :  { %663 = vmatprep.mubr.f32.mxu0 %v426_v5  ;;  %734 = vmatprep.mubr.f32.mxu1 %v426_v5  ;;  %v8789_v5 = vld [vmem:[#allocation68_spill] sm:$0xff] }
 0x13d   :  { %600 = vmatpush1.msra.mxu0 %v3808_v1  ;;  %671 = vmatpush1.msra.mxu1 %v3824_v7  ;;  %v8730_v1 = vld [vmem:[#allocation7_spill] sm:$0xff]  ;;  %v8735_v7 = vld [vmem:[#allocation14_spill] sm:$0xff] }
 0x13e   :  { %601 = vmatprep.subr.mxu0 %v3810_v2  ;;  %672 = vmatprep.subr.mxu1 %v3826_v8  ;;  %v8731_v2 = vld [vmem:[#allocation10_spill] sm:$0xff]  ;;  %v8736_v8 = vld [vmem:[#allocation11_spill] sm:$0xff] }
 0x13f   :  { %602 = vmatpush1.msra.mxu0 %v3813_v3  ;;  %673 = vmatpush1.msra.mxu1 %v3832_v10  ;;  %v8732_v3 = vld [vmem:[#allocation8_spill] sm:$0xff]  ;;  %v8738_v10 = vld [vmem:[#allocation13_spill] sm:$0xff] }
 0x140   :  { %603 = vmatprep.subr.mxu0 %v3816_v4  ;;  %674 = vmatprep.subr.mxu1 %v3838_v12  ;;  %v8733_v4 = vld [vmem:[#allocation12_spill] sm:$0xff]  ;;  %v8740_v12 = vld [vmem:[#allocation15_spill] sm:$0xff] }
 0x141   :  { %604 = vmatpush1.msra.mxu0 %v3821_v6  ;;  %675 = vmatpush1.msra.mxu1 %v3840_v13  ;;  %v8734_v6 = vld [vmem:[#allocation9_spill] sm:$0xff]  ;;  %v8741_v13 = vld [vmem:[#allocation20_spill] sm:$0xff] }
 0x142   :  { %605 = vmatprep.subr.mxu0 %v3829_v9  ;;  %676 = vmatprep.subr.mxu1 %v3846_v15  ;;  %v8737_v9 = vld [vmem:[#allocation16_spill] sm:$0xff]  ;;  %v8743_v15 = vld [vmem:[#allocation22_spill] sm:$0xff] }
 0x143   :  { %606 = vmatpush1.msra.mxu0 %v3835_v11  ;;  %677 = vmatpush1.msra.mxu1 %v3852_v17  ;;  %v8739_v11 = vld [vmem:[#allocation18_spill] sm:$0xff]  ;;  %v8745_v17 = vld [vmem:[#allocation24_spill] sm:$0xff] }
 0x144   :  { %607 = vmatprep.subr.mxu0 %v3843_v14  ;;  %678 = vmatprep.subr.mxu1 %v3858_v19  ;;  %v8742_v14 = vld [vmem:[#allocation17_spill] sm:$0xff]  ;;  %v8747_v19 = vld [vmem:[#allocation26_spill] sm:$0xff] }
 0x145   :  { %608 = vmatpush1.msra.mxu0 %v3849_v16  ;;  %679 = vmatpush1.msra.mxu1 %v3864_v21  ;;  %v8744_v16 = vld [vmem:[#allocation19_spill] sm:$0xff]  ;;  %v8749_v21 = vld [vmem:[#allocation28_spill] sm:$0xff] }
 0x146   :  { %609 = vmatprep.subr.mxu0 %v3855_v18  ;;  %680 = vmatprep.subr.mxu1 %v3870_v23  ;;  %v8746_v18 = vld [vmem:[#allocation21_spill] sm:$0xff]  ;;  %v8751_v23 = vld [vmem:[#allocation30_spill] sm:$0xff] }
 0x147   :  { %610 = vmatpush1.msra.mxu0 %v3861_v20  ;;  %681 = vmatpush1.msra.mxu1 %v3876_v25  ;;  %v8748_v20 = vld [vmem:[#allocation23_spill] sm:$0xff]  ;;  %v8753_v25 = vld [vmem:[#allocation32_spill] sm:$0xff] }
 0x148   :  { %611 = vmatprep.subr.mxu0 %v3867_v22  ;;  %682 = vmatprep.subr.mxu1 %v3882_v27  ;;  %v8750_v22 = vld [vmem:[#allocation25_spill] sm:$0xff]  ;;  %v8755_v27 = vld [vmem:[#allocation34_spill] sm:$0xff] }
 0x149   :  { %612 = vmatpush1.msra.mxu0 %v3873_v24  ;;  %683 = vmatpush1.msra.mxu1 %v3888_v29  ;;  %v8752_v24 = vld [vmem:[#allocation27_spill] sm:$0xff]  ;;  %v8757_v29 = vld [vmem:[#allocation36_spill] sm:$0xff] }
 0x14a   :  { %613 = vmatprep.subr.mxu0 %v3879_v26  ;;  %684 = vmatprep.subr.mxu1 %v3894_v31  ;;  %v8754_v26 = vld [vmem:[#allocation29_spill] sm:$0xff]  ;;  %v8759_v31 = vld [vmem:[#allocation38_spill] sm:$0xff] }
 0x14b   :  { %614 = vmatpush1.msra.mxu0 %v3885_v28  ;;  %685 = vmatpush1.msra.mxu1 %v3900_v33  ;;  %v8756_v28 = vld [vmem:[#allocation31_spill] sm:$0xff]  ;;  %v8761_v33 = vld [vmem:[#allocation40_spill] sm:$0xff] }
 0x14c   :  { %615 = vmatprep.subr.mxu0 %v3891_v30  ;;  %686 = vmatprep.subr.mxu1 %v3906_v35  ;;  %v8758_v30 = vld [vmem:[#allocation33_spill] sm:$0xff]  ;;  %v8763_v35 = vld [vmem:[#allocation42_spill] sm:$0xff] }
 0x14d   :  { %616 = vmatpush1.msra.mxu0 %v3897_v32  ;;  %687 = vmatpush1.msra.mxu1 %v3912_v37  ;;  %v8760_v32 = vld [vmem:[#allocation35_spill] sm:$0xff]  ;;  %v8765_v37 = vld [vmem:[#allocation44_spill] sm:$0xff] }
 0x14e   :  { %617 = vmatprep.subr.mxu0 %v3903_v34  ;;  %688 = vmatprep.subr.mxu1 %v3918_v39  ;;  %v8762_v34 = vld [vmem:[#allocation37_spill] sm:$0xff]  ;;  %v8767_v39 = vld [vmem:[#allocation46_spill] sm:$0xff] }
 0x14f   :  { %618 = vmatpush1.msra.mxu0 %v3909_v36  ;;  %689 = vmatpush1.msra.mxu1 %v3924_v41  ;;  %v8764_v36 = vld [vmem:[#allocation39_spill] sm:$0xff]  ;;  %v8769_v41 = vld [vmem:[#allocation48_spill] sm:$0xff] }
 0x150   :  { %619 = vmatprep.subr.mxu0 %v3915_v38  ;;  %690 = vmatprep.subr.mxu1 %v3930_v43  ;;  %v8766_v38 = vld [vmem:[#allocation41_spill] sm:$0xff]  ;;  %v8771_v43 = vld [vmem:[#allocation50_spill] sm:$0xff] }
 0x151   :  { %620 = vmatpush1.msra.mxu0 %v3921_v40  ;;  %691 = vmatpush1.msra.mxu1 %v3936_v45  ;;  %v8768_v40 = vld [vmem:[#allocation43_spill] sm:$0xff]  ;;  %v8773_v45 = vld [vmem:[#allocation52_spill] sm:$0xff] }
 0x152   :  { %621 = vmatprep.subr.mxu0 %v3927_v42  ;;  %692 = vmatprep.subr.mxu1 %v3942_v47  ;;  %v8770_v42 = vld [vmem:[#allocation45_spill] sm:$0xff] }
 0x153   :  { %622 = vmatpush1.msra.mxu0 %v8730_v1  ;;  %693 = vmatpush1.msra.mxu1 %v8731_v2  ;;  %v8774_v47 = vld [vmem:[#allocation49_spill] sm:$0xff]  ;;  %v8791_v2 = vld [vmem:[#allocation70_spill] sm:$0xff] }
 0x154   :  { %623 = vmatprep.subr.mxu0 %v8732_v3  ;;  %694 = vmatprep.subr.mxu1 %v8733_v4  ;;  %v8790_v1 = vld [vmem:[#allocation65_spill] sm:$0xff]  ;;  %v8792_v3 = vld [vmem:[#allocation67_spill] sm:$0xff]  ;;  %v8793_v4 = vld [vmem:[#allocation72_spill] sm:$0xff] }
 0x155   :  { %624 = vmatpush1.msra.mxu0 %v8734_v6  ;;  %695 = vmatpush1.msra.mxu1 %v8735_v7  ;;  %v8794_v6 = vld [vmem:[#allocation69_spill] sm:$0xff]  ;;  %v8795_v7 = vld [vmem:[#allocation74_spill] sm:$0xff] }
 0x156   :  { %625 = vmatprep.subr.mxu0 %v8736_v8  ;;  %696 = vmatprep.subr.mxu1 %v8737_v9  ;;  %v8796_v8 = vld [vmem:[#allocation71_spill] sm:$0xff]  ;;  %v8797_v9 = vld [vmem:[#allocation76_spill] sm:$0xff] }
 0x157   :  { %626 = vmatpush1.msra.mxu0 %v8738_v10  ;;  %697 = vmatpush1.msra.mxu1 %v8739_v11  ;;  %v8798_v10 = vld [vmem:[#allocation73_spill] sm:$0xff]  ;;  %v8799_v11 = vld [vmem:[#allocation79_spill] sm:$0xff] }
 0x158   :  { %627 = vmatprep.subr.mxu0 %v8740_v12  ;;  %698 = vmatprep.subr.mxu1 %v8741_v13  ;;  %v8800_v12 = vld [vmem:[#allocation75_spill] sm:$0xff]  ;;  %v8801_v13 = vld [vmem:[#allocation81_spill] sm:$0xff] }
 0x159   :  { %628 = vmatpush1.msra.mxu0 %v8742_v14  ;;  %699 = vmatpush1.msra.mxu1 %v8743_v15  ;;  %v8802_v14 = vld [vmem:[#allocation77_spill] sm:$0xff]  ;;  %v8803_v15 = vld [vmem:[#allocation83_spill] sm:$0xff] }
 0x15a   :  { %629 = vmatprep.subr.mxu0 %v8744_v16  ;;  %700 = vmatprep.subr.mxu1 %v8745_v17  ;;  %v8804_v16 = vld [vmem:[#allocation78_spill] sm:$0xff]  ;;  %v8805_v17 = vld [vmem:[#allocation85_spill] sm:$0xff] }
 0x15b   :  { %630 = vmatpush1.msra.mxu0 %v8746_v18  ;;  %701 = vmatpush1.msra.mxu1 %v8747_v19  ;;  %v8806_v18 = vld [vmem:[#allocation80_spill] sm:$0xff]  ;;  %v8807_v19 = vld [vmem:[#allocation86_spill] sm:$0xff] }
 0x15c   :  { %631 = vmatprep.subr.mxu0 %v8748_v20  ;;  %702 = vmatprep.subr.mxu1 %v8749_v21  ;;  %v8808_v20 = vld [vmem:[#allocation82_spill] sm:$0xff]  ;;  %v8809_v21 = vld [vmem:[#allocation87_spill] sm:$0xff] }
 0x15d   :  { %632 = vmatpush2.msra.mxu0 %v8750_v22  ;;  %703 = vmatpush2.msra.mxu1 %v8751_v23  ;;  %v8810_v22 = vld [vmem:[#allocation84_spill] sm:$0xff] }
 0x15e   :  { %633 = vmatprep.subr.mxu0 %v8752_v24  ;;  %704 = vmatprep.subr.mxu1 %v8753_v25  ;;  %v8811_v23 = vld [vmem:[#allocation88_spill] sm:$0xff]  ;;  %v8812_v24 = vld [vmem:[#allocation89_spill] sm:$0xff]  ;;  %v8813_v25 = vld [vmem:[#allocation90_spill] sm:$0xff] }
 0x15f   :  { %634 = vmatpush2.msra.mxu0 %v8754_v26  ;;  %705 = vmatpush2.msra.mxu1 %v8755_v27  ;;  %v427_v26 = vld [vmem:[%s7979_s0] sm:$0xff] }
 0x160   :  { %635 = vmatprep.subr.mxu0 %v8756_v28  ;;  %706 = vmatprep.subr.mxu1 %v8757_v29  ;;  %v428_v28 = vld [vmem:[%s7979_s0 + $0x8] sm:$0xff] }
 0x161   :  { %636 = vmatpush2.msra.mxu0 %v8758_v30  ;;  %707 = vmatpush2.msra.mxu1 %v8759_v31 }
 0x162   :  { %637 = vmatprep.subr.mxu0 %v8760_v32  ;;  %708 = vmatprep.subr.mxu1 %v8761_v33  ;;  %v429_v33 = vld [vmem:[%s7979_s0 + $0x10] sm:$0xff] }
 0x163   :  { %638 = vmatpush2.msra.mxu0 %v8762_v34  ;;  %709 = vmatpush2.msra.mxu1 %v8763_v35 }
 0x164   :  { %639 = vmatprep.subr.mxu0 %v8764_v36  ;;  %710 = vmatprep.subr.mxu1 %v8765_v37  ;;  %v430_v37 = vld [vmem:[%s7979_s0 + $0x18] sm:$0xff] }
 0x165   :  { %640 = vmatpush2.msra.mxu0 %v8766_v38  ;;  %711 = vmatpush2.msra.mxu1 %v8767_v39 }
 0x166   :  { %641 = vmatprep.subr.mxu0 %v8768_v40  ;;  %712 = vmatprep.subr.mxu1 %v8769_v41 }
 0x167   :  { %642 = vmatpush2.msra.mxu0 %v8770_v42  ;;  %713 = vmatpush2.msra.mxu1 %v8771_v43 }
 0x168   :  { %643 = vmatprep.subr.mxu0 %v8772_v44  ;;  %714 = vmatprep.subr.mxu1 %v8773_v45 }
 0x169   :  { %644 = vmatpush2.msra.mxu0 %v8774_v47  ;;  %715 = vmatpush2.msra.mxu1 %v8775_v58  ;;  %v45_v47 = vld [vmem:[%s7981_s2] sm:$0xff] }
 0x16a   :  { %645 = vmatprep.subr.mxu0 %v8776_v54  ;;  %716 = vmatprep.subr.mxu1 %v8777_v60 }
 0x16b   :  { %646 = vmatpush2.msra.mxu0 %v8778_v59  ;;  %717 = vmatpush2.msra.mxu1 %v8779_v52 }
 0x16c   :  { %647 = vmatprep.subr.mxu0 %v8780_v0  ;;  %718 = vmatprep.subr.mxu1 %v8781_v50 }
 0x16d   :  { %648 = vmatpush2.msra.mxu0 %v8782_v56  ;;  %719 = vmatpush2.msra.mxu1 %v8783_v53 }
 0x16e   :  { %649 = vmatprep.subr.mxu0 %v8784_v48  ;;  %720 = vmatprep.subr.mxu1 %v8785_v46  ;;  %v8814_v46 = vld [vmem:[#allocation91_spill] sm:$0xff] }
 0x16f   :  { %650 = vmatpush2.msra.mxu0 %v8786_v49  ;;  %721 = vmatpush2.msra.mxu1 %v8787_v61  ;;  %v8815_v49 = vld [vmem:[#allocation92_spill] sm:$0xff]  ;;  %v8816_v61 = vld [vmem:[#allocation93_spill] sm:$0xff] }
 0x170   :  { %651 = vmatprep.subr.mxu0 %v8788_v62  ;;  %722 = vmatprep.subr.mxu1 %v8789_v5  ;;  %v8817_v62 = vld [vmem:[#allocation94_spill] sm:$0xff]  ;;  %v8818_v5 = vld [vmem:[#allocation95_spill] sm:$0xff] }
 0x171   :  { %652 = vmatpush2.msra.mxu0 %v8790_v1  ;;  %723 = vmatpush2.msra.mxu1 %v8791_v2  ;;  %v8819_v1 = vld [vmem:[#allocation96_spill] sm:$0xff]  ;;  %v8820_v2 = vld [vmem:[#allocation97_spill] sm:$0xff] }
 0x172   :  { %653 = vmatprep.subr.mxu0 %v8792_v3  ;;  %724 = vmatprep.subr.mxu1 %v8793_v4  ;;  %v8821_v3 = vld [vmem:[#allocation98_spill] sm:$0xff]  ;;  %v8822_v4 = vld [vmem:[#allocation99_spill] sm:$0xff] }
 0x173   :  { %654 = vmatpush2.msra.mxu0 %v8794_v6  ;;  %725 = vmatpush2.msra.mxu1 %v8795_v7  ;;  %v8823_v6 = vld [vmem:[#allocation100_spill] sm:$0xff]  ;;  %v8824_v7 = vld [vmem:[#allocation101_spill] sm:$0xff] }
 0x174   :  { %655 = vmatprep.subr.mxu0 %v8796_v8  ;;  %726 = vmatprep.subr.mxu1 %v8797_v9  ;;  %v8825_v8 = vld [vmem:[#allocation102_spill] sm:$0xff]  ;;  %v8826_v9 = vld [vmem:[#allocation103_spill] sm:$0xff] }
 0x175   :  { %656 = vmatpush2.msra.mxu0 %v8798_v10  ;;  %727 = vmatpush2.msra.mxu1 %v8799_v11  ;;  %v8827_v10 = vld [vmem:[#allocation104_spill] sm:$0xff]  ;;  %v8828_v11 = vld [vmem:[#allocation105_spill] sm:$0xff] }
 0x176   :  { %657 = vmatprep.subr.mxu0 %v8800_v12  ;;  %728 = vmatprep.subr.mxu1 %v8801_v13  ;;  %v8829_v12 = vld [vmem:[#allocation106_spill] sm:$0xff]  ;;  %v8830_v13 = vld [vmem:[#allocation107_spill] sm:$0xff] }
 0x177   :  { %658 = vmatpush2.msra.mxu0 %v8802_v14  ;;  %729 = vmatpush2.msra.mxu1 %v8803_v15  ;;  %v8831_v14 = vld [vmem:[#allocation108_spill] sm:$0xff]  ;;  %v8832_v15 = vld [vmem:[#allocation109_spill] sm:$0xff] }
 0x178   :  { %659 = vmatprep.subr.mxu0 %v8804_v16  ;;  %730 = vmatprep.subr.mxu1 %v8805_v17  ;;  %v8833_v16 = vld [vmem:[#allocation110_spill] sm:$0xff]  ;;  %v8834_v17 = vld [vmem:[#allocation111_spill] sm:$0xff] }
 0x179   :  { %660 = vmatpush2.msra.mxu0 %v8806_v18  ;;  %731 = vmatpush2.msra.mxu1 %v8807_v19  ;;  %v8835_v18 = vld [vmem:[#allocation112_spill] sm:$0xff]  ;;  %v8836_v19 = vld [vmem:[#allocation113_spill] sm:$0xff] }
 0x17a   :  { %661 = vmatprep.subr.mxu0 %v8808_v20  ;;  %732 = vmatprep.subr.mxu1 %v8809_v21  ;;  %v8837_v20 = vld [vmem:[#allocation114_spill] sm:$0xff]  ;;  %v8838_v21 = vld [vmem:[#allocation115_spill] sm:$0xff] }
 0x17b   :  { %662 = vmatpush2.msra.mxu0 %v8810_v22  ;;  %733 = vmatpush2.msra.mxu1 %v8811_v23  ;;  %v8839_v22 = vld [vmem:[#allocation116_spill] sm:$0xff]  ;;  %v8840_v23 = vld [vmem:[#allocation117_spill] sm:$0xff] }
 0x17c   :  { %764 = vmatprep.subr.mxu0 %v8812_v24  ;;  %835 = vmatprep.subr.mxu1 %v8813_v25  ;;  %v8841_v24 = vld [vmem:[#allocation118_spill] sm:$0xff]  ;;  %v8842_v25 = vld [vmem:[#allocation119_spill] sm:$0xff] }
 0x1fb   :  { %v497_v27 = vpop.f32.mrf.mxu0  ;;  %v568_v34 = vpop.f32.mrf.mxu1 }
 0x1fc   :  { %v573_v29 = vadd.f32 %v497_v27, %v427_v26  ;;  %v575_v36 = vadd.f32 %v568_v34, %v429_v33  ;;  %v8843_v26 = vld [vmem:[#allocation120_spill] sm:$0xff]  ;;  %v8844_v27 = vld [vmem:[#allocation121_spill] sm:$0xff]  ;;  %v8850_v33 = vld [vmem:[#allocation127_spill] sm:$0xff] }
 0x1fd   :  { %v499_v30 = vpop.f32.mrf.mxu0  ;;  %v570_v38 = vpop.f32.mrf.mxu1  ;;  %v8851_v34 = vld [vmem:[#allocation128_spill] sm:$0xff] }
 0x1fe   :  { %v577_v31 = vmul.f32 0.5, %v573_v29  ;;  %v574_v32 = vadd.f32 %v499_v30, %v428_v28  ;;  %v576_v39 = vadd.f32 %v570_v38, %v430_v37  ;;  %v8845_v28 = vld [vmem:[#allocation122_spill] sm:$0xff]  ;;  %v8846_v29 = vld [vmem:[#allocation123_spill] sm:$0xff]  ;;  %v8847_v30 = vld [vmem:[#allocation124_spill] sm:$0xff] }
 0x1ff   :  { %v8854_v37 = vld [vmem:[#allocation131_spill] sm:$0xff]  ;;  %v8855_v38 = vld [vmem:[#allocation132_spill] sm:$0xff] }
 0x200   :  { %3016 = vtanh.f32 %v577_v31  ;;  %v581_v35 = vmul.f32 0.5, %v574_v32  ;;  %v586_v40 = vmul.f32 0.5, %v576_v39  ;;  %v8848_v31 = vld [vmem:[#allocation125_spill] sm:$0xff]  ;;  %v8849_v32 = vld [vmem:[#allocation126_spill] sm:$0xff] }
 0x201   :  { %v8856_v39 = vld [vmem:[#allocation133_spill] sm:$0xff] }
 0x202   :  { %3018 = vtanh.f32 %v581_v35  ;;  %v8852_v35 = vld [vmem:[#allocation129_spill] sm:$0xff] }
 0x203   :  { %3020 = vtanh.f32 %v575_v36  ;;  %v8853_v36 = vld [vmem:[#allocation130_spill] sm:$0xff] }
 0x204   :  { %3022 = vtanh.f32 %v586_v40  ;;  %v8857_v40 = vld [vmem:[#allocation134_spill] sm:$0xff] }
 0x20d   :  { %v3017_v41 = vpop.eup %3016 }
 0x20e   :  { %v579_v42 = vadd.f32 1.0, %v3017_v41  ;;  %v8858_v41 = vld [vmem:[#allocation135_spill] sm:$0xff] }
 0x20f   :  { %v3019_v43 = vpop.eup %3018 }
 0x210   :  { %v580_v44 = vmul.f32 0.5, %v579_v42  ;;  %v583_v45 = vadd.f32 1.0, %v3019_v43  ;;  %v3021_v54 = vpop.eup %3020  ;;  %v8859_v42 = vld [vmem:[#allocation136_spill] sm:$0xff]  ;;  %v8860_v43 = vld [vmem:[#allocation137_spill] sm:$0xff] }
 0x211   :  { %v3023_v0 = vpop.eup %3022 }
 0x212   :  { %v584_v58 = vmul.f32 0.5, %v583_v45  ;;  %v591_v59 = vmul.f32 %v3021_v54, %v580_v44  ;;  %v588_v50 = vadd.f32 1.0, %v3023_v0  ;;  %v8861_v44 = vld [vmem:[#allocation138_spill] sm:$0xff]  ;;  %v8862_v45 = vld [vmem:[#allocation139_spill] sm:$0xff]  ;;  %v8868_v0 = vld [vmem:[#allocation145_spill] sm:$0xff] }
 0x213   :  { %v8865_v54 = vld [vmem:[#allocation142_spill] sm:$0xff] }
 0x214   :  { %v590_v60 = vmul.f32 %v584_v58, %v45_v47  ;;  %v589_v56 = vmul.f32 0.5, %v588_v50  ;;  %v8863_v47 = vld [vmem:[#allocation140_spill] sm:$0xff]  ;;  %v8864_v58 = vld [vmem:[#allocation141_spill] sm:$0xff]  ;;  %v8869_v50 = vld [vmem:[#allocation146_spill] sm:$0xff] }
 0x216   :  { %v4755_v52 = vadd.f32 %v591_v59, %v590_v60  ;;  %v8866_v60 = vld [vmem:[#allocation143_spill] sm:$0xff]  ;;  %v8867_v59 = vld [vmem:[#allocation144_spill] sm:$0xff] }
 0x218   :  { %3024 = vtanh.f32 %v4755_v52  ;;  %597 = vst [vmem:[%s7985_s6 + $0x10] sm:$0xff] %v4755_v52 }
 0x225   :  { %v3025_v53 = vpop.eup %3024 }
 0x226   :  { %v594_v48 = vmul.f32 %v3025_v53, %v589_v56  ;;  %v8870_v56 = vld [vmem:[#allocation147_spill] sm:$0xff]  ;;  %v8871_v53 = vld [vmem:[#allocation148_spill] sm:$0xff] }
 0x228   :  { %595 = vst [vmem:[%s7985_s6] sm:$0xff] %v594_v48  ;;  %664 = vmatmul.mubr.f32.vlgmr.msra.gmra.mxu0 %v594_v48  ;;  %735 = vmatmul.mubr.f32.vlgmr.msra.gmra.mxu1 %v594_v48  ;;  %v8872_v48 = vld [vmem:[#allocation149_spill] sm:$0xff] }
 0x229   :  { %765 = vmatpush1.msra.mxu0 %v8814_v46  ;;  %836 = vmatpush1.msra.mxu1 %v8815_v49  ;;  %v8873_v46 = vld [vmem:[#allocation150_spill] sm:$0xff]  ;;  %v8874_v49 = vld [vmem:[#allocation151_spill] sm:$0xff] }
 0x22a   :  { %766 = vmatprep.subr.mxu0 %v8816_v61  ;;  %837 = vmatprep.subr.mxu1 %v8817_v62  ;;  %v8875_v61 = vmov 0.0   ;;  %v8876_v62 = vld [vmem:[#allocation152_spill] sm:$0xff] }
 0x22b   :  { %767 = vmatpush1.msra.mxu0 %v8818_v5  ;;  %838 = vmatpush1.msra.mxu1 %v8819_v1  ;;  %v4829_v5 = vld [vmem:[#allocation4 + $0x1e8] sm:$0xff]  ;;  %v4832_v1 = vld [vmem:[#allocation4 + $0x1f8] sm:$0xff] }
 0x22c   :  { %768 = vmatprep.subr.mxu0 %v8820_v2  ;;  %839 = vmatprep.subr.mxu1 %v8821_v3  ;;  %v8877_v3 = vld [vmem:[#allocation153_spill] sm:$0xff] }
 0x22d   :  { %769 = vmatpush1.msra.mxu0 %v8822_v4  ;;  %840 = vmatpush1.msra.mxu1 %v8823_v6 }
 0x22e   :  { %770 = vmatprep.subr.mxu0 %v8824_v7  ;;  %841 = vmatprep.subr.mxu1 %v8825_v8 }
 0x22f   :  { %771 = vmatpush1.msra.mxu0 %v8826_v9  ;;  %842 = vmatpush1.msra.mxu1 %v8827_v10 }
 0x230   :  { %772 = vmatprep.subr.mxu0 %v8828_v11  ;;  %843 = vmatprep.subr.mxu1 %v8829_v12 }
 0x231   :  { %773 = vmatpush1.msra.mxu0 %v8830_v13  ;;  %844 = vmatpush1.msra.mxu1 %v8831_v14 }
 0x232   :  { %774 = vmatprep.subr.mxu0 %v8832_v15  ;;  %845 = vmatprep.subr.mxu1 %v8833_v16 }
 0x233   :  { %775 = vmatpush1.msra.mxu0 %v8834_v17  ;;  %846 = vmatpush1.msra.mxu1 %v8835_v18 }
 0x234   :  { %776 = vmatprep.subr.mxu0 %v8836_v19  ;;  %847 = vmatprep.subr.mxu1 %v8837_v20 }
 0x235   :  { %777 = vmatpush1.msra.mxu0 %v8838_v21  ;;  %848 = vmatpush1.msra.mxu1 %v8839_v22 }
 0x236   :  { %778 = vmatprep.subr.mxu0 %v8840_v23  ;;  %849 = vmatprep.subr.mxu1 %v8841_v24 }
 0x237   :  { %779 = vmatpush1.msra.mxu0 %v8842_v25  ;;  %850 = vmatpush1.msra.mxu1 %v8843_v26 }
 0x238   :  { %780 = vmatprep.subr.mxu0 %v8844_v27  ;;  %851 = vmatprep.subr.mxu1 %v8845_v28 }
 0x239   :  { %781 = vmatpush1.msra.mxu0 %v8846_v29  ;;  %852 = vmatpush1.msra.mxu1 %v8847_v30  ;;  %v4853_v30 = vld [vmem:[#allocation4 + $0x1f0] sm:$0xff] }
 0x23a   :  { %782 = vmatprep.subr.mxu0 %v8848_v31  ;;  %853 = vmatprep.subr.mxu1 %v8849_v32  ;;  %v4856_v31 = vld [vmem:[#allocation4 + $0x1c8] sm:$0xff]  ;;  %v4859_v32 = vld [vmem:[#allocation4 + $0x1d8] sm:$0xff] }
 0x23b   :  { %783 = vmatpush1.msra.mxu0 %v8850_v33  ;;  %854 = vmatpush1.msra.mxu1 %v8851_v34  ;;  %v4862_v33 = vld [vmem:[#allocation4 + $0x1c0] sm:$0xff]  ;;  %v4865_v34 = vld [vmem:[#allocation4 + $0x1d0] sm:$0xff] }
 0x23c   :  { %784 = vmatprep.subr.mxu0 %v8852_v35  ;;  %855 = vmatprep.subr.mxu1 %v8853_v36  ;;  %v4868_v35 = vld [vmem:[#allocation4 + $0x1a8] sm:$0xff]  ;;  %v4871_v36 = vld [vmem:[#allocation4 + $0x1b8] sm:$0xff] }
 0x23d   :  { %785 = vmatpush1.msra.mxu0 %v8854_v37  ;;  %856 = vmatpush1.msra.mxu1 %v8855_v38  ;;  %v4874_v37 = vld [vmem:[#allocation4 + $0x1a0] sm:$0xff]  ;;  %v4877_v38 = vld [vmem:[#allocation4 + $0x1b0] sm:$0xff] }
 0x23e   :  { %786 = vmatprep.subr.mxu0 %v8856_v39  ;;  %857 = vmatprep.subr.mxu1 %v8857_v40  ;;  %v4880_v39 = vld [vmem:[#allocation4 + $0x188] sm:$0xff]  ;;  %v4883_v40 = vld [vmem:[#allocation4 + $0x198] sm:$0xff] }
 0x23f   :  { %787 = vmatpush1.msra.mxu0 %v8858_v41  ;;  %858 = vmatpush1.msra.mxu1 %v8859_v42  ;;  %v4886_v41 = vld [vmem:[#allocation4 + $0x180] sm:$0xff]  ;;  %v4889_v42 = vld [vmem:[#allocation4 + $0x190] sm:$0xff] }
 0x240   :  { %788 = vmatprep.subr.mxu0 %v8860_v43  ;;  %859 = vmatprep.subr.mxu1 %v8861_v44  ;;  %v4892_v43 = vld [vmem:[#allocation4 + $0x168] sm:$0xff]  ;;  %v4895_v44 = vld [vmem:[#allocation4 + $0x178] sm:$0xff] }
 0x241   :  { %789 = vmatpush1.msra.mxu0 %v8862_v45  ;;  %860 = vmatpush1.msra.mxu1 %v8863_v47  ;;  %v4898_v45 = vld [vmem:[#allocation4 + $0x160] sm:$0xff]  ;;  %v4901_v47 = vld [vmem:[#allocation4 + $0x170] sm:$0xff] }
 0x242   :  { %790 = vmatprep.subr.mxu0 %v8864_v58  ;;  %861 = vmatprep.subr.mxu1 %v8865_v54  ;;  %v4904_v58 = vld [vmem:[#allocation4 + $0x148] sm:$0xff]  ;;  %v4907_v54 = vld [vmem:[#allocation4 + $0x158] sm:$0xff] }
 0x243   :  { %791 = vmatpush1.msra.mxu0 %v8866_v60  ;;  %862 = vmatpush1.msra.mxu1 %v8867_v59  ;;  %v4910_v60 = vld [vmem:[#allocation4 + $0x140] sm:$0xff]  ;;  %v4913_v59 = vld [vmem:[#allocation4 + $0x150] sm:$0xff] }
 0x244   :  { %792 = vmatprep.subr.mxu0 %v8868_v0  ;;  %863 = vmatprep.subr.mxu1 %v8869_v50  ;;  %v4916_v0 = vld [vmem:[#allocation4 + $0x128] sm:$0xff]  ;;  %v4919_v50 = vld [vmem:[#allocation4 + $0x138] sm:$0xff] }
 0x245   :  { %793 = vmatpush1.msra.mxu0 %v8870_v56  ;;  %864 = vmatpush1.msra.mxu1 %v8871_v53  ;;  %v4922_v56 = vld [vmem:[#allocation4 + $0x120] sm:$0xff]  ;;  %v4925_v53 = vld [vmem:[#allocation4 + $0x130] sm:$0xff] }
 0x246   :  { %794 = vmatprep.subr.mxu0 %v8872_v48  ;;  %865 = vmatprep.subr.mxu1 %v8873_v46  ;;  %v4928_v48 = vld [vmem:[#allocation4 + $0x108] sm:$0xff]  ;;  %v4931_v46 = vld [vmem:[#allocation4 + $0x118] sm:$0xff] }
 0x247   :  { %795 = vmatpush1.msra.mxu0 %v8874_v49  ;;  %828 = vmatprep.mubr.f32.mxu0 %v8875_v61  ;;  %v4934_v49 = vld [vmem:[#allocation4 + $0x100] sm:$0xff] }
 0x248   :  { %866 = vmatpush1.msra.mxu1 %v8876_v62  ;;  %899 = vmatprep.mubr.f32.mxu1 %v8875_v61  ;;  %v4937_v62 = vld [vmem:[#allocation4 + $0x110] sm:$0xff] }
 0x249   :  { %933 = vmatprep.subr.mxu0 %v4829_v5  ;;  %1004 = vmatprep.subr.mxu1 %v4832_v1 }
 0x2e8   :  { %v665_v2 = vpop.f32.mrf.mxu0  ;;  %v736_v9 = vpop.f32.mrf.mxu1 }
 0x2e9   :  { %v666_v4 = vadd.f32 %v665_v2, %v8877_v3  ;;  %v737_v11 = vadd.f32 %v736_v9, %v4592_v55  ;;  %v4940_v2 = vld [vmem:[#allocation4 + $0xe8] sm:$0xff]  ;;  %v4955_v9 = vld [vmem:[#allocation4 + $0xd8] sm:$0xff] }
 0x2ea   :  { %v667_v6 = vpop.f32.mrf.mxu0  ;;  %v738_v12 = vpop.f32.mrf.mxu1 }
 0x2eb   :  { %v741_v7 = vmul.f32 0.5, %v666_v4  ;;  %v668_v8 = vadd.f32 %v667_v6, %v4589_v57  ;;  %v739_v13 = vadd.f32 %v738_v12, %v4596_v63  ;;  %v4943_v4 = vld [vmem:[#allocation4 + $0xf8] sm:$0xff]  ;;  %v4946_v6 = vld [vmem:[#allocation4 + $0xe0] sm:$0xff]  ;;  %v4964_v12 = vld [vmem:[#allocation4 + $0xa8] sm:$0xff] }
 0x2ec   :  { %8878 = vst [vmem:[#allocation7_spill] sm:$0xff] %v4964_v12 }
 0x2ed   :  { %3026 = vtanh.f32 %v741_v7  ;;  %v745_v10 = vmul.f32 0.5, %v668_v8  ;;  %v750_v14 = vmul.f32 0.5, %v739_v13  ;;  %v4949_v7 = vld [vmem:[#allocation4 + $0xf0] sm:$0xff]  ;;  %v4952_v8 = vld [vmem:[#allocation4 + $0xc8] sm:$0xff]  ;;  %v4967_v13 = vld [vmem:[#allocation4 + $0xb8] sm:$0xff] }
 0x2ee   :  { %8879 = vst [vmem:[#allocation10_spill] sm:$0xff] %v4967_v13 }
 0x2ef   :  { %3028 = vtanh.f32 %v745_v10  ;;  %v4958_v10 = vld [vmem:[#allocation4 + $0xc0] sm:$0xff] }
 0x2f0   :  { %3030 = vtanh.f32 %v737_v11  ;;  %v4961_v11 = vld [vmem:[#allocation4 + $0xd0] sm:$0xff] }
 0x2f1   :  { %3032 = vtanh.f32 %v750_v14  ;;  %v4970_v14 = vld [vmem:[#allocation4 + $0xa0] sm:$0xff] }
 0x2f2   :  { %8880 = vst [vmem:[#allocation8_spill] sm:$0xff] %v4970_v14 }
 0x2fa   :  { %v3027_v15 = vpop.eup %3026 }
 0x2fb   :  { %v743_v16 = vadd.f32 1.0, %v3027_v15  ;;  %v4973_v15 = vld [vmem:[#allocation4 + $0xb0] sm:$0xff] }
 0x2fc   :  { %v3029_v17 = vpop.eup %3028  ;;  %8881 = vst [vmem:[#allocation12_spill] sm:$0xff] %v4973_v15 }
 0x2fd   :  { %v744_v18 = vmul.f32 0.5, %v743_v16  ;;  %v747_v19 = vadd.f32 1.0, %v3029_v17  ;;  %v3031_v21 = vpop.eup %3030  ;;  %v4976_v16 = vld [vmem:[#allocation4 + $0x88] sm:$0xff]  ;;  %v4979_v17 = vld [vmem:[#allocation4 + $0x98] sm:$0xff] }
 0x2fe   :  { %v3033_v25 = vpop.eup %3032  ;;  %8882 = vst [vmem:[#allocation9_spill] sm:$0xff] %v4976_v16  ;;  %8883 = vst [vmem:[#allocation14_spill] sm:$0xff] %v4979_v17 }
 0x2ff   :  { %v748_v20 = vmul.f32 0.5, %v747_v19  ;;  %v755_v23 = vmul.f32 %v3031_v21, %v744_v18  ;;  %v752_v26 = vadd.f32 1.0, %v3033_v25  ;;  %v4982_v18 = vld [vmem:[#allocation4 + $0x80] sm:$0xff]  ;;  %v4985_v19 = vld [vmem:[#allocation4 + $0x90] sm:$0xff]  ;;  %v4991_v21 = vld [vmem:[#allocation4 + $0x78] sm:$0xff] }
 0x300   :  { %8884 = vst [vmem:[#allocation11_spill] sm:$0xff] %v4982_v18  ;;  %8885 = vst [vmem:[#allocation16_spill] sm:$0xff] %v4985_v19  ;;  %v5000_v25 = vld [vmem:[#allocation4 + $0x48] sm:$0xff] }
 0x301   :  { %v754_v22 = vmul.f32 %v748_v20, %v4602_v51  ;;  %v753_v27 = vmul.f32 0.5, %v752_v26  ;;  %v4850_v51 = vld [vmem:[#allocation4 + $0x1e0] sm:$0xff]  ;;  %v4988_v20 = vld [vmem:[#allocation4 + $0x68] sm:$0xff]  ;;  %8887 = vst [vmem:[#allocation18_spill] sm:$0xff] %v4991_v21  ;;  %8890 = vst [vmem:[#allocation17_spill] sm:$0xff] %v5000_v25 }
 0x302   :  { %8886 = vst [vmem:[#allocation13_spill] sm:$0xff] %v4988_v20  ;;  %v5003_v26 = vld [vmem:[#allocation4 + $0x58] sm:$0xff] }
 0x303   :  { %v4840_v24 = vadd.f32 %v755_v23, %v754_v22  ;;  %v4994_v22 = vld [vmem:[#allocation4 + $0x60] sm:$0xff]  ;;  %v4997_v23 = vld [vmem:[#allocation4 + $0x70] sm:$0xff]  ;;  %8891 = vst [vmem:[#allocation22_spill] sm:$0xff] %v5003_v26 }
 0x304   :  { %8888 = vst [vmem:[#allocation15_spill] sm:$0xff] %v4994_v22  ;;  %8889 = vst [vmem:[#allocation20_spill] sm:$0xff] %v4997_v23 }
 0x305   :  { %3034 = vtanh.f32 %v4840_v24  ;;  %2953 = vst [vmem:[%s7985_s6 + $0x38] sm:$0xff] %v4840_v24 }
 0x312   :  { %v3035_v28 = vpop.eup %3034 }
 0x313   :  { %v758_v29 = vmul.f32 %v3035_v28, %v753_v27  ;;  %v5006_v27 = vld [vmem:[#allocation4 + $0x40] sm:$0xff]  ;;  %v5009_v28 = vld [vmem:[#allocation4 + $0x50] sm:$0xff] }
 0x314   :  { %8892 = vst [vmem:[#allocation19_spill] sm:$0xff] %v5006_v27  ;;  %8893 = vst [vmem:[#allocation24_spill] sm:$0xff] %v5009_v28 }
 0x315   :  { %2951 = vst [vmem:[%s7985_s6 + $0x28] sm:$0xff] %v758_v29  ;;  %829 = vmatmul.mubr.f32.vlgmr.msra.gmra.mxu0 %v758_v29  ;;  %900 = vmatmul.mubr.f32.vlgmr.msra.gmra.mxu1 %v758_v29 }
 0x316   :  { %997 = vmatprep.mubr.f32.mxu0 %v758_v29  ;;  %1068 = vmatprep.mubr.f32.mxu1 %v758_v29  ;;  %v5012_v29 = vld [vmem:[#allocation4 + $0x28] sm:$0xff] }
 0x317   :  { %934 = vmatpush1.msra.mxu0 %v4850_v51  ;;  %1005 = vmatpush1.msra.mxu1 %v4853_v30  ;;  %8894 = vst [vmem:[#allocation21_spill] sm:$0xff] %v5012_v29 }
 0x318   :  { %935 = vmatprep.subr.mxu0 %v4856_v31  ;;  %1006 = vmatprep.subr.mxu1 %v4859_v32 }
 0x319   :  { %936 = vmatpush1.msra.mxu0 %v4862_v33  ;;  %1007 = vmatpush1.msra.mxu1 %v4865_v34 }
 0x31a   :  { %937 = vmatprep.subr.mxu0 %v4868_v35  ;;  %1008 = vmatprep.subr.mxu1 %v4871_v36 }
 0x31b   :  { %938 = vmatpush1.msra.mxu0 %v4874_v37  ;;  %1009 = vmatpush1.msra.mxu1 %v4877_v38 }
 0x31c   :  { %939 = vmatprep.subr.mxu0 %v4880_v39  ;;  %1010 = vmatprep.subr.mxu1 %v4883_v40 }
 0x31d   :  { %940 = vmatpush1.msra.mxu0 %v4886_v41  ;;  %1011 = vmatpush1.msra.mxu1 %v4889_v42 }
 0x31e   :  { %941 = vmatprep.subr.mxu0 %v4892_v43  ;;  %1012 = vmatprep.subr.mxu1 %v4895_v44 }
 0x31f   :  { %942 = vmatpush1.msra.mxu0 %v4898_v45  ;;  %1013 = vmatpush1.msra.mxu1 %v4901_v47 }
 0x320   :  { %943 = vmatprep.subr.mxu0 %v4904_v58  ;;  %1014 = vmatprep.subr.mxu1 %v4907_v54 }
 0x321   :  { %944 = vmatpush1.msra.mxu0 %v4910_v60  ;;  %1015 = vmatpush1.msra.mxu1 %v4913_v59 }
 0x322   :  { %945 = vmatprep.subr.mxu0 %v4916_v0  ;;  %1016 = vmatprep.subr.mxu1 %v4919_v50 }
 0x323   :  { %946 = vmatpush1.msra.mxu0 %v4922_v56  ;;  %1017 = vmatpush1.msra.mxu1 %v4925_v53 }
 0x324   :  { %947 = vmatprep.subr.mxu0 %v4928_v48  ;;  %1018 = vmatprep.subr.mxu1 %v4931_v46 }
 0x325   :  { %948 = vmatpush1.msra.mxu0 %v4934_v49  ;;  %1019 = vmatpush1.msra.mxu1 %v4937_v62 }
 0x326   :  { %949 = vmatprep.subr.mxu0 %v4940_v2  ;;  %1020 = vmatprep.subr.mxu1 %v4943_v4 }
 0x327   :  { %950 = vmatpush1.msra.mxu0 %v4946_v6  ;;  %1021 = vmatpush1.msra.mxu1 %v4949_v7 }
 0x328   :  { %951 = vmatprep.subr.mxu0 %v4952_v8  ;;  %1022 = vmatprep.subr.mxu1 %v4955_v9 }
 0x329   :  { %952 = vmatpush1.msra.mxu0 %v4958_v10  ;;  %1023 = vmatpush1.msra.mxu1 %v4961_v11 }
 0x32a   :  { %953 = vmatprep.subr.mxu0 %v4964_v12  ;;  %1024 = vmatprep.subr.mxu1 %v4967_v13 }
 0x32b   :  { %954 = vmatpush1.msra.mxu0 %v4970_v14  ;;  %1025 = vmatpush1.msra.mxu1 %v4973_v15 }
 0x32c   :  { %955 = vmatprep.subr.mxu0 %v4976_v16  ;;  %1026 = vmatprep.subr.mxu1 %v4979_v17  ;;  %v2949_v17 = vld [vmem:[%s7979_s0 + $0x38] sm:$0xff] }
 0x32d   :  { %956 = vmatpush1.msra.mxu0 %v4982_v18  ;;  %1027 = vmatpush1.msra.mxu1 %v4985_v19 }
 0x32e   :  { %957 = vmatprep.subr.mxu0 %v4988_v20  ;;  %1028 = vmatprep.subr.mxu1 %v4991_v21  ;;  %v2948_v20 = vld [vmem:[%s7979_s0 + $0x30] sm:$0xff] }
 0x32f   :  { %958 = vmatpush1.msra.mxu0 %v4994_v22  ;;  %1029 = vmatpush1.msra.mxu1 %v4997_v23  ;;  %v5015_v23 = vld [vmem:[#allocation4 + $0x38] sm:$0xff] }
 0x330   :  { %959 = vmatprep.subr.mxu0 %v5000_v25  ;;  %1030 = vmatprep.subr.mxu1 %v5003_v26  ;;  %8895 = vst [vmem:[#allocation26_spill] sm:$0xff] %v5015_v23  ;;  %v5018_v25 = vld [vmem:[#allocation4 + $0x20] sm:$0xff]  ;;  %v5021_v26 = vld [vmem:[#allocation4 + $0x30] sm:$0xff] }
 0x331   :  { %960 = vmatpush1.msra.mxu0 %v5006_v27  ;;  %1031 = vmatpush1.msra.mxu1 %v5009_v28  ;;  %8896 = vst [vmem:[#allocation23_spill] sm:$0xff] %v5018_v25  ;;  %8897 = vst [vmem:[#allocation28_spill] sm:$0xff] %v5021_v26  ;;  %v5024_v27 = vld [vmem:[#allocation4 + $0x8] sm:$0xff]  ;;  %v5027_v28 = vld [vmem:[#allocation4 + $0x18] sm:$0xff] }
 0x332   :  { %961 = vmatprep.subr.mxu0 %v5012_v29  ;;  %1032 = vmatprep.subr.mxu1 %v5015_v23  ;;  %8898 = vst [vmem:[#allocation25_spill] sm:$0xff] %v5024_v27  ;;  %8899 = vst [vmem:[#allocation30_spill] sm:$0xff] %v5027_v28  ;;  %v5030_v29 = vld [vmem:[#allocation4] sm:$0xff]  ;;  %v5033_v23 = vld [vmem:[#allocation4 + $0x10] sm:$0xff] }
 0x333   :  { %962 = vmatpush1.msra.mxu0 %v5018_v25  ;;  %1033 = vmatpush1.msra.mxu1 %v5021_v26  ;;  %8900 = vst [vmem:[#allocation27_spill] sm:$0xff] %v5030_v29  ;;  %8901 = vst [vmem:[#allocation32_spill] sm:$0xff] %v5033_v23  ;;  %v5036_v25 = vld [vmem:[#allocation4 + $0x3e8] sm:$0xff]  ;;  %v5039_v26 = vld [vmem:[#allocation4 + $0x3f8] sm:$0xff] }
 0x334   :  { %963 = vmatprep.subr.mxu0 %v5024_v27  ;;  %1034 = vmatprep.subr.mxu1 %v5027_v28  ;;  %8902 = vst [vmem:[#allocation29_spill] sm:$0xff] %v5036_v25  ;;  %8903 = vst [vmem:[#allocation34_spill] sm:$0xff] %v5039_v26  ;;  %v5042_v27 = vld [vmem:[#allocation4 + $0x3e0] sm:$0xff]  ;;  %v5045_v28 = vld [vmem:[#allocation4 + $0x3f0] sm:$0xff] }
 0x335   :  { %964 = vmatpush1.msra.mxu0 %v5030_v29  ;;  %1035 = vmatpush1.msra.mxu1 %v5033_v23  ;;  %8904 = vst [vmem:[#allocation31_spill] sm:$0xff] %v5042_v27  ;;  %8905 = vst [vmem:[#allocation36_spill] sm:$0xff] %v5045_v28  ;;  %v5048_v29 = vld [vmem:[#allocation4 + $0x3c8] sm:$0xff]  ;;  %v5051_v23 = vld [vmem:[#allocation4 + $0x3d8] sm:$0xff] }
 0x336   :  { %965 = vmatprep.subr.mxu0 %v5036_v25  ;;  %1036 = vmatprep.subr.mxu1 %v5039_v26  ;;  %8906 = vst [vmem:[#allocation33_spill] sm:$0xff] %v5048_v29  ;;  %8907 = vst [vmem:[#allocation38_spill] sm:$0xff] %v5051_v23  ;;  %v5054_v25 = vld [vmem:[#allocation4 + $0x3c0] sm:$0xff]  ;;  %v5057_v26 = vld [vmem:[#allocation4 + $0x3d0] sm:$0xff] }
 0x337   :  { %966 = vmatpush2.msra.mxu0 %v5042_v27  ;;  %1037 = vmatpush2.msra.mxu1 %v5045_v28  ;;  %8908 = vst [vmem:[#allocation35_spill] sm:$0xff] %v5054_v25  ;;  %8909 = vst [vmem:[#allocation40_spill] sm:$0xff] %v5057_v26  ;;  %v5060_v27 = vld [vmem:[#allocation4 + $0x3a8] sm:$0xff]  ;;  %v5063_v28 = vld [vmem:[#allocation4 + $0x3b8] sm:$0xff] }
 0x338   :  { %967 = vmatprep.subr.mxu0 %v5048_v29  ;;  %1038 = vmatprep.subr.mxu1 %v5051_v23  ;;  %8910 = vst [vmem:[#allocation37_spill] sm:$0xff] %v5060_v27  ;;  %8911 = vst [vmem:[#allocation42_spill] sm:$0xff] %v5063_v28  ;;  %v5066_v29 = vld [vmem:[#allocation4 + $0x3a0] sm:$0xff]  ;;  %v5069_v23 = vld [vmem:[#allocation4 + $0x3b0] sm:$0xff] }
 0x339   :  { %968 = vmatpush2.msra.mxu0 %v5054_v25  ;;  %1039 = vmatpush2.msra.mxu1 %v5057_v26  ;;  %8912 = vst [vmem:[#allocation39_spill] sm:$0xff] %v5066_v29  ;;  %8913 = vst [vmem:[#allocation44_spill] sm:$0xff] %v5069_v23  ;;  %v5072_v25 = vld [vmem:[#allocation4 + $0x388] sm:$0xff]  ;;  %v5075_v26 = vld [vmem:[#allocation4 + $0x398] sm:$0xff] }
 0x33a   :  { %969 = vmatprep.subr.mxu0 %v5060_v27  ;;  %1040 = vmatprep.subr.mxu1 %v5063_v28  ;;  %8914 = vst [vmem:[#allocation41_spill] sm:$0xff] %v5072_v25  ;;  %8915 = vst [vmem:[#allocation46_spill] sm:$0xff] %v5075_v26  ;;  %v5078_v27 = vld [vmem:[#allocation4 + $0x380] sm:$0xff]  ;;  %v5081_v28 = vld [vmem:[#allocation4 + $0x390] sm:$0xff] }
 0x33b   :  { %970 = vmatpush2.msra.mxu0 %v5066_v29  ;;  %1041 = vmatpush2.msra.mxu1 %v5069_v23  ;;  %8916 = vst [vmem:[#allocation43_spill] sm:$0xff] %v5078_v27  ;;  %8917 = vst [vmem:[#allocation48_spill] sm:$0xff] %v5081_v28  ;;  %v5084_v29 = vld [vmem:[#allocation4 + $0x368] sm:$0xff]  ;;  %v5087_v23 = vld [vmem:[#allocation4 + $0x378] sm:$0xff] }
 0x33c   :  { %971 = vmatprep.subr.mxu0 %v5072_v25  ;;  %1042 = vmatprep.subr.mxu1 %v5075_v26  ;;  %8918 = vst [vmem:[#allocation45_spill] sm:$0xff] %v5084_v29  ;;  %8919 = vst [vmem:[#allocation50_spill] sm:$0xff] %v5087_v23  ;;  %v5090_v25 = vld [vmem:[#allocation4 + $0x360] sm:$0xff]  ;;  %v5093_v26 = vld [vmem:[#allocation4 + $0x370] sm:$0xff] }
 0x33d   :  { %972 = vmatpush2.msra.mxu0 %v5078_v27  ;;  %1043 = vmatpush2.msra.mxu1 %v5081_v28  ;;  %8920 = vst [vmem:[#allocation47_spill] sm:$0xff] %v5090_v25  ;;  %8921 = vst [vmem:[#allocation52_spill] sm:$0xff] %v5093_v26  ;;  %v5096_v27 = vld [vmem:[#allocation4 + $0x348] sm:$0xff]  ;;  %v5099_v28 = vld [vmem:[#allocation4 + $0x358] sm:$0xff] }
 0x33e   :  { %973 = vmatprep.subr.mxu0 %v5084_v29  ;;  %1044 = vmatprep.subr.mxu1 %v5087_v23  ;;  %8922 = vst [vmem:[#allocation49_spill] sm:$0xff] %v5096_v27  ;;  %8923 = vst [vmem:[#allocation54_spill] sm:$0xff] %v5099_v28  ;;  %v5102_v29 = vld [vmem:[#allocation4 + $0x340] sm:$0xff]  ;;  %v5105_v23 = vld [vmem:[#allocation4 + $0x350] sm:$0xff] }
 0x33f   :  { %974 = vmatpush2.msra.mxu0 %v5090_v25  ;;  %1045 = vmatpush2.msra.mxu1 %v5093_v26  ;;  %8924 = vst [vmem:[#allocation51_spill] sm:$0xff] %v5102_v29  ;;  %8925 = vst [vmem:[#allocation56_spill] sm:$0xff] %v5105_v23  ;;  %v5108_v25 = vld [vmem:[#allocation4 + $0x328] sm:$0xff]  ;;  %v5111_v26 = vld [vmem:[#allocation4 + $0x338] sm:$0xff] }
 0x340   :  { %975 = vmatprep.subr.mxu0 %v5096_v27  ;;  %1046 = vmatprep.subr.mxu1 %v5099_v28  ;;  %8926 = vst [vmem:[#allocation53_spill] sm:$0xff] %v5108_v25  ;;  %8927 = vst [vmem:[#allocation58_spill] sm:$0xff] %v5111_v26  ;;  %v5114_v27 = vld [vmem:[#allocation4 + $0x320] sm:$0xff]  ;;  %v5117_v28 = vld [vmem:[#allocation4 + $0x330] sm:$0xff] }
 0x341   :  { %976 = vmatpush2.msra.mxu0 %v5102_v29  ;;  %1047 = vmatpush2.msra.mxu1 %v5105_v23  ;;  %8928 = vst [vmem:[#allocation55_spill] sm:$0xff] %v5114_v27  ;;  %8929 = vst [vmem:[#allocation60_spill] sm:$0xff] %v5117_v28  ;;  %v5120_v29 = vld [vmem:[#allocation4 + $0x308] sm:$0xff]  ;;  %v5123_v23 = vld [vmem:[#allocation4 + $0x318] sm:$0xff] }
 0x342   :  { %977 = vmatprep.subr.mxu0 %v5108_v25  ;;  %1048 = vmatprep.subr.mxu1 %v5111_v26  ;;  %8930 = vst [vmem:[#allocation57_spill] sm:$0xff] %v5120_v29  ;;  %8931 = vst [vmem:[#allocation62_spill] sm:$0xff] %v5123_v23  ;;  %v5126_v25 = vld [vmem:[#allocation4 + $0x300] sm:$0xff]  ;;  %v5129_v26 = vld [vmem:[#allocation4 + $0x310] sm:$0xff] }
 0x343   :  { %978 = vmatpush2.msra.mxu0 %v5114_v27  ;;  %1049 = vmatpush2.msra.mxu1 %v5117_v28  ;;  %8932 = vst [vmem:[#allocation59_spill] sm:$0xff] %v5126_v25  ;;  %8933 = vst [vmem:[#allocation64_spill] sm:$0xff] %v5129_v26  ;;  %v5132_v27 = vld [vmem:[#allocation4 + $0x2e8] sm:$0xff]  ;;  %v5135_v28 = vld [vmem:[#allocation4 + $0x2f8] sm:$0xff] }
 0x344   :  { %979 = vmatprep.subr.mxu0 %v5120_v29  ;;  %1050 = vmatprep.subr.mxu1 %v5123_v23  ;;  %8934 = vst [vmem:[#allocation61_spill] sm:$0xff] %v5132_v27  ;;  %8935 = vst [vmem:[#allocation66_spill] sm:$0xff] %v5135_v28  ;;  %v5138_v29 = vld [vmem:[#allocation4 + $0x2e0] sm:$0xff]  ;;  %v5141_v23 = vld [vmem:[#allocation4 + $0x2f0] sm:$0xff] }
 0x345   :  { %980 = vmatpush2.msra.mxu0 %v5126_v25  ;;  %1051 = vmatpush2.msra.mxu1 %v5129_v26  ;;  %8936 = vst [vmem:[#allocation63_spill] sm:$0xff] %v5138_v29  ;;  %8937 = vst [vmem:[#allocation68_spill] sm:$0xff] %v5141_v23  ;;  %v5144_v25 = vld [vmem:[#allocation4 + $0x2c8] sm:$0xff]  ;;  %v5147_v26 = vld [vmem:[#allocation4 + $0x2d8] sm:$0xff] }
 0x346   :  { %981 = vmatprep.subr.mxu0 %v5132_v27  ;;  %1052 = vmatprep.subr.mxu1 %v5135_v28  ;;  %8938 = vst [vmem:[#allocation65_spill] sm:$0xff] %v5144_v25  ;;  %8939 = vst [vmem:[#allocation70_spill] sm:$0xff] %v5147_v26  ;;  %v5150_v27 = vld [vmem:[#allocation4 + $0x2c0] sm:$0xff]  ;;  %v5153_v28 = vld [vmem:[#allocation4 + $0x2d0] sm:$0xff] }
 0x347   :  { %982 = vmatpush2.msra.mxu0 %v5138_v29  ;;  %1053 = vmatpush2.msra.mxu1 %v5141_v23  ;;  %8940 = vst [vmem:[#allocation67_spill] sm:$0xff] %v5150_v27  ;;  %8941 = vst [vmem:[#allocation72_spill] sm:$0xff] %v5153_v28  ;;  %v5156_v29 = vld [vmem:[#allocation4 + $0x2a8] sm:$0xff]  ;;  %v5159_v23 = vld [vmem:[#allocation4 + $0x2b8] sm:$0xff] }
 0x348   :  { %983 = vmatprep.subr.mxu0 %v5144_v25  ;;  %1054 = vmatprep.subr.mxu1 %v5147_v26  ;;  %8942 = vst [vmem:[#allocation69_spill] sm:$0xff] %v5156_v29  ;;  %8943 = vst [vmem:[#allocation74_spill] sm:$0xff] %v5159_v23  ;;  %v5162_v25 = vld [vmem:[#allocation4 + $0x2a0] sm:$0xff]  ;;  %v5165_v26 = vld [vmem:[#allocation4 + $0x2b0] sm:$0xff] }
 0x349   :  { %984 = vmatpush2.msra.mxu0 %v5150_v27  ;;  %1055 = vmatpush2.msra.mxu1 %v5153_v28  ;;  %8944 = vst [vmem:[#allocation71_spill] sm:$0xff] %v5162_v25  ;;  %8945 = vst [vmem:[#allocation76_spill] sm:$0xff] %v5165_v26  ;;  %v5168_v27 = vld [vmem:[#allocation4 + $0x288] sm:$0xff]  ;;  %v5171_v28 = vld [vmem:[#allocation4 + $0x298] sm:$0xff] }
 0x34a   :  { %985 = vmatprep.subr.mxu0 %v5156_v29  ;;  %1056 = vmatprep.subr.mxu1 %v5159_v23  ;;  %8946 = vst [vmem:[#allocation73_spill] sm:$0xff] %v5168_v27  ;;  %8947 = vst [vmem:[#allocation79_spill] sm:$0xff] %v5171_v28  ;;  %v5174_v29 = vld [vmem:[#allocation4 + $0x280] sm:$0xff]  ;;  %v5177_v23 = vld [vmem:[#allocation4 + $0x290] sm:$0xff] }
 0x34b   :  { %986 = vmatpush2.msra.mxu0 %v5162_v25  ;;  %1057 = vmatpush2.msra.mxu1 %v5165_v26  ;;  %8948 = vst [vmem:[#allocation75_spill] sm:$0xff] %v5174_v29  ;;  %8949 = vst [vmem:[#allocation81_spill] sm:$0xff] %v5177_v23  ;;  %v5180_v25 = vld [vmem:[#allocation4 + $0x268] sm:$0xff]  ;;  %v5183_v26 = vld [vmem:[#allocation4 + $0x278] sm:$0xff] }
 0x34c   :  { %987 = vmatprep.subr.mxu0 %v5168_v27  ;;  %1058 = vmatprep.subr.mxu1 %v5171_v28  ;;  %8950 = vst [vmem:[#allocation77_spill] sm:$0xff] %v5180_v25  ;;  %8951 = vst [vmem:[#allocation83_spill] sm:$0xff] %v5183_v26  ;;  %v5186_v27 = vld [vmem:[#allocation4 + $0x260] sm:$0xff]  ;;  %v5189_v28 = vld [vmem:[#allocation4 + $0x270] sm:$0xff] }
 0x34d   :  { %988 = vmatpush2.msra.mxu0 %v5174_v29  ;;  %1059 = vmatpush2.msra.mxu1 %v5177_v23  ;;  %8952 = vst [vmem:[#allocation78_spill] sm:$0xff] %v5186_v27  ;;  %8953 = vst [vmem:[#allocation85_spill] sm:$0xff] %v5189_v28  ;;  %v5192_v29 = vld [vmem:[#allocation4 + $0x248] sm:$0xff]  ;;  %v5195_v23 = vld [vmem:[#allocation4 + $0x258] sm:$0xff] }
 0x34e   :  { %989 = vmatprep.subr.mxu0 %v5180_v25  ;;  %1060 = vmatprep.subr.mxu1 %v5183_v26  ;;  %8954 = vst [vmem:[#allocation80_spill] sm:$0xff] %v5192_v29  ;;  %8955 = vst [vmem:[#allocation86_spill] sm:$0xff] %v5195_v23  ;;  %v5198_v25 = vld [vmem:[#allocation4 + $0x240] sm:$0xff]  ;;  %v5201_v26 = vld [vmem:[#allocation4 + $0x250] sm:$0xff] }
 0x34f   :  { %990 = vmatpush2.msra.mxu0 %v5186_v27  ;;  %1061 = vmatpush2.msra.mxu1 %v5189_v28  ;;  %8956 = vst [vmem:[#allocation82_spill] sm:$0xff] %v5198_v25  ;;  %8957 = vst [vmem:[#allocation87_spill] sm:$0xff] %v5201_v26  ;;  %v5204_v27 = vld [vmem:[#allocation4 + $0x228] sm:$0xff]  ;;  %v5207_v28 = vld [vmem:[#allocation4 + $0x238] sm:$0xff] }
 0x350   :  { %991 = vmatprep.subr.mxu0 %v5192_v29  ;;  %1062 = vmatprep.subr.mxu1 %v5195_v23  ;;  %8958 = vst [vmem:[#allocation84_spill] sm:$0xff] %v5204_v27  ;;  %8959 = vst [vmem:[#allocation88_spill] sm:$0xff] %v5207_v28  ;;  %v5210_v29 = vld [vmem:[#allocation4 + $0x220] sm:$0xff]  ;;  %v5213_v23 = vld [vmem:[#allocation4 + $0x230] sm:$0xff] }
 0x351   :  { %992 = vmatpush2.msra.mxu0 %v5198_v25  ;;  %1063 = vmatpush2.msra.mxu1 %v5201_v26  ;;  %8960 = vst [vmem:[#allocation89_spill] sm:$0xff] %v5210_v29  ;;  %8961 = vst [vmem:[#allocation90_spill] sm:$0xff] %v5213_v23  ;;  %v5216_v25 = vld [vmem:[#allocation4 + $0x208] sm:$0xff]  ;;  %v5219_v26 = vld [vmem:[#allocation4 + $0x218] sm:$0xff] }
 0x352   :  { %993 = vmatprep.subr.mxu0 %v5204_v27  ;;  %1064 = vmatprep.subr.mxu1 %v5207_v28  ;;  %8962 = vst [vmem:[#allocation91_spill] sm:$0xff] %v5216_v25  ;;  %8963 = vst [vmem:[#allocation92_spill] sm:$0xff] %v5219_v26  ;;  %v5222_v27 = vld [vmem:[#allocation4 + $0x200] sm:$0xff]  ;;  %v5225_v28 = vld [vmem:[#allocation4 + $0x210] sm:$0xff] }
 0x353   :  { %994 = vmatpush2.msra.mxu0 %v5210_v29  ;;  %1065 = vmatpush2.msra.mxu1 %v5213_v23  ;;  %8964 = vst [vmem:[#allocation93_spill] sm:$0xff] %v5222_v27  ;;  %8965 = vst [vmem:[#allocation94_spill] sm:$0xff] %v5225_v28  ;;  %v5231_v23 = vld [vmem:[%s7983_s4 + $0x1e8] sm:$0xff] }
 0x354   :  { %995 = vmatprep.subr.mxu0 %v5216_v25  ;;  %1066 = vmatprep.subr.mxu1 %v5219_v26  ;;  %8966 = vst [vmem:[#allocation95_spill] sm:$0xff] %v5231_v23  ;;  %v5237_v25 = vld [vmem:[%s7983_s4 + $0x1f8] sm:$0xff] }
 0x355   :  { %996 = vmatpush2.msra.mxu0 %v5222_v27  ;;  %1067 = vmatpush2.msra.mxu1 %v5225_v28  ;;  %8967 = vst [vmem:[#allocation96_spill] sm:$0xff] %v5237_v25  ;;  %v2946_v27 = vld [vmem:[%s7979_s0 + $0x20] sm:$0xff]  ;;  %v2947_v28 = vld [vmem:[%s7979_s0 + $0x28] sm:$0xff] }
 0x356   :  { %1098 = vmatprep.subr.mxu0 %v5231_v23  ;;  %1169 = vmatprep.subr.mxu1 %v5237_v25 }
 0x3d5   :  { %v830_v26 = vpop.f32.mrf.mxu0  ;;  %v901_v19 = vpop.f32.mrf.mxu1 }
 0x3d6   :  { %v906_v29 = vadd.f32 %v2946_v27, %v830_v26  ;;  %v908_v18 = vadd.f32 %v2948_v20, %v901_v19 }
 0x3d7   :  { %v832_v22 = vpop.f32.mrf.mxu0  ;;  %v903_v16 = vpop.f32.mrf.mxu1 }
 0x3d8   :  { %v910_v21 = vmul.f32 0.5, %v906_v29  ;;  %v907_v23 = vadd.f32 %v2947_v28, %v832_v22  ;;  %v909_v15 = vadd.f32 %v2949_v17, %v903_v16 }
 0x3da   :  { %3036 = vtanh.f32 %v910_v21  ;;  %v914_v25 = vmul.f32 0.5, %v907_v23  ;;  %v919_v26 = vmul.f32 0.5, %v909_v15 }
 0x3dc   :  { %3038 = vtanh.f32 %v914_v25  ;;  %v5290_v25 = vld [vmem:[%s7983_s4 + $0x1c0] sm:$0xff] }
 0x3dd   :  { %3040 = vtanh.f32 %v908_v18 }
 0x3de   :  { %3042 = vtanh.f32 %v919_v26  ;;  %v5296_v26 = vld [vmem:[%s7983_s4 + $0x1d0] sm:$0xff] }
 0x3df   :  { %8968 = vst [vmem:[#allocation97_spill] sm:$0xff] %v5296_v26 }
 0x3e7   :  { %v3037_v27 = vpop.eup %3036 }
 0x3e8   :  { %v912_v29 = vadd.f32 1.0, %v3037_v27  ;;  %v5302_v27 = vld [vmem:[%s7983_s4 + $0x1a8] sm:$0xff] }
 0x3e9   :  { %v3039_v22 = vpop.eup %3038  ;;  %8969 = vst [vmem:[#allocation98_spill] sm:$0xff] %v5302_v27 }
 0x3ea   :  { %v913_v28 = vmul.f32 0.5, %v912_v29  ;;  %v916_v14 = vadd.f32 1.0, %v3039_v22  ;;  %v3041_v12 = vpop.eup %3040  ;;  %v5308_v29 = vld [vmem:[%s7983_s4 + $0x1b8] sm:$0xff]  ;;  %v5314_v22 = vld [vmem:[%s7983_s4 + $0x1a0] sm:$0xff] }
 0x3eb   :  { %v3043_v15 = vpop.eup %3042  ;;  %8970 = vst [vmem:[#allocation99_spill] sm:$0xff] %v5308_v29  ;;  %8971 = vst [vmem:[#allocation100_spill] sm:$0xff] %v5314_v22 }
 0x3ec   :  { %v917_v13 = vmul.f32 0.5, %v916_v14  ;;  %v924_v19 = vmul.f32 %v3041_v12, %v913_v28  ;;  %v921_v16 = vadd.f32 1.0, %v3043_v15  ;;  %v5272_v12 = vld [vmem:[%s7983_s4 + $0x1f0] sm:$0xff]  ;;  %v5284_v14 = vld [vmem:[%s7983_s4 + $0x1d8] sm:$0xff]  ;;  %v5338_v15 = vld [vmem:[%s7983_s4 + $0x180] sm:$0xff] }
 0x3ed   :  { %v5320_v28 = vld [vmem:[%s7983_s4 + $0x1b0] sm:$0xff]  ;;  %8975 = vst [vmem:[#allocation104_spill] sm:$0xff] %v5338_v15 }
 0x3ee   :  { %v923_v21 = vmul.f32 %v917_v13, %v4755_v52  ;;  %v922_v17 = vmul.f32 0.5, %v921_v16  ;;  %v5266_v52 = vld [vmem:[%s7983_s4 + $0x1e0] sm:$0xff]  ;;  %v5278_v13 = vld [vmem:[%s7983_s4 + $0x1c8] sm:$0xff]  ;;  %8972 = vst [vmem:[#allocation101_spill] sm:$0xff] %v5320_v28  ;;  %v5344_v16 = vld [vmem:[%s7983_s4 + $0x190] sm:$0xff] }
 0x3ef   :  { %8976 = vst [vmem:[#allocation105_spill] sm:$0xff] %v5344_v16 }
 0x3f0   :  { %v5253_v20 = vadd.f32 %v924_v19, %v923_v21  ;;  %v5326_v21 = vld [vmem:[%s7983_s4 + $0x188] sm:$0xff]  ;;  %v5332_v19 = vld [vmem:[%s7983_s4 + $0x198] sm:$0xff] }
 0x3f1   :  { %8973 = vst [vmem:[#allocation102_spill] sm:$0xff] %v5326_v21  ;;  %8974 = vst [vmem:[#allocation103_spill] sm:$0xff] %v5332_v19 }
 0x3f2   :  { %3044 = vtanh.f32 %v5253_v20  ;;  %2952 = vst [vmem:[%s7985_s6 + $0x30] sm:$0xff] %v5253_v20 }
 0x3ff   :  { %v3045_v18 = vpop.eup %3044 }
 0x400   :  { %v927_v23 = vmul.f32 %v3045_v18, %v922_v17  ;;  %v5350_v17 = vld [vmem:[%s7983_s4 + $0x168] sm:$0xff]  ;;  %v5356_v18 = vld [vmem:[%s7983_s4 + $0x178] sm:$0xff] }
 0x401   :  { %8977 = vst [vmem:[#allocation106_spill] sm:$0xff] %v5350_v17  ;;  %8978 = vst [vmem:[#allocation107_spill] sm:$0xff] %v5356_v18 }
 0x402   :  { %2950 = vst [vmem:[%s7985_s6 + $0x20] sm:$0xff] %v927_v23  ;;  %998 = vmatmul.mubr.f32.vlgmr.msra.gmra.mxu0 %v927_v23  ;;  %1069 = vmatmul.mubr.f32.vlgmr.msra.gmra.mxu1 %v927_v23  ;;  %v5362_v23 = vld [vmem:[%s7983_s4 + $0x160] sm:$0xff] }
 0x403   :  { %1099 = vmatpush1.msra.mxu0 %v5266_v52  ;;  %1170 = vmatpush1.msra.mxu1 %v5272_v12  ;;  %8979 = vst [vmem:[#allocation108_spill] sm:$0xff] %v5362_v23 }
 0x404   :  { %1100 = vmatprep.subr.mxu0 %v5278_v13  ;;  %1171 = vmatprep.subr.mxu1 %v5284_v14 }
 0x405   :  { %1101 = vmatpush1.msra.mxu0 %v5290_v25  ;;  %1172 = vmatpush1.msra.mxu1 %v5296_v26 }
 0x406   :  { %1102 = vmatprep.subr.mxu0 %v5302_v27  ;;  %1173 = vmatprep.subr.mxu1 %v5308_v29 }
 0x407   :  { %1103 = vmatpush1.msra.mxu0 %v5314_v22  ;;  %1174 = vmatpush1.msra.mxu1 %v5320_v28 }
 0x408   :  { %1104 = vmatprep.subr.mxu0 %v5326_v21  ;;  %1175 = vmatprep.subr.mxu1 %v5332_v19 }
 0x409   :  { %1105 = vmatpush1.msra.mxu0 %v5338_v15  ;;  %1176 = vmatpush1.msra.mxu1 %v5344_v16  ;;  %v5368_v16 = vld [vmem:[%s7983_s4 + $0x170] sm:$0xff] }
 0x40a   :  { %1106 = vmatprep.subr.mxu0 %v5350_v17  ;;  %1177 = vmatprep.subr.mxu1 %v5356_v18  ;;  %8980 = vst [vmem:[#allocation109_spill] sm:$0xff] %v5368_v16  ;;  %v5374_v17 = vld [vmem:[%s7983_s4 + $0x148] sm:$0xff]  ;;  %v5380_v18 = vld [vmem:[%s7983_s4 + $0x158] sm:$0xff] }
 0x40b   :  { %1107 = vmatpush1.msra.mxu0 %v5362_v23  ;;  %1178 = vmatpush1.msra.mxu1 %v5368_v16  ;;  %8981 = vst [vmem:[#allocation110_spill] sm:$0xff] %v5374_v17  ;;  %8982 = vst [vmem:[#allocation111_spill] sm:$0xff] %v5380_v18  ;;  %v5386_v23 = vld [vmem:[%s7983_s4 + $0x140] sm:$0xff]  ;;  %v5392_v16 = vld [vmem:[%s7983_s4 + $0x150] sm:$0xff] }
 0x40c   :  { %1108 = vmatprep.subr.mxu0 %v5374_v17  ;;  %1179 = vmatprep.subr.mxu1 %v5380_v18  ;;  %8983 = vst [vmem:[#allocation112_spill] sm:$0xff] %v5386_v23  ;;  %8984 = vst [vmem:[#allocation113_spill] sm:$0xff] %v5392_v16  ;;  %v5398_v17 = vld [vmem:[%s7983_s4 + $0x128] sm:$0xff]  ;;  %v5404_v18 = vld [vmem:[%s7983_s4 + $0x138] sm:$0xff] }
 0x40d   :  { %1109 = vmatpush1.msra.mxu0 %v5386_v23  ;;  %1180 = vmatpush1.msra.mxu1 %v5392_v16  ;;  %8985 = vst [vmem:[#allocation114_spill] sm:$0xff] %v5398_v17  ;;  %8986 = vst [vmem:[#allocation115_spill] sm:$0xff] %v5404_v18  ;;  %v5410_v23 = vld [vmem:[%s7983_s4 + $0x120] sm:$0xff]  ;;  %v5416_v16 = vld [vmem:[%s7983_s4 + $0x130] sm:$0xff] }
 0x40e   :  { %1110 = vmatprep.subr.mxu0 %v5398_v17  ;;  %1181 = vmatprep.subr.mxu1 %v5404_v18  ;;  %8987 = vst [vmem:[#allocation116_spill] sm:$0xff] %v5410_v23  ;;  %8988 = vst [vmem:[#allocation117_spill] sm:$0xff] %v5416_v16  ;;  %v5422_v17 = vld [vmem:[%s7983_s4 + $0x108] sm:$0xff]  ;;  %v5428_v18 = vld [vmem:[%s7983_s4 + $0x118] sm:$0xff] }
 0x40f   :  { %1111 = vmatpush1.msra.mxu0 %v5410_v23  ;;  %1182 = vmatpush1.msra.mxu1 %v5416_v16  ;;  %8989 = vst [vmem:[#allocation118_spill] sm:$0xff] %v5422_v17  ;;  %8990 = vst [vmem:[#allocation119_spill] sm:$0xff] %v5428_v18  ;;  %v5434_v23 = vld [vmem:[%s7983_s4 + $0x100] sm:$0xff]  ;;  %v5440_v16 = vld [vmem:[%s7983_s4 + $0x110] sm:$0xff] }
 0x410   :  { %1112 = vmatprep.subr.mxu0 %v5422_v17  ;;  %1183 = vmatprep.subr.mxu1 %v5428_v18  ;;  %8991 = vst [vmem:[#allocation120_spill] sm:$0xff] %v5434_v23  ;;  %8992 = vst [vmem:[#allocation121_spill] sm:$0xff] %v5440_v16  ;;  %v5446_v17 = vld [vmem:[%s7983_s4 + $0xe8] sm:$0xff]  ;;  %v5452_v18 = vld [vmem:[%s7983_s4 + $0xf8] sm:$0xff] }
 0x411   :  { %1113 = vmatpush1.msra.mxu0 %v5434_v23  ;;  %1184 = vmatpush1.msra.mxu1 %v5440_v16  ;;  %8993 = vst [vmem:[#allocation122_spill] sm:$0xff] %v5446_v17  ;;  %8994 = vst [vmem:[#allocation123_spill] sm:$0xff] %v5452_v18  ;;  %v5458_v23 = vld [vmem:[%s7983_s4 + $0xe0] sm:$0xff]  ;;  %v5464_v16 = vld [vmem:[%s7983_s4 + $0xf0] sm:$0xff] }
 0x412   :  { %1114 = vmatprep.subr.mxu0 %v5446_v17  ;;  %1185 = vmatprep.subr.mxu1 %v5452_v18  ;;  %8995 = vst [vmem:[#allocation124_spill] sm:$0xff] %v5458_v23  ;;  %8996 = vst [vmem:[#allocation125_spill] sm:$0xff] %v5464_v16  ;;  %v5470_v17 = vld [vmem:[%s7983_s4 + $0xc8] sm:$0xff]  ;;  %v5476_v18 = vld [vmem:[%s7983_s4 + $0xd8] sm:$0xff] }
 0x413   :  { %1115 = vmatpush1.msra.mxu0 %v5458_v23  ;;  %1186 = vmatpush1.msra.mxu1 %v5464_v16  ;;  %8997 = vst [vmem:[#allocation126_spill] sm:$0xff] %v5470_v17  ;;  %8998 = vst [vmem:[#allocation127_spill] sm:$0xff] %v5476_v18  ;;  %v5482_v23 = vld [vmem:[%s7983_s4 + $0xc0] sm:$0xff]  ;;  %v5488_v16 = vld [vmem:[%s7983_s4 + $0xd0] sm:$0xff] }
 0x414   :  { %1116 = vmatprep.subr.mxu0 %v5470_v17  ;;  %1187 = vmatprep.subr.mxu1 %v5476_v18  ;;  %8999 = vst [vmem:[#allocation128_spill] sm:$0xff] %v5482_v23  ;;  %9000 = vst [vmem:[#allocation129_spill] sm:$0xff] %v5488_v16  ;;  %v5494_v17 = vld [vmem:[%s7983_s4 + $0xa8] sm:$0xff]  ;;  %v5500_v18 = vld [vmem:[%s7983_s4 + $0xb8] sm:$0xff] }
 0x415   :  { %1117 = vmatpush1.msra.mxu0 %v5482_v23  ;;  %1188 = vmatpush1.msra.mxu1 %v5488_v16  ;;  %9001 = vst [vmem:[#allocation130_spill] sm:$0xff] %v5494_v17  ;;  %9002 = vst [vmem:[#allocation131_spill] sm:$0xff] %v5500_v18  ;;  %v5506_v23 = vld [vmem:[%s7983_s4 + $0xa0] sm:$0xff]  ;;  %v5512_v16 = vld [vmem:[%s7983_s4 + $0xb0] sm:$0xff] }
 0x416   :  { %1118 = vmatprep.subr.mxu0 %v5494_v17  ;;  %1189 = vmatprep.subr.mxu1 %v5500_v18  ;;  %9003 = vst [vmem:[#allocation132_spill] sm:$0xff] %v5506_v23  ;;  %9004 = vst [vmem:[#allocation133_spill] sm:$0xff] %v5512_v16  ;;  %v5518_v17 = vld [vmem:[%s7983_s4 + $0x88] sm:$0xff]  ;;  %v5524_v18 = vld [vmem:[%s7983_s4 + $0x98] sm:$0xff] }
 0x417   :  { %1119 = vmatpush1.msra.mxu0 %v5506_v23  ;;  %1190 = vmatpush1.msra.mxu1 %v5512_v16  ;;  %9005 = vst [vmem:[#allocation134_spill] sm:$0xff] %v5518_v17  ;;  %9006 = vst [vmem:[#allocation135_spill] sm:$0xff] %v5524_v18  ;;  %v5530_v23 = vld [vmem:[%s7983_s4 + $0x80] sm:$0xff]  ;;  %v5536_v16 = vld [vmem:[%s7983_s4 + $0x90] sm:$0xff] }
 0x418   :  { %1120 = vmatprep.subr.mxu0 %v5518_v17  ;;  %1191 = vmatprep.subr.mxu1 %v5524_v18  ;;  %9007 = vst [vmem:[#allocation136_spill] sm:$0xff] %v5530_v23  ;;  %9008 = vst [vmem:[#allocation137_spill] sm:$0xff] %v5536_v16  ;;  %v5542_v17 = vld [vmem:[%s7983_s4 + $0x68] sm:$0xff]  ;;  %v5548_v18 = vld [vmem:[%s7983_s4 + $0x78] sm:$0xff] }
 0x419   :  { %1121 = vmatpush1.msra.mxu0 %v5530_v23  ;;  %1192 = vmatpush1.msra.mxu1 %v5536_v16  ;;  %9009 = vst [vmem:[#allocation138_spill] sm:$0xff] %v5542_v17  ;;  %9010 = vst [vmem:[#allocation139_spill] sm:$0xff] %v5548_v18  ;;  %v5554_v23 = vld [vmem:[%s7983_s4 + $0x60] sm:$0xff]  ;;  %v5560_v16 = vld [vmem:[%s7983_s4 + $0x70] sm:$0xff] }
 0x41a   :  { %1122 = vmatprep.subr.mxu0 %v5542_v17  ;;  %1193 = vmatprep.subr.mxu1 %v5548_v18  ;;  %9011 = vst [vmem:[#allocation140_spill] sm:$0xff] %v5554_v23  ;;  %9012 = vst [vmem:[#allocation141_spill] sm:$0xff] %v5560_v16  ;;  %v5566_v17 = vld [vmem:[%s7983_s4 + $0x48] sm:$0xff]  ;;  %v5572_v18 = vld [vmem:[%s7983_s4 + $0x58] sm:$0xff] }
 0x41b   :  { %1123 = vmatpush1.msra.mxu0 %v5554_v23  ;;  %1194 = vmatpush1.msra.mxu1 %v5560_v16  ;;  %9013 = vst [vmem:[#allocation142_spill] sm:$0xff] %v5566_v17  ;;  %9014 = vst [vmem:[#allocation143_spill] sm:$0xff] %v5572_v18  ;;  %v5578_v23 = vld [vmem:[%s7983_s4 + $0x40] sm:$0xff]  ;;  %v5584_v16 = vld [vmem:[%s7983_s4 + $0x50] sm:$0xff] }
 0x41c   :  { %1124 = vmatprep.subr.mxu0 %v5566_v17  ;;  %1195 = vmatprep.subr.mxu1 %v5572_v18  ;;  %9015 = vst [vmem:[#allocation144_spill] sm:$0xff] %v5578_v23  ;;  %9016 = vst [vmem:[#allocation145_spill] sm:$0xff] %v5584_v16  ;;  %v5590_v17 = vld [vmem:[%s7983_s4 + $0x28] sm:$0xff]  ;;  %v5596_v18 = vld [vmem:[%s7983_s4 + $0x38] sm:$0xff] }
 0x41d   :  { %1125 = vmatpush1.msra.mxu0 %v5578_v23  ;;  %1196 = vmatpush1.msra.mxu1 %v5584_v16  ;;  %9017 = vst [vmem:[#allocation146_spill] sm:$0xff] %v5590_v17  ;;  %9018 = vst [vmem:[#allocation147_spill] sm:$0xff] %v5596_v18  ;;  %v5602_v23 = vld [vmem:[%s7983_s4 + $0x20] sm:$0xff]  ;;  %v5608_v16 = vld [vmem:[%s7983_s4 + $0x30] sm:$0xff] }
 0x41e   :  { %1126 = vmatprep.subr.mxu0 %v5590_v17  ;;  %1197 = vmatprep.subr.mxu1 %v5596_v18  ;;  %9019 = vst [vmem:[#allocation148_spill] sm:$0xff] %v5602_v23  ;;  %9020 = vst [vmem:[#allocation149_spill] sm:$0xff] %v5608_v16  ;;  %v5614_v17 = vld [vmem:[%s7983_s4 + $0x8] sm:$0xff]  ;;  %v5620_v18 = vld [vmem:[%s7983_s4 + $0x18] sm:$0xff] }
 0x41f   :  { %1127 = vmatpush1.msra.mxu0 %v5602_v23  ;;  %1198 = vmatpush1.msra.mxu1 %v5608_v16  ;;  %9021 = vst [vmem:[#allocation150_spill] sm:$0xff] %v5614_v17  ;;  %9022 = vst [vmem:[#allocation151_spill] sm:$0xff] %v5620_v18  ;;  %v5626_v23 = vld [vmem:[%s7983_s4] sm:$0xff] }
 0x420   :  { %1128 = vmatprep.subr.mxu0 %v5614_v17  ;;  %1199 = vmatprep.subr.mxu1 %v5620_v18  ;;  %9023 = vst [vmem:[#allocation152_spill] sm:$0xff] %v5626_v23  ;;  %v5633_v17 = vld [vmem:[%s7983_s4 + $0x10] sm:$0xff] }
 0x421   :  { %1129 = vmatpush1.msra.mxu0 %v5626_v23  ;;  %1162 = vmatprep.mubr.f32.mxu0 %v8875_v61  ;;  %9024 = vst [vmem:[#allocation154_spill] sm:$0xff] %v5633_v17 }
 0x422   :  { %1200 = vmatpush1.msra.mxu1 %v5633_v17  ;;  %1233 = vmatprep.mubr.f32.mxu1 %v8875_v61 }
 0x423   :  { %1267 = vmatprep.subr.mxu0 %v4829_v5  ;;  %1338 = vmatprep.subr.mxu1 %v4832_v1 }
 0x4c2   :  { %v999_v18 = vpop.f32.mrf.mxu0  ;;  %v1070_v21 = vpop.f32.mrf.mxu1 }
 0x4c3   :  { %v1000_v16 = vadd.f32 %v999_v18, %v8877_v3  ;;  %v1071_v22 = vadd.f32 %v1070_v21, %v4592_v55  ;;  %v9066_v21 = vld [vmem:[#allocation50_spill] sm:$0xff] }
 0x4c4   :  { %v1001_v15 = vpop.f32.mrf.mxu0  ;;  %v1072_v17 = vpop.f32.mrf.mxu1 }
 0x4c5   :  { %v1075_v23 = vmul.f32 0.5, %v1000_v16  ;;  %v1002_v19 = vadd.f32 %v1001_v15, %v4589_v57  ;;  %v1073_v61 = vadd.f32 %v1072_v17, %v4596_v63  ;;  %v9067_v17 = vld [vmem:[#allocation47_spill] sm:$0xff] }
 0x4c7   :  { %3046 = vtanh.f32 %v1075_v23  ;;  %v1079_v28 = vmul.f32 0.5, %v1002_v19  ;;  %v1084_v5 = vmul.f32 0.5, %v1073_v61 }
 0x4c9   :  { %3048 = vtanh.f32 %v1079_v28 }
 0x4ca   :  { %3050 = vtanh.f32 %v1071_v22 }
 0x4cb   :  { %3052 = vtanh.f32 %v1084_v5  ;;  %v9068_v5 = vld [vmem:[#allocation52_spill] sm:$0xff] }
 0x4d4   :  { %v3047_v29 = vpop.eup %3046 }
 0x4d5   :  { %v1077_v1 = vadd.f32 1.0, %v3047_v29 }
 0x4d6   :  { %v3049_v27 = vpop.eup %3048 }
 0x4d7   :  { %v1078_v26 = vmul.f32 0.5, %v1077_v1  ;;  %v1081_v18 = vadd.f32 1.0, %v3049_v27  ;;  %v3051_v3 = vpop.eup %3050  ;;  %v9069_v1 = vld [vmem:[#allocation49_spill] sm:$0xff] }
 0x4d8   :  { %v3053_v61 = vpop.eup %3052 }
 0x4d9   :  { %v1082_v16 = vmul.f32 0.5, %v1081_v18  ;;  %v1089_v23 = vmul.f32 %v3051_v3, %v1078_v26  ;;  %v1086_v29 = vadd.f32 1.0, %v3053_v61  ;;  %v9025_v3 = vld [vmem:[#allocation7_spill] sm:$0xff]  ;;  %v9065_v26 = vld [vmem:[#allocation45_spill] sm:$0xff]  ;;  %v9070_v18 = vld [vmem:[#allocation54_spill] sm:$0xff] }
 0x4da   :  { %v9074_v61 = vld [vmem:[#allocation58_spill] sm:$0xff] }
 0x4db   :  { %v1088_v15 = vmul.f32 %v1082_v16, %v4840_v24  ;;  %v1087_v22 = vmul.f32 0.5, %v1086_v29  ;;  %v9026_v24 = vld [vmem:[#allocation10_spill] sm:$0xff]  ;;  %v9071_v16 = vld [vmem:[#allocation51_spill] sm:$0xff] }
 0x4dc   :  { %v9075_v29 = vld [vmem:[#allocation55_spill] sm:$0xff] }
 0x4dd   :  { %v5644_v19 = vadd.f32 %v1089_v23, %v1088_v15  ;;  %v9072_v15 = vld [vmem:[#allocation56_spill] sm:$0xff]  ;;  %v9073_v23 = vld [vmem:[#allocation53_spill] sm:$0xff] }
 0x4df   :  { %3054 = vtanh.f32 %v5644_v19  ;;  %2961 = vst [vmem:[%s7985_s6 + $0x58] sm:$0xff] %v5644_v19 }
 0x4ec   :  { %v3055_v28 = vpop.eup %3054 }
 0x4ed   :  { %v1092_v27 = vmul.f32 %v3055_v28, %v1087_v22  ;;  %v9076_v22 = vld [vmem:[#allocation60_spill] sm:$0xff]  ;;  %v9077_v28 = vld [vmem:[#allocation57_spill] sm:$0xff] }
 0x4ef   :  { %2959 = vst [vmem:[%s7985_s6 + $0x48] sm:$0xff] %v1092_v27  ;;  %1163 = vmatmul.mubr.f32.vlgmr.msra.gmra.mxu0 %v1092_v27  ;;  %1234 = vmatmul.mubr.f32.vlgmr.msra.gmra.mxu1 %v1092_v27 }
 0x4f0   :  { %1331 = vmatprep.mubr.f32.mxu0 %v1092_v27  ;;  %1402 = vmatprep.mubr.f32.mxu1 %v1092_v27  ;;  %v9078_v27 = vld [vmem:[#allocation62_spill] sm:$0xff] }
 0x4f1   :  { %1268 = vmatpush1.msra.mxu0 %v4850_v51  ;;  %1339 = vmatpush1.msra.mxu1 %v4853_v30  ;;  %v9027_v51 = vld [vmem:[#allocation8_spill] sm:$0xff] }
 0x4f2   :  { %1269 = vmatprep.subr.mxu0 %v4856_v31  ;;  %1340 = vmatprep.subr.mxu1 %v4859_v32  ;;  %v9028_v30 = vld [vmem:[#allocation12_spill] sm:$0xff]  ;;  %v9029_v31 = vld [vmem:[#allocation9_spill] sm:$0xff]  ;;  %v9030_v32 = vld [vmem:[#allocation14_spill] sm:$0xff] }
 0x4f3   :  { %1270 = vmatpush1.msra.mxu0 %v4862_v33  ;;  %1341 = vmatpush1.msra.mxu1 %v4865_v34  ;;  %v9031_v33 = vld [vmem:[#allocation11_spill] sm:$0xff]  ;;  %v9032_v34 = vld [vmem:[#allocation16_spill] sm:$0xff] }
 0x4f4   :  { %1271 = vmatprep.subr.mxu0 %v4868_v35  ;;  %1342 = vmatprep.subr.mxu1 %v4871_v36  ;;  %v9033_v35 = vld [vmem:[#allocation13_spill] sm:$0xff]  ;;  %v9034_v36 = vld [vmem:[#allocation18_spill] sm:$0xff] }
 0x4f5   :  { %1272 = vmatpush1.msra.mxu0 %v4874_v37  ;;  %1343 = vmatpush1.msra.mxu1 %v4877_v38  ;;  %v9035_v37 = vld [vmem:[#allocation15_spill] sm:$0xff]  ;;  %v9036_v38 = vld [vmem:[#allocation20_spill] sm:$0xff] }
 0x4f6   :  { %1273 = vmatprep.subr.mxu0 %v4880_v39  ;;  %1344 = vmatprep.subr.mxu1 %v4883_v40  ;;  %v9037_v39 = vld [vmem:[#allocation17_spill] sm:$0xff]  ;;  %v9038_v40 = vld [vmem:[#allocation22_spill] sm:$0xff] }
 0x4f7   :  { %1274 = vmatpush1.msra.mxu0 %v4886_v41  ;;  %1345 = vmatpush1.msra.mxu1 %v4889_v42  ;;  %v9039_v41 = vld [vmem:[#allocation19_spill] sm:$0xff]  ;;  %v9040_v42 = vld [vmem:[#allocation24_spill] sm:$0xff] }
 0x4f8   :  { %1275 = vmatprep.subr.mxu0 %v4892_v43  ;;  %1346 = vmatprep.subr.mxu1 %v4895_v44  ;;  %v9041_v43 = vld [vmem:[#allocation21_spill] sm:$0xff]  ;;  %v9042_v44 = vld [vmem:[#allocation26_spill] sm:$0xff] }
 0x4f9   :  { %1276 = vmatpush1.msra.mxu0 %v4898_v45  ;;  %1347 = vmatpush1.msra.mxu1 %v4901_v47  ;;  %v9043_v45 = vld [vmem:[#allocation23_spill] sm:$0xff]  ;;  %v9044_v47 = vld [vmem:[#allocation28_spill] sm:$0xff] }
 0x4fa   :  { %1277 = vmatprep.subr.mxu0 %v4904_v58  ;;  %1348 = vmatprep.subr.mxu1 %v4907_v54  ;;  %v9045_v58 = vld [vmem:[#allocation25_spill] sm:$0xff]  ;;  %v9046_v54 = vld [vmem:[#allocation30_spill] sm:$0xff] }
 0x4fb   :  { %1278 = vmatpush1.msra.mxu0 %v4910_v60  ;;  %1349 = vmatpush1.msra.mxu1 %v4913_v59  ;;  %v9047_v60 = vld [vmem:[#allocation27_spill] sm:$0xff]  ;;  %v9048_v59 = vld [vmem:[#allocation32_spill] sm:$0xff] }
 0x4fc   :  { %1279 = vmatprep.subr.mxu0 %v4916_v0  ;;  %1350 = vmatprep.subr.mxu1 %v4919_v50  ;;  %v9049_v0 = vld [vmem:[#allocation29_spill] sm:$0xff]  ;;  %v9050_v50 = vld [vmem:[#allocation34_spill] sm:$0xff] }
 0x4fd   :  { %1280 = vmatpush1.msra.mxu0 %v4922_v56  ;;  %1351 = vmatpush1.msra.mxu1 %v4925_v53  ;;  %v9051_v56 = vld [vmem:[#allocation31_spill] sm:$0xff]  ;;  %v9052_v53 = vld [vmem:[#allocation36_spill] sm:$0xff] }
 0x4fe   :  { %1281 = vmatprep.subr.mxu0 %v4928_v48  ;;  %1352 = vmatprep.subr.mxu1 %v4931_v46  ;;  %v9053_v48 = vld [vmem:[#allocation33_spill] sm:$0xff]  ;;  %v9054_v46 = vld [vmem:[#allocation38_spill] sm:$0xff] }
 0x4ff   :  { %1282 = vmatpush1.msra.mxu0 %v4934_v49  ;;  %1353 = vmatpush1.msra.mxu1 %v4937_v62  ;;  %v9055_v49 = vld [vmem:[#allocation35_spill] sm:$0xff]  ;;  %v9056_v62 = vld [vmem:[#allocation40_spill] sm:$0xff] }
 0x500   :  { %1283 = vmatprep.subr.mxu0 %v4940_v2  ;;  %1354 = vmatprep.subr.mxu1 %v4943_v4  ;;  %v9057_v2 = vld [vmem:[#allocation37_spill] sm:$0xff]  ;;  %v9058_v4 = vld [vmem:[#allocation42_spill] sm:$0xff] }
 0x501   :  { %1284 = vmatpush1.msra.mxu0 %v4946_v6  ;;  %1355 = vmatpush1.msra.mxu1 %v4949_v7  ;;  %v9059_v6 = vld [vmem:[#allocation39_spill] sm:$0xff]  ;;  %v9060_v7 = vld [vmem:[#allocation44_spill] sm:$0xff] }
 0x502   :  { %1285 = vmatprep.subr.mxu0 %v4952_v8  ;;  %1356 = vmatprep.subr.mxu1 %v4955_v9  ;;  %v9061_v8 = vld [vmem:[#allocation41_spill] sm:$0xff]  ;;  %v9062_v9 = vld [vmem:[#allocation46_spill] sm:$0xff] }
 0x503   :  { %1286 = vmatpush1.msra.mxu0 %v4958_v10  ;;  %1357 = vmatpush1.msra.mxu1 %v4961_v11  ;;  %v9063_v10 = vld [vmem:[#allocation43_spill] sm:$0xff]  ;;  %v9064_v11 = vld [vmem:[#allocation48_spill] sm:$0xff] }
 0x504   :  { %1287 = vmatprep.subr.mxu0 %v9025_v3  ;;  %1358 = vmatprep.subr.mxu1 %v9026_v24  ;;  %v9079_v3 = vld [vmem:[#allocation59_spill] sm:$0xff]  ;;  %v9080_v24 = vld [vmem:[#allocation64_spill] sm:$0xff] }
 0x505   :  { %1288 = vmatpush1.msra.mxu0 %v9027_v51  ;;  %1359 = vmatpush1.msra.mxu1 %v9028_v30  ;;  %v9081_v51 = vld [vmem:[#allocation61_spill] sm:$0xff]  ;;  %v9082_v30 = vld [vmem:[#allocation66_spill] sm:$0xff] }
 0x506   :  { %1289 = vmatprep.subr.mxu0 %v9029_v31  ;;  %1360 = vmatprep.subr.mxu1 %v9030_v32  ;;  %v9083_v31 = vld [vmem:[#allocation63_spill] sm:$0xff]  ;;  %v9084_v32 = vld [vmem:[#allocation68_spill] sm:$0xff] }
 0x507   :  { %1290 = vmatpush1.msra.mxu0 %v9031_v33  ;;  %1361 = vmatpush1.msra.mxu1 %v9032_v34  ;;  %v9085_v33 = vld [vmem:[#allocation65_spill] sm:$0xff]  ;;  %v9086_v34 = vld [vmem:[#allocation70_spill] sm:$0xff] }
 0x508   :  { %1291 = vmatprep.subr.mxu0 %v9033_v35  ;;  %1362 = vmatprep.subr.mxu1 %v9034_v36  ;;  %v9087_v35 = vld [vmem:[#allocation67_spill] sm:$0xff]  ;;  %v9088_v36 = vld [vmem:[#allocation72_spill] sm:$0xff] }
 0x509   :  { %1292 = vmatpush1.msra.mxu0 %v9035_v37  ;;  %1363 = vmatpush1.msra.mxu1 %v9036_v38  ;;  %v9089_v37 = vld [vmem:[#allocation69_spill] sm:$0xff]  ;;  %v9090_v38 = vld [vmem:[#allocation74_spill] sm:$0xff] }
 0x50a   :  { %1293 = vmatprep.subr.mxu0 %v9037_v39  ;;  %1364 = vmatprep.subr.mxu1 %v9038_v40  ;;  %v9091_v39 = vld [vmem:[#allocation71_spill] sm:$0xff]  ;;  %v9092_v40 = vld [vmem:[#allocation76_spill] sm:$0xff] }
 0x50b   :  { %1294 = vmatpush1.msra.mxu0 %v9039_v41  ;;  %1365 = vmatpush1.msra.mxu1 %v9040_v42  ;;  %v9093_v41 = vld [vmem:[#allocation73_spill] sm:$0xff]  ;;  %v9094_v42 = vld [vmem:[#allocation79_spill] sm:$0xff] }
 0x50c   :  { %1295 = vmatprep.subr.mxu0 %v9041_v43  ;;  %1366 = vmatprep.subr.mxu1 %v9042_v44  ;;  %v9095_v43 = vld [vmem:[#allocation75_spill] sm:$0xff]  ;;  %v9096_v44 = vld [vmem:[#allocation81_spill] sm:$0xff] }
 0x50d   :  { %1296 = vmatpush1.msra.mxu0 %v9043_v45  ;;  %1367 = vmatpush1.msra.mxu1 %v9044_v47  ;;  %v9097_v45 = vld [vmem:[#allocation77_spill] sm:$0xff]  ;;  %v9098_v47 = vld [vmem:[#allocation83_spill] sm:$0xff] }
 0x50e   :  { %1297 = vmatprep.subr.mxu0 %v9045_v58  ;;  %1368 = vmatprep.subr.mxu1 %v9046_v54  ;;  %v9099_v58 = vld [vmem:[#allocation78_spill] sm:$0xff]  ;;  %v9100_v54 = vld [vmem:[#allocation85_spill] sm:$0xff] }
 0x50f   :  { %1298 = vmatpush1.msra.mxu0 %v9047_v60  ;;  %1369 = vmatpush1.msra.mxu1 %v9048_v59  ;;  %v9101_v60 = vld [vmem:[#allocation80_spill] sm:$0xff]  ;;  %v9102_v59 = vld [vmem:[#allocation86_spill] sm:$0xff] }
 0x510   :  { %1299 = vmatprep.subr.mxu0 %v9049_v0  ;;  %1370 = vmatprep.subr.mxu1 %v9050_v50  ;;  %v9103_v0 = vld [vmem:[#allocation82_spill] sm:$0xff]  ;;  %v9104_v50 = vld [vmem:[#allocation87_spill] sm:$0xff] }
 0x511   :  { %1300 = vmatpush2.msra.mxu0 %v9051_v56  ;;  %1371 = vmatpush2.msra.mxu1 %v9052_v53  ;;  %v9105_v56 = vld [vmem:[#allocation84_spill] sm:$0xff] }
 0x512   :  { %1301 = vmatprep.subr.mxu0 %v9053_v48  ;;  %1372 = vmatprep.subr.mxu1 %v9054_v46  ;;  %v9106_v53 = vld [vmem:[#allocation88_spill] sm:$0xff]  ;;  %v9107_v48 = vld [vmem:[#allocation89_spill] sm:$0xff]  ;;  %v9108_v46 = vld [vmem:[#allocation90_spill] sm:$0xff] }
 0x513   :  { %1302 = vmatpush2.msra.mxu0 %v9055_v49  ;;  %1373 = vmatpush2.msra.mxu1 %v9056_v62  ;;  %v9109_v49 = vld [vmem:[#allocation91_spill] sm:$0xff]  ;;  %v9110_v62 = vld [vmem:[#allocation92_spill] sm:$0xff] }
 0x514   :  { %1303 = vmatprep.subr.mxu0 %v9057_v2  ;;  %1374 = vmatprep.subr.mxu1 %v9058_v4  ;;  %v9111_v2 = vld [vmem:[#allocation93_spill] sm:$0xff]  ;;  %v9112_v4 = vld [vmem:[#allocation94_spill] sm:$0xff] }
 0x515   :  { %1304 = vmatpush2.msra.mxu0 %v9059_v6  ;;  %1375 = vmatpush2.msra.mxu1 %v9060_v7  ;;  %v9113_v6 = vld [vmem:[#allocation95_spill] sm:$0xff]  ;;  %v9114_v7 = vld [vmem:[#allocation96_spill] sm:$0xff] }
 0x516   :  { %1305 = vmatprep.subr.mxu0 %v9061_v8  ;;  %1376 = vmatprep.subr.mxu1 %v9062_v9  ;;  %v2954_v8 = vld [vmem:[%s7979_s0 + $0x40] sm:$0xff] }
 0x517   :  { %1306 = vmatpush2.msra.mxu0 %v9063_v10  ;;  %1377 = vmatpush2.msra.mxu1 %v9064_v11  ;;  %v2955_v10 = vld [vmem:[%s7979_s0 + $0x48] sm:$0xff] }
 0x518   :  { %1307 = vmatprep.subr.mxu0 %v9065_v26  ;;  %1378 = vmatprep.subr.mxu1 %v9066_v21 }
 0x519   :  { %1308 = vmatpush2.msra.mxu0 %v9067_v17  ;;  %1379 = vmatpush2.msra.mxu1 %v9068_v5  ;;  %v2956_v5 = vld [vmem:[%s7979_s0 + $0x50] sm:$0xff] }
 0x51a   :  { %1309 = vmatprep.subr.mxu0 %v9069_v1  ;;  %1380 = vmatprep.subr.mxu1 %v9070_v18 }
 0x51b   :  { %1310 = vmatpush2.msra.mxu0 %v9071_v16  ;;  %1381 = vmatpush2.msra.mxu1 %v9072_v15  ;;  %v2957_v15 = vld [vmem:[%s7979_s0 + $0x58] sm:$0xff] }
 0x51c   :  { %1311 = vmatprep.subr.mxu0 %v9073_v23  ;;  %1382 = vmatprep.subr.mxu1 %v9074_v61 }
 0x51d   :  { %1312 = vmatpush2.msra.mxu0 %v9075_v29  ;;  %1383 = vmatpush2.msra.mxu1 %v9076_v22 }
 0x51e   :  { %1313 = vmatprep.subr.mxu0 %v9077_v28  ;;  %1384 = vmatprep.subr.mxu1 %v9078_v27 }
 0x51f   :  { %1314 = vmatpush2.msra.mxu0 %v9079_v3  ;;  %1385 = vmatpush2.msra.mxu1 %v9080_v24 }
 0x520   :  { %1315 = vmatprep.subr.mxu0 %v9081_v51  ;;  %1386 = vmatprep.subr.mxu1 %v9082_v30 }
 0x521   :  { %1316 = vmatpush2.msra.mxu0 %v9083_v31  ;;  %1387 = vmatpush2.msra.mxu1 %v9084_v32 }
 0x522   :  { %1317 = vmatprep.subr.mxu0 %v9085_v33  ;;  %1388 = vmatprep.subr.mxu1 %v9086_v34 }
 0x523   :  { %1318 = vmatpush2.msra.mxu0 %v9087_v35  ;;  %1389 = vmatpush2.msra.mxu1 %v9088_v36 }
 0x524   :  { %1319 = vmatprep.subr.mxu0 %v9089_v37  ;;  %1390 = vmatprep.subr.mxu1 %v9090_v38 }
 0x525   :  { %1320 = vmatpush2.msra.mxu0 %v9091_v39  ;;  %1391 = vmatpush2.msra.mxu1 %v9092_v40  ;;  %v9116_v39 = vld [vmem:[#allocation98_spill] sm:$0xff]  ;;  %v9117_v40 = vld [vmem:[#allocation99_spill] sm:$0xff] }
 0x526   :  { %1321 = vmatprep.subr.mxu0 %v9093_v41  ;;  %1392 = vmatprep.subr.mxu1 %v9094_v42  ;;  %v9118_v41 = vld [vmem:[#allocation100_spill] sm:$0xff]  ;;  %v9119_v42 = vld [vmem:[#allocation101_spill] sm:$0xff] }
 0x527   :  { %1322 = vmatpush2.msra.mxu0 %v9095_v43  ;;  %1393 = vmatpush2.msra.mxu1 %v9096_v44  ;;  %v9120_v43 = vld [vmem:[#allocation102_spill] sm:$0xff]  ;;  %v9126_v44 = vld [vmem:[#allocation108_spill] sm:$0xff] }
 0x528   :  { %1323 = vmatprep.subr.mxu0 %v9097_v45  ;;  %1394 = vmatprep.subr.mxu1 %v9098_v47  ;;  %v9127_v45 = vld [vmem:[#allocation109_spill] sm:$0xff]  ;;  %v9128_v47 = vld [vmem:[#allocation110_spill] sm:$0xff] }
 0x529   :  { %1324 = vmatpush2.msra.mxu0 %v9099_v58  ;;  %1395 = vmatpush2.msra.mxu1 %v9100_v54  ;;  %v9129_v58 = vld [vmem:[#allocation111_spill] sm:$0xff]  ;;  %v9130_v54 = vld [vmem:[#allocation112_spill] sm:$0xff] }
 0x52a   :  { %1325 = vmatprep.subr.mxu0 %v9101_v60  ;;  %1396 = vmatprep.subr.mxu1 %v9102_v59  ;;  %v9131_v60 = vld [vmem:[#allocation113_spill] sm:$0xff]  ;;  %v9132_v59 = vld [vmem:[#allocation114_spill] sm:$0xff] }
 0x52b   :  { %1326 = vmatpush2.msra.mxu0 %v9103_v0  ;;  %1397 = vmatpush2.msra.mxu1 %v9104_v50  ;;  %v9133_v0 = vld [vmem:[#allocation115_spill] sm:$0xff]  ;;  %v9134_v50 = vld [vmem:[#allocation116_spill] sm:$0xff] }
 0x52c   :  { %1327 = vmatprep.subr.mxu0 %v9105_v56  ;;  %1398 = vmatprep.subr.mxu1 %v9106_v53  ;;  %v9135_v56 = vld [vmem:[#allocation117_spill] sm:$0xff]  ;;  %v9136_v53 = vld [vmem:[#allocation118_spill] sm:$0xff] }
 0x52d   :  { %1328 = vmatpush2.msra.mxu0 %v9107_v48  ;;  %1399 = vmatpush2.msra.mxu1 %v9108_v46  ;;  %v9137_v48 = vld [vmem:[#allocation119_spill] sm:$0xff]  ;;  %v9138_v46 = vld [vmem:[#allocation120_spill] sm:$0xff] }
 0x52e   :  { %1329 = vmatprep.subr.mxu0 %v9109_v49  ;;  %1400 = vmatprep.subr.mxu1 %v9110_v62  ;;  %v9139_v49 = vld [vmem:[#allocation121_spill] sm:$0xff]  ;;  %v9140_v62 = vld [vmem:[#allocation122_spill] sm:$0xff] }
 0x52f   :  { %1330 = vmatpush2.msra.mxu0 %v9111_v2  ;;  %1401 = vmatpush2.msra.mxu1 %v9112_v4  ;;  %v9141_v2 = vld [vmem:[#allocation123_spill] sm:$0xff]  ;;  %v9142_v4 = vld [vmem:[#allocation124_spill] sm:$0xff] }
 0x530   :  { %1432 = vmatprep.subr.mxu0 %v9113_v6  ;;  %1503 = vmatprep.subr.mxu1 %v9114_v7  ;;  %v9143_v6 = vld [vmem:[#allocation125_spill] sm:$0xff]  ;;  %v9144_v7 = vld [vmem:[#allocation126_spill] sm:$0xff] }
 0x5af   :  { %v1164_v9 = vpop.f32.mrf.mxu0  ;;  %v1235_v1 = vpop.f32.mrf.mxu1 }
 0x5b0   :  { %v1240_v11 = vadd.f32 %v2954_v8, %v1164_v9  ;;  %v1242_v16 = vadd.f32 %v2956_v5, %v1235_v1  ;;  %v9145_v8 = vld [vmem:[#allocation127_spill] sm:$0xff]  ;;  %v9146_v9 = vld [vmem:[#allocation128_spill] sm:$0xff]  ;;  %v9152_v5 = vld [vmem:[#allocation134_spill] sm:$0xff] }
 0x5b1   :  { %v1166_v26 = vpop.f32.mrf.mxu0  ;;  %v1237_v23 = vpop.f32.mrf.mxu1  ;;  %v9153_v1 = vld [vmem:[#allocation135_spill] sm:$0xff] }
 0x5b2   :  { %v1244_v21 = vmul.f32 0.5, %v1240_v11  ;;  %v1241_v17 = vadd.f32 %v2955_v10, %v1166_v26  ;;  %v1243_v61 = vadd.f32 %v2957_v15, %v1237_v23  ;;  %v9147_v10 = vld [vmem:[#allocation129_spill] sm:$0xff]  ;;  %v9148_v11 = vld [vmem:[#allocation130_spill] sm:$0xff]  ;;  %v9149_v26 = vld [vmem:[#allocation131_spill] sm:$0xff] }
 0x5b3   :  { %v9156_v15 = vld [vmem:[#allocation138_spill] sm:$0xff]  ;;  %v9157_v23 = vld [vmem:[#allocation139_spill] sm:$0xff] }
 0x5b4   :  { %3056 = vtanh.f32 %v1244_v21  ;;  %v1248_v18 = vmul.f32 0.5, %v1241_v17  ;;  %v1253_v29 = vmul.f32 0.5, %v1243_v61  ;;  %v9150_v21 = vld [vmem:[#allocation132_spill] sm:$0xff]  ;;  %v9151_v17 = vld [vmem:[#allocation133_spill] sm:$0xff] }
 0x5b5   :  { %v9158_v61 = vld [vmem:[#allocation140_spill] sm:$0xff] }
 0x5b6   :  { %3058 = vtanh.f32 %v1248_v18  ;;  %v9154_v18 = vld [vmem:[#allocation136_spill] sm:$0xff] }
 0x5b7   :  { %3060 = vtanh.f32 %v1242_v16  ;;  %v9155_v16 = vld [vmem:[#allocation137_spill] sm:$0xff] }
 0x5b8   :  { %3062 = vtanh.f32 %v1253_v29  ;;  %v9159_v29 = vld [vmem:[#allocation141_spill] sm:$0xff] }
 0x5c1   :  { %v3057_v22 = vpop.eup %3056 }
 0x5c2   :  { %v1246_v28 = vadd.f32 1.0, %v3057_v22  ;;  %v9160_v22 = vld [vmem:[#allocation142_spill] sm:$0xff] }
 0x5c3   :  { %v3059_v27 = vpop.eup %3058 }
 0x5c4   :  { %v1247_v3 = vmul.f32 0.5, %v1246_v28  ;;  %v1250_v24 = vadd.f32 1.0, %v3059_v27  ;;  %v3061_v30 = vpop.eup %3060  ;;  %v9161_v28 = vld [vmem:[#allocation143_spill] sm:$0xff]  ;;  %v9162_v27 = vld [vmem:[#allocation144_spill] sm:$0xff] }
 0x5c5   :  { %v3063_v34 = vpop.eup %3062 }
 0x5c6   :  { %v1251_v51 = vmul.f32 0.5, %v1250_v24  ;;  %v1258_v32 = vmul.f32 %v3061_v30, %v1247_v3  ;;  %v1255_v35 = vadd.f32 1.0, %v3063_v34  ;;  %v9163_v3 = vld [vmem:[#allocation145_spill] sm:$0xff]  ;;  %v9164_v24 = vld [vmem:[#allocation146_spill] sm:$0xff]  ;;  %v9166_v30 = vld [vmem:[#allocation148_spill] sm:$0xff] }
 0x5c7   :  { %v9169_v34 = vld [vmem:[#allocation151_spill] sm:$0xff] }
 0x5c8   :  { %v1257_v31 = vmul.f32 %v1251_v51, %v5253_v20  ;;  %v1256_v36 = vmul.f32 0.5, %v1255_v35  ;;  %v9115_v20 = vld [vmem:[#allocation97_spill] sm:$0xff]  ;;  %v9165_v51 = vld [vmem:[#allocation147_spill] sm:$0xff]  ;;  %v9170_v35 = vld [vmem:[#allocation152_spill] sm:$0xff] }
 0x5ca   :  { %v5795_v33 = vadd.f32 %v1258_v32, %v1257_v31  ;;  %v9167_v31 = vld [vmem:[#allocation149_spill] sm:$0xff]  ;;  %v9168_v32 = vld [vmem:[#allocation150_spill] sm:$0xff] }
 0x5cc   :  { %3064 = vtanh.f32 %v5795_v33  ;;  %2960 = vst [vmem:[%s7985_s6 + $0x50] sm:$0xff] %v5795_v33 }
 0x5d9   :  { %v3065_v37 = vpop.eup %3064 }
 0x5da   :  { %v1261_v38 = vmul.f32 %v3065_v37, %v1256_v36  ;;  %v9171_v36 = vmov 0.0   ;;  %v9172_v37 = vld [vmem:[#allocation154_spill] sm:$0xff] }
 0x5dc   :  { %2958 = vst [vmem:[%s7985_s6 + $0x40] sm:$0xff] %v1261_v38  ;;  %1332 = vmatmul.mubr.f32.vlgmr.msra.gmra.mxu0 %v1261_v38  ;;  %1403 = vmatmul.mubr.f32.vlgmr.msra.gmra.mxu1 %v1261_v38  ;;  %v5869_v38 = vld [vmem:[#allocation4 + $0x1e8] sm:$0xff] }
 0x5dd   :  { %1433 = vmatpush1.msra.mxu0 %v5266_v52  ;;  %1504 = vmatpush1.msra.mxu1 %v5272_v12  ;;  %v9121_v52 = vld [vmem:[#allocation103_spill] sm:$0xff]  ;;  %v9122_v12 = vld [vmem:[#allocation104_spill] sm:$0xff] }
 0x5de   :  { %1434 = vmatprep.subr.mxu0 %v5278_v13  ;;  %1505 = vmatprep.subr.mxu1 %v5284_v14  ;;  %v9123_v13 = vld [vmem:[#allocation105_spill] sm:$0xff]  ;;  %v9124_v14 = vld [vmem:[#allocation106_spill] sm:$0xff] }
 0x5df   :  { %1435 = vmatpush1.msra.mxu0 %v5290_v25  ;;  %1506 = vmatpush1.msra.mxu1 %v9115_v20  ;;  %v9125_v25 = vld [vmem:[#allocation107_spill] sm:$0xff]  ;;  %v5872_v20 = vld [vmem:[#allocation4 + $0x1f8] sm:$0xff] }
 0x5e0   :  { %1436 = vmatprep.subr.mxu0 %v9116_v39  ;;  %1507 = vmatprep.subr.mxu1 %v9117_v40  ;;  %v9173_v40 = vld [vmem:[#allocation153_spill] sm:$0xff] }
 0x5e1   :  { %1437 = vmatpush1.msra.mxu0 %v9118_v41  ;;  %1508 = vmatpush1.msra.mxu1 %v9119_v42 }
 0x5e2   :  { %1438 = vmatprep.subr.mxu0 %v9120_v43  ;;  %1509 = vmatprep.subr.mxu1 %v9121_v52 }
 0x5e3   :  { %1439 = vmatpush1.msra.mxu0 %v9122_v12  ;;  %1510 = vmatpush1.msra.mxu1 %v9123_v13 }
 0x5e4   :  { %1440 = vmatprep.subr.mxu0 %v9124_v14  ;;  %1511 = vmatprep.subr.mxu1 %v9125_v25 }
 0x5e5   :  { %1441 = vmatpush1.msra.mxu0 %v9126_v44  ;;  %1512 = vmatpush1.msra.mxu1 %v9127_v45 }
 0x5e6   :  { %1442 = vmatprep.subr.mxu0 %v9128_v47  ;;  %1513 = vmatprep.subr.mxu1 %v9129_v58 }
 0x5e7   :  { %1443 = vmatpush1.msra.mxu0 %v9130_v54  ;;  %1514 = vmatpush1.msra.mxu1 %v9131_v60 }
 0x5e8   :  { %1444 = vmatprep.subr.mxu0 %v9132_v59  ;;  %1515 = vmatprep.subr.mxu1 %v9133_v0 }
 0x5e9   :  { %1445 = vmatpush1.msra.mxu0 %v9134_v50  ;;  %1516 = vmatpush1.msra.mxu1 %v9135_v56 }
 0x5ea   :  { %1446 = vmatprep.subr.mxu0 %v9136_v53  ;;  %1517 = vmatprep.subr.mxu1 %v9137_v48 }
 0x5eb   :  { %1447 = vmatpush1.msra.mxu0 %v9138_v46  ;;  %1518 = vmatpush1.msra.mxu1 %v9139_v49 }
 0x5ec   :  { %1448 = vmatprep.subr.mxu0 %v9140_v62  ;;  %1519 = vmatprep.subr.mxu1 %v9141_v2 }
 0x5ed   :  { %1449 = vmatpush1.msra.mxu0 %v9142_v4  ;;  %1520 = vmatpush1.msra.mxu1 %v9143_v6  ;;  %v5893_v6 = vld [vmem:[#allocation4 + $0x1f0] sm:$0xff] }
 0x5ee   :  { %1450 = vmatprep.subr.mxu0 %v9144_v7  ;;  %1521 = vmatprep.subr.mxu1 %v9145_v8  ;;  %v5896_v7 = vld [vmem:[#allocation4 + $0x1c8] sm:$0xff]  ;;  %v5899_v8 = vld [vmem:[#allocation4 + $0x1d8] sm:$0xff] }
 0x5ef   :  { %1451 = vmatpush1.msra.mxu0 %v9146_v9  ;;  %1522 = vmatpush1.msra.mxu1 %v9147_v10  ;;  %v5902_v9 = vld [vmem:[#allocation4 + $0x1c0] sm:$0xff]  ;;  %v5905_v10 = vld [vmem:[#allocation4 + $0x1d0] sm:$0xff] }
 0x5f0   :  { %1452 = vmatprep.subr.mxu0 %v9148_v11  ;;  %1523 = vmatprep.subr.mxu1 %v9149_v26  ;;  %v5908_v11 = vld [vmem:[#allocation4 + $0x1a8] sm:$0xff]  ;;  %v5911_v26 = vld [vmem:[#allocation4 + $0x1b8] sm:$0xff] }
 0x5f1   :  { %1453 = vmatpush1.msra.mxu0 %v9150_v21  ;;  %1524 = vmatpush1.msra.mxu1 %v9151_v17  ;;  %v5914_v21 = vld [vmem:[#allocation4 + $0x1a0] sm:$0xff]  ;;  %v5917_v17 = vld [vmem:[#allocation4 + $0x1b0] sm:$0xff] }
 0x5f2   :  { %1454 = vmatprep.subr.mxu0 %v9152_v5  ;;  %1525 = vmatprep.subr.mxu1 %v9153_v1  ;;  %v5920_v5 = vld [vmem:[#allocation4 + $0x188] sm:$0xff]  ;;  %v5923_v1 = vld [vmem:[#allocation4 + $0x198] sm:$0xff] }
 0x5f3   :  { %1455 = vmatpush1.msra.mxu0 %v9154_v18  ;;  %1526 = vmatpush1.msra.mxu1 %v9155_v16  ;;  %v5926_v18 = vld [vmem:[#allocation4 + $0x180] sm:$0xff]  ;;  %v5929_v16 = vld [vmem:[#allocation4 + $0x190] sm:$0xff] }
 0x5f4   :  { %1456 = vmatprep.subr.mxu0 %v9156_v15  ;;  %1527 = vmatprep.subr.mxu1 %v9157_v23  ;;  %v5932_v15 = vld [vmem:[#allocation4 + $0x168] sm:$0xff]  ;;  %v5935_v23 = vld [vmem:[#allocation4 + $0x178] sm:$0xff] }
 0x5f5   :  { %1457 = vmatpush1.msra.mxu0 %v9158_v61  ;;  %1528 = vmatpush1.msra.mxu1 %v9159_v29  ;;  %v5938_v61 = vld [vmem:[#allocation4 + $0x160] sm:$0xff]  ;;  %v5941_v29 = vld [vmem:[#allocation4 + $0x170] sm:$0xff] }
 0x5f6   :  { %1458 = vmatprep.subr.mxu0 %v9160_v22  ;;  %1529 = vmatprep.subr.mxu1 %v9161_v28  ;;  %v5944_v22 = vld [vmem:[#allocation4 + $0x148] sm:$0xff]  ;;  %v5947_v28 = vld [vmem:[#allocation4 + $0x158] sm:$0xff] }
 0x5f7   :  { %1459 = vmatpush1.msra.mxu0 %v9162_v27  ;;  %1530 = vmatpush1.msra.mxu1 %v9163_v3  ;;  %v5950_v27 = vld [vmem:[#allocation4 + $0x140] sm:$0xff]  ;;  %v5953_v3 = vld [vmem:[#allocation4 + $0x150] sm:$0xff] }
 0x5f8   :  { %1460 = vmatprep.subr.mxu0 %v9164_v24  ;;  %1531 = vmatprep.subr.mxu1 %v9165_v51  ;;  %v5956_v24 = vld [vmem:[#allocation4 + $0x128] sm:$0xff]  ;;  %v5959_v51 = vld [vmem:[#allocation4 + $0x138] sm:$0xff] }
 0x5f9   :  { %1461 = vmatpush1.msra.mxu0 %v9166_v30  ;;  %1532 = vmatpush1.msra.mxu1 %v9167_v31  ;;  %v5962_v30 = vld [vmem:[#allocation4 + $0x120] sm:$0xff]  ;;  %v5965_v31 = vld [vmem:[#allocation4 + $0x130] sm:$0xff] }
 0x5fa   :  { %1462 = vmatprep.subr.mxu0 %v9168_v32  ;;  %1533 = vmatprep.subr.mxu1 %v9169_v34  ;;  %v5968_v32 = vld [vmem:[#allocation4 + $0x108] sm:$0xff]  ;;  %v5971_v34 = vld [vmem:[#allocation4 + $0x118] sm:$0xff] }
 0x5fb   :  { %1463 = vmatpush1.msra.mxu0 %v9170_v35  ;;  %1496 = vmatprep.mubr.f32.mxu0 %v9171_v36  ;;  %v5974_v35 = vld [vmem:[#allocation4 + $0x100] sm:$0xff] }
 0x5fc   :  { %1534 = vmatpush1.msra.mxu1 %v9172_v37  ;;  %1567 = vmatprep.mubr.f32.mxu1 %v9171_v36  ;;  %v5977_v37 = vld [vmem:[#allocation4 + $0x110] sm:$0xff] }
 0x5fd   :  { %1601 = vmatprep.subr.mxu0 %v5869_v38  ;;  %1672 = vmatprep.subr.mxu1 %v5872_v20 }
 0x69c   :  { %v1333_v39 = vpop.f32.mrf.mxu0  ;;  %v1404_v12 = vpop.f32.mrf.mxu1 }
 0x69d   :  { %v1334_v41 = vadd.f32 %v1333_v39, %v9173_v40  ;;  %v1405_v14 = vadd.f32 %v1404_v12, %v4592_v55  ;;  %v5980_v39 = vld [vmem:[#allocation4 + $0xe8] sm:$0xff]  ;;  %v5995_v12 = vld [vmem:[#allocation4 + $0xd8] sm:$0xff] }
 0x69e   :  { %v1335_v42 = vpop.f32.mrf.mxu0  ;;  %v1406_v25 = vpop.f32.mrf.mxu1 }
 0x69f   :  { %v1409_v43 = vmul.f32 0.5, %v1334_v41  ;;  %v1336_v52 = vadd.f32 %v1335_v42, %v4589_v57  ;;  %v1407_v44 = vadd.f32 %v1406_v25, %v4596_v63  ;;  %v5983_v41 = vld [vmem:[#allocation4 + $0xf8] sm:$0xff]  ;;  %v5986_v42 = vld [vmem:[#allocation4 + $0xe0] sm:$0xff]  ;;  %v6004_v25 = vld [vmem:[#allocation4 + $0xa8] sm:$0xff] }
 0x6a0   :  { %9174 = vst [vmem:[#allocation7_spill] sm:$0xff] %v6004_v25 }
 0x6a1   :  { %3066 = vtanh.f32 %v1409_v43  ;;  %v1413_v13 = vmul.f32 0.5, %v1336_v52  ;;  %v1418_v45 = vmul.f32 0.5, %v1407_v44  ;;  %v5989_v43 = vld [vmem:[#allocation4 + $0xf0] sm:$0xff]  ;;  %v5992_v52 = vld [vmem:[#allocation4 + $0xc8] sm:$0xff]  ;;  %v6007_v44 = vld [vmem:[#allocation4 + $0xb8] sm:$0xff] }
 0x6a2   :  { %9175 = vst [vmem:[#allocation10_spill] sm:$0xff] %v6007_v44 }
 0x6a3   :  { %3068 = vtanh.f32 %v1413_v13  ;;  %v5998_v13 = vld [vmem:[#allocation4 + $0xc0] sm:$0xff] }
 0x6a4   :  { %3070 = vtanh.f32 %v1405_v14  ;;  %v6001_v14 = vld [vmem:[#allocation4 + $0xd0] sm:$0xff] }
 0x6a5   :  { %3072 = vtanh.f32 %v1418_v45  ;;  %v6010_v45 = vld [vmem:[#allocation4 + $0xa0] sm:$0xff] }
 0x6a6   :  { %9176 = vst [vmem:[#allocation8_spill] sm:$0xff] %v6010_v45 }
 0x6ae   :  { %v3067_v47 = vpop.eup %3066 }
 0x6af   :  { %v1411_v58 = vadd.f32 1.0, %v3067_v47  ;;  %v6013_v47 = vld [vmem:[#allocation4 + $0xb0] sm:$0xff] }
 0x6b0   :  { %v3069_v54 = vpop.eup %3068  ;;  %9177 = vst [vmem:[#allocation12_spill] sm:$0xff] %v6013_v47 }
 0x6b1   :  { %v1412_v60 = vmul.f32 0.5, %v1411_v58  ;;  %v1415_v59 = vadd.f32 1.0, %v3069_v54  ;;  %v3071_v50 = vpop.eup %3070  ;;  %v6016_v58 = vld [vmem:[#allocation4 + $0x88] sm:$0xff]  ;;  %v6019_v54 = vld [vmem:[#allocation4 + $0x98] sm:$0xff] }
 0x6b2   :  { %v3073_v46 = vpop.eup %3072  ;;  %9178 = vst [vmem:[#allocation9_spill] sm:$0xff] %v6016_v58  ;;  %9179 = vst [vmem:[#allocation14_spill] sm:$0xff] %v6019_v54 }
 0x6b3   :  { %v1416_v0 = vmul.f32 0.5, %v1415_v59  ;;  %v1423_v53 = vmul.f32 %v3071_v50, %v1412_v60  ;;  %v1420_v49 = vadd.f32 1.0, %v3073_v46  ;;  %v6022_v60 = vld [vmem:[#allocation4 + $0x80] sm:$0xff]  ;;  %v6025_v59 = vld [vmem:[#allocation4 + $0x90] sm:$0xff]  ;;  %v6031_v50 = vld [vmem:[#allocation4 + $0x78] sm:$0xff] }
 0x6b4   :  { %9180 = vst [vmem:[#allocation11_spill] sm:$0xff] %v6022_v60  ;;  %9181 = vst [vmem:[#allocation16_spill] sm:$0xff] %v6025_v59  ;;  %v6040_v46 = vld [vmem:[#allocation4 + $0x48] sm:$0xff] }
 0x6b5   :  { %v1422_v56 = vmul.f32 %v1416_v0, %v5644_v19  ;;  %v1421_v62 = vmul.f32 0.5, %v1420_v49  ;;  %v5890_v19 = vld [vmem:[#allocation4 + $0x1e0] sm:$0xff]  ;;  %v6028_v0 = vld [vmem:[#allocation4 + $0x68] sm:$0xff]  ;;  %9183 = vst [vmem:[#allocation18_spill] sm:$0xff] %v6031_v50  ;;  %9186 = vst [vmem:[#allocation17_spill] sm:$0xff] %v6040_v46 }
 0x6b6   :  { %9182 = vst [vmem:[#allocation13_spill] sm:$0xff] %v6028_v0  ;;  %v6043_v49 = vld [vmem:[#allocation4 + $0x58] sm:$0xff] }
 0x6b7   :  { %v5880_v48 = vadd.f32 %v1423_v53, %v1422_v56  ;;  %v6034_v56 = vld [vmem:[#allocation4 + $0x60] sm:$0xff]  ;;  %v6037_v53 = vld [vmem:[#allocation4 + $0x70] sm:$0xff]  ;;  %9187 = vst [vmem:[#allocation22_spill] sm:$0xff] %v6043_v49 }
 0x6b8   :  { %9184 = vst [vmem:[#allocation15_spill] sm:$0xff] %v6034_v56  ;;  %9185 = vst [vmem:[#allocation20_spill] sm:$0xff] %v6037_v53 }
 0x6b9   :  { %3074 = vtanh.f32 %v5880_v48  ;;  %2969 = vst [vmem:[%s7985_s6 + $0x78] sm:$0xff] %v5880_v48 }
 0x6c6   :  { %v3075_v2 = vpop.eup %3074 }
 0x6c7   :  { %v1426_v4 = vmul.f32 %v3075_v2, %v1421_v62  ;;  %v6046_v62 = vld [vmem:[#allocation4 + $0x40] sm:$0xff]  ;;  %v6049_v2 = vld [vmem:[#allocation4 + $0x50] sm:$0xff] }
 0x6c8   :  { %9188 = vst [vmem:[#allocation19_spill] sm:$0xff] %v6046_v62  ;;  %9189 = vst [vmem:[#allocation24_spill] sm:$0xff] %v6049_v2 }
 0x6c9   :  { %2967 = vst [vmem:[%s7985_s6 + $0x68] sm:$0xff] %v1426_v4  ;;  %1497 = vmatmul.mubr.f32.vlgmr.msra.gmra.mxu0 %v1426_v4  ;;  %1568 = vmatmul.mubr.f32.vlgmr.msra.gmra.mxu1 %v1426_v4 }
 0x6ca   :  { %1665 = vmatprep.mubr.f32.mxu0 %v1426_v4  ;;  %1736 = vmatprep.mubr.f32.mxu1 %v1426_v4  ;;  %v6052_v4 = vld [vmem:[#allocation4 + $0x28] sm:$0xff] }
 0x6cb   :  { %1602 = vmatpush1.msra.mxu0 %v5890_v19  ;;  %1673 = vmatpush1.msra.mxu1 %v5893_v6  ;;  %9190 = vst [vmem:[#allocation21_spill] sm:$0xff] %v6052_v4 }
 0x6cc   :  { %1603 = vmatprep.subr.mxu0 %v5896_v7  ;;  %1674 = vmatprep.subr.mxu1 %v5899_v8 }
 0x6cd   :  { %1604 = vmatpush1.msra.mxu0 %v5902_v9  ;;  %1675 = vmatpush1.msra.mxu1 %v5905_v10 }
 0x6ce   :  { %1605 = vmatprep.subr.mxu0 %v5908_v11  ;;  %1676 = vmatprep.subr.mxu1 %v5911_v26 }
 0x6cf   :  { %1606 = vmatpush1.msra.mxu0 %v5914_v21  ;;  %1677 = vmatpush1.msra.mxu1 %v5917_v17 }
 0x6d0   :  { %1607 = vmatprep.subr.mxu0 %v5920_v5  ;;  %1678 = vmatprep.subr.mxu1 %v5923_v1 }
 0x6d1   :  { %1608 = vmatpush1.msra.mxu0 %v5926_v18  ;;  %1679 = vmatpush1.msra.mxu1 %v5929_v16 }
 0x6d2   :  { %1609 = vmatprep.subr.mxu0 %v5932_v15  ;;  %1680 = vmatprep.subr.mxu1 %v5935_v23 }
 0x6d3   :  { %1610 = vmatpush1.msra.mxu0 %v5938_v61  ;;  %1681 = vmatpush1.msra.mxu1 %v5941_v29 }
 0x6d4   :  { %1611 = vmatprep.subr.mxu0 %v5944_v22  ;;  %1682 = vmatprep.subr.mxu1 %v5947_v28 }
 0x6d5   :  { %1612 = vmatpush1.msra.mxu0 %v5950_v27  ;;  %1683 = vmatpush1.msra.mxu1 %v5953_v3 }
 0x6d6   :  { %1613 = vmatprep.subr.mxu0 %v5956_v24  ;;  %1684 = vmatprep.subr.mxu1 %v5959_v51 }
 0x6d7   :  { %1614 = vmatpush1.msra.mxu0 %v5962_v30  ;;  %1685 = vmatpush1.msra.mxu1 %v5965_v31 }
 0x6d8   :  { %1615 = vmatprep.subr.mxu0 %v5968_v32  ;;  %1686 = vmatprep.subr.mxu1 %v5971_v34 }
 0x6d9   :  { %1616 = vmatpush1.msra.mxu0 %v5974_v35  ;;  %1687 = vmatpush1.msra.mxu1 %v5977_v37 }
 0x6da   :  { %1617 = vmatprep.subr.mxu0 %v5980_v39  ;;  %1688 = vmatprep.subr.mxu1 %v5983_v41 }
 0x6db   :  { %1618 = vmatpush1.msra.mxu0 %v5986_v42  ;;  %1689 = vmatpush1.msra.mxu1 %v5989_v43 }
 0x6dc   :  { %1619 = vmatprep.subr.mxu0 %v5992_v52  ;;  %1690 = vmatprep.subr.mxu1 %v5995_v12 }
 0x6dd   :  { %1620 = vmatpush1.msra.mxu0 %v5998_v13  ;;  %1691 = vmatpush1.msra.mxu1 %v6001_v14 }
 0x6de   :  { %1621 = vmatprep.subr.mxu0 %v6004_v25  ;;  %1692 = vmatprep.subr.mxu1 %v6007_v44 }
 0x6df   :  { %1622 = vmatpush1.msra.mxu0 %v6010_v45  ;;  %1693 = vmatpush1.msra.mxu1 %v6013_v47 }
 0x6e0   :  { %1623 = vmatprep.subr.mxu0 %v6016_v58  ;;  %1694 = vmatprep.subr.mxu1 %v6019_v54  ;;  %v2965_v54 = vld [vmem:[%s7979_s0 + $0x78] sm:$0xff] }
 0x6e1   :  { %1624 = vmatpush1.msra.mxu0 %v6022_v60  ;;  %1695 = vmatpush1.msra.mxu1 %v6025_v59 }
 0x6e2   :  { %1625 = vmatprep.subr.mxu0 %v6028_v0  ;;  %1696 = vmatprep.subr.mxu1 %v6031_v50  ;;  %v2964_v0 = vld [vmem:[%s7979_s0 + $0x70] sm:$0xff] }
 0x6e3   :  { %1626 = vmatpush1.msra.mxu0 %v6034_v56  ;;  %1697 = vmatpush1.msra.mxu1 %v6037_v53  ;;  %v6055_v53 = vld [vmem:[#allocation4 + $0x38] sm:$0xff] }
 0x6e4   :  { %1627 = vmatprep.subr.mxu0 %v6040_v46  ;;  %1698 = vmatprep.subr.mxu1 %v6043_v49  ;;  %9191 = vst [vmem:[#allocation26_spill] sm:$0xff] %v6055_v53  ;;  %v6058_v46 = vld [vmem:[#allocation4 + $0x20] sm:$0xff]  ;;  %v6061_v49 = vld [vmem:[#allocation4 + $0x30] sm:$0xff] }
 0x6e5   :  { %1628 = vmatpush1.msra.mxu0 %v6046_v62  ;;  %1699 = vmatpush1.msra.mxu1 %v6049_v2  ;;  %9192 = vst [vmem:[#allocation23_spill] sm:$0xff] %v6058_v46  ;;  %9193 = vst [vmem:[#allocation28_spill] sm:$0xff] %v6061_v49  ;;  %v6064_v62 = vld [vmem:[#allocation4 + $0x8] sm:$0xff]  ;;  %v6067_v2 = vld [vmem:[#allocation4 + $0x18] sm:$0xff] }
 0x6e6   :  { %1629 = vmatprep.subr.mxu0 %v6052_v4  ;;  %1700 = vmatprep.subr.mxu1 %v6055_v53  ;;  %9194 = vst [vmem:[#allocation25_spill] sm:$0xff] %v6064_v62  ;;  %9195 = vst [vmem:[#allocation30_spill] sm:$0xff] %v6067_v2  ;;  %v6070_v4 = vld [vmem:[#allocation4] sm:$0xff]  ;;  %v6073_v53 = vld [vmem:[#allocation4 + $0x10] sm:$0xff] }
 0x6e7   :  { %1630 = vmatpush1.msra.mxu0 %v6058_v46  ;;  %1701 = vmatpush1.msra.mxu1 %v6061_v49  ;;  %9196 = vst [vmem:[#allocation27_spill] sm:$0xff] %v6070_v4  ;;  %9197 = vst [vmem:[#allocation32_spill] sm:$0xff] %v6073_v53  ;;  %v6076_v46 = vld [vmem:[#allocation4 + $0x3e8] sm:$0xff]  ;;  %v6079_v49 = vld [vmem:[#allocation4 + $0x3f8] sm:$0xff] }
 0x6e8   :  { %1631 = vmatprep.subr.mxu0 %v6064_v62  ;;  %1702 = vmatprep.subr.mxu1 %v6067_v2  ;;  %9198 = vst [vmem:[#allocation29_spill] sm:$0xff] %v6076_v46  ;;  %9199 = vst [vmem:[#allocation34_spill] sm:$0xff] %v6079_v49  ;;  %v6082_v62 = vld [vmem:[#allocation4 + $0x3e0] sm:$0xff]  ;;  %v6085_v2 = vld [vmem:[#allocation4 + $0x3f0] sm:$0xff] }
 0x6e9   :  { %1632 = vmatpush1.msra.mxu0 %v6070_v4  ;;  %1703 = vmatpush1.msra.mxu1 %v6073_v53  ;;  %9200 = vst [vmem:[#allocation31_spill] sm:$0xff] %v6082_v62  ;;  %9201 = vst [vmem:[#allocation36_spill] sm:$0xff] %v6085_v2  ;;  %v6088_v4 = vld [vmem:[#allocation4 + $0x3c8] sm:$0xff]  ;;  %v6091_v53 = vld [vmem:[#allocation4 + $0x3d8] sm:$0xff] }
 0x6ea   :  { %1633 = vmatprep.subr.mxu0 %v6076_v46  ;;  %1704 = vmatprep.subr.mxu1 %v6079_v49  ;;  %9202 = vst [vmem:[#allocation33_spill] sm:$0xff] %v6088_v4  ;;  %9203 = vst [vmem:[#allocation38_spill] sm:$0xff] %v6091_v53  ;;  %v6094_v46 = vld [vmem:[#allocation4 + $0x3c0] sm:$0xff]  ;;  %v6097_v49 = vld [vmem:[#allocation4 + $0x3d0] sm:$0xff] }
 0x6eb   :  { %1634 = vmatpush2.msra.mxu0 %v6082_v62  ;;  %1705 = vmatpush2.msra.mxu1 %v6085_v2  ;;  %9204 = vst [vmem:[#allocation35_spill] sm:$0xff] %v6094_v46  ;;  %9205 = vst [vmem:[#allocation40_spill] sm:$0xff] %v6097_v49  ;;  %v6100_v62 = vld [vmem:[#allocation4 + $0x3a8] sm:$0xff]  ;;  %v6103_v2 = vld [vmem:[#allocation4 + $0x3b8] sm:$0xff] }
 0x6ec   :  { %1635 = vmatprep.subr.mxu0 %v6088_v4  ;;  %1706 = vmatprep.subr.mxu1 %v6091_v53  ;;  %9206 = vst [vmem:[#allocation37_spill] sm:$0xff] %v6100_v62  ;;  %9207 = vst [vmem:[#allocation42_spill] sm:$0xff] %v6103_v2  ;;  %v6106_v4 = vld [vmem:[#allocation4 + $0x3a0] sm:$0xff]  ;;  %v6109_v53 = vld [vmem:[#allocation4 + $0x3b0] sm:$0xff] }
 0x6ed   :  { %1636 = vmatpush2.msra.mxu0 %v6094_v46  ;;  %1707 = vmatpush2.msra.mxu1 %v6097_v49  ;;  %9208 = vst [vmem:[#allocation39_spill] sm:$0xff] %v6106_v4  ;;  %9209 = vst [vmem:[#allocation44_spill] sm:$0xff] %v6109_v53  ;;  %v6112_v46 = vld [vmem:[#allocation4 + $0x388] sm:$0xff]  ;;  %v6115_v49 = vld [vmem:[#allocation4 + $0x398] sm:$0xff] }
 0x6ee   :  { %1637 = vmatprep.subr.mxu0 %v6100_v62  ;;  %1708 = vmatprep.subr.mxu1 %v6103_v2  ;;  %9210 = vst [vmem:[#allocation41_spill] sm:$0xff] %v6112_v46  ;;  %9211 = vst [vmem:[#allocation46_spill] sm:$0xff] %v6115_v49  ;;  %v6118_v62 = vld [vmem:[#allocation4 + $0x380] sm:$0xff]  ;;  %v6121_v2 = vld [vmem:[#allocation4 + $0x390] sm:$0xff] }
 0x6ef   :  { %1638 = vmatpush2.msra.mxu0 %v6106_v4  ;;  %1709 = vmatpush2.msra.mxu1 %v6109_v53  ;;  %9212 = vst [vmem:[#allocation43_spill] sm:$0xff] %v6118_v62  ;;  %9213 = vst [vmem:[#allocation48_spill] sm:$0xff] %v6121_v2  ;;  %v6124_v4 = vld [vmem:[#allocation4 + $0x368] sm:$0xff]  ;;  %v6127_v53 = vld [vmem:[#allocation4 + $0x378] sm:$0xff] }
 0x6f0   :  { %1639 = vmatprep.subr.mxu0 %v6112_v46  ;;  %1710 = vmatprep.subr.mxu1 %v6115_v49  ;;  %9214 = vst [vmem:[#allocation45_spill] sm:$0xff] %v6124_v4  ;;  %9215 = vst [vmem:[#allocation50_spill] sm:$0xff] %v6127_v53  ;;  %v6130_v46 = vld [vmem:[#allocation4 + $0x360] sm:$0xff]  ;;  %v6133_v49 = vld [vmem:[#allocation4 + $0x370] sm:$0xff] }
 0x6f1   :  { %1640 = vmatpush2.msra.mxu0 %v6118_v62  ;;  %1711 = vmatpush2.msra.mxu1 %v6121_v2  ;;  %9216 = vst [vmem:[#allocation47_spill] sm:$0xff] %v6130_v46  ;;  %9217 = vst [vmem:[#allocation52_spill] sm:$0xff] %v6133_v49  ;;  %v6136_v62 = vld [vmem:[#allocation4 + $0x348] sm:$0xff]  ;;  %v6139_v2 = vld [vmem:[#allocation4 + $0x358] sm:$0xff] }
 0x6f2   :  { %1641 = vmatprep.subr.mxu0 %v6124_v4  ;;  %1712 = vmatprep.subr.mxu1 %v6127_v53  ;;  %9218 = vst [vmem:[#allocation49_spill] sm:$0xff] %v6136_v62  ;;  %9219 = vst [vmem:[#allocation54_spill] sm:$0xff] %v6139_v2  ;;  %v6142_v4 = vld [vmem:[#allocation4 + $0x340] sm:$0xff]  ;;  %v6145_v53 = vld [vmem:[#allocation4 + $0x350] sm:$0xff] }
 0x6f3   :  { %1642 = vmatpush2.msra.mxu0 %v6130_v46  ;;  %1713 = vmatpush2.msra.mxu1 %v6133_v49  ;;  %9220 = vst [vmem:[#allocation51_spill] sm:$0xff] %v6142_v4  ;;  %9221 = vst [vmem:[#allocation56_spill] sm:$0xff] %v6145_v53  ;;  %v6148_v46 = vld [vmem:[#allocation4 + $0x328] sm:$0xff]  ;;  %v6151_v49 = vld [vmem:[#allocation4 + $0x338] sm:$0xff] }
 0x6f4   :  { %1643 = vmatprep.subr.mxu0 %v6136_v62  ;;  %1714 = vmatprep.subr.mxu1 %v6139_v2  ;;  %9222 = vst [vmem:[#allocation53_spill] sm:$0xff] %v6148_v46  ;;  %9223 = vst [vmem:[#allocation58_spill] sm:$0xff] %v6151_v49  ;;  %v6154_v62 = vld [vmem:[#allocation4 + $0x320] sm:$0xff]  ;;  %v6157_v2 = vld [vmem:[#allocation4 + $0x330] sm:$0xff] }
 0x6f5   :  { %1644 = vmatpush2.msra.mxu0 %v6142_v4  ;;  %1715 = vmatpush2.msra.mxu1 %v6145_v53  ;;  %9224 = vst [vmem:[#allocation55_spill] sm:$0xff] %v6154_v62  ;;  %9225 = vst [vmem:[#allocation60_spill] sm:$0xff] %v6157_v2  ;;  %v6160_v4 = vld [vmem:[#allocation4 + $0x308] sm:$0xff]  ;;  %v6163_v53 = vld [vmem:[#allocation4 + $0x318] sm:$0xff] }
 0x6f6   :  { %1645 = vmatprep.subr.mxu0 %v6148_v46  ;;  %1716 = vmatprep.subr.mxu1 %v6151_v49  ;;  %9226 = vst [vmem:[#allocation57_spill] sm:$0xff] %v6160_v4  ;;  %9227 = vst [vmem:[#allocation62_spill] sm:$0xff] %v6163_v53  ;;  %v6166_v46 = vld [vmem:[#allocation4 + $0x300] sm:$0xff]  ;;  %v6169_v49 = vld [vmem:[#allocation4 + $0x310] sm:$0xff] }
 0x6f7   :  { %1646 = vmatpush2.msra.mxu0 %v6154_v62  ;;  %1717 = vmatpush2.msra.mxu1 %v6157_v2  ;;  %9228 = vst [vmem:[#allocation59_spill] sm:$0xff] %v6166_v46  ;;  %9229 = vst [vmem:[#allocation64_spill] sm:$0xff] %v6169_v49  ;;  %v6172_v62 = vld [vmem:[#allocation4 + $0x2e8] sm:$0xff]  ;;  %v6175_v2 = vld [vmem:[#allocation4 + $0x2f8] sm:$0xff] }
 0x6f8   :  { %1647 = vmatprep.subr.mxu0 %v6160_v4  ;;  %1718 = vmatprep.subr.mxu1 %v6163_v53  ;;  %9230 = vst [vmem:[#allocation61_spill] sm:$0xff] %v6172_v62  ;;  %9231 = vst [vmem:[#allocation66_spill] sm:$0xff] %v6175_v2  ;;  %v6178_v4 = vld [vmem:[#allocation4 + $0x2e0] sm:$0xff]  ;;  %v6181_v53 = vld [vmem:[#allocation4 + $0x2f0] sm:$0xff] }
 0x6f9   :  { %1648 = vmatpush2.msra.mxu0 %v6166_v46  ;;  %1719 = vmatpush2.msra.mxu1 %v6169_v49  ;;  %9232 = vst [vmem:[#allocation63_spill] sm:$0xff] %v6178_v4  ;;  %9233 = vst [vmem:[#allocation68_spill] sm:$0xff] %v6181_v53  ;;  %v6184_v46 = vld [vmem:[#allocation4 + $0x2c8] sm:$0xff]  ;;  %v6187_v49 = vld [vmem:[#allocation4 + $0x2d8] sm:$0xff] }
 0x6fa   :  { %1649 = vmatprep.subr.mxu0 %v6172_v62  ;;  %1720 = vmatprep.subr.mxu1 %v6175_v2  ;;  %9234 = vst [vmem:[#allocation65_spill] sm:$0xff] %v6184_v46  ;;  %9235 = vst [vmem:[#allocation70_spill] sm:$0xff] %v6187_v49  ;;  %v6190_v62 = vld [vmem:[#allocation4 + $0x2c0] sm:$0xff]  ;;  %v6193_v2 = vld [vmem:[#allocation4 + $0x2d0] sm:$0xff] }
 0x6fb   :  { %1650 = vmatpush2.msra.mxu0 %v6178_v4  ;;  %1721 = vmatpush2.msra.mxu1 %v6181_v53  ;;  %9236 = vst [vmem:[#allocation67_spill] sm:$0xff] %v6190_v62  ;;  %9237 = vst [vmem:[#allocation72_spill] sm:$0xff] %v6193_v2  ;;  %v6196_v4 = vld [vmem:[#allocation4 + $0x2a8] sm:$0xff]  ;;  %v6199_v53 = vld [vmem:[#allocation4 + $0x2b8] sm:$0xff] }
 0x6fc   :  { %1651 = vmatprep.subr.mxu0 %v6184_v46  ;;  %1722 = vmatprep.subr.mxu1 %v6187_v49  ;;  %9238 = vst [vmem:[#allocation69_spill] sm:$0xff] %v6196_v4  ;;  %9239 = vst [vmem:[#allocation74_spill] sm:$0xff] %v6199_v53  ;;  %v6202_v46 = vld [vmem:[#allocation4 + $0x2a0] sm:$0xff]  ;;  %v6205_v49 = vld [vmem:[#allocation4 + $0x2b0] sm:$0xff] }
 0x6fd   :  { %1652 = vmatpush2.msra.mxu0 %v6190_v62  ;;  %1723 = vmatpush2.msra.mxu1 %v6193_v2  ;;  %9240 = vst [vmem:[#allocation71_spill] sm:$0xff] %v6202_v46  ;;  %9241 = vst [vmem:[#allocation76_spill] sm:$0xff] %v6205_v49  ;;  %v6208_v62 = vld [vmem:[#allocation4 + $0x288] sm:$0xff]  ;;  %v6211_v2 = vld [vmem:[#allocation4 + $0x298] sm:$0xff] }
 0x6fe   :  { %1653 = vmatprep.subr.mxu0 %v6196_v4  ;;  %1724 = vmatprep.subr.mxu1 %v6199_v53  ;;  %9242 = vst [vmem:[#allocation73_spill] sm:$0xff] %v6208_v62  ;;  %9243 = vst [vmem:[#allocation79_spill] sm:$0xff] %v6211_v2  ;;  %v6214_v4 = vld [vmem:[#allocation4 + $0x280] sm:$0xff]  ;;  %v6217_v53 = vld [vmem:[#allocation4 + $0x290] sm:$0xff] }
 0x6ff   :  { %1654 = vmatpush2.msra.mxu0 %v6202_v46  ;;  %1725 = vmatpush2.msra.mxu1 %v6205_v49  ;;  %9244 = vst [vmem:[#allocation75_spill] sm:$0xff] %v6214_v4  ;;  %9245 = vst [vmem:[#allocation81_spill] sm:$0xff] %v6217_v53  ;;  %v6220_v46 = vld [vmem:[#allocation4 + $0x268] sm:$0xff]  ;;  %v6223_v49 = vld [vmem:[#allocation4 + $0x278] sm:$0xff] }
 0x700   :  { %1655 = vmatprep.subr.mxu0 %v6208_v62  ;;  %1726 = vmatprep.subr.mxu1 %v6211_v2  ;;  %9246 = vst [vmem:[#allocation77_spill] sm:$0xff] %v6220_v46  ;;  %9247 = vst [vmem:[#allocation83_spill] sm:$0xff] %v6223_v49  ;;  %v6226_v62 = vld [vmem:[#allocation4 + $0x260] sm:$0xff]  ;;  %v6229_v2 = vld [vmem:[#allocation4 + $0x270] sm:$0xff] }
 0x701   :  { %1656 = vmatpush2.msra.mxu0 %v6214_v4  ;;  %1727 = vmatpush2.msra.mxu1 %v6217_v53  ;;  %9248 = vst [vmem:[#allocation78_spill] sm:$0xff] %v6226_v62  ;;  %9249 = vst [vmem:[#allocation85_spill] sm:$0xff] %v6229_v2  ;;  %v6232_v4 = vld [vmem:[#allocation4 + $0x248] sm:$0xff]  ;;  %v6235_v53 = vld [vmem:[#allocation4 + $0x258] sm:$0xff] }
 0x702   :  { %1657 = vmatprep.subr.mxu0 %v6220_v46  ;;  %1728 = vmatprep.subr.mxu1 %v6223_v49  ;;  %9250 = vst [vmem:[#allocation80_spill] sm:$0xff] %v6232_v4  ;;  %9251 = vst [vmem:[#allocation86_spill] sm:$0xff] %v6235_v53  ;;  %v6238_v46 = vld [vmem:[#allocation4 + $0x240] sm:$0xff]  ;;  %v6241_v49 = vld [vmem:[#allocation4 + $0x250] sm:$0xff] }
 0x703   :  { %1658 = vmatpush2.msra.mxu0 %v6226_v62  ;;  %1729 = vmatpush2.msra.mxu1 %v6229_v2  ;;  %9252 = vst [vmem:[#allocation82_spill] sm:$0xff] %v6238_v46  ;;  %9253 = vst [vmem:[#allocation87_spill] sm:$0xff] %v6241_v49  ;;  %v6244_v62 = vld [vmem:[#allocation4 + $0x228] sm:$0xff]  ;;  %v6247_v2 = vld [vmem:[#allocation4 + $0x238] sm:$0xff] }
 0x704   :  { %1659 = vmatprep.subr.mxu0 %v6232_v4  ;;  %1730 = vmatprep.subr.mxu1 %v6235_v53  ;;  %9254 = vst [vmem:[#allocation84_spill] sm:$0xff] %v6244_v62  ;;  %9255 = vst [vmem:[#allocation88_spill] sm:$0xff] %v6247_v2  ;;  %v6250_v4 = vld [vmem:[#allocation4 + $0x220] sm:$0xff]  ;;  %v6253_v53 = vld [vmem:[#allocation4 + $0x230] sm:$0xff] }
 0x705   :  { %1660 = vmatpush2.msra.mxu0 %v6238_v46  ;;  %1731 = vmatpush2.msra.mxu1 %v6241_v49  ;;  %9256 = vst [vmem:[#allocation89_spill] sm:$0xff] %v6250_v4  ;;  %9257 = vst [vmem:[#allocation90_spill] sm:$0xff] %v6253_v53  ;;  %v6256_v46 = vld [vmem:[#allocation4 + $0x208] sm:$0xff]  ;;  %v6259_v49 = vld [vmem:[#allocation4 + $0x218] sm:$0xff] }
 0x706   :  { %1661 = vmatprep.subr.mxu0 %v6244_v62  ;;  %1732 = vmatprep.subr.mxu1 %v6247_v2  ;;  %9258 = vst [vmem:[#allocation91_spill] sm:$0xff] %v6256_v46  ;;  %9259 = vst [vmem:[#allocation92_spill] sm:$0xff] %v6259_v49  ;;  %v6262_v62 = vld [vmem:[#allocation4 + $0x200] sm:$0xff]  ;;  %v6265_v2 = vld [vmem:[#allocation4 + $0x210] sm:$0xff] }
 0x707   :  { %1662 = vmatpush2.msra.mxu0 %v6250_v4  ;;  %1733 = vmatpush2.msra.mxu1 %v6253_v53  ;;  %9260 = vst [vmem:[#allocation93_spill] sm:$0xff] %v6262_v62  ;;  %9261 = vst [vmem:[#allocation94_spill] sm:$0xff] %v6265_v2  ;;  %v6271_v53 = vld [vmem:[%s7983_s4 + $0x1e8] sm:$0xff] }
 0x708   :  { %1663 = vmatprep.subr.mxu0 %v6256_v46  ;;  %1734 = vmatprep.subr.mxu1 %v6259_v49  ;;  %9262 = vst [vmem:[#allocation95_spill] sm:$0xff] %v6271_v53  ;;  %v6277_v46 = vld [vmem:[%s7983_s4 + $0x1f8] sm:$0xff] }
 0x709   :  { %1664 = vmatpush2.msra.mxu0 %v6262_v62  ;;  %1735 = vmatpush2.msra.mxu1 %v6265_v2  ;;  %9263 = vst [vmem:[#allocation96_spill] sm:$0xff] %v6277_v46  ;;  %v2962_v62 = vld [vmem:[%s7979_s0 + $0x60] sm:$0xff]  ;;  %v2963_v2 = vld [vmem:[%s7979_s0 + $0x68] sm:$0xff] }
 0x70a   :  { %1766 = vmatprep.subr.mxu0 %v6271_v53  ;;  %1837 = vmatprep.subr.mxu1 %v6277_v46 }
 0x789   :  { %v1498_v49 = vpop.f32.mrf.mxu0  ;;  %v1569_v59 = vpop.f32.mrf.mxu1 }
 0x78a   :  { %v1574_v4 = vadd.f32 %v2962_v62, %v1498_v49  ;;  %v1576_v60 = vadd.f32 %v2964_v0, %v1569_v59 }
 0x78b   :  { %v1500_v56 = vpop.f32.mrf.mxu0  ;;  %v1571_v58 = vpop.f32.mrf.mxu1 }
 0x78c   :  { %v1578_v50 = vmul.f32 0.5, %v1574_v4  ;;  %v1575_v53 = vadd.f32 %v2963_v2, %v1500_v56  ;;  %v1577_v47 = vadd.f32 %v2965_v54, %v1571_v58 }
 0x78e   :  { %3076 = vtanh.f32 %v1578_v50  ;;  %v1582_v46 = vmul.f32 0.5, %v1575_v53  ;;  %v1587_v49 = vmul.f32 0.5, %v1577_v47 }
 0x790   :  { %3078 = vtanh.f32 %v1582_v46  ;;  %v6330_v46 = vld [vmem:[%s7983_s4 + $0x1c0] sm:$0xff] }
 0x791   :  { %3080 = vtanh.f32 %v1576_v60 }
 0x792   :  { %3082 = vtanh.f32 %v1587_v49  ;;  %v6336_v49 = vld [vmem:[%s7983_s4 + $0x1d0] sm:$0xff] }
 0x793   :  { %9264 = vst [vmem:[#allocation97_spill] sm:$0xff] %v6336_v49 }
 0x79b   :  { %v3077_v62 = vpop.eup %3076 }
 0x79c   :  { %v1580_v4 = vadd.f32 1.0, %v3077_v62  ;;  %v6342_v62 = vld [vmem:[%s7983_s4 + $0x1a8] sm:$0xff] }
 0x79d   :  { %v3079_v56 = vpop.eup %3078  ;;  %9265 = vst [vmem:[#allocation98_spill] sm:$0xff] %v6342_v62 }
 0x79e   :  { %v1581_v2 = vmul.f32 0.5, %v1580_v4  ;;  %v1584_v45 = vadd.f32 1.0, %v3079_v56  ;;  %v3081_v25 = vpop.eup %3080  ;;  %v6348_v4 = vld [vmem:[%s7983_s4 + $0x1b8] sm:$0xff]  ;;  %v6354_v56 = vld [vmem:[%s7983_s4 + $0x1a0] sm:$0xff] }
 0x79f   :  { %v3083_v47 = vpop.eup %3082  ;;  %9266 = vst [vmem:[#allocation99_spill] sm:$0xff] %v6348_v4  ;;  %9267 = vst [vmem:[#allocation100_spill] sm:$0xff] %v6354_v56 }
 0x7a0   :  { %v1585_v44 = vmul.f32 0.5, %v1584_v45  ;;  %v1592_v59 = vmul.f32 %v3081_v25, %v1581_v2  ;;  %v1589_v58 = vadd.f32 1.0, %v3083_v47  ;;  %v6312_v25 = vld [vmem:[%s7983_s4 + $0x1f0] sm:$0xff]  ;;  %v6324_v45 = vld [vmem:[%s7983_s4 + $0x1d8] sm:$0xff]  ;;  %v6378_v47 = vld [vmem:[%s7983_s4 + $0x180] sm:$0xff] }
 0x7a1   :  { %v6360_v2 = vld [vmem:[%s7983_s4 + $0x1b0] sm:$0xff]  ;;  %9271 = vst [vmem:[#allocation104_spill] sm:$0xff] %v6378_v47 }
 0x7a2   :  { %v1591_v50 = vmul.f32 %v1585_v44, %v5795_v33  ;;  %v1590_v54 = vmul.f32 0.5, %v1589_v58  ;;  %v6306_v33 = vld [vmem:[%s7983_s4 + $0x1e0] sm:$0xff]  ;;  %v6318_v44 = vld [vmem:[%s7983_s4 + $0x1c8] sm:$0xff]  ;;  %9268 = vst [vmem:[#allocation101_spill] sm:$0xff] %v6360_v2  ;;  %v6384_v58 = vld [vmem:[%s7983_s4 + $0x190] sm:$0xff] }
 0x7a3   :  { %9272 = vst [vmem:[#allocation105_spill] sm:$0xff] %v6384_v58 }
 0x7a4   :  { %v6293_v0 = vadd.f32 %v1592_v59, %v1591_v50  ;;  %v6366_v50 = vld [vmem:[%s7983_s4 + $0x188] sm:$0xff]  ;;  %v6372_v59 = vld [vmem:[%s7983_s4 + $0x198] sm:$0xff] }
 0x7a5   :  { %9269 = vst [vmem:[#allocation102_spill] sm:$0xff] %v6366_v50  ;;  %9270 = vst [vmem:[#allocation103_spill] sm:$0xff] %v6372_v59 }
 0x7a6   :  { %3084 = vtanh.f32 %v6293_v0  ;;  %2968 = vst [vmem:[%s7985_s6 + $0x70] sm:$0xff] %v6293_v0 }
 0x7b3   :  { %v3085_v60 = vpop.eup %3084 }
 0x7b4   :  { %v1595_v53 = vmul.f32 %v3085_v60, %v1590_v54  ;;  %v6390_v54 = vld [vmem:[%s7983_s4 + $0x168] sm:$0xff]  ;;  %v6396_v60 = vld [vmem:[%s7983_s4 + $0x178] sm:$0xff] }
 0x7b5   :  { %9273 = vst [vmem:[#allocation106_spill] sm:$0xff] %v6390_v54  ;;  %9274 = vst [vmem:[#allocation107_spill] sm:$0xff] %v6396_v60 }
 0x7b6   :  { %2966 = vst [vmem:[%s7985_s6 + $0x60] sm:$0xff] %v1595_v53  ;;  %1666 = vmatmul.mubr.f32.vlgmr.msra.gmra.mxu0 %v1595_v53  ;;  %1737 = vmatmul.mubr.f32.vlgmr.msra.gmra.mxu1 %v1595_v53  ;;  %v6402_v53 = vld [vmem:[%s7983_s4 + $0x160] sm:$0xff] }
 0x7b7   :  { %1767 = vmatpush1.msra.mxu0 %v6306_v33  ;;  %1838 = vmatpush1.msra.mxu1 %v6312_v25  ;;  %9275 = vst [vmem:[#allocation108_spill] sm:$0xff] %v6402_v53 }
 0x7b8   :  { %1768 = vmatprep.subr.mxu0 %v6318_v44  ;;  %1839 = vmatprep.subr.mxu1 %v6324_v45 }
 0x7b9   :  { %1769 = vmatpush1.msra.mxu0 %v6330_v46  ;;  %1840 = vmatpush1.msra.mxu1 %v6336_v49 }
 0x7ba   :  { %1770 = vmatprep.subr.mxu0 %v6342_v62  ;;  %1841 = vmatprep.subr.mxu1 %v6348_v4 }
 0x7bb   :  { %1771 = vmatpush1.msra.mxu0 %v6354_v56  ;;  %1842 = vmatpush1.msra.mxu1 %v6360_v2 }
 0x7bc   :  { %1772 = vmatprep.subr.mxu0 %v6366_v50  ;;  %1843 = vmatprep.subr.mxu1 %v6372_v59 }
 0x7bd   :  { %1773 = vmatpush1.msra.mxu0 %v6378_v47  ;;  %1844 = vmatpush1.msra.mxu1 %v6384_v58  ;;  %v6408_v58 = vld [vmem:[%s7983_s4 + $0x170] sm:$0xff] }
 0x7be   :  { %1774 = vmatprep.subr.mxu0 %v6390_v54  ;;  %1845 = vmatprep.subr.mxu1 %v6396_v60  ;;  %9276 = vst [vmem:[#allocation109_spill] sm:$0xff] %v6408_v58  ;;  %v6414_v54 = vld [vmem:[%s7983_s4 + $0x148] sm:$0xff]  ;;  %v6420_v60 = vld [vmem:[%s7983_s4 + $0x158] sm:$0xff] }
 0x7bf   :  { %1775 = vmatpush1.msra.mxu0 %v6402_v53  ;;  %1846 = vmatpush1.msra.mxu1 %v6408_v58  ;;  %9277 = vst [vmem:[#allocation110_spill] sm:$0xff] %v6414_v54  ;;  %9278 = vst [vmem:[#allocation111_spill] sm:$0xff] %v6420_v60  ;;  %v6426_v53 = vld [vmem:[%s7983_s4 + $0x140] sm:$0xff]  ;;  %v6432_v58 = vld [vmem:[%s7983_s4 + $0x150] sm:$0xff] }
 0x7c0   :  { %1776 = vmatprep.subr.mxu0 %v6414_v54  ;;  %1847 = vmatprep.subr.mxu1 %v6420_v60  ;;  %9279 = vst [vmem:[#allocation112_spill] sm:$0xff] %v6426_v53  ;;  %9280 = vst [vmem:[#allocation113_spill] sm:$0xff] %v6432_v58  ;;  %v6438_v54 = vld [vmem:[%s7983_s4 + $0x128] sm:$0xff]  ;;  %v6444_v60 = vld [vmem:[%s7983_s4 + $0x138] sm:$0xff] }
 0x7c1   :  { %1777 = vmatpush1.msra.mxu0 %v6426_v53  ;;  %1848 = vmatpush1.msra.mxu1 %v6432_v58  ;;  %9281 = vst [vmem:[#allocation114_spill] sm:$0xff] %v6438_v54  ;;  %9282 = vst [vmem:[#allocation115_spill] sm:$0xff] %v6444_v60  ;;  %v6450_v53 = vld [vmem:[%s7983_s4 + $0x120] sm:$0xff]  ;;  %v6456_v58 = vld [vmem:[%s7983_s4 + $0x130] sm:$0xff] }
 0x7c2   :  { %1778 = vmatprep.subr.mxu0 %v6438_v54  ;;  %1849 = vmatprep.subr.mxu1 %v6444_v60  ;;  %9283 = vst [vmem:[#allocation116_spill] sm:$0xff] %v6450_v53  ;;  %9284 = vst [vmem:[#allocation117_spill] sm:$0xff] %v6456_v58  ;;  %v6462_v54 = vld [vmem:[%s7983_s4 + $0x108] sm:$0xff]  ;;  %v6468_v60 = vld [vmem:[%s7983_s4 + $0x118] sm:$0xff] }
 0x7c3   :  { %1779 = vmatpush1.msra.mxu0 %v6450_v53  ;;  %1850 = vmatpush1.msra.mxu1 %v6456_v58  ;;  %9285 = vst [vmem:[#allocation118_spill] sm:$0xff] %v6462_v54  ;;  %9286 = vst [vmem:[#allocation119_spill] sm:$0xff] %v6468_v60  ;;  %v6474_v53 = vld [vmem:[%s7983_s4 + $0x100] sm:$0xff]  ;;  %v6480_v58 = vld [vmem:[%s7983_s4 + $0x110] sm:$0xff] }
 0x7c4   :  { %1780 = vmatprep.subr.mxu0 %v6462_v54  ;;  %1851 = vmatprep.subr.mxu1 %v6468_v60  ;;  %9287 = vst [vmem:[#allocation120_spill] sm:$0xff] %v6474_v53  ;;  %9288 = vst [vmem:[#allocation121_spill] sm:$0xff] %v6480_v58  ;;  %v6486_v54 = vld [vmem:[%s7983_s4 + $0xe8] sm:$0xff]  ;;  %v6492_v60 = vld [vmem:[%s7983_s4 + $0xf8] sm:$0xff] }
 0x7c5   :  { %1781 = vmatpush1.msra.mxu0 %v6474_v53  ;;  %1852 = vmatpush1.msra.mxu1 %v6480_v58  ;;  %9289 = vst [vmem:[#allocation122_spill] sm:$0xff] %v6486_v54  ;;  %9290 = vst [vmem:[#allocation123_spill] sm:$0xff] %v6492_v60  ;;  %v6498_v53 = vld [vmem:[%s7983_s4 + $0xe0] sm:$0xff]  ;;  %v6504_v58 = vld [vmem:[%s7983_s4 + $0xf0] sm:$0xff] }
 0x7c6   :  { %1782 = vmatprep.subr.mxu0 %v6486_v54  ;;  %1853 = vmatprep.subr.mxu1 %v6492_v60  ;;  %9291 = vst [vmem:[#allocation124_spill] sm:$0xff] %v6498_v53  ;;  %9292 = vst [vmem:[#allocation125_spill] sm:$0xff] %v6504_v58  ;;  %v6510_v54 = vld [vmem:[%s7983_s4 + $0xc8] sm:$0xff]  ;;  %v6516_v60 = vld [vmem:[%s7983_s4 + $0xd8] sm:$0xff] }
 0x7c7   :  { %1783 = vmatpush1.msra.mxu0 %v6498_v53  ;;  %1854 = vmatpush1.msra.mxu1 %v6504_v58  ;;  %9293 = vst [vmem:[#allocation126_spill] sm:$0xff] %v6510_v54  ;;  %9294 = vst [vmem:[#allocation127_spill] sm:$0xff] %v6516_v60  ;;  %v6522_v53 = vld [vmem:[%s7983_s4 + $0xc0] sm:$0xff]  ;;  %v6528_v58 = vld [vmem:[%s7983_s4 + $0xd0] sm:$0xff] }
 0x7c8   :  { %1784 = vmatprep.subr.mxu0 %v6510_v54  ;;  %1855 = vmatprep.subr.mxu1 %v6516_v60  ;;  %9295 = vst [vmem:[#allocation128_spill] sm:$0xff] %v6522_v53  ;;  %9296 = vst [vmem:[#allocation129_spill] sm:$0xff] %v6528_v58  ;;  %v6534_v54 = vld [vmem:[%s7983_s4 + $0xa8] sm:$0xff]  ;;  %v6540_v60 = vld [vmem:[%s7983_s4 + $0xb8] sm:$0xff] }
 0x7c9   :  { %1785 = vmatpush1.msra.mxu0 %v6522_v53  ;;  %1856 = vmatpush1.msra.mxu1 %v6528_v58  ;;  %9297 = vst [vmem:[#allocation130_spill] sm:$0xff] %v6534_v54  ;;  %9298 = vst [vmem:[#allocation131_spill] sm:$0xff] %v6540_v60  ;;  %v6546_v53 = vld [vmem:[%s7983_s4 + $0xa0] sm:$0xff]  ;;  %v6552_v58 = vld [vmem:[%s7983_s4 + $0xb0] sm:$0xff] }
 0x7ca   :  { %1786 = vmatprep.subr.mxu0 %v6534_v54  ;;  %1857 = vmatprep.subr.mxu1 %v6540_v60  ;;  %9299 = vst [vmem:[#allocation132_spill] sm:$0xff] %v6546_v53  ;;  %9300 = vst [vmem:[#allocation133_spill] sm:$0xff] %v6552_v58  ;;  %v6558_v54 = vld [vmem:[%s7983_s4 + $0x88] sm:$0xff]  ;;  %v6564_v60 = vld [vmem:[%s7983_s4 + $0x98] sm:$0xff] }
 0x7cb   :  { %1787 = vmatpush1.msra.mxu0 %v6546_v53  ;;  %1858 = vmatpush1.msra.mxu1 %v6552_v58  ;;  %9301 = vst [vmem:[#allocation134_spill] sm:$0xff] %v6558_v54  ;;  %9302 = vst [vmem:[#allocation135_spill] sm:$0xff] %v6564_v60  ;;  %v6570_v53 = vld [vmem:[%s7983_s4 + $0x80] sm:$0xff]  ;;  %v6576_v58 = vld [vmem:[%s7983_s4 + $0x90] sm:$0xff] }
 0x7cc   :  { %1788 = vmatprep.subr.mxu0 %v6558_v54  ;;  %1859 = vmatprep.subr.mxu1 %v6564_v60  ;;  %9303 = vst [vmem:[#allocation136_spill] sm:$0xff] %v6570_v53  ;;  %9304 = vst [vmem:[#allocation137_spill] sm:$0xff] %v6576_v58  ;;  %v6582_v54 = vld [vmem:[%s7983_s4 + $0x68] sm:$0xff]  ;;  %v6588_v60 = vld [vmem:[%s7983_s4 + $0x78] sm:$0xff] }
 0x7cd   :  { %1789 = vmatpush1.msra.mxu0 %v6570_v53  ;;  %1860 = vmatpush1.msra.mxu1 %v6576_v58  ;;  %9305 = vst [vmem:[#allocation138_spill] sm:$0xff] %v6582_v54  ;;  %9306 = vst [vmem:[#allocation139_spill] sm:$0xff] %v6588_v60  ;;  %v6594_v53 = vld [vmem:[%s7983_s4 + $0x60] sm:$0xff]  ;;  %v6600_v58 = vld [vmem:[%s7983_s4 + $0x70] sm:$0xff] }
 0x7ce   :  { %1790 = vmatprep.subr.mxu0 %v6582_v54  ;;  %1861 = vmatprep.subr.mxu1 %v6588_v60  ;;  %9307 = vst [vmem:[#allocation140_spill] sm:$0xff] %v6594_v53  ;;  %9308 = vst [vmem:[#allocation141_spill] sm:$0xff] %v6600_v58  ;;  %v6606_v54 = vld [vmem:[%s7983_s4 + $0x48] sm:$0xff]  ;;  %v6612_v60 = vld [vmem:[%s7983_s4 + $0x58] sm:$0xff] }
 0x7cf   :  { %1791 = vmatpush1.msra.mxu0 %v6594_v53  ;;  %1862 = vmatpush1.msra.mxu1 %v6600_v58  ;;  %9309 = vst [vmem:[#allocation142_spill] sm:$0xff] %v6606_v54  ;;  %9310 = vst [vmem:[#allocation143_spill] sm:$0xff] %v6612_v60  ;;  %v6618_v53 = vld [vmem:[%s7983_s4 + $0x40] sm:$0xff]  ;;  %v6624_v58 = vld [vmem:[%s7983_s4 + $0x50] sm:$0xff] }
 0x7d0   :  { %1792 = vmatprep.subr.mxu0 %v6606_v54  ;;  %1863 = vmatprep.subr.mxu1 %v6612_v60  ;;  %9311 = vst [vmem:[#allocation144_spill] sm:$0xff] %v6618_v53  ;;  %9312 = vst [vmem:[#allocation145_spill] sm:$0xff] %v6624_v58  ;;  %v6630_v54 = vld [vmem:[%s7983_s4 + $0x28] sm:$0xff]  ;;  %v6636_v60 = vld [vmem:[%s7983_s4 + $0x38] sm:$0xff] }
 0x7d1   :  { %1793 = vmatpush1.msra.mxu0 %v6618_v53  ;;  %1864 = vmatpush1.msra.mxu1 %v6624_v58  ;;  %9313 = vst [vmem:[#allocation146_spill] sm:$0xff] %v6630_v54  ;;  %9314 = vst [vmem:[#allocation147_spill] sm:$0xff] %v6636_v60  ;;  %v6642_v53 = vld [vmem:[%s7983_s4 + $0x20] sm:$0xff]  ;;  %v6648_v58 = vld [vmem:[%s7983_s4 + $0x30] sm:$0xff] }
 0x7d2   :  { %1794 = vmatprep.subr.mxu0 %v6630_v54  ;;  %1865 = vmatprep.subr.mxu1 %v6636_v60  ;;  %9315 = vst [vmem:[#allocation148_spill] sm:$0xff] %v6642_v53  ;;  %9316 = vst [vmem:[#allocation149_spill] sm:$0xff] %v6648_v58  ;;  %v6654_v54 = vld [vmem:[%s7983_s4 + $0x8] sm:$0xff]  ;;  %v6660_v60 = vld [vmem:[%s7983_s4 + $0x18] sm:$0xff] }
 0x7d3   :  { %1795 = vmatpush1.msra.mxu0 %v6642_v53  ;;  %1866 = vmatpush1.msra.mxu1 %v6648_v58  ;;  %9317 = vst [vmem:[#allocation150_spill] sm:$0xff] %v6654_v54  ;;  %9318 = vst [vmem:[#allocation151_spill] sm:$0xff] %v6660_v60  ;;  %v6666_v53 = vld [vmem:[%s7983_s4] sm:$0xff] }
 0x7d4   :  { %1796 = vmatprep.subr.mxu0 %v6654_v54  ;;  %1867 = vmatprep.subr.mxu1 %v6660_v60  ;;  %9319 = vst [vmem:[#allocation152_spill] sm:$0xff] %v6666_v53  ;;  %v6673_v54 = vld [vmem:[%s7983_s4 + $0x10] sm:$0xff] }
 0x7d5   :  { %1797 = vmatpush1.msra.mxu0 %v6666_v53  ;;  %1830 = vmatprep.mubr.f32.mxu0 %v9171_v36  ;;  %9320 = vst [vmem:[#allocation154_spill] sm:$0xff] %v6673_v54 }
 0x7d6   :  { %1868 = vmatpush1.msra.mxu1 %v6673_v54  ;;  %1901 = vmatprep.mubr.f32.mxu1 %v9171_v36 }
 0x7d7   :  { %1935 = vmatprep.subr.mxu0 %v5869_v38  ;;  %2006 = vmatprep.subr.mxu1 %v5872_v20 }
 0x876   :  { %v1667_v60 = vpop.f32.mrf.mxu0  ;;  %v1738_v50 = vpop.f32.mrf.mxu1 }
 0x877   :  { %v1668_v58 = vadd.f32 %v1667_v60, %v9173_v40  ;;  %v1739_v56 = vadd.f32 %v1738_v50, %v4592_v55  ;;  %v9362_v50 = vld [vmem:[#allocation50_spill] sm:$0xff] }
 0x878   :  { %v1669_v47 = vpop.f32.mrf.mxu0  ;;  %v1740_v54 = vpop.f32.mrf.mxu1 }
 0x879   :  { %v1743_v53 = vmul.f32 0.5, %v1668_v58  ;;  %v1670_v59 = vadd.f32 %v1669_v47, %v4589_v57  ;;  %v1741_v36 = vadd.f32 %v1740_v54, %v4596_v63  ;;  %v9363_v54 = vld [vmem:[#allocation47_spill] sm:$0xff] }
 0x87b   :  { %3086 = vtanh.f32 %v1743_v53  ;;  %v1747_v2 = vmul.f32 0.5, %v1670_v59  ;;  %v1752_v38 = vmul.f32 0.5, %v1741_v36 }
 0x87d   :  { %3088 = vtanh.f32 %v1747_v2 }
 0x87e   :  { %3090 = vtanh.f32 %v1739_v56 }
 0x87f   :  { %3092 = vtanh.f32 %v1752_v38  ;;  %v9364_v38 = vld [vmem:[#allocation52_spill] sm:$0xff] }
 0x888   :  { %v3087_v4 = vpop.eup %3086 }
 0x889   :  { %v1745_v20 = vadd.f32 1.0, %v3087_v4 }
 0x88a   :  { %v3089_v62 = vpop.eup %3088 }
 0x88b   :  { %v1746_v49 = vmul.f32 0.5, %v1745_v20  ;;  %v1749_v60 = vadd.f32 1.0, %v3089_v62  ;;  %v3091_v40 = vpop.eup %3090  ;;  %v9365_v20 = vld [vmem:[#allocation49_spill] sm:$0xff] }
 0x88c   :  { %v3093_v36 = vpop.eup %3092 }
 0x88d   :  { %v1750_v58 = vmul.f32 0.5, %v1749_v60  ;;  %v1757_v53 = vmul.f32 %v3091_v40, %v1746_v49  ;;  %v1754_v4 = vadd.f32 1.0, %v3093_v36  ;;  %v9321_v40 = vld [vmem:[#allocation7_spill] sm:$0xff]  ;;  %v9361_v49 = vld [vmem:[#allocation45_spill] sm:$0xff]  ;;  %v9366_v60 = vld [vmem:[#allocation54_spill] sm:$0xff] }
 0x88e   :  { %v9370_v36 = vld [vmem:[#allocation58_spill] sm:$0xff] }
 0x88f   :  { %v1756_v47 = vmul.f32 %v1750_v58, %v5880_v48  ;;  %v1755_v56 = vmul.f32 0.5, %v1754_v4  ;;  %v9322_v48 = vld [vmem:[#allocation10_spill] sm:$0xff]  ;;  %v9367_v58 = vld [vmem:[#allocation51_spill] sm:$0xff] }
 0x890   :  { %v9371_v4 = vld [vmem:[#allocation55_spill] sm:$0xff] }
 0x891   :  { %v6684_v59 = vadd.f32 %v1757_v53, %v1756_v47  ;;  %v9368_v47 = vld [vmem:[#allocation56_spill] sm:$0xff]  ;;  %v9369_v53 = vld [vmem:[#allocation53_spill] sm:$0xff] }
 0x893   :  { %3094 = vtanh.f32 %v6684_v59  ;;  %2977 = vst [vmem:[%s7985_s6 + $0x98] sm:$0xff] %v6684_v59 }
 0x8a0   :  { %v3095_v2 = vpop.eup %3094 }
 0x8a1   :  { %v1760_v62 = vmul.f32 %v3095_v2, %v1755_v56  ;;  %v9372_v56 = vld [vmem:[#allocation60_spill] sm:$0xff]  ;;  %v9373_v2 = vld [vmem:[#allocation57_spill] sm:$0xff] }
 0x8a3   :  { %2975 = vst [vmem:[%s7985_s6 + $0x88] sm:$0xff] %v1760_v62  ;;  %1831 = vmatmul.mubr.f32.vlgmr.msra.gmra.mxu0 %v1760_v62  ;;  %1902 = vmatmul.mubr.f32.vlgmr.msra.gmra.mxu1 %v1760_v62 }
 0x8a4   :  { %1999 = vmatprep.mubr.f32.mxu0 %v1760_v62  ;;  %2070 = vmatprep.mubr.f32.mxu1 %v1760_v62  ;;  %v9374_v62 = vld [vmem:[#allocation62_spill] sm:$0xff] }
 0x8a5   :  { %1936 = vmatpush1.msra.mxu0 %v5890_v19  ;;  %2007 = vmatpush1.msra.mxu1 %v5893_v6  ;;  %v9323_v19 = vld [vmem:[#allocation8_spill] sm:$0xff] }
 0x8a6   :  { %1937 = vmatprep.subr.mxu0 %v5896_v7  ;;  %2008 = vmatprep.subr.mxu1 %v5899_v8  ;;  %v9324_v6 = vld [vmem:[#allocation12_spill] sm:$0xff]  ;;  %v9325_v7 = vld [vmem:[#allocation9_spill] sm:$0xff]  ;;  %v9326_v8 = vld [vmem:[#allocation14_spill] sm:$0xff] }
 0x8a7   :  { %1938 = vmatpush1.msra.mxu0 %v5902_v9  ;;  %2009 = vmatpush1.msra.mxu1 %v5905_v10  ;;  %v9327_v9 = vld [vmem:[#allocation11_spill] sm:$0xff]  ;;  %v9328_v10 = vld [vmem:[#allocation16_spill] sm:$0xff] }
 0x8a8   :  { %1939 = vmatprep.subr.mxu0 %v5908_v11  ;;  %2010 = vmatprep.subr.mxu1 %v5911_v26  ;;  %v9329_v11 = vld [vmem:[#allocation13_spill] sm:$0xff]  ;;  %v9330_v26 = vld [vmem:[#allocation18_spill] sm:$0xff] }
 0x8a9   :  { %1940 = vmatpush1.msra.mxu0 %v5914_v21  ;;  %2011 = vmatpush1.msra.mxu1 %v5917_v17  ;;  %v9331_v21 = vld [vmem:[#allocation15_spill] sm:$0xff]  ;;  %v9332_v17 = vld [vmem:[#allocation20_spill] sm:$0xff] }
 0x8aa   :  { %1941 = vmatprep.subr.mxu0 %v5920_v5  ;;  %2012 = vmatprep.subr.mxu1 %v5923_v1  ;;  %v9333_v5 = vld [vmem:[#allocation17_spill] sm:$0xff]  ;;  %v9334_v1 = vld [vmem:[#allocation22_spill] sm:$0xff] }
 0x8ab   :  { %1942 = vmatpush1.msra.mxu0 %v5926_v18  ;;  %2013 = vmatpush1.msra.mxu1 %v5929_v16  ;;  %v9335_v18 = vld [vmem:[#allocation19_spill] sm:$0xff]  ;;  %v9336_v16 = vld [vmem:[#allocation24_spill] sm:$0xff] }
 0x8ac   :  { %1943 = vmatprep.subr.mxu0 %v5932_v15  ;;  %2014 = vmatprep.subr.mxu1 %v5935_v23  ;;  %v9337_v15 = vld [vmem:[#allocation21_spill] sm:$0xff]  ;;  %v9338_v23 = vld [vmem:[#allocation26_spill] sm:$0xff] }
 0x8ad   :  { %1944 = vmatpush1.msra.mxu0 %v5938_v61  ;;  %2015 = vmatpush1.msra.mxu1 %v5941_v29  ;;  %v9339_v61 = vld [vmem:[#allocation23_spill] sm:$0xff]  ;;  %v9340_v29 = vld [vmem:[#allocation28_spill] sm:$0xff] }
 0x8ae   :  { %1945 = vmatprep.subr.mxu0 %v5944_v22  ;;  %2016 = vmatprep.subr.mxu1 %v5947_v28  ;;  %v9341_v22 = vld [vmem:[#allocation25_spill] sm:$0xff]  ;;  %v9342_v28 = vld [vmem:[#allocation30_spill] sm:$0xff] }
 0x8af   :  { %1946 = vmatpush1.msra.mxu0 %v5950_v27  ;;  %2017 = vmatpush1.msra.mxu1 %v5953_v3  ;;  %v9343_v27 = vld [vmem:[#allocation27_spill] sm:$0xff]  ;;  %v9344_v3 = vld [vmem:[#allocation32_spill] sm:$0xff] }
 0x8b0   :  { %1947 = vmatprep.subr.mxu0 %v5956_v24  ;;  %2018 = vmatprep.subr.mxu1 %v5959_v51  ;;  %v9345_v24 = vld [vmem:[#allocation29_spill] sm:$0xff]  ;;  %v9346_v51 = vld [vmem:[#allocation34_spill] sm:$0xff] }
 0x8b1   :  { %1948 = vmatpush1.msra.mxu0 %v5962_v30  ;;  %2019 = vmatpush1.msra.mxu1 %v5965_v31  ;;  %v9347_v30 = vld [vmem:[#allocation31_spill] sm:$0xff]  ;;  %v9348_v31 = vld [vmem:[#allocation36_spill] sm:$0xff] }
 0x8b2   :  { %1949 = vmatprep.subr.mxu0 %v5968_v32  ;;  %2020 = vmatprep.subr.mxu1 %v5971_v34  ;;  %v9349_v32 = vld [vmem:[#allocation33_spill] sm:$0xff]  ;;  %v9350_v34 = vld [vmem:[#allocation38_spill] sm:$0xff] }
 0x8b3   :  { %1950 = vmatpush1.msra.mxu0 %v5974_v35  ;;  %2021 = vmatpush1.msra.mxu1 %v5977_v37  ;;  %v9351_v35 = vld [vmem:[#allocation35_spill] sm:$0xff]  ;;  %v9352_v37 = vld [vmem:[#allocation40_spill] sm:$0xff] }
 0x8b4   :  { %1951 = vmatprep.subr.mxu0 %v5980_v39  ;;  %2022 = vmatprep.subr.mxu1 %v5983_v41  ;;  %v9353_v39 = vld [vmem:[#allocation37_spill] sm:$0xff]  ;;  %v9354_v41 = vld [vmem:[#allocation42_spill] sm:$0xff] }
 0x8b5   :  { %1952 = vmatpush1.msra.mxu0 %v5986_v42  ;;  %2023 = vmatpush1.msra.mxu1 %v5989_v43  ;;  %v9355_v42 = vld [vmem:[#allocation39_spill] sm:$0xff]  ;;  %v9356_v43 = vld [vmem:[#allocation44_spill] sm:$0xff] }
 0x8b6   :  { %1953 = vmatprep.subr.mxu0 %v5992_v52  ;;  %2024 = vmatprep.subr.mxu1 %v5995_v12  ;;  %v9357_v52 = vld [vmem:[#allocation41_spill] sm:$0xff]  ;;  %v9358_v12 = vld [vmem:[#allocation46_spill] sm:$0xff] }
 0x8b7   :  { %1954 = vmatpush1.msra.mxu0 %v5998_v13  ;;  %2025 = vmatpush1.msra.mxu1 %v6001_v14  ;;  %v9359_v13 = vld [vmem:[#allocation43_spill] sm:$0xff]  ;;  %v9360_v14 = vld [vmem:[#allocation48_spill] sm:$0xff] }
 0x8b8   :  { %1955 = vmatprep.subr.mxu0 %v9321_v40  ;;  %2026 = vmatprep.subr.mxu1 %v9322_v48  ;;  %v9375_v40 = vld [vmem:[#allocation59_spill] sm:$0xff]  ;;  %v9376_v48 = vld [vmem:[#allocation64_spill] sm:$0xff] }
 0x8b9   :  { %1956 = vmatpush1.msra.mxu0 %v9323_v19  ;;  %2027 = vmatpush1.msra.mxu1 %v9324_v6  ;;  %v9377_v19 = vld [vmem:[#allocation61_spill] sm:$0xff]  ;;  %v9378_v6 = vld [vmem:[#allocation66_spill] sm:$0xff] }
 0x8ba   :  { %1957 = vmatprep.subr.mxu0 %v9325_v7  ;;  %2028 = vmatprep.subr.mxu1 %v9326_v8  ;;  %v9379_v7 = vld [vmem:[#allocation63_spill] sm:$0xff]  ;;  %v9380_v8 = vld [vmem:[#allocation68_spill] sm:$0xff] }
 0x8bb   :  { %1958 = vmatpush1.msra.mxu0 %v9327_v9  ;;  %2029 = vmatpush1.msra.mxu1 %v9328_v10  ;;  %v9381_v9 = vld [vmem:[#allocation65_spill] sm:$0xff]  ;;  %v9382_v10 = vld [vmem:[#allocation70_spill] sm:$0xff] }
 0x8bc   :  { %1959 = vmatprep.subr.mxu0 %v9329_v11  ;;  %2030 = vmatprep.subr.mxu1 %v9330_v26  ;;  %v9383_v11 = vld [vmem:[#allocation67_spill] sm:$0xff]  ;;  %v9384_v26 = vld [vmem:[#allocation72_spill] sm:$0xff] }
 0x8bd   :  { %1960 = vmatpush1.msra.mxu0 %v9331_v21  ;;  %2031 = vmatpush1.msra.mxu1 %v9332_v17  ;;  %v9385_v21 = vld [vmem:[#allocation69_spill] sm:$0xff]  ;;  %v9386_v17 = vld [vmem:[#allocation74_spill] sm:$0xff] }
 0x8be   :  { %1961 = vmatprep.subr.mxu0 %v9333_v5  ;;  %2032 = vmatprep.subr.mxu1 %v9334_v1  ;;  %v9387_v5 = vld [vmem:[#allocation71_spill] sm:$0xff]  ;;  %v9388_v1 = vld [vmem:[#allocation76_spill] sm:$0xff] }
 0x8bf   :  { %1962 = vmatpush1.msra.mxu0 %v9335_v18  ;;  %2033 = vmatpush1.msra.mxu1 %v9336_v16  ;;  %v9389_v18 = vld [vmem:[#allocation73_spill] sm:$0xff]  ;;  %v9390_v16 = vld [vmem:[#allocation79_spill] sm:$0xff] }
 0x8c0   :  { %1963 = vmatprep.subr.mxu0 %v9337_v15  ;;  %2034 = vmatprep.subr.mxu1 %v9338_v23  ;;  %v9391_v15 = vld [vmem:[#allocation75_spill] sm:$0xff]  ;;  %v9392_v23 = vld [vmem:[#allocation81_spill] sm:$0xff] }
 0x8c1   :  { %1964 = vmatpush1.msra.mxu0 %v9339_v61  ;;  %2035 = vmatpush1.msra.mxu1 %v9340_v29  ;;  %v9393_v61 = vld [vmem:[#allocation77_spill] sm:$0xff]  ;;  %v9394_v29 = vld [vmem:[#allocation83_spill] sm:$0xff] }
 0x8c2   :  { %1965 = vmatprep.subr.mxu0 %v9341_v22  ;;  %2036 = vmatprep.subr.mxu1 %v9342_v28  ;;  %v9395_v22 = vld [vmem:[#allocation78_spill] sm:$0xff]  ;;  %v9396_v28 = vld [vmem:[#allocation85_spill] sm:$0xff] }
 0x8c3   :  { %1966 = vmatpush1.msra.mxu0 %v9343_v27  ;;  %2037 = vmatpush1.msra.mxu1 %v9344_v3  ;;  %v9397_v27 = vld [vmem:[#allocation80_spill] sm:$0xff]  ;;  %v9398_v3 = vld [vmem:[#allocation86_spill] sm:$0xff] }
 0x8c4   :  { %1967 = vmatprep.subr.mxu0 %v9345_v24  ;;  %2038 = vmatprep.subr.mxu1 %v9346_v51  ;;  %v9399_v24 = vld [vmem:[#allocation82_spill] sm:$0xff]  ;;  %v9400_v51 = vld [vmem:[#allocation87_spill] sm:$0xff] }
 0x8c5   :  { %1968 = vmatpush2.msra.mxu0 %v9347_v30  ;;  %2039 = vmatpush2.msra.mxu1 %v9348_v31  ;;  %v9401_v30 = vld [vmem:[#allocation84_spill] sm:$0xff] }
 0x8c6   :  { %1969 = vmatprep.subr.mxu0 %v9349_v32  ;;  %2040 = vmatprep.subr.mxu1 %v9350_v34  ;;  %v9402_v31 = vld [vmem:[#allocation88_spill] sm:$0xff]  ;;  %v9403_v32 = vld [vmem:[#allocation89_spill] sm:$0xff]  ;;  %v9404_v34 = vld [vmem:[#allocation90_spill] sm:$0xff] }
 0x8c7   :  { %1970 = vmatpush2.msra.mxu0 %v9351_v35  ;;  %2041 = vmatpush2.msra.mxu1 %v9352_v37  ;;  %v9405_v35 = vld [vmem:[#allocation91_spill] sm:$0xff]  ;;  %v9406_v37 = vld [vmem:[#allocation92_spill] sm:$0xff] }
 0x8c8   :  { %1971 = vmatprep.subr.mxu0 %v9353_v39  ;;  %2042 = vmatprep.subr.mxu1 %v9354_v41  ;;  %v9407_v39 = vld [vmem:[#allocation93_spill] sm:$0xff]  ;;  %v9408_v41 = vld [vmem:[#allocation94_spill] sm:$0xff] }
 0x8c9   :  { %1972 = vmatpush2.msra.mxu0 %v9355_v42  ;;  %2043 = vmatpush2.msra.mxu1 %v9356_v43  ;;  %v9409_v42 = vld [vmem:[#allocation95_spill] sm:$0xff]  ;;  %v9410_v43 = vld [vmem:[#allocation96_spill] sm:$0xff] }
 0x8ca   :  { %1973 = vmatprep.subr.mxu0 %v9357_v52  ;;  %2044 = vmatprep.subr.mxu1 %v9358_v12  ;;  %v2970_v52 = vld [vmem:[%s7979_s0 + $0x80] sm:$0xff] }
 0x8cb   :  { %1974 = vmatpush2.msra.mxu0 %v9359_v13  ;;  %2045 = vmatpush2.msra.mxu1 %v9360_v14  ;;  %v2971_v13 = vld [vmem:[%s7979_s0 + $0x88] sm:$0xff] }
 0x8cc   :  { %1975 = vmatprep.subr.mxu0 %v9361_v49  ;;  %2046 = vmatprep.subr.mxu1 %v9362_v50 }
 0x8cd   :  { %1976 = vmatpush2.msra.mxu0 %v9363_v54  ;;  %2047 = vmatpush2.msra.mxu1 %v9364_v38  ;;  %v2972_v38 = vld [vmem:[%s7979_s0 + $0x90] sm:$0xff] }
 0x8ce   :  { %1977 = vmatprep.subr.mxu0 %v9365_v20  ;;  %2048 = vmatprep.subr.mxu1 %v9366_v60 }
 0x8cf   :  { %1978 = vmatpush2.msra.mxu0 %v9367_v58  ;;  %2049 = vmatpush2.msra.mxu1 %v9368_v47  ;;  %v2973_v47 = vld [vmem:[%s7979_s0 + $0x98] sm:$0xff] }
 0x8d0   :  { %1979 = vmatprep.subr.mxu0 %v9369_v53  ;;  %2050 = vmatprep.subr.mxu1 %v9370_v36 }
 0x8d1   :  { %1980 = vmatpush2.msra.mxu0 %v9371_v4  ;;  %2051 = vmatpush2.msra.mxu1 %v9372_v56 }
 0x8d2   :  { %1981 = vmatprep.subr.mxu0 %v9373_v2  ;;  %2052 = vmatprep.subr.mxu1 %v9374_v62 }
 0x8d3   :  { %1982 = vmatpush2.msra.mxu0 %v9375_v40  ;;  %2053 = vmatpush2.msra.mxu1 %v9376_v48 }
 0x8d4   :  { %1983 = vmatprep.subr.mxu0 %v9377_v19  ;;  %2054 = vmatprep.subr.mxu1 %v9378_v6 }
 0x8d5   :  { %1984 = vmatpush2.msra.mxu0 %v9379_v7  ;;  %2055 = vmatpush2.msra.mxu1 %v9380_v8 }
 0x8d6   :  { %1985 = vmatprep.subr.mxu0 %v9381_v9  ;;  %2056 = vmatprep.subr.mxu1 %v9382_v10 }
 0x8d7   :  { %1986 = vmatpush2.msra.mxu0 %v9383_v11  ;;  %2057 = vmatpush2.msra.mxu1 %v9384_v26 }
 0x8d8   :  { %1987 = vmatprep.subr.mxu0 %v9385_v21  ;;  %2058 = vmatprep.subr.mxu1 %v9386_v17 }
 0x8d9   :  { %1988 = vmatpush2.msra.mxu0 %v9387_v5  ;;  %2059 = vmatpush2.msra.mxu1 %v9388_v1  ;;  %v9412_v5 = vld [vmem:[#allocation98_spill] sm:$0xff]  ;;  %v9413_v1 = vld [vmem:[#allocation99_spill] sm:$0xff] }
 0x8da   :  { %1989 = vmatprep.subr.mxu0 %v9389_v18  ;;  %2060 = vmatprep.subr.mxu1 %v9390_v16  ;;  %v9414_v18 = vld [vmem:[#allocation100_spill] sm:$0xff]  ;;  %v9415_v16 = vld [vmem:[#allocation101_spill] sm:$0xff] }
 0x8db   :  { %1990 = vmatpush2.msra.mxu0 %v9391_v15  ;;  %2061 = vmatpush2.msra.mxu1 %v9392_v23  ;;  %v9416_v15 = vld [vmem:[#allocation102_spill] sm:$0xff]  ;;  %v9422_v23 = vld [vmem:[#allocation108_spill] sm:$0xff] }
 0x8dc   :  { %1991 = vmatprep.subr.mxu0 %v9393_v61  ;;  %2062 = vmatprep.subr.mxu1 %v9394_v29  ;;  %v9423_v61 = vld [vmem:[#allocation109_spill] sm:$0xff]  ;;  %v9424_v29 = vld [vmem:[#allocation110_spill] sm:$0xff] }
 0x8dd   :  { %1992 = vmatpush2.msra.mxu0 %v9395_v22  ;;  %2063 = vmatpush2.msra.mxu1 %v9396_v28  ;;  %v9425_v22 = vld [vmem:[#allocation111_spill] sm:$0xff]  ;;  %v9426_v28 = vld [vmem:[#allocation112_spill] sm:$0xff] }
 0x8de   :  { %1993 = vmatprep.subr.mxu0 %v9397_v27  ;;  %2064 = vmatprep.subr.mxu1 %v9398_v3  ;;  %v9427_v27 = vld [vmem:[#allocation113_spill] sm:$0xff]  ;;  %v9428_v3 = vld [vmem:[#allocation114_spill] sm:$0xff] }
 0x8df   :  { %1994 = vmatpush2.msra.mxu0 %v9399_v24  ;;  %2065 = vmatpush2.msra.mxu1 %v9400_v51  ;;  %v9429_v24 = vld [vmem:[#allocation115_spill] sm:$0xff]  ;;  %v9430_v51 = vld [vmem:[#allocation116_spill] sm:$0xff] }
 0x8e0   :  { %1995 = vmatprep.subr.mxu0 %v9401_v30  ;;  %2066 = vmatprep.subr.mxu1 %v9402_v31  ;;  %v9431_v30 = vld [vmem:[#allocation117_spill] sm:$0xff]  ;;  %v9432_v31 = vld [vmem:[#allocation118_spill] sm:$0xff] }
 0x8e1   :  { %1996 = vmatpush2.msra.mxu0 %v9403_v32  ;;  %2067 = vmatpush2.msra.mxu1 %v9404_v34  ;;  %v9433_v32 = vld [vmem:[#allocation119_spill] sm:$0xff]  ;;  %v9434_v34 = vld [vmem:[#allocation120_spill] sm:$0xff] }
 0x8e2   :  { %1997 = vmatprep.subr.mxu0 %v9405_v35  ;;  %2068 = vmatprep.subr.mxu1 %v9406_v37  ;;  %v9435_v35 = vld [vmem:[#allocation121_spill] sm:$0xff]  ;;  %v9436_v37 = vld [vmem:[#allocation122_spill] sm:$0xff] }
 0x8e3   :  { %1998 = vmatpush2.msra.mxu0 %v9407_v39  ;;  %2069 = vmatpush2.msra.mxu1 %v9408_v41  ;;  %v9437_v39 = vld [vmem:[#allocation123_spill] sm:$0xff]  ;;  %v9438_v41 = vld [vmem:[#allocation124_spill] sm:$0xff] }
 0x8e4   :  { %2100 = vmatprep.subr.mxu0 %v9409_v42  ;;  %2171 = vmatprep.subr.mxu1 %v9410_v43  ;;  %v9439_v42 = vld [vmem:[#allocation125_spill] sm:$0xff]  ;;  %v9440_v43 = vld [vmem:[#allocation126_spill] sm:$0xff] }
 0x963   :  { %v1832_v12 = vpop.f32.mrf.mxu0  ;;  %v1903_v20 = vpop.f32.mrf.mxu1 }
 0x964   :  { %v1908_v14 = vadd.f32 %v2970_v52, %v1832_v12  ;;  %v1910_v58 = vadd.f32 %v2972_v38, %v1903_v20  ;;  %v9441_v52 = vld [vmem:[#allocation127_spill] sm:$0xff]  ;;  %v9442_v12 = vld [vmem:[#allocation128_spill] sm:$0xff]  ;;  %v9448_v38 = vld [vmem:[#allocation134_spill] sm:$0xff] }
 0x965   :  { %v1834_v49 = vpop.f32.mrf.mxu0  ;;  %v1905_v53 = vpop.f32.mrf.mxu1  ;;  %v9449_v20 = vld [vmem:[#allocation135_spill] sm:$0xff] }
 0x966   :  { %v1912_v50 = vmul.f32 0.5, %v1908_v14  ;;  %v1909_v54 = vadd.f32 %v2971_v13, %v1834_v49  ;;  %v1911_v36 = vadd.f32 %v2973_v47, %v1905_v53  ;;  %v9443_v13 = vld [vmem:[#allocation129_spill] sm:$0xff]  ;;  %v9444_v14 = vld [vmem:[#allocation130_spill] sm:$0xff]  ;;  %v9445_v49 = vld [vmem:[#allocation131_spill] sm:$0xff] }
 0x967   :  { %v9452_v47 = vld [vmem:[#allocation138_spill] sm:$0xff]  ;;  %v9453_v53 = vld [vmem:[#allocation139_spill] sm:$0xff] }
 0x968   :  { %3096 = vtanh.f32 %v1912_v50  ;;  %v1916_v60 = vmul.f32 0.5, %v1909_v54  ;;  %v1921_v4 = vmul.f32 0.5, %v1911_v36  ;;  %v9446_v50 = vld [vmem:[#allocation132_spill] sm:$0xff]  ;;  %v9447_v54 = vld [vmem:[#allocation133_spill] sm:$0xff] }
 0x969   :  { %v9454_v36 = vld [vmem:[#allocation140_spill] sm:$0xff] }
 0x96a   :  { %3098 = vtanh.f32 %v1916_v60  ;;  %v9450_v60 = vld [vmem:[#allocation136_spill] sm:$0xff] }
 0x96b   :  { %3100 = vtanh.f32 %v1910_v58  ;;  %v9451_v58 = vld [vmem:[#allocation137_spill] sm:$0xff] }
 0x96c   :  { %3102 = vtanh.f32 %v1921_v4  ;;  %v9455_v4 = vld [vmem:[#allocation141_spill] sm:$0xff] }
 0x975   :  { %v3097_v56 = vpop.eup %3096 }
 0x976   :  { %v1914_v2 = vadd.f32 1.0, %v3097_v56  ;;  %v9456_v56 = vld [vmem:[#allocation142_spill] sm:$0xff] }
 0x977   :  { %v3099_v62 = vpop.eup %3098 }
 0x978   :  { %v1915_v40 = vmul.f32 0.5, %v1914_v2  ;;  %v1918_v48 = vadd.f32 1.0, %v3099_v62  ;;  %v3101_v6 = vpop.eup %3100  ;;  %v9457_v2 = vld [vmem:[#allocation143_spill] sm:$0xff]  ;;  %v9458_v62 = vld [vmem:[#allocation144_spill] sm:$0xff] }
 0x979   :  { %v3103_v10 = vpop.eup %3102 }
 0x97a   :  { %v1919_v19 = vmul.f32 0.5, %v1918_v48  ;;  %v1926_v8 = vmul.f32 %v3101_v6, %v1915_v40  ;;  %v1923_v11 = vadd.f32 1.0, %v3103_v10  ;;  %v9459_v40 = vld [vmem:[#allocation145_spill] sm:$0xff]  ;;  %v9460_v48 = vld [vmem:[#allocation146_spill] sm:$0xff]  ;;  %v9462_v6 = vld [vmem:[#allocation148_spill] sm:$0xff] }
 0x97b   :  { %v9465_v10 = vld [vmem:[#allocation151_spill] sm:$0xff] }
 0x97c   :  { %v1925_v7 = vmul.f32 %v1919_v19, %v6293_v0  ;;  %v1924_v26 = vmul.f32 0.5, %v1923_v11  ;;  %v9411_v0 = vld [vmem:[#allocation97_spill] sm:$0xff]  ;;  %v9461_v19 = vld [vmem:[#allocation147_spill] sm:$0xff]  ;;  %v9466_v11 = vld [vmem:[#allocation152_spill] sm:$0xff] }
 0x97e   :  { %v6835_v9 = vadd.f32 %v1926_v8, %v1925_v7  ;;  %v9463_v7 = vld [vmem:[#allocation149_spill] sm:$0xff]  ;;  %v9464_v8 = vld [vmem:[#allocation150_spill] sm:$0xff] }
 0x980   :  { %3104 = vtanh.f32 %v6835_v9  ;;  %2976 = vst [vmem:[%s7985_s6 + $0x90] sm:$0xff] %v6835_v9 }
 0x98d   :  { %v3105_v21 = vpop.eup %3104 }
 0x98e   :  { %v1929_v17 = vmul.f32 %v3105_v21, %v1924_v26  ;;  %v9467_v26 = vmov 0.0   ;;  %v9468_v21 = vld [vmem:[#allocation154_spill] sm:$0xff] }
 0x990   :  { %2974 = vst [vmem:[%s7985_s6 + $0x80] sm:$0xff] %v1929_v17  ;;  %2000 = vmatmul.mubr.f32.vlgmr.msra.gmra.mxu0 %v1929_v17  ;;  %2071 = vmatmul.mubr.f32.vlgmr.msra.gmra.mxu1 %v1929_v17  ;;  %v6909_v17 = vld [vmem:[#allocation4 + $0x1e8] sm:$0xff] }
 0x991   :  { %2101 = vmatpush1.msra.mxu0 %v6306_v33  ;;  %2172 = vmatpush1.msra.mxu1 %v6312_v25  ;;  %v9417_v33 = vld [vmem:[#allocation103_spill] sm:$0xff]  ;;  %v9418_v25 = vld [vmem:[#allocation104_spill] sm:$0xff] }
 0x992   :  { %2102 = vmatprep.subr.mxu0 %v6318_v44  ;;  %2173 = vmatprep.subr.mxu1 %v6324_v45  ;;  %v9419_v44 = vld [vmem:[#allocation105_spill] sm:$0xff]  ;;  %v9420_v45 = vld [vmem:[#allocation106_spill] sm:$0xff] }
 0x993   :  { %2103 = vmatpush1.msra.mxu0 %v6330_v46  ;;  %2174 = vmatpush1.msra.mxu1 %v9411_v0  ;;  %v9421_v46 = vld [vmem:[#allocation107_spill] sm:$0xff]  ;;  %v6912_v0 = vld [vmem:[#allocation4 + $0x1f8] sm:$0xff] }
 0x994   :  { %2104 = vmatprep.subr.mxu0 %v9412_v5  ;;  %2175 = vmatprep.subr.mxu1 %v9413_v1  ;;  %v9469_v1 = vld [vmem:[#allocation153_spill] sm:$0xff] }
 0x995   :  { %2105 = vmatpush1.msra.mxu0 %v9414_v18  ;;  %2176 = vmatpush1.msra.mxu1 %v9415_v16 }
 0x996   :  { %2106 = vmatprep.subr.mxu0 %v9416_v15  ;;  %2177 = vmatprep.subr.mxu1 %v9417_v33 }
 0x997   :  { %2107 = vmatpush1.msra.mxu0 %v9418_v25  ;;  %2178 = vmatpush1.msra.mxu1 %v9419_v44 }
 0x998   :  { %2108 = vmatprep.subr.mxu0 %v9420_v45  ;;  %2179 = vmatprep.subr.mxu1 %v9421_v46 }
 0x999   :  { %2109 = vmatpush1.msra.mxu0 %v9422_v23  ;;  %2180 = vmatpush1.msra.mxu1 %v9423_v61 }
 0x99a   :  { %2110 = vmatprep.subr.mxu0 %v9424_v29  ;;  %2181 = vmatprep.subr.mxu1 %v9425_v22 }
 0x99b   :  { %2111 = vmatpush1.msra.mxu0 %v9426_v28  ;;  %2182 = vmatpush1.msra.mxu1 %v9427_v27 }
 0x99c   :  { %2112 = vmatprep.subr.mxu0 %v9428_v3  ;;  %2183 = vmatprep.subr.mxu1 %v9429_v24 }
 0x99d   :  { %2113 = vmatpush1.msra.mxu0 %v9430_v51  ;;  %2184 = vmatpush1.msra.mxu1 %v9431_v30 }
 0x99e   :  { %2114 = vmatprep.subr.mxu0 %v9432_v31  ;;  %2185 = vmatprep.subr.mxu1 %v9433_v32 }
 0x99f   :  { %2115 = vmatpush1.msra.mxu0 %v9434_v34  ;;  %2186 = vmatpush1.msra.mxu1 %v9435_v35 }
 0x9a0   :  { %2116 = vmatprep.subr.mxu0 %v9436_v37  ;;  %2187 = vmatprep.subr.mxu1 %v9437_v39 }
 0x9a1   :  { %2117 = vmatpush1.msra.mxu0 %v9438_v41  ;;  %2188 = vmatpush1.msra.mxu1 %v9439_v42  ;;  %v6933_v42 = vld [vmem:[#allocation4 + $0x1f0] sm:$0xff] }
 0x9a2   :  { %2118 = vmatprep.subr.mxu0 %v9440_v43  ;;  %2189 = vmatprep.subr.mxu1 %v9441_v52  ;;  %v6936_v43 = vld [vmem:[#allocation4 + $0x1c8] sm:$0xff]  ;;  %v6939_v52 = vld [vmem:[#allocation4 + $0x1d8] sm:$0xff] }
 0x9a3   :  { %2119 = vmatpush1.msra.mxu0 %v9442_v12  ;;  %2190 = vmatpush1.msra.mxu1 %v9443_v13  ;;  %v6942_v12 = vld [vmem:[#allocation4 + $0x1c0] sm:$0xff]  ;;  %v6945_v13 = vld [vmem:[#allocation4 + $0x1d0] sm:$0xff] }
 0x9a4   :  { %2120 = vmatprep.subr.mxu0 %v9444_v14  ;;  %2191 = vmatprep.subr.mxu1 %v9445_v49  ;;  %v6948_v14 = vld [vmem:[#allocation4 + $0x1a8] sm:$0xff]  ;;  %v6951_v49 = vld [vmem:[#allocation4 + $0x1b8] sm:$0xff] }
 0x9a5   :  { %2121 = vmatpush1.msra.mxu0 %v9446_v50  ;;  %2192 = vmatpush1.msra.mxu1 %v9447_v54  ;;  %v6954_v50 = vld [vmem:[#allocation4 + $0x1a0] sm:$0xff]  ;;  %v6957_v54 = vld [vmem:[#allocation4 + $0x1b0] sm:$0xff] }
 0x9a6   :  { %2122 = vmatprep.subr.mxu0 %v9448_v38  ;;  %2193 = vmatprep.subr.mxu1 %v9449_v20  ;;  %v6960_v38 = vld [vmem:[#allocation4 + $0x188] sm:$0xff]  ;;  %v6963_v20 = vld [vmem:[#allocation4 + $0x198] sm:$0xff] }
 0x9a7   :  { %2123 = vmatpush1.msra.mxu0 %v9450_v60  ;;  %2194 = vmatpush1.msra.mxu1 %v9451_v58  ;;  %v6966_v60 = vld [vmem:[#allocation4 + $0x180] sm:$0xff]  ;;  %v6969_v58 = vld [vmem:[#allocation4 + $0x190] sm:$0xff] }
 0x9a8   :  { %2124 = vmatprep.subr.mxu0 %v9452_v47  ;;  %2195 = vmatprep.subr.mxu1 %v9453_v53  ;;  %v6972_v47 = vld [vmem:[#allocation4 + $0x168] sm:$0xff]  ;;  %v6975_v53 = vld [vmem:[#allocation4 + $0x178] sm:$0xff] }
 0x9a9   :  { %2125 = vmatpush1.msra.mxu0 %v9454_v36  ;;  %2196 = vmatpush1.msra.mxu1 %v9455_v4  ;;  %v6978_v36 = vld [vmem:[#allocation4 + $0x160] sm:$0xff]  ;;  %v6981_v4 = vld [vmem:[#allocation4 + $0x170] sm:$0xff] }
 0x9aa   :  { %2126 = vmatprep.subr.mxu0 %v9456_v56  ;;  %2197 = vmatprep.subr.mxu1 %v9457_v2  ;;  %v6984_v56 = vld [vmem:[#allocation4 + $0x148] sm:$0xff]  ;;  %v6987_v2 = vld [vmem:[#allocation4 + $0x158] sm:$0xff] }
 0x9ab   :  { %2127 = vmatpush1.msra.mxu0 %v9458_v62  ;;  %2198 = vmatpush1.msra.mxu1 %v9459_v40  ;;  %v6990_v62 = vld [vmem:[#allocation4 + $0x140] sm:$0xff]  ;;  %v6993_v40 = vld [vmem:[#allocation4 + $0x150] sm:$0xff] }
 0x9ac   :  { %2128 = vmatprep.subr.mxu0 %v9460_v48  ;;  %2199 = vmatprep.subr.mxu1 %v9461_v19  ;;  %v6996_v48 = vld [vmem:[#allocation4 + $0x128] sm:$0xff]  ;;  %v6999_v19 = vld [vmem:[#allocation4 + $0x138] sm:$0xff] }
 0x9ad   :  { %2129 = vmatpush1.msra.mxu0 %v9462_v6  ;;  %2200 = vmatpush1.msra.mxu1 %v9463_v7  ;;  %v7002_v6 = vld [vmem:[#allocation4 + $0x120] sm:$0xff]  ;;  %v7005_v7 = vld [vmem:[#allocation4 + $0x130] sm:$0xff] }
 0x9ae   :  { %2130 = vmatprep.subr.mxu0 %v9464_v8  ;;  %2201 = vmatprep.subr.mxu1 %v9465_v10  ;;  %v7008_v8 = vld [vmem:[#allocation4 + $0x108] sm:$0xff]  ;;  %v7011_v10 = vld [vmem:[#allocation4 + $0x118] sm:$0xff] }
 0x9af   :  { %2131 = vmatpush1.msra.mxu0 %v9466_v11  ;;  %2164 = vmatprep.mubr.f32.mxu0 %v9467_v26  ;;  %v7014_v11 = vld [vmem:[#allocation4 + $0x100] sm:$0xff] }
 0x9b0   :  { %2202 = vmatpush1.msra.mxu1 %v9468_v21  ;;  %2235 = vmatprep.mubr.f32.mxu1 %v9467_v26  ;;  %v7017_v21 = vld [vmem:[#allocation4 + $0x110] sm:$0xff] }
 0x9b1   :  { %2269 = vmatprep.subr.mxu0 %v6909_v17  ;;  %2340 = vmatprep.subr.mxu1 %v6912_v0 }
 0xa50   :  { %v2001_v5 = vpop.f32.mrf.mxu0  ;;  %v2072_v25 = vpop.f32.mrf.mxu1 }
 0xa51   :  { %v2002_v18 = vadd.f32 %v2001_v5, %v9469_v1  ;;  %v2073_v45 = vadd.f32 %v2072_v25, %v4592_v55  ;;  %v7020_v5 = vld [vmem:[#allocation4 + $0xe8] sm:$0xff]  ;;  %v7035_v25 = vld [vmem:[#allocation4 + $0xd8] sm:$0xff] }
 0xa52   :  { %v2003_v16 = vpop.f32.mrf.mxu0  ;;  %v2074_v46 = vpop.f32.mrf.mxu1 }
 0xa53   :  { %v2077_v15 = vmul.f32 0.5, %v2002_v18  ;;  %v2004_v33 = vadd.f32 %v2003_v16, %v4589_v57  ;;  %v2075_v23 = vadd.f32 %v2074_v46, %v4596_v63  ;;  %v7023_v18 = vld [vmem:[#allocation4 + $0xf8] sm:$0xff]  ;;  %v7026_v16 = vld [vmem:[#allocation4 + $0xe0] sm:$0xff]  ;;  %v7044_v46 = vld [vmem:[#allocation4 + $0xa8] sm:$0xff] }
 0xa54   :  { %9470 = vst [vmem:[#allocation7_spill] sm:$0xff] %v7044_v46 }
 0xa55   :  { %3106 = vtanh.f32 %v2077_v15  ;;  %v2081_v44 = vmul.f32 0.5, %v2004_v33  ;;  %v2086_v61 = vmul.f32 0.5, %v2075_v23  ;;  %v7029_v15 = vld [vmem:[#allocation4 + $0xf0] sm:$0xff]  ;;  %v7032_v33 = vld [vmem:[#allocation4 + $0xc8] sm:$0xff]  ;;  %v7047_v23 = vld [vmem:[#allocation4 + $0xb8] sm:$0xff] }
 0xa56   :  { %9471 = vst [vmem:[#allocation10_spill] sm:$0xff] %v7047_v23 }
 0xa57   :  { %3108 = vtanh.f32 %v2081_v44  ;;  %v7038_v44 = vld [vmem:[#allocation4 + $0xc0] sm:$0xff] }
 0xa58   :  { %3110 = vtanh.f32 %v2073_v45  ;;  %v7041_v45 = vld [vmem:[#allocation4 + $0xd0] sm:$0xff] }
 0xa59   :  { %3112 = vtanh.f32 %v2086_v61  ;;  %v7050_v61 = vld [vmem:[#allocation4 + $0xa0] sm:$0xff] }
 0xa5a   :  { %9472 = vst [vmem:[#allocation8_spill] sm:$0xff] %v7050_v61 }
 0xa62   :  { %v3107_v29 = vpop.eup %3106 }
 0xa63   :  { %v2079_v22 = vadd.f32 1.0, %v3107_v29  ;;  %v7053_v29 = vld [vmem:[#allocation4 + $0xb0] sm:$0xff] }
 0xa64   :  { %v3109_v28 = vpop.eup %3108  ;;  %9473 = vst [vmem:[#allocation12_spill] sm:$0xff] %v7053_v29 }
 0xa65   :  { %v2080_v27 = vmul.f32 0.5, %v2079_v22  ;;  %v2083_v3 = vadd.f32 1.0, %v3109_v28  ;;  %v3111_v51 = vpop.eup %3110  ;;  %v7056_v22 = vld [vmem:[#allocation4 + $0x88] sm:$0xff]  ;;  %v7059_v28 = vld [vmem:[#allocation4 + $0x98] sm:$0xff] }
 0xa66   :  { %v3113_v34 = vpop.eup %3112  ;;  %9474 = vst [vmem:[#allocation9_spill] sm:$0xff] %v7056_v22  ;;  %9475 = vst [vmem:[#allocation14_spill] sm:$0xff] %v7059_v28 }
 0xa67   :  { %v2084_v24 = vmul.f32 0.5, %v2083_v3  ;;  %v2091_v31 = vmul.f32 %v3111_v51, %v2080_v27  ;;  %v2088_v35 = vadd.f32 1.0, %v3113_v34  ;;  %v7062_v27 = vld [vmem:[#allocation4 + $0x80] sm:$0xff]  ;;  %v7065_v3 = vld [vmem:[#allocation4 + $0x90] sm:$0xff]  ;;  %v7071_v51 = vld [vmem:[#allocation4 + $0x78] sm:$0xff] }
 0xa68   :  { %9476 = vst [vmem:[#allocation11_spill] sm:$0xff] %v7062_v27  ;;  %9477 = vst [vmem:[#allocation16_spill] sm:$0xff] %v7065_v3  ;;  %v7080_v34 = vld [vmem:[#allocation4 + $0x48] sm:$0xff] }
 0xa69   :  { %v2090_v30 = vmul.f32 %v2084_v24, %v6684_v59  ;;  %v2089_v37 = vmul.f32 0.5, %v2088_v35  ;;  %v6930_v59 = vld [vmem:[#allocation4 + $0x1e0] sm:$0xff]  ;;  %v7068_v24 = vld [vmem:[#allocation4 + $0x68] sm:$0xff]  ;;  %9479 = vst [vmem:[#allocation18_spill] sm:$0xff] %v7071_v51  ;;  %9482 = vst [vmem:[#allocation17_spill] sm:$0xff] %v7080_v34 }
 0xa6a   :  { %9478 = vst [vmem:[#allocation13_spill] sm:$0xff] %v7068_v24  ;;  %v7083_v35 = vld [vmem:[#allocation4 + $0x58] sm:$0xff] }
 0xa6b   :  { %v6920_v32 = vadd.f32 %v2091_v31, %v2090_v30  ;;  %v7074_v30 = vld [vmem:[#allocation4 + $0x60] sm:$0xff]  ;;  %v7077_v31 = vld [vmem:[#allocation4 + $0x70] sm:$0xff]  ;;  %9483 = vst [vmem:[#allocation22_spill] sm:$0xff] %v7083_v35 }
 0xa6c   :  { %9480 = vst [vmem:[#allocation15_spill] sm:$0xff] %v7074_v30  ;;  %9481 = vst [vmem:[#allocation20_spill] sm:$0xff] %v7077_v31 }
 0xa6d   :  { %3114 = vtanh.f32 %v6920_v32  ;;  %2985 = vst [vmem:[%s7985_s6 + $0xb8] sm:$0xff] %v6920_v32 }
 0xa7a   :  { %v3115_v39 = vpop.eup %3114 }
 0xa7b   :  { %v2094_v41 = vmul.f32 %v3115_v39, %v2089_v37  ;;  %v7086_v37 = vld [vmem:[#allocation4 + $0x40] sm:$0xff]  ;;  %v7089_v39 = vld [vmem:[#allocation4 + $0x50] sm:$0xff] }
 0xa7c   :  { %9484 = vst [vmem:[#allocation19_spill] sm:$0xff] %v7086_v37  ;;  %9485 = vst [vmem:[#allocation24_spill] sm:$0xff] %v7089_v39 }
 0xa7d   :  { %2983 = vst [vmem:[%s7985_s6 + $0xa8] sm:$0xff] %v2094_v41  ;;  %2165 = vmatmul.mubr.f32.vlgmr.msra.gmra.mxu0 %v2094_v41  ;;  %2236 = vmatmul.mubr.f32.vlgmr.msra.gmra.mxu1 %v2094_v41 }
 0xa7e   :  { %2333 = vmatprep.mubr.f32.mxu0 %v2094_v41  ;;  %2404 = vmatprep.mubr.f32.mxu1 %v2094_v41  ;;  %v7092_v41 = vld [vmem:[#allocation4 + $0x28] sm:$0xff] }
 0xa7f   :  { %2270 = vmatpush1.msra.mxu0 %v6930_v59  ;;  %2341 = vmatpush1.msra.mxu1 %v6933_v42  ;;  %9486 = vst [vmem:[#allocation21_spill] sm:$0xff] %v7092_v41 }
 0xa80   :  { %2271 = vmatprep.subr.mxu0 %v6936_v43  ;;  %2342 = vmatprep.subr.mxu1 %v6939_v52 }
 0xa81   :  { %2272 = vmatpush1.msra.mxu0 %v6942_v12  ;;  %2343 = vmatpush1.msra.mxu1 %v6945_v13 }
 0xa82   :  { %2273 = vmatprep.subr.mxu0 %v6948_v14  ;;  %2344 = vmatprep.subr.mxu1 %v6951_v49 }
 0xa83   :  { %2274 = vmatpush1.msra.mxu0 %v6954_v50  ;;  %2345 = vmatpush1.msra.mxu1 %v6957_v54 }
 0xa84   :  { %2275 = vmatprep.subr.mxu0 %v6960_v38  ;;  %2346 = vmatprep.subr.mxu1 %v6963_v20 }
 0xa85   :  { %2276 = vmatpush1.msra.mxu0 %v6966_v60  ;;  %2347 = vmatpush1.msra.mxu1 %v6969_v58 }
 0xa86   :  { %2277 = vmatprep.subr.mxu0 %v6972_v47  ;;  %2348 = vmatprep.subr.mxu1 %v6975_v53 }
 0xa87   :  { %2278 = vmatpush1.msra.mxu0 %v6978_v36  ;;  %2349 = vmatpush1.msra.mxu1 %v6981_v4 }
 0xa88   :  { %2279 = vmatprep.subr.mxu0 %v6984_v56  ;;  %2350 = vmatprep.subr.mxu1 %v6987_v2 }
 0xa89   :  { %2280 = vmatpush1.msra.mxu0 %v6990_v62  ;;  %2351 = vmatpush1.msra.mxu1 %v6993_v40 }
 0xa8a   :  { %2281 = vmatprep.subr.mxu0 %v6996_v48  ;;  %2352 = vmatprep.subr.mxu1 %v6999_v19 }
 0xa8b   :  { %2282 = vmatpush1.msra.mxu0 %v7002_v6  ;;  %2353 = vmatpush1.msra.mxu1 %v7005_v7 }
 0xa8c   :  { %2283 = vmatprep.subr.mxu0 %v7008_v8  ;;  %2354 = vmatprep.subr.mxu1 %v7011_v10 }
 0xa8d   :  { %2284 = vmatpush1.msra.mxu0 %v7014_v11  ;;  %2355 = vmatpush1.msra.mxu1 %v7017_v21 }
 0xa8e   :  { %2285 = vmatprep.subr.mxu0 %v7020_v5  ;;  %2356 = vmatprep.subr.mxu1 %v7023_v18 }
 0xa8f   :  { %2286 = vmatpush1.msra.mxu0 %v7026_v16  ;;  %2357 = vmatpush1.msra.mxu1 %v7029_v15 }
 0xa90   :  { %2287 = vmatprep.subr.mxu0 %v7032_v33  ;;  %2358 = vmatprep.subr.mxu1 %v7035_v25 }
 0xa91   :  { %2288 = vmatpush1.msra.mxu0 %v7038_v44  ;;  %2359 = vmatpush1.msra.mxu1 %v7041_v45 }
 0xa92   :  { %2289 = vmatprep.subr.mxu0 %v7044_v46  ;;  %2360 = vmatprep.subr.mxu1 %v7047_v23 }
 0xa93   :  { %2290 = vmatpush1.msra.mxu0 %v7050_v61  ;;  %2361 = vmatpush1.msra.mxu1 %v7053_v29 }
 0xa94   :  { %2291 = vmatprep.subr.mxu0 %v7056_v22  ;;  %2362 = vmatprep.subr.mxu1 %v7059_v28  ;;  %v2981_v28 = vld [vmem:[%s7979_s0 + $0xb8] sm:$0xff] }
 0xa95   :  { %2292 = vmatpush1.msra.mxu0 %v7062_v27  ;;  %2363 = vmatpush1.msra.mxu1 %v7065_v3 }
 0xa96   :  { %2293 = vmatprep.subr.mxu0 %v7068_v24  ;;  %2364 = vmatprep.subr.mxu1 %v7071_v51  ;;  %v2980_v24 = vld [vmem:[%s7979_s0 + $0xb0] sm:$0xff] }
 0xa97   :  { %2294 = vmatpush1.msra.mxu0 %v7074_v30  ;;  %2365 = vmatpush1.msra.mxu1 %v7077_v31  ;;  %v7095_v31 = vld [vmem:[#allocation4 + $0x38] sm:$0xff] }
 0xa98   :  { %2295 = vmatprep.subr.mxu0 %v7080_v34  ;;  %2366 = vmatprep.subr.mxu1 %v7083_v35  ;;  %9487 = vst [vmem:[#allocation26_spill] sm:$0xff] %v7095_v31  ;;  %v7098_v34 = vld [vmem:[#allocation4 + $0x20] sm:$0xff]  ;;  %v7101_v35 = vld [vmem:[#allocation4 + $0x30] sm:$0xff] }
 0xa99   :  { %2296 = vmatpush1.msra.mxu0 %v7086_v37  ;;  %2367 = vmatpush1.msra.mxu1 %v7089_v39  ;;  %9488 = vst [vmem:[#allocation23_spill] sm:$0xff] %v7098_v34  ;;  %9489 = vst [vmem:[#allocation28_spill] sm:$0xff] %v7101_v35  ;;  %v7104_v37 = vld [vmem:[#allocation4 + $0x8] sm:$0xff]  ;;  %v7107_v39 = vld [vmem:[#allocation4 + $0x18] sm:$0xff] }
 0xa9a   :  { %2297 = vmatprep.subr.mxu0 %v7092_v41  ;;  %2368 = vmatprep.subr.mxu1 %v7095_v31  ;;  %9490 = vst [vmem:[#allocation25_spill] sm:$0xff] %v7104_v37  ;;  %9491 = vst [vmem:[#allocation30_spill] sm:$0xff] %v7107_v39  ;;  %v7110_v41 = vld [vmem:[#allocation4] sm:$0xff]  ;;  %v7113_v31 = vld [vmem:[#allocation4 + $0x10] sm:$0xff] }
 0xa9b   :  { %2298 = vmatpush1.msra.mxu0 %v7098_v34  ;;  %2369 = vmatpush1.msra.mxu1 %v7101_v35  ;;  %9492 = vst [vmem:[#allocation27_spill] sm:$0xff] %v7110_v41  ;;  %9493 = vst [vmem:[#allocation32_spill] sm:$0xff] %v7113_v31  ;;  %v7116_v34 = vld [vmem:[#allocation4 + $0x3e8] sm:$0xff]  ;;  %v7119_v35 = vld [vmem:[#allocation4 + $0x3f8] sm:$0xff] }
 0xa9c   :  { %2299 = vmatprep.subr.mxu0 %v7104_v37  ;;  %2370 = vmatprep.subr.mxu1 %v7107_v39  ;;  %9494 = vst [vmem:[#allocation29_spill] sm:$0xff] %v7116_v34  ;;  %9495 = vst [vmem:[#allocation34_spill] sm:$0xff] %v7119_v35  ;;  %v7122_v37 = vld [vmem:[#allocation4 + $0x3e0] sm:$0xff]  ;;  %v7125_v39 = vld [vmem:[#allocation4 + $0x3f0] sm:$0xff] }
 0xa9d   :  { %2300 = vmatpush1.msra.mxu0 %v7110_v41  ;;  %2371 = vmatpush1.msra.mxu1 %v7113_v31  ;;  %9496 = vst [vmem:[#allocation31_spill] sm:$0xff] %v7122_v37  ;;  %9497 = vst [vmem:[#allocation36_spill] sm:$0xff] %v7125_v39  ;;  %v7128_v41 = vld [vmem:[#allocation4 + $0x3c8] sm:$0xff]  ;;  %v7131_v31 = vld [vmem:[#allocation4 + $0x3d8] sm:$0xff] }
 0xa9e   :  { %2301 = vmatprep.subr.mxu0 %v7116_v34  ;;  %2372 = vmatprep.subr.mxu1 %v7119_v35  ;;  %9498 = vst [vmem:[#allocation33_spill] sm:$0xff] %v7128_v41  ;;  %9499 = vst [vmem:[#allocation38_spill] sm:$0xff] %v7131_v31  ;;  %v7134_v34 = vld [vmem:[#allocation4 + $0x3c0] sm:$0xff]  ;;  %v7137_v35 = vld [vmem:[#allocation4 + $0x3d0] sm:$0xff] }
 0xa9f   :  { %2302 = vmatpush2.msra.mxu0 %v7122_v37  ;;  %2373 = vmatpush2.msra.mxu1 %v7125_v39  ;;  %9500 = vst [vmem:[#allocation35_spill] sm:$0xff] %v7134_v34  ;;  %9501 = vst [vmem:[#allocation40_spill] sm:$0xff] %v7137_v35  ;;  %v7140_v37 = vld [vmem:[#allocation4 + $0x3a8] sm:$0xff]  ;;  %v7143_v39 = vld [vmem:[#allocation4 + $0x3b8] sm:$0xff] }
 0xaa0   :  { %2303 = vmatprep.subr.mxu0 %v7128_v41  ;;  %2374 = vmatprep.subr.mxu1 %v7131_v31  ;;  %9502 = vst [vmem:[#allocation37_spill] sm:$0xff] %v7140_v37  ;;  %9503 = vst [vmem:[#allocation42_spill] sm:$0xff] %v7143_v39  ;;  %v7146_v41 = vld [vmem:[#allocation4 + $0x3a0] sm:$0xff]  ;;  %v7149_v31 = vld [vmem:[#allocation4 + $0x3b0] sm:$0xff] }
 0xaa1   :  { %2304 = vmatpush2.msra.mxu0 %v7134_v34  ;;  %2375 = vmatpush2.msra.mxu1 %v7137_v35  ;;  %9504 = vst [vmem:[#allocation39_spill] sm:$0xff] %v7146_v41  ;;  %9505 = vst [vmem:[#allocation44_spill] sm:$0xff] %v7149_v31  ;;  %v7152_v34 = vld [vmem:[#allocation4 + $0x388] sm:$0xff]  ;;  %v7155_v35 = vld [vmem:[#allocation4 + $0x398] sm:$0xff] }
 0xaa2   :  { %2305 = vmatprep.subr.mxu0 %v7140_v37  ;;  %2376 = vmatprep.subr.mxu1 %v7143_v39  ;;  %9506 = vst [vmem:[#allocation41_spill] sm:$0xff] %v7152_v34  ;;  %9507 = vst [vmem:[#allocation46_spill] sm:$0xff] %v7155_v35  ;;  %v7158_v37 = vld [vmem:[#allocation4 + $0x380] sm:$0xff]  ;;  %v7161_v39 = vld [vmem:[#allocation4 + $0x390] sm:$0xff] }
 0xaa3   :  { %2306 = vmatpush2.msra.mxu0 %v7146_v41  ;;  %2377 = vmatpush2.msra.mxu1 %v7149_v31  ;;  %9508 = vst [vmem:[#allocation43_spill] sm:$0xff] %v7158_v37  ;;  %9509 = vst [vmem:[#allocation48_spill] sm:$0xff] %v7161_v39  ;;  %v7164_v41 = vld [vmem:[#allocation4 + $0x368] sm:$0xff]  ;;  %v7167_v31 = vld [vmem:[#allocation4 + $0x378] sm:$0xff] }
 0xaa4   :  { %2307 = vmatprep.subr.mxu0 %v7152_v34  ;;  %2378 = vmatprep.subr.mxu1 %v7155_v35  ;;  %9510 = vst [vmem:[#allocation45_spill] sm:$0xff] %v7164_v41  ;;  %9511 = vst [vmem:[#allocation50_spill] sm:$0xff] %v7167_v31  ;;  %v7170_v34 = vld [vmem:[#allocation4 + $0x360] sm:$0xff]  ;;  %v7173_v35 = vld [vmem:[#allocation4 + $0x370] sm:$0xff] }
 0xaa5   :  { %2308 = vmatpush2.msra.mxu0 %v7158_v37  ;;  %2379 = vmatpush2.msra.mxu1 %v7161_v39  ;;  %9512 = vst [vmem:[#allocation47_spill] sm:$0xff] %v7170_v34  ;;  %9513 = vst [vmem:[#allocation52_spill] sm:$0xff] %v7173_v35  ;;  %v7176_v37 = vld [vmem:[#allocation4 + $0x348] sm:$0xff]  ;;  %v7179_v39 = vld [vmem:[#allocation4 + $0x358] sm:$0xff] }
 0xaa6   :  { %2309 = vmatprep.subr.mxu0 %v7164_v41  ;;  %2380 = vmatprep.subr.mxu1 %v7167_v31  ;;  %9514 = vst [vmem:[#allocation49_spill] sm:$0xff] %v7176_v37  ;;  %9515 = vst [vmem:[#allocation54_spill] sm:$0xff] %v7179_v39  ;;  %v7182_v41 = vld [vmem:[#allocation4 + $0x340] sm:$0xff]  ;;  %v7185_v31 = vld [vmem:[#allocation4 + $0x350] sm:$0xff] }
 0xaa7   :  { %2310 = vmatpush2.msra.mxu0 %v7170_v34  ;;  %2381 = vmatpush2.msra.mxu1 %v7173_v35  ;;  %9516 = vst [vmem:[#allocation51_spill] sm:$0xff] %v7182_v41  ;;  %9517 = vst [vmem:[#allocation56_spill] sm:$0xff] %v7185_v31  ;;  %v7188_v34 = vld [vmem:[#allocation4 + $0x328] sm:$0xff]  ;;  %v7191_v35 = vld [vmem:[#allocation4 + $0x338] sm:$0xff] }
 0xaa8   :  { %2311 = vmatprep.subr.mxu0 %v7176_v37  ;;  %2382 = vmatprep.subr.mxu1 %v7179_v39  ;;  %9518 = vst [vmem:[#allocation53_spill] sm:$0xff] %v7188_v34  ;;  %9519 = vst [vmem:[#allocation58_spill] sm:$0xff] %v7191_v35  ;;  %v7194_v37 = vld [vmem:[#allocation4 + $0x320] sm:$0xff]  ;;  %v7197_v39 = vld [vmem:[#allocation4 + $0x330] sm:$0xff] }
 0xaa9   :  { %2312 = vmatpush2.msra.mxu0 %v7182_v41  ;;  %2383 = vmatpush2.msra.mxu1 %v7185_v31  ;;  %9520 = vst [vmem:[#allocation55_spill] sm:$0xff] %v7194_v37  ;;  %9521 = vst [vmem:[#allocation60_spill] sm:$0xff] %v7197_v39  ;;  %v7200_v41 = vld [vmem:[#allocation4 + $0x308] sm:$0xff]  ;;  %v7203_v31 = vld [vmem:[#allocation4 + $0x318] sm:$0xff] }
 0xaaa   :  { %2313 = vmatprep.subr.mxu0 %v7188_v34  ;;  %2384 = vmatprep.subr.mxu1 %v7191_v35  ;;  %9522 = vst [vmem:[#allocation57_spill] sm:$0xff] %v7200_v41  ;;  %9523 = vst [vmem:[#allocation62_spill] sm:$0xff] %v7203_v31  ;;  %v7206_v34 = vld [vmem:[#allocation4 + $0x300] sm:$0xff]  ;;  %v7209_v35 = vld [vmem:[#allocation4 + $0x310] sm:$0xff] }
 0xaab   :  { %2314 = vmatpush2.msra.mxu0 %v7194_v37  ;;  %2385 = vmatpush2.msra.mxu1 %v7197_v39  ;;  %9524 = vst [vmem:[#allocation59_spill] sm:$0xff] %v7206_v34  ;;  %9525 = vst [vmem:[#allocation64_spill] sm:$0xff] %v7209_v35  ;;  %v7212_v37 = vld [vmem:[#allocation4 + $0x2e8] sm:$0xff]  ;;  %v7215_v39 = vld [vmem:[#allocation4 + $0x2f8] sm:$0xff] }
 0xaac   :  { %2315 = vmatprep.subr.mxu0 %v7200_v41  ;;  %2386 = vmatprep.subr.mxu1 %v7203_v31  ;;  %9526 = vst [vmem:[#allocation61_spill] sm:$0xff] %v7212_v37  ;;  %9527 = vst [vmem:[#allocation66_spill] sm:$0xff] %v7215_v39  ;;  %v7218_v41 = vld [vmem:[#allocation4 + $0x2e0] sm:$0xff]  ;;  %v7221_v31 = vld [vmem:[#allocation4 + $0x2f0] sm:$0xff] }
 0xaad   :  { %2316 = vmatpush2.msra.mxu0 %v7206_v34  ;;  %2387 = vmatpush2.msra.mxu1 %v7209_v35  ;;  %9528 = vst [vmem:[#allocation63_spill] sm:$0xff] %v7218_v41  ;;  %9529 = vst [vmem:[#allocation68_spill] sm:$0xff] %v7221_v31  ;;  %v7224_v34 = vld [vmem:[#allocation4 + $0x2c8] sm:$0xff]  ;;  %v7227_v35 = vld [vmem:[#allocation4 + $0x2d8] sm:$0xff] }
 0xaae   :  { %2317 = vmatprep.subr.mxu0 %v7212_v37  ;;  %2388 = vmatprep.subr.mxu1 %v7215_v39  ;;  %9530 = vst [vmem:[#allocation65_spill] sm:$0xff] %v7224_v34  ;;  %9531 = vst [vmem:[#allocation70_spill] sm:$0xff] %v7227_v35  ;;  %v7230_v37 = vld [vmem:[#allocation4 + $0x2c0] sm:$0xff]  ;;  %v7233_v39 = vld [vmem:[#allocation4 + $0x2d0] sm:$0xff] }
 0xaaf   :  { %2318 = vmatpush2.msra.mxu0 %v7218_v41  ;;  %2389 = vmatpush2.msra.mxu1 %v7221_v31  ;;  %9532 = vst [vmem:[#allocation67_spill] sm:$0xff] %v7230_v37  ;;  %9533 = vst [vmem:[#allocation72_spill] sm:$0xff] %v7233_v39  ;;  %v7236_v41 = vld [vmem:[#allocation4 + $0x2a8] sm:$0xff]  ;;  %v7239_v31 = vld [vmem:[#allocation4 + $0x2b8] sm:$0xff] }
 0xab0   :  { %2319 = vmatprep.subr.mxu0 %v7224_v34  ;;  %2390 = vmatprep.subr.mxu1 %v7227_v35  ;;  %9534 = vst [vmem:[#allocation69_spill] sm:$0xff] %v7236_v41  ;;  %9535 = vst [vmem:[#allocation74_spill] sm:$0xff] %v7239_v31  ;;  %v7242_v34 = vld [vmem:[#allocation4 + $0x2a0] sm:$0xff]  ;;  %v7245_v35 = vld [vmem:[#allocation4 + $0x2b0] sm:$0xff] }
 0xab1   :  { %2320 = vmatpush2.msra.mxu0 %v7230_v37  ;;  %2391 = vmatpush2.msra.mxu1 %v7233_v39  ;;  %9536 = vst [vmem:[#allocation71_spill] sm:$0xff] %v7242_v34  ;;  %9537 = vst [vmem:[#allocation76_spill] sm:$0xff] %v7245_v35  ;;  %v7248_v37 = vld [vmem:[#allocation4 + $0x288] sm:$0xff]  ;;  %v7251_v39 = vld [vmem:[#allocation4 + $0x298] sm:$0xff] }
 0xab2   :  { %2321 = vmatprep.subr.mxu0 %v7236_v41  ;;  %2392 = vmatprep.subr.mxu1 %v7239_v31  ;;  %9538 = vst [vmem:[#allocation73_spill] sm:$0xff] %v7248_v37  ;;  %9539 = vst [vmem:[#allocation79_spill] sm:$0xff] %v7251_v39  ;;  %v7254_v41 = vld [vmem:[#allocation4 + $0x280] sm:$0xff]  ;;  %v7257_v31 = vld [vmem:[#allocation4 + $0x290] sm:$0xff] }
 0xab3   :  { %2322 = vmatpush2.msra.mxu0 %v7242_v34  ;;  %2393 = vmatpush2.msra.mxu1 %v7245_v35  ;;  %9540 = vst [vmem:[#allocation75_spill] sm:$0xff] %v7254_v41  ;;  %9541 = vst [vmem:[#allocation81_spill] sm:$0xff] %v7257_v31  ;;  %v7260_v34 = vld [vmem:[#allocation4 + $0x268] sm:$0xff]  ;;  %v7263_v35 = vld [vmem:[#allocation4 + $0x278] sm:$0xff] }
 0xab4   :  { %2323 = vmatprep.subr.mxu0 %v7248_v37  ;;  %2394 = vmatprep.subr.mxu1 %v7251_v39  ;;  %9542 = vst [vmem:[#allocation77_spill] sm:$0xff] %v7260_v34  ;;  %9543 = vst [vmem:[#allocation83_spill] sm:$0xff] %v7263_v35  ;;  %v7266_v37 = vld [vmem:[#allocation4 + $0x260] sm:$0xff]  ;;  %v7269_v39 = vld [vmem:[#allocation4 + $0x270] sm:$0xff] }
 0xab5   :  { %2324 = vmatpush2.msra.mxu0 %v7254_v41  ;;  %2395 = vmatpush2.msra.mxu1 %v7257_v31  ;;  %9544 = vst [vmem:[#allocation78_spill] sm:$0xff] %v7266_v37  ;;  %9545 = vst [vmem:[#allocation85_spill] sm:$0xff] %v7269_v39  ;;  %v7272_v41 = vld [vmem:[#allocation4 + $0x248] sm:$0xff]  ;;  %v7275_v31 = vld [vmem:[#allocation4 + $0x258] sm:$0xff] }
 0xab6   :  { %2325 = vmatprep.subr.mxu0 %v7260_v34  ;;  %2396 = vmatprep.subr.mxu1 %v7263_v35  ;;  %9546 = vst [vmem:[#allocation80_spill] sm:$0xff] %v7272_v41  ;;  %9547 = vst [vmem:[#allocation86_spill] sm:$0xff] %v7275_v31  ;;  %v7278_v34 = vld [vmem:[#allocation4 + $0x240] sm:$0xff]  ;;  %v7281_v35 = vld [vmem:[#allocation4 + $0x250] sm:$0xff] }
 0xab7   :  { %2326 = vmatpush2.msra.mxu0 %v7266_v37  ;;  %2397 = vmatpush2.msra.mxu1 %v7269_v39  ;;  %9548 = vst [vmem:[#allocation82_spill] sm:$0xff] %v7278_v34  ;;  %9549 = vst [vmem:[#allocation87_spill] sm:$0xff] %v7281_v35  ;;  %v7284_v37 = vld [vmem:[#allocation4 + $0x228] sm:$0xff]  ;;  %v7287_v39 = vld [vmem:[#allocation4 + $0x238] sm:$0xff] }
 0xab8   :  { %2327 = vmatprep.subr.mxu0 %v7272_v41  ;;  %2398 = vmatprep.subr.mxu1 %v7275_v31  ;;  %9550 = vst [vmem:[#allocation84_spill] sm:$0xff] %v7284_v37  ;;  %9551 = vst [vmem:[#allocation88_spill] sm:$0xff] %v7287_v39  ;;  %v7290_v41 = vld [vmem:[#allocation4 + $0x220] sm:$0xff]  ;;  %v7293_v31 = vld [vmem:[#allocation4 + $0x230] sm:$0xff] }
 0xab9   :  { %2328 = vmatpush2.msra.mxu0 %v7278_v34  ;;  %2399 = vmatpush2.msra.mxu1 %v7281_v35  ;;  %9552 = vst [vmem:[#allocation89_spill] sm:$0xff] %v7290_v41  ;;  %9553 = vst [vmem:[#allocation90_spill] sm:$0xff] %v7293_v31  ;;  %v7296_v34 = vld [vmem:[#allocation4 + $0x208] sm:$0xff]  ;;  %v7299_v35 = vld [vmem:[#allocation4 + $0x218] sm:$0xff] }
 0xaba   :  { %2329 = vmatprep.subr.mxu0 %v7284_v37  ;;  %2400 = vmatprep.subr.mxu1 %v7287_v39  ;;  %9554 = vst [vmem:[#allocation91_spill] sm:$0xff] %v7296_v34  ;;  %9555 = vst [vmem:[#allocation92_spill] sm:$0xff] %v7299_v35  ;;  %v7302_v37 = vld [vmem:[#allocation4 + $0x200] sm:$0xff]  ;;  %v7305_v39 = vld [vmem:[#allocation4 + $0x210] sm:$0xff] }
 0xabb   :  { %2330 = vmatpush2.msra.mxu0 %v7290_v41  ;;  %2401 = vmatpush2.msra.mxu1 %v7293_v31  ;;  %9556 = vst [vmem:[#allocation93_spill] sm:$0xff] %v7302_v37  ;;  %9557 = vst [vmem:[#allocation94_spill] sm:$0xff] %v7305_v39  ;;  %v7311_v31 = vld [vmem:[%s7983_s4 + $0x1e8] sm:$0xff] }
 0xabc   :  { %2331 = vmatprep.subr.mxu0 %v7296_v34  ;;  %2402 = vmatprep.subr.mxu1 %v7299_v35  ;;  %9558 = vst [vmem:[#allocation95_spill] sm:$0xff] %v7311_v31  ;;  %v7317_v34 = vld [vmem:[%s7983_s4 + $0x1f8] sm:$0xff] }
 0xabd   :  { %2332 = vmatpush2.msra.mxu0 %v7302_v37  ;;  %2403 = vmatpush2.msra.mxu1 %v7305_v39  ;;  %9559 = vst [vmem:[#allocation96_spill] sm:$0xff] %v7317_v34  ;;  %v2978_v37 = vld [vmem:[%s7979_s0 + $0xa0] sm:$0xff]  ;;  %v2979_v39 = vld [vmem:[%s7979_s0 + $0xa8] sm:$0xff] }
 0xabe   :  { %2434 = vmatprep.subr.mxu0 %v7311_v31  ;;  %2505 = vmatprep.subr.mxu1 %v7317_v34 }
 0xb3d   :  { %v2166_v35 = vpop.f32.mrf.mxu0  ;;  %v2237_v3 = vpop.f32.mrf.mxu1 }
 0xb3e   :  { %v2242_v41 = vadd.f32 %v2978_v37, %v2166_v35  ;;  %v2244_v27 = vadd.f32 %v2980_v24, %v2237_v3 }
 0xb3f   :  { %v2168_v30 = vpop.f32.mrf.mxu0  ;;  %v2239_v22 = vpop.f32.mrf.mxu1 }
 0xb40   :  { %v2246_v51 = vmul.f32 0.5, %v2242_v41  ;;  %v2243_v31 = vadd.f32 %v2979_v39, %v2168_v30  ;;  %v2245_v29 = vadd.f32 %v2981_v28, %v2239_v22 }
 0xb42   :  { %3116 = vtanh.f32 %v2246_v51  ;;  %v2250_v34 = vmul.f32 0.5, %v2243_v31  ;;  %v2255_v35 = vmul.f32 0.5, %v2245_v29 }
 0xb44   :  { %3118 = vtanh.f32 %v2250_v34  ;;  %v7370_v34 = vld [vmem:[%s7983_s4 + $0x1c0] sm:$0xff] }
 0xb45   :  { %3120 = vtanh.f32 %v2244_v27 }
 0xb46   :  { %3122 = vtanh.f32 %v2255_v35  ;;  %v7376_v35 = vld [vmem:[%s7983_s4 + $0x1d0] sm:$0xff] }
 0xb47   :  { %9560 = vst [vmem:[#allocation97_spill] sm:$0xff] %v7376_v35 }
 0xb4f   :  { %v3117_v37 = vpop.eup %3116 }
 0xb50   :  { %v2248_v41 = vadd.f32 1.0, %v3117_v37  ;;  %v7382_v37 = vld [vmem:[%s7983_s4 + $0x1a8] sm:$0xff] }
 0xb51   :  { %v3119_v30 = vpop.eup %3118  ;;  %9561 = vst [vmem:[#allocation98_spill] sm:$0xff] %v7382_v37 }
 0xb52   :  { %v2249_v39 = vmul.f32 0.5, %v2248_v41  ;;  %v2252_v61 = vadd.f32 1.0, %v3119_v30  ;;  %v3121_v46 = vpop.eup %3120  ;;  %v7388_v41 = vld [vmem:[%s7983_s4 + $0x1b8] sm:$0xff]  ;;  %v7394_v30 = vld [vmem:[%s7983_s4 + $0x1a0] sm:$0xff] }
 0xb53   :  { %v3123_v29 = vpop.eup %3122  ;;  %9562 = vst [vmem:[#allocation99_spill] sm:$0xff] %v7388_v41  ;;  %9563 = vst [vmem:[#allocation100_spill] sm:$0xff] %v7394_v30 }
 0xb54   :  { %v2253_v23 = vmul.f32 0.5, %v2252_v61  ;;  %v2260_v3 = vmul.f32 %v3121_v46, %v2249_v39  ;;  %v2257_v22 = vadd.f32 1.0, %v3123_v29  ;;  %v7352_v46 = vld [vmem:[%s7983_s4 + $0x1f0] sm:$0xff]  ;;  %v7364_v61 = vld [vmem:[%s7983_s4 + $0x1d8] sm:$0xff]  ;;  %v7418_v29 = vld [vmem:[%s7983_s4 + $0x180] sm:$0xff] }
 0xb55   :  { %v7400_v39 = vld [vmem:[%s7983_s4 + $0x1b0] sm:$0xff]  ;;  %9567 = vst [vmem:[#allocation104_spill] sm:$0xff] %v7418_v29 }
 0xb56   :  { %v2259_v51 = vmul.f32 %v2253_v23, %v6835_v9  ;;  %v2258_v28 = vmul.f32 0.5, %v2257_v22  ;;  %v7346_v9 = vld [vmem:[%s7983_s4 + $0x1e0] sm:$0xff]  ;;  %v7358_v23 = vld [vmem:[%s7983_s4 + $0x1c8] sm:$0xff]  ;;  %9564 = vst [vmem:[#allocation101_spill] sm:$0xff] %v7400_v39  ;;  %v7424_v22 = vld [vmem:[%s7983_s4 + $0x190] sm:$0xff] }
 0xb57   :  { %9568 = vst [vmem:[#allocation105_spill] sm:$0xff] %v7424_v22 }
 0xb58   :  { %v7333_v24 = vadd.f32 %v2260_v3, %v2259_v51  ;;  %v7406_v51 = vld [vmem:[%s7983_s4 + $0x188] sm:$0xff]  ;;  %v7412_v3 = vld [vmem:[%s7983_s4 + $0x198] sm:$0xff] }
 0xb59   :  { %9565 = vst [vmem:[#allocation102_spill] sm:$0xff] %v7406_v51  ;;  %9566 = vst [vmem:[#allocation103_spill] sm:$0xff] %v7412_v3 }
 0xb5a   :  { %3124 = vtanh.f32 %v7333_v24  ;;  %2984 = vst [vmem:[%s7985_s6 + $0xb0] sm:$0xff] %v7333_v24 }
 0xb67   :  { %v3125_v27 = vpop.eup %3124 }
 0xb68   :  { %v2263_v31 = vmul.f32 %v3125_v27, %v2258_v28  ;;  %v7430_v28 = vld [vmem:[%s7983_s4 + $0x168] sm:$0xff]  ;;  %v7436_v27 = vld [vmem:[%s7983_s4 + $0x178] sm:$0xff] }
 0xb69   :  { %9569 = vst [vmem:[#allocation106_spill] sm:$0xff] %v7430_v28  ;;  %9570 = vst [vmem:[#allocation107_spill] sm:$0xff] %v7436_v27 }
 0xb6a   :  { %2982 = vst [vmem:[%s7985_s6 + $0xa0] sm:$0xff] %v2263_v31  ;;  %2334 = vmatmul.mubr.f32.vlgmr.msra.gmra.mxu0 %v2263_v31  ;;  %2405 = vmatmul.mubr.f32.vlgmr.msra.gmra.mxu1 %v2263_v31  ;;  %v7442_v31 = vld [vmem:[%s7983_s4 + $0x160] sm:$0xff] }
 0xb6b   :  { %2435 = vmatpush1.msra.mxu0 %v7346_v9  ;;  %2506 = vmatpush1.msra.mxu1 %v7352_v46  ;;  %9571 = vst [vmem:[#allocation108_spill] sm:$0xff] %v7442_v31 }
 0xb6c   :  { %2436 = vmatprep.subr.mxu0 %v7358_v23  ;;  %2507 = vmatprep.subr.mxu1 %v7364_v61 }
 0xb6d   :  { %2437 = vmatpush1.msra.mxu0 %v7370_v34  ;;  %2508 = vmatpush1.msra.mxu1 %v7376_v35 }
 0xb6e   :  { %2438 = vmatprep.subr.mxu0 %v7382_v37  ;;  %2509 = vmatprep.subr.mxu1 %v7388_v41 }
 0xb6f   :  { %2439 = vmatpush1.msra.mxu0 %v7394_v30  ;;  %2510 = vmatpush1.msra.mxu1 %v7400_v39 }
 0xb70   :  { %2440 = vmatprep.subr.mxu0 %v7406_v51  ;;  %2511 = vmatprep.subr.mxu1 %v7412_v3 }
 0xb71   :  { %2441 = vmatpush1.msra.mxu0 %v7418_v29  ;;  %2512 = vmatpush1.msra.mxu1 %v7424_v22  ;;  %v7448_v22 = vld [vmem:[%s7983_s4 + $0x170] sm:$0xff] }
 0xb72   :  { %2442 = vmatprep.subr.mxu0 %v7430_v28  ;;  %2513 = vmatprep.subr.mxu1 %v7436_v27  ;;  %9572 = vst [vmem:[#allocation109_spill] sm:$0xff] %v7448_v22  ;;  %v7454_v28 = vld [vmem:[%s7983_s4 + $0x148] sm:$0xff]  ;;  %v7460_v27 = vld [vmem:[%s7983_s4 + $0x158] sm:$0xff] }
 0xb73   :  { %2443 = vmatpush1.msra.mxu0 %v7442_v31  ;;  %2514 = vmatpush1.msra.mxu1 %v7448_v22  ;;  %9573 = vst [vmem:[#allocation110_spill] sm:$0xff] %v7454_v28  ;;  %9574 = vst [vmem:[#allocation111_spill] sm:$0xff] %v7460_v27  ;;  %v7466_v31 = vld [vmem:[%s7983_s4 + $0x140] sm:$0xff]  ;;  %v7472_v22 = vld [vmem:[%s7983_s4 + $0x150] sm:$0xff] }
 0xb74   :  { %2444 = vmatprep.subr.mxu0 %v7454_v28  ;;  %2515 = vmatprep.subr.mxu1 %v7460_v27  ;;  %9575 = vst [vmem:[#allocation112_spill] sm:$0xff] %v7466_v31  ;;  %9576 = vst [vmem:[#allocation113_spill] sm:$0xff] %v7472_v22  ;;  %v7478_v28 = vld [vmem:[%s7983_s4 + $0x128] sm:$0xff]  ;;  %v7484_v27 = vld [vmem:[%s7983_s4 + $0x138] sm:$0xff] }
 0xb75   :  { %2445 = vmatpush1.msra.mxu0 %v7466_v31  ;;  %2516 = vmatpush1.msra.mxu1 %v7472_v22  ;;  %9577 = vst [vmem:[#allocation114_spill] sm:$0xff] %v7478_v28  ;;  %9578 = vst [vmem:[#allocation115_spill] sm:$0xff] %v7484_v27  ;;  %v7490_v31 = vld [vmem:[%s7983_s4 + $0x120] sm:$0xff]  ;;  %v7496_v22 = vld [vmem:[%s7983_s4 + $0x130] sm:$0xff] }
 0xb76   :  { %2446 = vmatprep.subr.mxu0 %v7478_v28  ;;  %2517 = vmatprep.subr.mxu1 %v7484_v27  ;;  %9579 = vst [vmem:[#allocation116_spill] sm:$0xff] %v7490_v31  ;;  %9580 = vst [vmem:[#allocation117_spill] sm:$0xff] %v7496_v22  ;;  %v7502_v28 = vld [vmem:[%s7983_s4 + $0x108] sm:$0xff]  ;;  %v7508_v27 = vld [vmem:[%s7983_s4 + $0x118] sm:$0xff] }
 0xb77   :  { %2447 = vmatpush1.msra.mxu0 %v7490_v31  ;;  %2518 = vmatpush1.msra.mxu1 %v7496_v22  ;;  %9581 = vst [vmem:[#allocation118_spill] sm:$0xff] %v7502_v28  ;;  %9582 = vst [vmem:[#allocation119_spill] sm:$0xff] %v7508_v27  ;;  %v7514_v31 = vld [vmem:[%s7983_s4 + $0x100] sm:$0xff]  ;;  %v7520_v22 = vld [vmem:[%s7983_s4 + $0x110] sm:$0xff] }
 0xb78   :  { %2448 = vmatprep.subr.mxu0 %v7502_v28  ;;  %2519 = vmatprep.subr.mxu1 %v7508_v27  ;;  %9583 = vst [vmem:[#allocation120_spill] sm:$0xff] %v7514_v31  ;;  %9584 = vst [vmem:[#allocation121_spill] sm:$0xff] %v7520_v22  ;;  %v7526_v28 = vld [vmem:[%s7983_s4 + $0xe8] sm:$0xff]  ;;  %v7532_v27 = vld [vmem:[%s7983_s4 + $0xf8] sm:$0xff] }
 0xb79   :  { %2449 = vmatpush1.msra.mxu0 %v7514_v31  ;;  %2520 = vmatpush1.msra.mxu1 %v7520_v22  ;;  %9585 = vst [vmem:[#allocation122_spill] sm:$0xff] %v7526_v28  ;;  %9586 = vst [vmem:[#allocation123_spill] sm:$0xff] %v7532_v27  ;;  %v7538_v31 = vld [vmem:[%s7983_s4 + $0xe0] sm:$0xff]  ;;  %v7544_v22 = vld [vmem:[%s7983_s4 + $0xf0] sm:$0xff] }
 0xb7a   :  { %2450 = vmatprep.subr.mxu0 %v7526_v28  ;;  %2521 = vmatprep.subr.mxu1 %v7532_v27  ;;  %9587 = vst [vmem:[#allocation124_spill] sm:$0xff] %v7538_v31  ;;  %9588 = vst [vmem:[#allocation125_spill] sm:$0xff] %v7544_v22  ;;  %v7550_v28 = vld [vmem:[%s7983_s4 + $0xc8] sm:$0xff]  ;;  %v7556_v27 = vld [vmem:[%s7983_s4 + $0xd8] sm:$0xff] }
 0xb7b   :  { %2451 = vmatpush1.msra.mxu0 %v7538_v31  ;;  %2522 = vmatpush1.msra.mxu1 %v7544_v22  ;;  %9589 = vst [vmem:[#allocation126_spill] sm:$0xff] %v7550_v28  ;;  %9590 = vst [vmem:[#allocation127_spill] sm:$0xff] %v7556_v27  ;;  %v7562_v31 = vld [vmem:[%s7983_s4 + $0xc0] sm:$0xff]  ;;  %v7568_v22 = vld [vmem:[%s7983_s4 + $0xd0] sm:$0xff] }
 0xb7c   :  { %2452 = vmatprep.subr.mxu0 %v7550_v28  ;;  %2523 = vmatprep.subr.mxu1 %v7556_v27  ;;  %9591 = vst [vmem:[#allocation128_spill] sm:$0xff] %v7562_v31  ;;  %9592 = vst [vmem:[#allocation129_spill] sm:$0xff] %v7568_v22  ;;  %v7574_v28 = vld [vmem:[%s7983_s4 + $0xa8] sm:$0xff]  ;;  %v7580_v27 = vld [vmem:[%s7983_s4 + $0xb8] sm:$0xff] }
 0xb7d   :  { %2453 = vmatpush1.msra.mxu0 %v7562_v31  ;;  %2524 = vmatpush1.msra.mxu1 %v7568_v22  ;;  %9593 = vst [vmem:[#allocation130_spill] sm:$0xff] %v7574_v28  ;;  %9594 = vst [vmem:[#allocation131_spill] sm:$0xff] %v7580_v27  ;;  %v7586_v31 = vld [vmem:[%s7983_s4 + $0xa0] sm:$0xff]  ;;  %v7592_v22 = vld [vmem:[%s7983_s4 + $0xb0] sm:$0xff] }
 0xb7e   :  { %2454 = vmatprep.subr.mxu0 %v7574_v28  ;;  %2525 = vmatprep.subr.mxu1 %v7580_v27  ;;  %9595 = vst [vmem:[#allocation132_spill] sm:$0xff] %v7586_v31  ;;  %9596 = vst [vmem:[#allocation133_spill] sm:$0xff] %v7592_v22  ;;  %v7598_v28 = vld [vmem:[%s7983_s4 + $0x88] sm:$0xff]  ;;  %v7604_v27 = vld [vmem:[%s7983_s4 + $0x98] sm:$0xff] }
 0xb7f   :  { %2455 = vmatpush1.msra.mxu0 %v7586_v31  ;;  %2526 = vmatpush1.msra.mxu1 %v7592_v22  ;;  %9597 = vst [vmem:[#allocation134_spill] sm:$0xff] %v7598_v28  ;;  %9598 = vst [vmem:[#allocation135_spill] sm:$0xff] %v7604_v27  ;;  %v7610_v31 = vld [vmem:[%s7983_s4 + $0x80] sm:$0xff]  ;;  %v7616_v22 = vld [vmem:[%s7983_s4 + $0x90] sm:$0xff] }
 0xb80   :  { %2456 = vmatprep.subr.mxu0 %v7598_v28  ;;  %2527 = vmatprep.subr.mxu1 %v7604_v27  ;;  %9599 = vst [vmem:[#allocation136_spill] sm:$0xff] %v7610_v31  ;;  %9600 = vst [vmem:[#allocation137_spill] sm:$0xff] %v7616_v22  ;;  %v7622_v28 = vld [vmem:[%s7983_s4 + $0x68] sm:$0xff]  ;;  %v7628_v27 = vld [vmem:[%s7983_s4 + $0x78] sm:$0xff] }
 0xb81   :  { %2457 = vmatpush1.msra.mxu0 %v7610_v31  ;;  %2528 = vmatpush1.msra.mxu1 %v7616_v22  ;;  %9601 = vst [vmem:[#allocation138_spill] sm:$0xff] %v7622_v28  ;;  %9602 = vst [vmem:[#allocation139_spill] sm:$0xff] %v7628_v27  ;;  %v7634_v31 = vld [vmem:[%s7983_s4 + $0x60] sm:$0xff]  ;;  %v7640_v22 = vld [vmem:[%s7983_s4 + $0x70] sm:$0xff] }
 0xb82   :  { %2458 = vmatprep.subr.mxu0 %v7622_v28  ;;  %2529 = vmatprep.subr.mxu1 %v7628_v27  ;;  %9603 = vst [vmem:[#allocation140_spill] sm:$0xff] %v7634_v31  ;;  %9604 = vst [vmem:[#allocation141_spill] sm:$0xff] %v7640_v22  ;;  %v7646_v28 = vld [vmem:[%s7983_s4 + $0x48] sm:$0xff]  ;;  %v7652_v27 = vld [vmem:[%s7983_s4 + $0x58] sm:$0xff] }
 0xb83   :  { %2459 = vmatpush1.msra.mxu0 %v7634_v31  ;;  %2530 = vmatpush1.msra.mxu1 %v7640_v22  ;;  %9605 = vst [vmem:[#allocation142_spill] sm:$0xff] %v7646_v28  ;;  %9606 = vst [vmem:[#allocation143_spill] sm:$0xff] %v7652_v27  ;;  %v7658_v31 = vld [vmem:[%s7983_s4 + $0x40] sm:$0xff]  ;;  %v7664_v22 = vld [vmem:[%s7983_s4 + $0x50] sm:$0xff] }
 0xb84   :  { %2460 = vmatprep.subr.mxu0 %v7646_v28  ;;  %2531 = vmatprep.subr.mxu1 %v7652_v27  ;;  %9607 = vst [vmem:[#allocation144_spill] sm:$0xff] %v7658_v31  ;;  %9608 = vst [vmem:[#allocation145_spill] sm:$0xff] %v7664_v22  ;;  %v7670_v28 = vld [vmem:[%s7983_s4 + $0x28] sm:$0xff]  ;;  %v7676_v27 = vld [vmem:[%s7983_s4 + $0x38] sm:$0xff] }
 0xb85   :  { %2461 = vmatpush1.msra.mxu0 %v7658_v31  ;;  %2532 = vmatpush1.msra.mxu1 %v7664_v22  ;;  %9609 = vst [vmem:[#allocation146_spill] sm:$0xff] %v7670_v28  ;;  %9610 = vst [vmem:[#allocation147_spill] sm:$0xff] %v7676_v27  ;;  %v7682_v31 = vld [vmem:[%s7983_s4 + $0x20] sm:$0xff]  ;;  %v7688_v22 = vld [vmem:[%s7983_s4 + $0x30] sm:$0xff] }
 0xb86   :  { %2462 = vmatprep.subr.mxu0 %v7670_v28  ;;  %2533 = vmatprep.subr.mxu1 %v7676_v27  ;;  %9611 = vst [vmem:[#allocation148_spill] sm:$0xff] %v7682_v31  ;;  %9612 = vst [vmem:[#allocation149_spill] sm:$0xff] %v7688_v22  ;;  %v7694_v28 = vld [vmem:[%s7983_s4 + $0x8] sm:$0xff]  ;;  %v7700_v27 = vld [vmem:[%s7983_s4 + $0x18] sm:$0xff] }
 0xb87   :  { %2463 = vmatpush1.msra.mxu0 %v7682_v31  ;;  %2534 = vmatpush1.msra.mxu1 %v7688_v22  ;;  %9613 = vst [vmem:[#allocation150_spill] sm:$0xff] %v7694_v28  ;;  %9614 = vst [vmem:[#allocation151_spill] sm:$0xff] %v7700_v27  ;;  %v7706_v31 = vld [vmem:[%s7983_s4] sm:$0xff] }
 0xb88   :  { %2464 = vmatprep.subr.mxu0 %v7694_v28  ;;  %2535 = vmatprep.subr.mxu1 %v7700_v27  ;;  %9615 = vst [vmem:[#allocation152_spill] sm:$0xff] %v7706_v31  ;;  %v7713_v28 = vld [vmem:[%s7983_s4 + $0x10] sm:$0xff] }
 0xb89   :  { %2465 = vmatpush1.msra.mxu0 %v7706_v31  ;;  %2498 = vmatprep.mubr.f32.mxu0 %v9467_v26  ;;  %9616 = vst [vmem:[#allocation154_spill] sm:$0xff] %v7713_v28 }
 0xb8a   :  { %2536 = vmatpush1.msra.mxu1 %v7713_v28  ;;  %2569 = vmatprep.mubr.f32.mxu1 %v9467_v26 }
 0xb8b   :  { %2603 = vmatprep.subr.mxu0 %v6909_v17  ;;  %2674 = vmatprep.subr.mxu1 %v6912_v0 }
 0xc2a   :  { %v2335_v27 = vpop.f32.mrf.mxu0  ;;  %v2406_v51 = vpop.f32.mrf.mxu1 }
 0xc2b   :  { %v2336_v22 = vadd.f32 %v2335_v27, %v9469_v1  ;;  %v2407_v30 = vadd.f32 %v2406_v51, %v4592_v55  ;;  %v9658_v51 = vld [vmem:[#allocation50_spill] sm:$0xff] }
 0xc2c   :  { %v2337_v29 = vpop.f32.mrf.mxu0  ;;  %v2408_v28 = vpop.f32.mrf.mxu1 }
 0xc2d   :  { %v2411_v31 = vmul.f32 0.5, %v2336_v22  ;;  %v2338_v3 = vadd.f32 %v2337_v29, %v4589_v57  ;;  %v2409_v26 = vadd.f32 %v2408_v28, %v4596_v63  ;;  %v9659_v28 = vld [vmem:[#allocation47_spill] sm:$0xff] }
 0xc2f   :  { %3126 = vtanh.f32 %v2411_v31  ;;  %v2415_v39 = vmul.f32 0.5, %v2338_v3  ;;  %v2420_v17 = vmul.f32 0.5, %v2409_v26 }
 0xc31   :  { %3128 = vtanh.f32 %v2415_v39 }
 0xc32   :  { %3130 = vtanh.f32 %v2407_v30 }
 0xc33   :  { %3132 = vtanh.f32 %v2420_v17  ;;  %v9660_v17 = vld [vmem:[#allocation52_spill] sm:$0xff] }
 0xc3c   :  { %v3127_v41 = vpop.eup %3126 }
 0xc3d   :  { %v2413_v0 = vadd.f32 1.0, %v3127_v41 }
 0xc3e   :  { %v3129_v37 = vpop.eup %3128 }
 0xc3f   :  { %v2414_v35 = vmul.f32 0.5, %v2413_v0  ;;  %v2417_v27 = vadd.f32 1.0, %v3129_v37  ;;  %v3131_v1 = vpop.eup %3130  ;;  %v9661_v0 = vld [vmem:[#allocation49_spill] sm:$0xff] }
 0xc40   :  { %v3133_v26 = vpop.eup %3132 }
 0xc41   :  { %v2418_v22 = vmul.f32 0.5, %v2417_v27  ;;  %v2425_v31 = vmul.f32 %v3131_v1, %v2414_v35  ;;  %v2422_v41 = vadd.f32 1.0, %v3133_v26  ;;  %v9617_v1 = vld [vmem:[#allocation7_spill] sm:$0xff]  ;;  %v9657_v35 = vld [vmem:[#allocation45_spill] sm:$0xff]  ;;  %v9662_v27 = vld [vmem:[#allocation54_spill] sm:$0xff] }
 0xc42   :  { %v9666_v26 = vld [vmem:[#allocation58_spill] sm:$0xff] }
 0xc43   :  { %v2424_v29 = vmul.f32 %v2418_v22, %v6920_v32  ;;  %v2423_v30 = vmul.f32 0.5, %v2422_v41  ;;  %v9618_v32 = vld [vmem:[#allocation10_spill] sm:$0xff]  ;;  %v9663_v22 = vld [vmem:[#allocation51_spill] sm:$0xff] }
 0xc44   :  { %v9667_v41 = vld [vmem:[#allocation55_spill] sm:$0xff] }
 0xc45   :  { %v7724_v3 = vadd.f32 %v2425_v31, %v2424_v29  ;;  %v9664_v29 = vld [vmem:[#allocation56_spill] sm:$0xff]  ;;  %v9665_v31 = vld [vmem:[#allocation53_spill] sm:$0xff] }
 0xc47   :  { %3134 = vtanh.f32 %v7724_v3  ;;  %2993 = vst [vmem:[%s7985_s6 + $0xd8] sm:$0xff] %v7724_v3 }
 0xc54   :  { %v3135_v39 = vpop.eup %3134 }
 0xc55   :  { %v2428_v37 = vmul.f32 %v3135_v39, %v2423_v30  ;;  %v9668_v30 = vld [vmem:[#allocation60_spill] sm:$0xff]  ;;  %v9669_v39 = vld [vmem:[#allocation57_spill] sm:$0xff] }
 0xc57   :  { %2991 = vst [vmem:[%s7985_s6 + $0xc8] sm:$0xff] %v2428_v37  ;;  %2499 = vmatmul.mubr.f32.vlgmr.msra.gmra.mxu0 %v2428_v37  ;;  %2570 = vmatmul.mubr.f32.vlgmr.msra.gmra.mxu1 %v2428_v37 }
 0xc58   :  { %2667 = vmatprep.mubr.f32.mxu0 %v2428_v37  ;;  %2738 = vmatprep.mubr.f32.mxu1 %v2428_v37  ;;  %v9670_v37 = vld [vmem:[#allocation62_spill] sm:$0xff] }
 0xc59   :  { %2604 = vmatpush1.msra.mxu0 %v6930_v59  ;;  %2675 = vmatpush1.msra.mxu1 %v6933_v42  ;;  %v9619_v59 = vld [vmem:[#allocation8_spill] sm:$0xff] }
 0xc5a   :  { %2605 = vmatprep.subr.mxu0 %v6936_v43  ;;  %2676 = vmatprep.subr.mxu1 %v6939_v52  ;;  %v9620_v42 = vld [vmem:[#allocation12_spill] sm:$0xff]  ;;  %v9621_v43 = vld [vmem:[#allocation9_spill] sm:$0xff]  ;;  %v9622_v52 = vld [vmem:[#allocation14_spill] sm:$0xff] }
 0xc5b   :  { %2606 = vmatpush1.msra.mxu0 %v6942_v12  ;;  %2677 = vmatpush1.msra.mxu1 %v6945_v13  ;;  %v9623_v12 = vld [vmem:[#allocation11_spill] sm:$0xff]  ;;  %v9624_v13 = vld [vmem:[#allocation16_spill] sm:$0xff] }
 0xc5c   :  { %2607 = vmatprep.subr.mxu0 %v6948_v14  ;;  %2678 = vmatprep.subr.mxu1 %v6951_v49  ;;  %v9625_v14 = vld [vmem:[#allocation13_spill] sm:$0xff]  ;;  %v9626_v49 = vld [vmem:[#allocation18_spill] sm:$0xff] }
 0xc5d   :  { %2608 = vmatpush1.msra.mxu0 %v6954_v50  ;;  %2679 = vmatpush1.msra.mxu1 %v6957_v54  ;;  %v9627_v50 = vld [vmem:[#allocation15_spill] sm:$0xff]  ;;  %v9628_v54 = vld [vmem:[#allocation20_spill] sm:$0xff] }
 0xc5e   :  { %2609 = vmatprep.subr.mxu0 %v6960_v38  ;;  %2680 = vmatprep.subr.mxu1 %v6963_v20  ;;  %v9629_v38 = vld [vmem:[#allocation17_spill] sm:$0xff]  ;;  %v9630_v20 = vld [vmem:[#allocation22_spill] sm:$0xff] }
 0xc5f   :  { %2610 = vmatpush1.msra.mxu0 %v6966_v60  ;;  %2681 = vmatpush1.msra.mxu1 %v6969_v58  ;;  %v9631_v60 = vld [vmem:[#allocation19_spill] sm:$0xff]  ;;  %v9632_v58 = vld [vmem:[#allocation24_spill] sm:$0xff] }
 0xc60   :  { %2611 = vmatprep.subr.mxu0 %v6972_v47  ;;  %2682 = vmatprep.subr.mxu1 %v6975_v53  ;;  %v9633_v47 = vld [vmem:[#allocation21_spill] sm:$0xff]  ;;  %v9634_v53 = vld [vmem:[#allocation26_spill] sm:$0xff] }
 0xc61   :  { %2612 = vmatpush1.msra.mxu0 %v6978_v36  ;;  %2683 = vmatpush1.msra.mxu1 %v6981_v4  ;;  %v9635_v36 = vld [vmem:[#allocation23_spill] sm:$0xff]  ;;  %v9636_v4 = vld [vmem:[#allocation28_spill] sm:$0xff] }
 0xc62   :  { %2613 = vmatprep.subr.mxu0 %v6984_v56  ;;  %2684 = vmatprep.subr.mxu1 %v6987_v2  ;;  %v9637_v56 = vld [vmem:[#allocation25_spill] sm:$0xff]  ;;  %v9638_v2 = vld [vmem:[#allocation30_spill] sm:$0xff] }
 0xc63   :  { %2614 = vmatpush1.msra.mxu0 %v6990_v62  ;;  %2685 = vmatpush1.msra.mxu1 %v6993_v40  ;;  %v9639_v62 = vld [vmem:[#allocation27_spill] sm:$0xff]  ;;  %v9640_v40 = vld [vmem:[#allocation32_spill] sm:$0xff] }
 0xc64   :  { %2615 = vmatprep.subr.mxu0 %v6996_v48  ;;  %2686 = vmatprep.subr.mxu1 %v6999_v19  ;;  %v9641_v48 = vld [vmem:[#allocation29_spill] sm:$0xff]  ;;  %v9642_v19 = vld [vmem:[#allocation34_spill] sm:$0xff] }
 0xc65   :  { %2616 = vmatpush1.msra.mxu0 %v7002_v6  ;;  %2687 = vmatpush1.msra.mxu1 %v7005_v7  ;;  %v9643_v6 = vld [vmem:[#allocation31_spill] sm:$0xff]  ;;  %v9644_v7 = vld [vmem:[#allocation36_spill] sm:$0xff] }
 0xc66   :  { %2617 = vmatprep.subr.mxu0 %v7008_v8  ;;  %2688 = vmatprep.subr.mxu1 %v7011_v10  ;;  %v9645_v8 = vld [vmem:[#allocation33_spill] sm:$0xff]  ;;  %v9646_v10 = vld [vmem:[#allocation38_spill] sm:$0xff] }
 0xc67   :  { %2618 = vmatpush1.msra.mxu0 %v7014_v11  ;;  %2689 = vmatpush1.msra.mxu1 %v7017_v21  ;;  %v9647_v11 = vld [vmem:[#allocation35_spill] sm:$0xff]  ;;  %v9648_v21 = vld [vmem:[#allocation40_spill] sm:$0xff] }
 0xc68   :  { %2619 = vmatprep.subr.mxu0 %v7020_v5  ;;  %2690 = vmatprep.subr.mxu1 %v7023_v18  ;;  %v9649_v5 = vld [vmem:[#allocation37_spill] sm:$0xff]  ;;  %v9650_v18 = vld [vmem:[#allocation42_spill] sm:$0xff] }
 0xc69   :  { %2620 = vmatpush1.msra.mxu0 %v7026_v16  ;;  %2691 = vmatpush1.msra.mxu1 %v7029_v15  ;;  %v9651_v16 = vld [vmem:[#allocation39_spill] sm:$0xff]  ;;  %v9652_v15 = vld [vmem:[#allocation44_spill] sm:$0xff] }
 0xc6a   :  { %2621 = vmatprep.subr.mxu0 %v7032_v33  ;;  %2692 = vmatprep.subr.mxu1 %v7035_v25  ;;  %v9653_v33 = vld [vmem:[#allocation41_spill] sm:$0xff]  ;;  %v9654_v25 = vld [vmem:[#allocation46_spill] sm:$0xff] }
 0xc6b   :  { %2622 = vmatpush1.msra.mxu0 %v7038_v44  ;;  %2693 = vmatpush1.msra.mxu1 %v7041_v45  ;;  %v9655_v44 = vld [vmem:[#allocation43_spill] sm:$0xff]  ;;  %v9656_v45 = vld [vmem:[#allocation48_spill] sm:$0xff] }
 0xc6c   :  { %2623 = vmatprep.subr.mxu0 %v9617_v1  ;;  %2694 = vmatprep.subr.mxu1 %v9618_v32  ;;  %v9671_v1 = vld [vmem:[#allocation59_spill] sm:$0xff]  ;;  %v9672_v32 = vld [vmem:[#allocation64_spill] sm:$0xff] }
 0xc6d   :  { %2624 = vmatpush1.msra.mxu0 %v9619_v59  ;;  %2695 = vmatpush1.msra.mxu1 %v9620_v42  ;;  %v9673_v59 = vld [vmem:[#allocation61_spill] sm:$0xff]  ;;  %v9674_v42 = vld [vmem:[#allocation66_spill] sm:$0xff] }
 0xc6e   :  { %2625 = vmatprep.subr.mxu0 %v9621_v43  ;;  %2696 = vmatprep.subr.mxu1 %v9622_v52  ;;  %v9675_v43 = vld [vmem:[#allocation63_spill] sm:$0xff]  ;;  %v9676_v52 = vld [vmem:[#allocation68_spill] sm:$0xff] }
 0xc6f   :  { %2626 = vmatpush1.msra.mxu0 %v9623_v12  ;;  %2697 = vmatpush1.msra.mxu1 %v9624_v13  ;;  %v9677_v12 = vld [vmem:[#allocation65_spill] sm:$0xff]  ;;  %v9678_v13 = vld [vmem:[#allocation70_spill] sm:$0xff] }
 0xc70   :  { %2627 = vmatprep.subr.mxu0 %v9625_v14  ;;  %2698 = vmatprep.subr.mxu1 %v9626_v49  ;;  %v9679_v14 = vld [vmem:[#allocation67_spill] sm:$0xff]  ;;  %v9680_v49 = vld [vmem:[#allocation72_spill] sm:$0xff] }
 0xc71   :  { %2628 = vmatpush1.msra.mxu0 %v9627_v50  ;;  %2699 = vmatpush1.msra.mxu1 %v9628_v54  ;;  %v9681_v50 = vld [vmem:[#allocation69_spill] sm:$0xff]  ;;  %v9682_v54 = vld [vmem:[#allocation74_spill] sm:$0xff] }
 0xc72   :  { %2629 = vmatprep.subr.mxu0 %v9629_v38  ;;  %2700 = vmatprep.subr.mxu1 %v9630_v20  ;;  %v9683_v38 = vld [vmem:[#allocation71_spill] sm:$0xff]  ;;  %v9684_v20 = vld [vmem:[#allocation76_spill] sm:$0xff] }
 0xc73   :  { %2630 = vmatpush1.msra.mxu0 %v9631_v60  ;;  %2701 = vmatpush1.msra.mxu1 %v9632_v58  ;;  %v9685_v60 = vld [vmem:[#allocation73_spill] sm:$0xff]  ;;  %v9686_v58 = vld [vmem:[#allocation79_spill] sm:$0xff] }
 0xc74   :  { %2631 = vmatprep.subr.mxu0 %v9633_v47  ;;  %2702 = vmatprep.subr.mxu1 %v9634_v53  ;;  %v9687_v47 = vld [vmem:[#allocation75_spill] sm:$0xff]  ;;  %v9688_v53 = vld [vmem:[#allocation81_spill] sm:$0xff] }
 0xc75   :  { %2632 = vmatpush1.msra.mxu0 %v9635_v36  ;;  %2703 = vmatpush1.msra.mxu1 %v9636_v4  ;;  %v9689_v36 = vld [vmem:[#allocation77_spill] sm:$0xff]  ;;  %v9690_v4 = vld [vmem:[#allocation83_spill] sm:$0xff] }
 0xc76   :  { %2633 = vmatprep.subr.mxu0 %v9637_v56  ;;  %2704 = vmatprep.subr.mxu1 %v9638_v2  ;;  %v9691_v56 = vld [vmem:[#allocation78_spill] sm:$0xff]  ;;  %v9692_v2 = vld [vmem:[#allocation85_spill] sm:$0xff] }
 0xc77   :  { %2634 = vmatpush1.msra.mxu0 %v9639_v62  ;;  %2705 = vmatpush1.msra.mxu1 %v9640_v40  ;;  %v9693_v62 = vld [vmem:[#allocation80_spill] sm:$0xff]  ;;  %v9694_v40 = vld [vmem:[#allocation86_spill] sm:$0xff] }
 0xc78   :  { %2635 = vmatprep.subr.mxu0 %v9641_v48  ;;  %2706 = vmatprep.subr.mxu1 %v9642_v19  ;;  %v9695_v48 = vld [vmem:[#allocation82_spill] sm:$0xff]  ;;  %v9696_v19 = vld [vmem:[#allocation87_spill] sm:$0xff] }
 0xc79   :  { %2636 = vmatpush2.msra.mxu0 %v9643_v6  ;;  %2707 = vmatpush2.msra.mxu1 %v9644_v7  ;;  %v9697_v6 = vld [vmem:[#allocation84_spill] sm:$0xff] }
 0xc7a   :  { %2637 = vmatprep.subr.mxu0 %v9645_v8  ;;  %2708 = vmatprep.subr.mxu1 %v9646_v10  ;;  %v9698_v7 = vld [vmem:[#allocation88_spill] sm:$0xff]  ;;  %v9699_v8 = vld [vmem:[#allocation89_spill] sm:$0xff]  ;;  %v9700_v10 = vld [vmem:[#allocation90_spill] sm:$0xff] }
 0xc7b   :  { %2638 = vmatpush2.msra.mxu0 %v9647_v11  ;;  %2709 = vmatpush2.msra.mxu1 %v9648_v21  ;;  %v9701_v11 = vld [vmem:[#allocation91_spill] sm:$0xff]  ;;  %v9702_v21 = vld [vmem:[#allocation92_spill] sm:$0xff] }
 0xc7c   :  { %2639 = vmatprep.subr.mxu0 %v9649_v5  ;;  %2710 = vmatprep.subr.mxu1 %v9650_v18  ;;  %v9703_v5 = vld [vmem:[#allocation93_spill] sm:$0xff]  ;;  %v9704_v18 = vld [vmem:[#allocation94_spill] sm:$0xff] }
 0xc7d   :  { %2640 = vmatpush2.msra.mxu0 %v9651_v16  ;;  %2711 = vmatpush2.msra.mxu1 %v9652_v15  ;;  %v9705_v16 = vld [vmem:[#allocation95_spill] sm:$0xff]  ;;  %v9706_v15 = vld [vmem:[#allocation96_spill] sm:$0xff] }
 0xc7e   :  { %2641 = vmatprep.subr.mxu0 %v9653_v33  ;;  %2712 = vmatprep.subr.mxu1 %v9654_v25  ;;  %v2986_v33 = vld [vmem:[%s7979_s0 + $0xc0] sm:$0xff] }
 0xc7f   :  { %2642 = vmatpush2.msra.mxu0 %v9655_v44  ;;  %2713 = vmatpush2.msra.mxu1 %v9656_v45  ;;  %v2987_v44 = vld [vmem:[%s7979_s0 + $0xc8] sm:$0xff] }
 0xc80   :  { %2643 = vmatprep.subr.mxu0 %v9657_v35  ;;  %2714 = vmatprep.subr.mxu1 %v9658_v51 }
 0xc81   :  { %2644 = vmatpush2.msra.mxu0 %v9659_v28  ;;  %2715 = vmatpush2.msra.mxu1 %v9660_v17  ;;  %v2988_v17 = vld [vmem:[%s7979_s0 + $0xd0] sm:$0xff] }
 0xc82   :  { %2645 = vmatprep.subr.mxu0 %v9661_v0  ;;  %2716 = vmatprep.subr.mxu1 %v9662_v27 }
 0xc83   :  { %2646 = vmatpush2.msra.mxu0 %v9663_v22  ;;  %2717 = vmatpush2.msra.mxu1 %v9664_v29  ;;  %v2989_v29 = vld [vmem:[%s7979_s0 + $0xd8] sm:$0xff] }
 0xc84   :  { %2647 = vmatprep.subr.mxu0 %v9665_v31  ;;  %2718 = vmatprep.subr.mxu1 %v9666_v26 }
 0xc85   :  { %2648 = vmatpush2.msra.mxu0 %v9667_v41  ;;  %2719 = vmatpush2.msra.mxu1 %v9668_v30 }
 0xc86   :  { %2649 = vmatprep.subr.mxu0 %v9669_v39  ;;  %2720 = vmatprep.subr.mxu1 %v9670_v37 }
 0xc87   :  { %2650 = vmatpush2.msra.mxu0 %v9671_v1  ;;  %2721 = vmatpush2.msra.mxu1 %v9672_v32 }
 0xc88   :  { %2651 = vmatprep.subr.mxu0 %v9673_v59  ;;  %2722 = vmatprep.subr.mxu1 %v9674_v42 }
 0xc89   :  { %2652 = vmatpush2.msra.mxu0 %v9675_v43  ;;  %2723 = vmatpush2.msra.mxu1 %v9676_v52 }
 0xc8a   :  { %2653 = vmatprep.subr.mxu0 %v9677_v12  ;;  %2724 = vmatprep.subr.mxu1 %v9678_v13 }
 0xc8b   :  { %2654 = vmatpush2.msra.mxu0 %v9679_v14  ;;  %2725 = vmatpush2.msra.mxu1 %v9680_v49 }
 0xc8c   :  { %2655 = vmatprep.subr.mxu0 %v9681_v50  ;;  %2726 = vmatprep.subr.mxu1 %v9682_v54 }
 0xc8d   :  { %2656 = vmatpush2.msra.mxu0 %v9683_v38  ;;  %2727 = vmatpush2.msra.mxu1 %v9684_v20  ;;  %v9708_v38 = vld [vmem:[#allocation98_spill] sm:$0xff]  ;;  %v9709_v20 = vld [vmem:[#allocation99_spill] sm:$0xff] }
 0xc8e   :  { %2657 = vmatprep.subr.mxu0 %v9685_v60  ;;  %2728 = vmatprep.subr.mxu1 %v9686_v58  ;;  %v9710_v60 = vld [vmem:[#allocation100_spill] sm:$0xff]  ;;  %v9711_v58 = vld [vmem:[#allocation101_spill] sm:$0xff] }
 0xc8f   :  { %2658 = vmatpush2.msra.mxu0 %v9687_v47  ;;  %2729 = vmatpush2.msra.mxu1 %v9688_v53  ;;  %v9712_v47 = vld [vmem:[#allocation102_spill] sm:$0xff]  ;;  %v9718_v53 = vld [vmem:[#allocation108_spill] sm:$0xff] }
 0xc90   :  { %2659 = vmatprep.subr.mxu0 %v9689_v36  ;;  %2730 = vmatprep.subr.mxu1 %v9690_v4  ;;  %v9719_v36 = vld [vmem:[#allocation109_spill] sm:$0xff]  ;;  %v9720_v4 = vld [vmem:[#allocation110_spill] sm:$0xff] }
 0xc91   :  { %2660 = vmatpush2.msra.mxu0 %v9691_v56  ;;  %2731 = vmatpush2.msra.mxu1 %v9692_v2  ;;  %v9721_v56 = vld [vmem:[#allocation111_spill] sm:$0xff]  ;;  %v9722_v2 = vld [vmem:[#allocation112_spill] sm:$0xff] }
 0xc92   :  { %2661 = vmatprep.subr.mxu0 %v9693_v62  ;;  %2732 = vmatprep.subr.mxu1 %v9694_v40  ;;  %v9723_v62 = vld [vmem:[#allocation113_spill] sm:$0xff]  ;;  %v9724_v40 = vld [vmem:[#allocation114_spill] sm:$0xff] }
 0xc93   :  { %2662 = vmatpush2.msra.mxu0 %v9695_v48  ;;  %2733 = vmatpush2.msra.mxu1 %v9696_v19  ;;  %v9725_v48 = vld [vmem:[#allocation115_spill] sm:$0xff]  ;;  %v9726_v19 = vld [vmem:[#allocation116_spill] sm:$0xff] }
 0xc94   :  { %2663 = vmatprep.subr.mxu0 %v9697_v6  ;;  %2734 = vmatprep.subr.mxu1 %v9698_v7  ;;  %v9727_v6 = vld [vmem:[#allocation117_spill] sm:$0xff]  ;;  %v9728_v7 = vld [vmem:[#allocation118_spill] sm:$0xff] }
 0xc95   :  { %2664 = vmatpush2.msra.mxu0 %v9699_v8  ;;  %2735 = vmatpush2.msra.mxu1 %v9700_v10  ;;  %v9729_v8 = vld [vmem:[#allocation119_spill] sm:$0xff]  ;;  %v9730_v10 = vld [vmem:[#allocation120_spill] sm:$0xff] }
 0xc96   :  { %2665 = vmatprep.subr.mxu0 %v9701_v11  ;;  %2736 = vmatprep.subr.mxu1 %v9702_v21  ;;  %v9731_v11 = vld [vmem:[#allocation121_spill] sm:$0xff]  ;;  %v9732_v21 = vld [vmem:[#allocation122_spill] sm:$0xff] }
 0xc97   :  { %2666 = vmatpush2.msra.mxu0 %v9703_v5  ;;  %2737 = vmatpush2.msra.mxu1 %v9704_v18  ;;  %v9733_v5 = vld [vmem:[#allocation123_spill] sm:$0xff]  ;;  %v9734_v18 = vld [vmem:[#allocation124_spill] sm:$0xff] }
 0xc98   :  { %2768 = vmatprep.subr.mxu0 %v9705_v16  ;;  %2839 = vmatprep.subr.mxu1 %v9706_v15  ;;  %v9735_v16 = vld [vmem:[#allocation125_spill] sm:$0xff]  ;;  %v9736_v15 = vld [vmem:[#allocation126_spill] sm:$0xff] }
 0xd17   :  { %v2500_v25 = vpop.f32.mrf.mxu0  ;;  %v2571_v0 = vpop.f32.mrf.mxu1 }
 0xd18   :  { %v2576_v45 = vadd.f32 %v2986_v33, %v2500_v25  ;;  %v2578_v22 = vadd.f32 %v2988_v17, %v2571_v0  ;;  %v9737_v33 = vld [vmem:[#allocation127_spill] sm:$0xff]  ;;  %v9738_v25 = vld [vmem:[#allocation128_spill] sm:$0xff]  ;;  %v9744_v17 = vld [vmem:[#allocation134_spill] sm:$0xff] }
 0xd19   :  { %v2502_v35 = vpop.f32.mrf.mxu0  ;;  %v2573_v31 = vpop.f32.mrf.mxu1  ;;  %v9745_v0 = vld [vmem:[#allocation135_spill] sm:$0xff] }
 0xd1a   :  { %v2580_v51 = vmul.f32 0.5, %v2576_v45  ;;  %v2577_v28 = vadd.f32 %v2987_v44, %v2502_v35  ;;  %v2579_v26 = vadd.f32 %v2989_v29, %v2573_v31  ;;  %v9739_v44 = vld [vmem:[#allocation129_spill] sm:$0xff]  ;;  %v9740_v45 = vld [vmem:[#allocation130_spill] sm:$0xff]  ;;  %v9741_v35 = vld [vmem:[#allocation131_spill] sm:$0xff] }
 0xd1b   :  { %v9748_v29 = vld [vmem:[#allocation138_spill] sm:$0xff]  ;;  %v9749_v31 = vld [vmem:[#allocation139_spill] sm:$0xff] }
 0xd1c   :  { %3136 = vtanh.f32 %v2580_v51  ;;  %v2584_v27 = vmul.f32 0.5, %v2577_v28  ;;  %v2589_v41 = vmul.f32 0.5, %v2579_v26  ;;  %v9742_v51 = vld [vmem:[#allocation132_spill] sm:$0xff]  ;;  %v9743_v28 = vld [vmem:[#allocation133_spill] sm:$0xff] }
 0xd1d   :  { %v9750_v26 = vld [vmem:[#allocation140_spill] sm:$0xff] }
 0xd1e   :  { %3138 = vtanh.f32 %v2584_v27  ;;  %v9746_v27 = vld [vmem:[#allocation136_spill] sm:$0xff] }
 0xd1f   :  { %3140 = vtanh.f32 %v2578_v22  ;;  %v9747_v22 = vld [vmem:[#allocation137_spill] sm:$0xff] }
 0xd20   :  { %3142 = vtanh.f32 %v2589_v41  ;;  %v9751_v41 = vld [vmem:[#allocation141_spill] sm:$0xff] }
 0xd29   :  { %v3137_v30 = vpop.eup %3136 }
 0xd2a   :  { %v2582_v39 = vadd.f32 1.0, %v3137_v30  ;;  %v9752_v30 = vld [vmem:[#allocation142_spill] sm:$0xff] }
 0xd2b   :  { %v3139_v37 = vpop.eup %3138 }
 0xd2c   :  { %v2583_v1 = vmul.f32 0.5, %v2582_v39  ;;  %v2586_v32 = vadd.f32 1.0, %v3139_v37  ;;  %v3141_v42 = vpop.eup %3140  ;;  %v9753_v39 = vld [vmem:[#allocation143_spill] sm:$0xff]  ;;  %v9754_v37 = vld [vmem:[#allocation144_spill] sm:$0xff] }
 0xd2d   :  { %v3143_v13 = vpop.eup %3142 }
 0xd2e   :  { %v2587_v59 = vmul.f32 0.5, %v2586_v32  ;;  %v2594_v52 = vmul.f32 %v3141_v42, %v2583_v1  ;;  %v2591_v14 = vadd.f32 1.0, %v3143_v13  ;;  %v9755_v1 = vld [vmem:[#allocation145_spill] sm:$0xff]  ;;  %v9756_v32 = vld [vmem:[#allocation146_spill] sm:$0xff]  ;;  %v9758_v42 = vld [vmem:[#allocation148_spill] sm:$0xff] }
 0xd2f   :  { %v9761_v13 = vld [vmem:[#allocation151_spill] sm:$0xff] }
 0xd30   :  { %v2593_v43 = vmul.f32 %v2587_v59, %v7333_v24  ;;  %v2592_v49 = vmul.f32 0.5, %v2591_v14  ;;  %v9707_v24 = vld [vmem:[#allocation97_spill] sm:$0xff]  ;;  %v9757_v59 = vld [vmem:[#allocation147_spill] sm:$0xff]  ;;  %v9762_v14 = vld [vmem:[#allocation152_spill] sm:$0xff] }
 0xd32   :  { %v7875_v12 = vadd.f32 %v2594_v52, %v2593_v43  ;;  %v9759_v43 = vld [vmem:[#allocation149_spill] sm:$0xff]  ;;  %v9760_v52 = vld [vmem:[#allocation150_spill] sm:$0xff] }
 0xd34   :  { %3144 = vtanh.f32 %v7875_v12  ;;  %2992 = vst [vmem:[%s7985_s6 + $0xd0] sm:$0xff] %v7875_v12 }
 0xd41   :  { %v3145_v50 = vpop.eup %3144 }
 0xd42   :  { %v2597_v54 = vmul.f32 %v3145_v50, %v2592_v49  ;;  %v9763_v49 = vmov 0.0   ;;  %v9764_v50 = vld [vmem:[#allocation154_spill] sm:$0xff] }
 0xd44   :  { %2990 = vst [vmem:[%s7985_s6 + $0xc0] sm:$0xff] %v2597_v54  ;;  %2668 = vmatmul.mubr.f32.vlgmr.msra.gmra.mxu0 %v2597_v54  ;;  %2739 = vmatmul.mubr.f32.vlgmr.msra.gmra.mxu1 %v2597_v54 }
 0xd45   :  { %2769 = vmatpush1.msra.mxu0 %v7346_v9  ;;  %2840 = vmatpush1.msra.mxu1 %v7352_v46  ;;  %v9713_v9 = vld [vmem:[#allocation103_spill] sm:$0xff]  ;;  %v9714_v46 = vld [vmem:[#allocation104_spill] sm:$0xff] }
 0xd46   :  { %2770 = vmatprep.subr.mxu0 %v7358_v23  ;;  %2841 = vmatprep.subr.mxu1 %v7364_v61  ;;  %v9715_v23 = vld [vmem:[#allocation105_spill] sm:$0xff]  ;;  %v9716_v61 = vld [vmem:[#allocation106_spill] sm:$0xff] }
 0xd47   :  { %2771 = vmatpush1.msra.mxu0 %v7370_v34  ;;  %2842 = vmatpush1.msra.mxu1 %v9707_v24  ;;  %v9717_v34 = vld [vmem:[#allocation107_spill] sm:$0xff]  ;;  %v9765_v24 = vld [vmem:[#allocation153_spill] sm:$0xff] }
 0xd48   :  { %2772 = vmatprep.subr.mxu0 %v9708_v38  ;;  %2843 = vmatprep.subr.mxu1 %v9709_v20 }
 0xd49   :  { %2773 = vmatpush1.msra.mxu0 %v9710_v60  ;;  %2844 = vmatpush1.msra.mxu1 %v9711_v58 }
 0xd4a   :  { %2774 = vmatprep.subr.mxu0 %v9712_v47  ;;  %2845 = vmatprep.subr.mxu1 %v9713_v9 }
 0xd4b   :  { %2775 = vmatpush1.msra.mxu0 %v9714_v46  ;;  %2846 = vmatpush1.msra.mxu1 %v9715_v23 }
 0xd4c   :  { %2776 = vmatprep.subr.mxu0 %v9716_v61  ;;  %2847 = vmatprep.subr.mxu1 %v9717_v34 }
 0xd4d   :  { %2777 = vmatpush1.msra.mxu0 %v9718_v53  ;;  %2848 = vmatpush1.msra.mxu1 %v9719_v36 }
 0xd4e   :  { %2778 = vmatprep.subr.mxu0 %v9720_v4  ;;  %2849 = vmatprep.subr.mxu1 %v9721_v56 }
 0xd4f   :  { %2779 = vmatpush1.msra.mxu0 %v9722_v2  ;;  %2850 = vmatpush1.msra.mxu1 %v9723_v62 }
 0xd50   :  { %2780 = vmatprep.subr.mxu0 %v9724_v40  ;;  %2851 = vmatprep.subr.mxu1 %v9725_v48 }
 0xd51   :  { %2781 = vmatpush1.msra.mxu0 %v9726_v19  ;;  %2852 = vmatpush1.msra.mxu1 %v9727_v6 }
 0xd52   :  { %2782 = vmatprep.subr.mxu0 %v9728_v7  ;;  %2853 = vmatprep.subr.mxu1 %v9729_v8 }
 0xd53   :  { %2783 = vmatpush1.msra.mxu0 %v9730_v10  ;;  %2854 = vmatpush1.msra.mxu1 %v9731_v11  ;;  %v2995_v11 = vld [vmem:[%s7979_s0 + $0xe8] sm:$0xff] }
 0xd54   :  { %2784 = vmatprep.subr.mxu0 %v9732_v21  ;;  %2855 = vmatprep.subr.mxu1 %v9733_v5 }
 0xd55   :  { %2785 = vmatpush1.msra.mxu0 %v9734_v18  ;;  %2856 = vmatpush1.msra.mxu1 %v9735_v16 }
 0xd56   :  { %2786 = vmatprep.subr.mxu0 %v9736_v15  ;;  %2857 = vmatprep.subr.mxu1 %v9737_v33  ;;  %v2996_v15 = vld [vmem:[%s7979_s0 + $0xf0] sm:$0xff] }
 0xd57   :  { %2787 = vmatpush1.msra.mxu0 %v9738_v25  ;;  %2858 = vmatpush1.msra.mxu1 %v9739_v44 }
 0xd58   :  { %2788 = vmatprep.subr.mxu0 %v9740_v45  ;;  %2859 = vmatprep.subr.mxu1 %v9741_v35  ;;  %v2997_v45 = vld [vmem:[%s7979_s0 + $0xf8] sm:$0xff] }
 0xd59   :  { %2789 = vmatpush1.msra.mxu0 %v9742_v51  ;;  %2860 = vmatpush1.msra.mxu1 %v9743_v28 }
 0xd5a   :  { %2790 = vmatprep.subr.mxu0 %v9744_v17  ;;  %2861 = vmatprep.subr.mxu1 %v9745_v0 }
 0xd5b   :  { %2791 = vmatpush1.msra.mxu0 %v9746_v27  ;;  %2862 = vmatpush1.msra.mxu1 %v9747_v22 }
 0xd5c   :  { %2792 = vmatprep.subr.mxu0 %v9748_v29  ;;  %2863 = vmatprep.subr.mxu1 %v9749_v31 }
 0xd5d   :  { %2793 = vmatpush1.msra.mxu0 %v9750_v26  ;;  %2864 = vmatpush1.msra.mxu1 %v9751_v41 }
 0xd5e   :  { %2794 = vmatprep.subr.mxu0 %v9752_v30  ;;  %2865 = vmatprep.subr.mxu1 %v9753_v39 }
 0xd5f   :  { %2795 = vmatpush1.msra.mxu0 %v9754_v37  ;;  %2866 = vmatpush1.msra.mxu1 %v9755_v1 }
 0xd60   :  { %2796 = vmatprep.subr.mxu0 %v9756_v32  ;;  %2867 = vmatprep.subr.mxu1 %v9757_v59 }
 0xd61   :  { %2797 = vmatpush1.msra.mxu0 %v9758_v42  ;;  %2868 = vmatpush1.msra.mxu1 %v9759_v43 }
 0xd62   :  { %2798 = vmatprep.subr.mxu0 %v9760_v52  ;;  %2869 = vmatprep.subr.mxu1 %v9761_v13 }
 0xd63   :  { %2799 = vmatpush1.msra.mxu0 %v9762_v14  ;;  %2832 = vmatprep.mubr.f32.mxu0 %v9763_v49 }
 0xd64   :  { %2870 = vmatpush1.msra.mxu1 %v9764_v50  ;;  %2903 = vmatprep.mubr.f32.mxu1 %v9763_v49 }
 0xe04   :  { %v2669_v54 = vpop.f32.mrf.mxu0  ;;  %v2740_v47 = vpop.f32.mrf.mxu1 }
 0xe05   :  { %v2670_v38 = vadd.f32 %v2669_v54, %v9765_v24  ;;  %v2741_v46 = vadd.f32 %v2740_v47, %v4592_v55 }
 0xe06   :  { %v2671_v20 = vpop.f32.mrf.mxu0  ;;  %v2742_v23 = vpop.f32.mrf.mxu1 }
 0xe07   :  { %v2745_v60 = vmul.f32 0.5, %v2670_v38  ;;  %v2672_v58 = vadd.f32 %v2671_v20, %v4589_v57  ;;  %v2743_v61 = vadd.f32 %v2742_v23, %v4596_v63 }
 0xe09   :  { %3146 = vtanh.f32 %v2745_v60  ;;  %v2749_v9 = vmul.f32 0.5, %v2672_v58  ;;  %v2754_v34 = vmul.f32 0.5, %v2743_v61 }
 0xe0b   :  { %3148 = vtanh.f32 %v2749_v9 }
 0xe0c   :  { %3150 = vtanh.f32 %v2741_v46 }
 0xe0d   :  { %3152 = vtanh.f32 %v2754_v34 }
 0xe16   :  { %v3147_v53 = vpop.eup %3146 }
 0xe17   :  { %v2747_v36 = vadd.f32 1.0, %v3147_v53 }
 0xe18   :  { %v3149_v4 = vpop.eup %3148 }
 0xe19   :  { %v2748_v56 = vmul.f32 0.5, %v2747_v36  ;;  %v2751_v2 = vadd.f32 1.0, %v3149_v4  ;;  %v3151_v40 = vpop.eup %3150 }
 0xe1a   :  { %v3153_v55 = vpop.eup %3152 }
 0xe1b   :  { %v2752_v62 = vmul.f32 0.5, %v2751_v2  ;;  %v2759_v48 = vmul.f32 %v3151_v40, %v2748_v56  ;;  %v2756_v63 = vadd.f32 1.0, %v3153_v55 }
 0xe1d   :  { %v2758_v57 = vmul.f32 %v2752_v62, %v7724_v3  ;;  %v2757_v6 = vmul.f32 0.5, %v2756_v63  ;;  %v2994_v3 = vld [vmem:[%s7979_s0 + $0xe0] sm:$0xff] }
 0xe1f   :  { %v2760_v19 = vadd.f32 %v2759_v48, %v2758_v57 }
 0xe21   :  { %3154 = vtanh.f32 %v2760_v19  ;;  %3001 = vst [vmem:[%s7985_s6 + $0xf8] sm:$0xff] %v2760_v19 }
 0xe2e   :  { %v3155_v7 = vpop.eup %3154 }
 0xe2f   :  { %v2762_v8 = vmul.f32 %v3155_v7, %v2757_v6 }
 0xe31   :  { %2833 = vmatmul.mubr.f32.vlgmr.msra.gmra.mxu0 %v2762_v8  ;;  %2999 = vst [vmem:[%s7985_s6 + $0xe8] sm:$0xff] %v2762_v8  ;;  %2904 = vmatmul.mubr.f32.vlgmr.msra.gmra.mxu1 %v2762_v8 }
 0xef1   :  { %v2834_v10 = vpop.f32.mrf.mxu0  ;;  %v2905_v33 = vpop.f32.mrf.mxu1 }
 0xef2   :  { %v2910_v21 = vadd.f32 %v2994_v3, %v2834_v10  ;;  %v2912_v44 = vadd.f32 %v2996_v15, %v2905_v33 }
 0xef3   :  { %v2836_v5 = vpop.f32.mrf.mxu0  ;;  %v2907_v35 = vpop.f32.mrf.mxu1 }
 0xef4   :  { %v2914_v18 = vmul.f32 0.5, %v2910_v21  ;;  %v2911_v16 = vadd.f32 %v2995_v11, %v2836_v5  ;;  %v2913_v51 = vadd.f32 %v2997_v45, %v2907_v35 }
 0xef6   :  { %3156 = vtanh.f32 %v2914_v18  ;;  %v2918_v25 = vmul.f32 0.5, %v2911_v16  ;;  %v2923_v28 = vmul.f32 0.5, %v2913_v51 }
 0xef8   :  { %3158 = vtanh.f32 %v2918_v25 }
 0xef9   :  { %3160 = vtanh.f32 %v2912_v44 }
 0xefa   :  { %3162 = vtanh.f32 %v2923_v28 }
 0xf03   :  { %v3157_v17 = vpop.eup %3156 }
 0xf04   :  { %v2916_v0 = vadd.f32 1.0, %v3157_v17 }
 0xf05   :  { %v3159_v27 = vpop.eup %3158 }
 0xf06   :  { %v2917_v22 = vmul.f32 0.5, %v2916_v0  ;;  %v2920_v29 = vadd.f32 1.0, %v3159_v27  ;;  %v3161_v26 = vpop.eup %3160 }
 0xf07   :  { %v3163_v37 = vpop.eup %3162 }
 0xf08   :  { %v2921_v31 = vmul.f32 0.5, %v2920_v29  ;;  %v2928_v30 = vmul.f32 %v3161_v26, %v2917_v22  ;;  %v2925_v1 = vadd.f32 1.0, %v3163_v37 }
 0xf0a   :  { %v2927_v41 = vmul.f32 %v2921_v31, %v7875_v12  ;;  %v2926_v32 = vmul.f32 0.5, %v2925_v1 }
 0xf0c   :  { %v2929_v39 = vadd.f32 %v2928_v30, %v2927_v41 }
 0xf0e   :  { %3164 = vtanh.f32 %v2929_v39  ;;  %3000 = vst [vmem:[%s7985_s6 + $0xf0] sm:$0xff] %v2929_v39 }
 0xf1b   :  { %v3165_v59 = vpop.eup %3164 }
 0xf1c   :  { %v2931_v42 = vmul.f32 %v3165_v59, %v2926_v32 }
 0xf1e   :  { %2998 = vst [vmem:[%s7985_s6 + $0xe0] sm:$0xff] %v2931_v42 }
 0xf1f   :  { %2945 = vsyncpa [#allocation5], 1 }

</bundles_post_ra>
